<compile_context>
chip_gen: v5e
topology: v5e:2x2
jax: 0.10.0
libtpu: 0.0.40
codegen_flags: <defaults>
</compile_context>

<pallas_src>
from functools import partial

import jax
import jax.numpy as jnp
from jax.experimental import pallas as pl
from jax.experimental.pallas import tpu as pltpu


HEAD_WIDTH = 128  # lane-dense packed head output width (K logits, reg pred, class idx)


# ----------------------------------------------------------------------------
# Fused Pallas kernel
# ----------------------------------------------------------------------------
def _fused_kernel(x_ref, w1_ref, b1_ref, w2_ref, b2_ref, ws1_ref, bs1_ref,
                  whs_ref, bh_ref, wreg_ref, *rest, num_classes, with_loss):
    """One M-tile of the whole multi-task forward pass.

    x_ref:    [tm, Cin] f32 flattened NHWC pixels
    w*/b*:    VMEM-resident weights / biases (same block every grid step)
    whs_ref:  [hidden, 128] bf16, cols 0:K hold seg head weights
    bh_ref:   [1, 128] f32, cols 0:K seg bias, col K reg bias
    wreg_ref: [1, hidden] f32 regression head weight (VPU path)
    rest:     (tgt_ref [tm,2] f32, heads_ref, loss_ref) if with_loss
              else (heads_ref,)
    heads_ref:[tm, 128] bf16: cols 0:K seg logits, col K reg pred, col K+1 argmax class
    loss_ref: [1, 128] f32: lane 0 = sum(nll), lane 1 = sum(sq err)
    """
    if with_loss:
        tgt_ref, heads_ref, loss_ref = rest
    else:
        (heads_ref,) = rest

    f32 = jnp.float32
    bf16 = jnp.bfloat16
    k = num_classes

    # ---- Encoder layer 1 (Cin -> hidden) on the VPU: Cin broadcast-FMAs ----
    x = x_ref[...].astype(f32)                                       # [tm, Cin]
    cin = x_ref.shape[1]
    h = b1_ref[...] + x[:, 0:1] * w1_ref[0:1, :]
    for c in range(1, cin):
        h = h + x[:, c:c + 1] * w1_ref[c:c + 1, :]
    h = jnp.maximum(h, 0.0)                                          # [tm, hidden]

    # ---- Encoder layer 2 + seg decoder conv on the MXU (bf16 in, f32 acc) ---
    feat = jnp.dot(h.astype(bf16), w2_ref[...], preferred_element_type=f32) + b2_ref[...]
    feat = jnp.maximum(feat, 0.0)                                    # [tm, hidden]
    hseg = jnp.dot(feat.astype(bf16), ws1_ref[...], preferred_element_type=f32) + bs1_ref[...]
    hseg = jnp.maximum(hseg, 0.0)                                    # [tm, hidden]

    # ---- Seg head: one lane-dense [hidden,128] matmul (cols 0:K = logits) ---
    heads = jnp.dot(hseg.astype(bf16), whs_ref[...], preferred_element_type=f32) + bh_ref[...]
    logits = heads[:, :k]                                            # [tm, K] f32
    # Store the wide block immediately to keep its live range short.
    heads_ref[...] = heads.astype(heads_ref.dtype)

    # ---- Regression head: VPU multiply + cross-lane reduce ------------------
    pred = jnp.sum(feat * wreg_ref[...], axis=-1, keepdims=True) + bh_ref[:, k:k + 1]
    heads_ref[:, k:k + 1] = pred.astype(heads_ref.dtype)             # masked VMEM store

    # ---- In-kernel argmax over the K logit columns ---------------------------
    mx = jnp.max(logits, axis=-1, keepdims=True)                     # [tm, 1]
    cls_iota = jax.lax.broadcasted_iota(jnp.int32, logits.shape, 1)  # [tm, K]
    cls = jnp.min(jnp.where(logits >= mx, cls_iota.astype(f32), float(k)),
                  axis=-1, keepdims=True)                            # first max index
    heads_ref[:, k + 1:k + 2] = cls.astype(heads_ref.dtype)          # masked VMEM store

    if with_loss:
        # TODO(synk): out-of-range / ignore-index seg targets are not masked out of the CE sum.
        segt = tgt_ref[:, 0:1].astype(jnp.int32)                     # class ids (packed as f32)
        regt = tgt_ref[:, 1:2]                                       # [tm, 1] f32

        # Per-pixel softmax cross-entropy (max-shifted logsumexp), all f32.
        lse = jnp.log(jnp.sum(jnp.exp(logits - mx), axis=-1, keepdims=True)) + mx
        picked = jnp.sum(jnp.where(cls_iota == segt, logits, 0.0),
                         axis=-1, keepdims=True)
        nll_sum = jnp.sum(lse - picked)                              # scalar
        se_sum = jnp.sum((pred - regt) ** 2)                         # scalar

        lane = jax.lax.broadcasted_iota(jnp.int32, (1, HEAD_WIDTH), 1)
        loss_part = (jnp.where(lane == 0, nll_sum, 0.0)
                     + jnp.where(lane == 1, se_sum, 0.0))            # [1, 128]

        @pl.when(pl.program_id(0) == 0)
        def _():
            loss_ref[...] = jnp.zeros_like(loss_ref)

        loss_ref[...] += loss_part


def _pick_tile(m):
    """One grid step when the whole problem fits comfortably; otherwise the
    largest divisor tile.  Per-step overhead (~0.35 us) dominates at this size,
    so fewer grid steps wins on every TPU generation."""
    if m <= 1024:
        return m
    for tm in (1024, 512, 256, 128, 64, 32, 16, 8):
        if m % tm == 0:
            return tm
    return m


def fused_forward(x, params, tgt=None, *, num_classes):
    """x: [M, Cin] f32; tgt: optional [M, 2] f32 (seg id, reg value).

    Returns packed heads [M, HEAD_WIDTH] bf16, and if tgt given also a
    [1, HEAD_WIDTH] f32 loss-sum vector (lane 0 = sum nll, lane 1 = sum sqerr).
    """
    m, cin = x.shape
    hidden = params["w2"].shape[0]
    tm = _pick_tile(m)
    with_loss = tgt is not None

    def rep(i):   # weights/biases: same block every grid step -> VMEM resident
        return (0, 0)

    def row(i):   # per-row tiles along M
        return (i, 0)

    in_specs = [
        pl.BlockSpec((tm, cin), row),
        pl.BlockSpec((cin, hidden), rep),
        pl.BlockSpec((1, hidden), rep),
        pl.BlockSpec((hidden, hidden), rep),
        pl.BlockSpec((1, hidden), rep),
        pl.BlockSpec((hidden, hidden), rep),
        pl.BlockSpec((1, hidden), rep),
        pl.BlockSpec((hidden, HEAD_WIDTH), rep),
        pl.BlockSpec((1, HEAD_WIDTH), rep),
        pl.BlockSpec((1, hidden), rep),
    ]
    args = [x, params["w1"], params["b1"], params["w2"], params["b2"],
            params["ws1"], params["bs1"], params["whs"], params["bh"], params["wreg"]]

    out_shape = [jax.ShapeDtypeStruct((m, HEAD_WIDTH), jnp.bfloat16)]
    out_specs = [pl.BlockSpec((tm, HEAD_WIDTH), row)]
    if with_loss:
        in_specs.append(pl.BlockSpec((tm, 2), row))
        args.append(tgt)
        out_shape.append(jax.ShapeDtypeStruct((1, HEAD_WIDTH), jnp.float32))
        out_specs.append(pl.BlockSpec((1, HEAD_WIDTH), lambda i: (0, 0)))

    flops = 2 * m * (cin * hidden + 2 * hidden * hidden + hidden * HEAD_WIDTH + hidden)
    transcendentals = m * (num_classes + 1) if with_loss else 0
    bytes_accessed = (sum(int(a.size) * a.dtype.itemsize for a in args)
                      + m * HEAD_WIDTH * 2
                      + (HEAD_WIDTH * 4 if with_loss else 0))

    out = pl.pallas_call(
        partial(_fused_kernel, num_classes=num_classes, with_loss=with_loss),
        out_shape=tuple(out_shape),
        grid=(m // tm,),
        in_specs=in_specs,
        out_specs=tuple(out_specs),
        compiler_params=pltpu.CompilerParams(
            dimension_semantics=("arbitrary",),     # loss output accumulates across grid
            vmem_limit_bytes=8 * 1024 * 1024,
        ),
        cost_estimate=pl.CostEstimate(flops=flops,
                                      transcendentals=transcendentals,
                                      bytes_accessed=bytes_accessed),
    )(*args)
    return out if with_loss else out[0]


# ----------------------------------------------------------------------------
# Jitted array-level forward (only reshapes / casts around the fused kernel)
# ----------------------------------------------------------------------------
@partial(jax.jit, static_argnames=("num_classes",))
def _forward_arrays(params, imgs, seg_t, reg_t, *, num_classes):
    n, c, h, w = imgs.shape
    m = n * h * w
    x = jnp.transpose(imgs, (0, 2, 3, 1)).reshape(m, c).astype(jnp.float32)
    tgt = jnp.stack([seg_t.reshape(m).astype(jnp.float32),
                     reg_t.reshape(m).astype(jnp.float32)], axis=-1)        # [M, 2]

    heads, loss = fused_forward(x, params, tgt, num_classes=num_classes)

    k = num_classes
    logits = heads[:, :k].astype(jnp.float32).reshape(n, h, w, k).transpose(0, 3, 1, 2)
    classes = heads[:, k + 1].astype(jnp.int32).reshape(n, h, w)
    value = heads[:, k:k + 1].astype(jnp.float32).reshape(n, h, w, 1).transpose(0, 3, 1, 2)
    ce = loss[0, 0] / m
    mse = loss[0, 1] / m
    return logits, classes, value, ce, mse


@partial(jax.jit, static_argnames=("num_classes",))
def _forward_arrays_no_targets(params, imgs, *, num_classes):
    n, c, h, w = imgs.shape
    m = n * h * w
    x = jnp.transpose(imgs, (0, 2, 3, 1)).reshape(m, c).astype(jnp.float32)

    heads = fused_forward(x, params, num_classes=num_classes)

    k = num_classes
    logits = heads[:, :k].astype(jnp.float32).reshape(n, h, w, k).transpose(0, 3, 1, 2)
    classes = heads[:, k + 1].astype(jnp.int32).reshape(n, h, w)
    value = heads[:, k:k + 1].astype(jnp.float32).reshape(n, h, w, 1).transpose(0, 3, 1, 2)
    return logits, classes, value


# ----------------------------------------------------------------------------
# MultiTaskModel: same forward semantics as the PyTorch wrapper; the concrete
# encoder/decoder chain is fused into one Pallas kernel.
# ----------------------------------------------------------------------------
class MultiTaskModel:
    def __init__(self, encoder, decoders):
        """encoder: [(w_e1, b_e1), (w_e2, b_e2)]  (image stack/flatten implicit)
        decoders: {"seg": [(w_s1, b_s1), (w_sh, b_sh)], "reg": [(w_rh, b_rh)]}
        """
        (w_e1, b_e1), (w_e2, b_e2) = encoder
        (w_s1, b_s1), (w_sh, b_sh) = decoders["seg"]
        ((w_rh, b_rh),) = decoders["reg"]

        self.decoder_names = list(decoders.keys())
        self.num_classes = int(w_sh.shape[1])
        hidden = int(w_e2.shape[1])
        k = self.num_classes
        assert k + 2 <= HEAD_WIDTH, "packed head width too small"

        # Pack seg head into a lane-dense [hidden, 128] weight; reg head stays a
        # [1, hidden] f32 vector (computed on the VPU in-kernel).
        whs = jnp.zeros((hidden, HEAD_WIDTH), jnp.float32).at[:, :k].set(w_sh)
        bh = (jnp.zeros((1, HEAD_WIDTH), jnp.float32)
              .at[0, :k].set(b_sh).at[0, k].set(b_rh[0]))

        self.params = {
            "w1": w_e1.astype(jnp.float32),                 # VPU first layer: keep f32
            "b1": b_e1.reshape(1, -1).astype(jnp.float32),
            "w2": w_e2.astype(jnp.bfloat16),
            "b2": b_e2.reshape(1, -1).astype(jnp.float32),
            "ws1": w_s1.astype(jnp.bfloat16),
            "bs1": b_s1.reshape(1, -1).astype(jnp.float32),
            "whs": whs.astype(jnp.bfloat16),
            "bh": bh,
            "wreg": w_rh[:, 0].reshape(1, hidden).astype(jnp.float32),
        }

    def forward(self, inputs, targets=None):
        imgs = jnp.stack([inp["image"] for inp in inputs]).astype(jnp.float32)
        n = imgs.shape[0]

        if targets is not None:
            seg_t = jnp.stack([t["seg"] for t in targets])
            reg_t = jnp.stack([t["reg"] for t in targets])
            logits, classes, value, ce, mse = _forward_arrays(
                self.params, imgs, seg_t, reg_t, num_classes=self.num_classes)
            task_losses = {"seg": {"ce": ce}, "reg": {"mse": mse}}
        else:
            logits, classes, value = _forward_arrays_no_targets(
                self.params, imgs, num_classes=self.num_classes)
            task_losses = {"seg": {}, "reg": {}}

        task_outputs = {
            "seg": [{"logits": logits[i], "classes": classes[i]} for i in range(n)],
            "reg": [{"value": value[i]} for i in range(n)],
        }

        # Same output / loss assembly as the reference MultiTaskModel.forward.
        outputs = [{} for _ in inputs]
        losses = {}
        for name in self.decoder_names:
            cur_output = task_outputs[name]
            cur_loss_dict = task_losses[name]
            for idx, entry in enumerate(cur_output):
                outputs[idx][name] = entry
            for loss_name, loss_value in cur_loss_dict.items():
                losses[f"{name}_{loss_name}"] = loss_value
        return outputs, losses


# ----------------------------------------------------------------------------
# Pure-JAX reference (same rounding points as the kernel) for correctness check
# ----------------------------------------------------------------------------
def _reference(params, x_f32, seg_flat, reg_flat, num_classes):
    hi = jax.lax.Precision.HIGHEST
    f32 = jnp.float32
    h = jnp.maximum(jnp.dot(x_f32, params["w1"], precision=hi) + params["b1"], 0.0)
    feat = jnp.maximum(
        jnp.dot(h.astype(jnp.bfloat16).astype(f32), params["w2"].astype(f32),
                precision=hi) + params["b2"], 0.0)
    hseg = jnp.maximum(
        jnp.dot(feat.astype(jnp.bfloat16).astype(f32), params["ws1"].astype(f32),
                precision=hi) + params["bs1"], 0.0)
    heads = (jnp.dot(hseg.astype(jnp.bfloat16).astype(f32), params["whs"].astype(f32),
                     precision=hi) + params["bh"])
    k = num_classes
    logits = heads[:, :k]
    pred = jnp.sum(feat * params["wreg"], axis=-1, keepdims=True) + params["bh"][:, k:k + 1]
    lse = jax.nn.logsumexp(logits, axis=-1, keepdims=True)
    nll = lse - jnp.take_along_axis(logits, seg_flat, axis=-1)
    return logits, pred, jnp.mean(nll), jnp.mean((pred - reg_flat) ** 2)


# ----------------------------------------------------------------------------
# Main
# ----------------------------------------------------------------------------
if __name__ == "__main__":
    N, C_IN, H, W = 2, 4, 16, 16
    HIDDEN, NUM_CLASSES = 32, 8

    key = jax.random.PRNGKey(0)
    keys = jax.random.split(key, 12)

    def init_linear(kw, kb, cin, cout):
        scale = 1.0 / jnp.sqrt(jnp.float32(cin))
        w = jax.random.normal(kw, (cin, cout), jnp.float32) * scale
        b = jax.random.normal(kb, (cout,), jnp.float32) * 0.01
        return w, b

    # Encoder params
    w_e1, b_e1 = init_linear(keys[0], keys[1], C_IN, HIDDEN)
    w_e2, b_e2 = init_linear(keys[2], keys[3], HIDDEN, HIDDEN)
    # Segmentation decoder params
    w_s1, b_s1 = init_linear(keys[4], keys[5], HIDDEN, HIDDEN)
    w_sh, b_sh = init_linear(keys[6], keys[7], HIDDEN, NUM_CLASSES)
    # Regression decoder params
    w_rh, b_rh = init_linear(keys[8], keys[9], HIDDEN, 1)

    model = MultiTaskModel(
        encoder=[(w_e1, b_e1), (w_e2, b_e2)],
        decoders={
            "seg": [(w_s1, b_s1), (w_sh, b_sh)],
            "reg": [(w_rh, b_rh)],
        },
    )

    # Inputs: list of dicts with NCHW images (PyTorch convention).
    img_key0, img_key1 = jax.random.split(keys[10])
    inputs = [
        {"image": jax.random.normal(img_key0, (C_IN, H, W), jnp.float32)},
        {"image": jax.random.normal(img_key1, (C_IN, H, W), jnp.float32)},
    ]
    # Targets: per-sample dicts keyed by task name.
    tkey0, tkey1, tkey2, tkey3 = jax.random.split(keys[11], 4)
    targets = [
        {
            "seg": jax.random.randint(tkey0, (H, W), 0, NUM_CLASSES, jnp.int32),
            "reg": jax.random.normal(tkey1, (H, W), jnp.float32),
        },
        {
            "seg": jax.random.randint(tkey2, (H, W), 0, NUM_CLASSES, jnp.int32),
            "reg": jax.random.normal(tkey3, (H, W), jnp.float32),
        },
    ]

    outputs, losses = model.forward(inputs, targets)

    # Block on results.
    for out in outputs:
        for task_out in out.values():
            for v in task_out.values():
                jax.block_until_ready(v)
    for v in losses.values():
        jax.block_until_ready(v)

    # Structural checks (same as the reference module's contract).
    assert set(losses.keys()) == {"seg_ce", "reg_mse"}
    assert outputs[0]["seg"]["logits"].shape == (NUM_CLASSES, H, W)
    assert outputs[0]["seg"]["classes"].shape == (H, W)
    assert outputs[1]["reg"]["value"].shape == (1, H, W)
    assert all(jnp.isfinite(v) for v in losses.values())

    # Inference path (targets=None) also works and yields no losses.
    outputs_nt, losses_nt = model.forward(inputs)
    jax.block_until_ready(outputs_nt[0]["seg"]["logits"])
    assert losses_nt == {}
    assert outputs_nt[1]["reg"]["value"].shape == (1, H, W)
    assert outputs_nt[0]["seg"]["classes"].shape == (H, W)

    # Numerical check against a pure-JAX reference with the same rounding points.
    imgs = jnp.stack([inp["image"] for inp in inputs])
    x_flat = jnp.transpose(imgs, (0, 2, 3, 1)).reshape(N * H * W, C_IN).astype(jnp.float32)
    seg_flat = jnp.stack([t["seg"] for t in targets]).reshape(-1, 1).astype(jnp.int32)
    reg_flat = jnp.stack([t["reg"] for t in targets]).reshape(-1, 1).astype(jnp.float32)
    ref_logits, ref_pred, ref_ce, ref_mse = _reference(
        model.params, x_flat, seg_flat, reg_flat, NUM_CLASSES)

    got_logits = jnp.stack([o["seg"]["logits"] for o in outputs])          # [N,K,H,W]
    got_value = jnp.stack([o["reg"]["value"] for o in outputs])            # [N,1,H,W]
    got_classes = jnp.stack([o["seg"]["classes"] for o in outputs])        # [N,H,W]
    exp_logits = ref_logits.reshape(N, H, W, NUM_CLASSES).transpose(0, 3, 1, 2)
    exp_value = ref_pred.reshape(N, H, W, 1).transpose(0, 3, 1, 2)

    # Outputs pass through bf16 on the way out -> ~0.4% relative tolerance.
    assert jnp.allclose(got_logits, exp_logits, atol=1e-2, rtol=1e-2)
    assert jnp.allclose(got_value, exp_value, atol=1e-2, rtol=1e-2)
    # Losses are reduced in f32 inside the kernel.
    assert jnp.allclose(losses["seg_ce"], ref_ce, atol=5e-3, rtol=5e-3)
    assert jnp.allclose(losses["reg_mse"], ref_mse, atol=5e-3, rtol=5e-3)

    # In-kernel argmax: class ids in range and their logit matches the row max.
    assert bool(jnp.all((got_classes >= 0) & (got_classes < NUM_CLASSES)))
    flat_logits = got_logits.transpose(0, 2, 3, 1).reshape(-1, NUM_CLASSES)
    picked_logit = jnp.take_along_axis(flat_logits, got_classes.reshape(-1, 1), axis=1)
    assert bool(jnp.all(picked_logit >= flat_logits.max(axis=1, keepdims=True) - 1e-2))

    print("KERNEL_OK")
</pallas_src>

<mosaic_0001>
module attributes {stable_mosaic.version = 11 : i64} {
  func.func @_fused_kernel(%arg0: i32, %arg1: memref<512x4xf32, #tpu.memory_space<vmem>>, %arg2: memref<4x32xf32, #tpu.memory_space<vmem>>, %arg3: memref<1x32xf32, #tpu.memory_space<vmem>>, %arg4: memref<32x32xbf16, #tpu.memory_space<vmem>>, %arg5: memref<1x32xf32, #tpu.memory_space<vmem>>, %arg6: memref<32x32xbf16, #tpu.memory_space<vmem>>, %arg7: memref<1x32xf32, #tpu.memory_space<vmem>>, %arg8: memref<32x128xbf16, #tpu.memory_space<vmem>>, %arg9: memref<1x128xf32, #tpu.memory_space<vmem>>, %arg10: memref<1x32xf32, #tpu.memory_space<vmem>>, %arg11: memref<512x2xf32, #tpu.memory_space<vmem>>, %arg12: memref<512x128xbf16, #tpu.memory_space<vmem>>, %arg13: memref<1x128xf32, #tpu.memory_space<vmem>>) attributes {dimension_semantics = [#tpu.dimension_semantics<arbitrary>], iteration_bounds = array<i64: 1>, scalar_prefetch = 0 : i64, scratch_operands = 0 : i64, tpu.core_type = #tpu.core_type<tc>, window_params = [{transform_indices = @transform_0, window_bounds = array<i64: 512, 4>}, {pipeline_mode = #tpu.pipeline_mode<synchronous>, transform_indices = @transform_1, window_bounds = array<i64: 4, 32>}, {pipeline_mode = #tpu.pipeline_mode<synchronous>, transform_indices = @transform_2, window_bounds = array<i64: 1, 32>}, {pipeline_mode = #tpu.pipeline_mode<synchronous>, transform_indices = @transform_3, window_bounds = array<i64: 32, 32>}, {pipeline_mode = #tpu.pipeline_mode<synchronous>, transform_indices = @transform_4, window_bounds = array<i64: 1, 32>}, {pipeline_mode = #tpu.pipeline_mode<synchronous>, transform_indices = @transform_5, window_bounds = array<i64: 32, 32>}, {pipeline_mode = #tpu.pipeline_mode<synchronous>, transform_indices = @transform_6, window_bounds = array<i64: 1, 32>}, {pipeline_mode = #tpu.pipeline_mode<synchronous>, transform_indices = @transform_7, window_bounds = array<i64: 32, 128>}, {pipeline_mode = #tpu.pipeline_mode<synchronous>, transform_indices = @transform_8, window_bounds = array<i64: 1, 128>}, {pipeline_mode = #tpu.pipeline_mode<synchronous>, transform_indices = @transform_9, window_bounds = array<i64: 1, 32>}, {transform_indices = @transform_10, window_bounds = array<i64: 512, 2>}, {transform_indices = @transform_11, window_bounds = array<i64: 512, 128>}, {pipeline_mode = #tpu.pipeline_mode<synchronous>, transform_indices = @transform_12, window_bounds = array<i64: 1, 128>}]} {
    %c0 = arith.constant 0 : index
    %c0_0 = arith.constant 0 : index
    %0 = vector.load %arg1[%c0, %c0_0] : memref<512x4xf32, #tpu.memory_space<vmem>>, vector<512x4xf32>
    %c0_1 = arith.constant 0 : index
    %c0_2 = arith.constant 0 : index
    %1 = vector.load %arg3[%c0_1, %c0_2] : memref<1x32xf32, #tpu.memory_space<vmem>>, vector<1x32xf32>
    %2 = vector.extract_strided_slice %0 {offsets = [0, 0], sizes = [512, 1], strides = [1, 1]} : vector<512x4xf32> to vector<512x1xf32>
    %c0_3 = arith.constant 0 : index
    %c0_4 = arith.constant 0 : index
    %3 = vector.load %arg2[%c0_3, %c0_4] : memref<4x32xf32, #tpu.memory_space<vmem>>, vector<1x32xf32>
    %4 = vector.broadcast %2 : vector<512x1xf32> to vector<512x32xf32>
    %5 = vector.broadcast %3 : vector<1x32xf32> to vector<512x32xf32>
    %6 = arith.mulf %4, %5 : vector<512x32xf32>
    %7 = vector.broadcast %1 : vector<1x32xf32> to vector<512x32xf32>
    %8 = arith.addf %7, %6 : vector<512x32xf32>
    %9 = vector.extract_strided_slice %0 {offsets = [0, 1], sizes = [512, 1], strides = [1, 1]} : vector<512x4xf32> to vector<512x1xf32>
    %c1 = arith.constant 1 : index
    %c0_5 = arith.constant 0 : index
    %10 = vector.load %arg2[%c1, %c0_5] : memref<4x32xf32, #tpu.memory_space<vmem>>, vector<1x32xf32>
    %11 = vector.broadcast %9 : vector<512x1xf32> to vector<512x32xf32>
    %12 = vector.broadcast %10 : vector<1x32xf32> to vector<512x32xf32>
    %13 = arith.mulf %11, %12 : vector<512x32xf32>
    %14 = arith.addf %8, %13 : vector<512x32xf32>
    %15 = vector.extract_strided_slice %0 {offsets = [0, 2], sizes = [512, 1], strides = [1, 1]} : vector<512x4xf32> to vector<512x1xf32>
    %c2 = arith.constant 2 : index
    %c0_6 = arith.constant 0 : index
    %16 = vector.load %arg2[%c2, %c0_6] : memref<4x32xf32, #tpu.memory_space<vmem>>, vector<1x32xf32>
    %17 = vector.broadcast %15 : vector<512x1xf32> to vector<512x32xf32>
    %18 = vector.broadcast %16 : vector<1x32xf32> to vector<512x32xf32>
    %19 = arith.mulf %17, %18 : vector<512x32xf32>
    %20 = arith.addf %14, %19 : vector<512x32xf32>
    %21 = vector.extract_strided_slice %0 {offsets = [0, 3], sizes = [512, 1], strides = [1, 1]} : vector<512x4xf32> to vector<512x1xf32>
    %c3 = arith.constant 3 : index
    %c0_7 = arith.constant 0 : index
    %22 = vector.load %arg2[%c3, %c0_7] : memref<4x32xf32, #tpu.memory_space<vmem>>, vector<1x32xf32>
    %23 = vector.broadcast %21 : vector<512x1xf32> to vector<512x32xf32>
    %24 = vector.broadcast %22 : vector<1x32xf32> to vector<512x32xf32>
    %25 = arith.mulf %23, %24 : vector<512x32xf32>
    %26 = arith.addf %20, %25 : vector<512x32xf32>
    %cst = arith.constant 0.000000e+00 : f32
    %27 = vector.broadcast %cst : f32 to vector<512x32xf32>
    %28 = arith.maximumf %26, %27 : vector<512x32xf32>
    %29 = arith.truncf %28 : vector<512x32xf32> to vector<512x32xbf16>
    %c0_8 = arith.constant 0 : index
    %c0_9 = arith.constant 0 : index
    %30 = vector.load %arg4[%c0_8, %c0_9] : memref<32x32xbf16, #tpu.memory_space<vmem>>, vector<32x32xbf16>
    %cst_10 = arith.constant dense<0.000000e+00> : vector<512x32xf32>
    %31 = tpu.matmul %29, %30, %cst_10 {dimension_numbers = #tpu.dot_dimension_numbers<[1], [0], [0], [1], [0, 0, 1, 1], [], []>} : vector<512x32xbf16>, vector<32x32xbf16>, vector<512x32xf32> -> vector<512x32xf32>
    %c0_11 = arith.constant 0 : index
    %c0_12 = arith.constant 0 : index
    %32 = vector.load %arg5[%c0_11, %c0_12] : memref<1x32xf32, #tpu.memory_space<vmem>>, vector<1x32xf32>
    %33 = vector.broadcast %32 : vector<1x32xf32> to vector<512x32xf32>
    %34 = arith.addf %31, %33 : vector<512x32xf32>
    %cst_13 = arith.constant 0.000000e+00 : f32
    %35 = vector.broadcast %cst_13 : f32 to vector<512x32xf32>
    %36 = arith.maximumf %34, %35 : vector<512x32xf32>
    %37 = arith.truncf %36 : vector<512x32xf32> to vector<512x32xbf16>
    %c0_14 = arith.constant 0 : index
    %c0_15 = arith.constant 0 : index
    %38 = vector.load %arg6[%c0_14, %c0_15] : memref<32x32xbf16, #tpu.memory_space<vmem>>, vector<32x32xbf16>
    %cst_16 = arith.constant dense<0.000000e+00> : vector<512x32xf32>
    %39 = tpu.matmul %37, %38, %cst_16 {dimension_numbers = #tpu.dot_dimension_numbers<[1], [0], [0], [1], [0, 0, 1, 1], [], []>} : vector<512x32xbf16>, vector<32x32xbf16>, vector<512x32xf32> -> vector<512x32xf32>
    %c0_17 = arith.constant 0 : index
    %c0_18 = arith.constant 0 : index
    %40 = vector.load %arg7[%c0_17, %c0_18] : memref<1x32xf32, #tpu.memory_space<vmem>>, vector<1x32xf32>
    %41 = vector.broadcast %40 : vector<1x32xf32> to vector<512x32xf32>
    %42 = arith.addf %39, %41 : vector<512x32xf32>
    %cst_19 = arith.constant 0.000000e+00 : f32
    %43 = vector.broadcast %cst_19 : f32 to vector<512x32xf32>
    %44 = arith.maximumf %42, %43 : vector<512x32xf32>
    %45 = arith.truncf %44 : vector<512x32xf32> to vector<512x32xbf16>
    %c0_20 = arith.constant 0 : index
    %c0_21 = arith.constant 0 : index
    %46 = vector.load %arg8[%c0_20, %c0_21] : memref<32x128xbf16, #tpu.memory_space<vmem>>, vector<32x128xbf16>
    %cst_22 = arith.constant dense<0.000000e+00> : vector<512x128xf32>
    %47 = tpu.matmul %45, %46, %cst_22 {dimension_numbers = #tpu.dot_dimension_numbers<[1], [0], [0], [1], [0, 0, 1, 1], [], []>} : vector<512x32xbf16>, vector<32x128xbf16>, vector<512x128xf32> -> vector<512x128xf32>
    %c0_23 = arith.constant 0 : index
    %c0_24 = arith.constant 0 : index
    %48 = vector.load %arg9[%c0_23, %c0_24] : memref<1x128xf32, #tpu.memory_space<vmem>>, vector<1x128xf32>
    %49 = vector.broadcast %48 : vector<1x128xf32> to vector<512x128xf32>
    %50 = arith.addf %47, %49 : vector<512x128xf32>
    %51 = vector.extract_strided_slice %50 {offsets = [0, 0], sizes = [512, 8], strides = [1, 1]} : vector<512x128xf32> to vector<512x8xf32>
    %52 = arith.truncf %50 : vector<512x128xf32> to vector<512x128xbf16>
    %c0_25 = arith.constant 0 : index
    %c0_26 = arith.constant 0 : index
    %53 = vector.load %arg12[%c0_25, %c0_26] : memref<512x128xbf16, #tpu.memory_space<vmem>>, vector<512x128xbf16>
    tpu.vector_store %arg12[%c0_25, %c0_26], %52 {strides = array<i32>} : memref<512x128xbf16, #tpu.memory_space<vmem>>, vector<512x128xbf16>,
    %c0_27 = arith.constant 0 : index
    %c0_28 = arith.constant 0 : index
    %54 = vector.load %arg10[%c0_27, %c0_28] : memref<1x32xf32, #tpu.memory_space<vmem>>, vector<1x32xf32>
    %55 = vector.broadcast %54 : vector<1x32xf32> to vector<512x32xf32>
    %56 = arith.mulf %36, %55 : vector<512x32xf32>
    %cst_29 = arith.constant dense<0.000000e+00> : vector<512xf32>
    %57 = vector.multi_reduction <add>, %56, %cst_29 [1] : vector<512x32xf32> to vector<512xf32>
    %58 = vector.shape_cast %57 : vector<512xf32> to vector<512x1xf32>
    %c0_30 = arith.constant 0 : index
    %c8 = arith.constant 8 : index
    %59 = vector.load %arg9[%c0_30, %c8] : memref<1x128xf32, #tpu.memory_space<vmem>>, vector<1x1xf32>
    %60 = vector.broadcast %59 : vector<1x1xf32> to vector<512x1xf32>
    %61 = arith.addf %58, %60 : vector<512x1xf32>
    %62 = arith.truncf %61 : vector<512x1xf32> to vector<512x1xbf16>
    %c0_31 = arith.constant 0 : index
    %c8_32 = arith.constant 8 : index
    %63 = vector.load %arg12[%c0_31, %c8_32] : memref<512x128xbf16, #tpu.memory_space<vmem>>, vector<512x1xbf16>
    tpu.vector_store %arg12[%c0_31, %c8_32], %62 {strides = array<i32>} : memref<512x128xbf16, #tpu.memory_space<vmem>>, vector<512x1xbf16>,
    %cst_33 = arith.constant dense<0xFF800000> : vector<512xf32>
    %64 = vector.multi_reduction <maximumf>, %51, %cst_33 [1] : vector<512x8xf32> to vector<512xf32>
    %65 = vector.shape_cast %64 : vector<512xf32> to vector<512x1xf32>
    %66 = tpu.iota {dimensions = array<i32: 1>} : vector<512x8xi32>
    %67 = vector.broadcast %65 : vector<512x1xf32> to vector<512x8xf32>
    %68 = arith.cmpf oge, %51, %67 : vector<512x8xf32>
    %69 = arith.sitofp %66 : vector<512x8xi32> to vector<512x8xf32>
    %cst_34 = arith.constant 8.000000e+00 : f32
    %70 = vector.broadcast %cst_34 : f32 to vector<512x8xf32>
    %71 = arith.select %68, %69, %70 : vector<512x8xi1>, vector<512x8xf32>
    %cst_35 = arith.constant dense<0x7F800000> : vector<512xf32>
    %72 = vector.multi_reduction <minimumf>, %71, %cst_35 [1] : vector<512x8xf32> to vector<512xf32>
    %73 = vector.shape_cast %72 : vector<512xf32> to vector<512x1xf32>
    %74 = arith.truncf %73 : vector<512x1xf32> to vector<512x1xbf16>
    %c0_36 = arith.constant 0 : index
    %c9 = arith.constant 9 : index
    %75 = vector.load %arg12[%c0_36, %c9] : memref<512x128xbf16, #tpu.memory_space<vmem>>, vector<512x1xbf16>
    tpu.vector_store %arg12[%c0_36, %c9], %74 {strides = array<i32>} : memref<512x128xbf16, #tpu.memory_space<vmem>>, vector<512x1xbf16>,
    %c0_37 = arith.constant 0 : index
    %c0_38 = arith.constant 0 : index
    %76 = vector.load %arg11[%c0_37, %c0_38] : memref<512x2xf32, #tpu.memory_space<vmem>>, vector<512x1xf32>
    %77 = arith.fptosi %76 : vector<512x1xf32> to vector<512x1xi32>
    %c0_39 = arith.constant 0 : index
    %c1_40 = arith.constant 1 : index
    %78 = vector.load %arg11[%c0_39, %c1_40] : memref<512x2xf32, #tpu.memory_space<vmem>>, vector<512x1xf32>
    %79 = vector.broadcast %65 : vector<512x1xf32> to vector<512x8xf32>
    %80 = arith.subf %51, %79 : vector<512x8xf32>
    %81 = math.exp %80 : vector<512x8xf32>
    %cst_41 = arith.constant dense<0.000000e+00> : vector<512xf32>
    %82 = vector.multi_reduction <add>, %81, %cst_41 [1] : vector<512x8xf32> to vector<512xf32>
    %83 = vector.shape_cast %82 : vector<512xf32> to vector<512x1xf32>
    %84 = math.log %83 : vector<512x1xf32>
    %85 = arith.addf %84, %65 : vector<512x1xf32>
    %86 = vector.broadcast %77 : vector<512x1xi32> to vector<512x8xi32>
    %87 = arith.cmpi eq, %66, %86 : vector<512x8xi32>
    %cst_42 = arith.constant 0.000000e+00 : f32
    %88 = vector.broadcast %cst_42 : f32 to vector<512x8xf32>
    %89 = arith.select %87, %51, %88 : vector<512x8xi1>, vector<512x8xf32>
    %cst_43 = arith.constant dense<0.000000e+00> : vector<512xf32>
    %90 = vector.multi_reduction <add>, %89, %cst_43 [1] : vector<512x8xf32> to vector<512xf32>
    %91 = vector.shape_cast %90 : vector<512xf32> to vector<512x1xf32>
    %92 = arith.subf %85, %91 : vector<512x1xf32>
    %93 = vector.shape_cast %92 : vector<512x1xf32> to vector<1x512x1xf32>
    %cst_44 = arith.constant dense<0.000000e+00> : vector<1xf32>
    %94 = vector.multi_reduction <add>, %93, %cst_44 [1, 2] : vector<1x512x1xf32> to vector<1xf32>
    %95 = vector.shape_cast %94 : vector<1xf32> to vector<1x1x1xf32>
    %96 = vector.extract %95[0, 0, 0] : f32 from vector<1x1x1xf32>
    %97 = arith.subf %61, %78 : vector<512x1xf32>
    %98 = arith.mulf %97, %97 : vector<512x1xf32>
    %99 = vector.shape_cast %98 : vector<512x1xf32> to vector<1x512x1xf32>
    %cst_45 = arith.constant dense<0.000000e+00> : vector<1xf32>
    %100 = vector.multi_reduction <add>, %99, %cst_45 [1, 2] : vector<1x512x1xf32> to vector<1xf32>
    %101 = vector.shape_cast %100 : vector<1xf32> to vector<1x1x1xf32>
    %102 = vector.extract %101[0, 0, 0] : f32 from vector<1x1x1xf32>
    %103 = tpu.iota {dimensions = array<i32: 1>} : vector<1x128xi32>
    %c0_i32 = arith.constant 0 : i32
    %104 = vector.broadcast %c0_i32 : i32 to vector<1x128xi32>
    %105 = arith.cmpi eq, %103, %104 : vector<1x128xi32>
    %cst_46 = arith.constant 0.000000e+00 : f32
    %106 = vector.broadcast %96 : f32 to vector<1x128xf32>
    %107 = vector.broadcast %cst_46 : f32 to vector<1x128xf32>
    %108 = arith.select %105, %106, %107 : vector<1x128xi1>, vector<1x128xf32>
    %c1_i32 = arith.constant 1 : i32
    %109 = vector.broadcast %c1_i32 : i32 to vector<1x128xi32>
    %110 = arith.cmpi eq, %103, %109 : vector<1x128xi32>
    %cst_47 = arith.constant 0.000000e+00 : f32
    %111 = vector.broadcast %102 : f32 to vector<1x128xf32>
    %112 = vector.broadcast %cst_47 : f32 to vector<1x128xf32>
    %113 = arith.select %110, %111, %112 : vector<1x128xi1>, vector<1x128xf32>
    %114 = arith.addf %108, %113 : vector<1x128xf32>
    %c0_i32_48 = arith.constant 0 : i32
    %115 = arith.cmpi eq, %arg0, %c0_i32_48 : i32
    %116 = arith.extui %115 : i1 to i32
    %c0_i32_49 = arith.constant 0 : i32
    %117 = arith.cmpi ne, %116, %c0_i32_49 : i32
    scf.if %117 {
      %cst_54 = arith.constant 0.000000e+00 : f32
      %121 = vector.broadcast %cst_54 : f32 to vector<1x128xf32>
      %c0_55 = arith.constant 0 : index
      %c0_56 = arith.constant 0 : index
      %122 = vector.load %arg13[%c0_55, %c0_56] : memref<1x128xf32, #tpu.memory_space<vmem>>, vector<1x128xf32>
      tpu.vector_store %arg13[%c0_55, %c0_56], %121 {strides = array<i32>} : memref<1x128xf32, #tpu.memory_space<vmem>>, vector<1x128xf32>,
    } else {
    }
    %c0_50 = arith.constant 0 : index
    %c0_51 = arith.constant 0 : index
    %118 = vector.load %arg13[%c0_50, %c0_51] : memref<1x128xf32, #tpu.memory_space<vmem>>, vector<1x128xf32>
    %119 = arith.addf %118, %114 : vector<1x128xf32>
    %c0_52 = arith.constant 0 : index
    %c0_53 = arith.constant 0 : index
    %120 = vector.load %arg13[%c0_52, %c0_53] : memref<1x128xf32, #tpu.memory_space<vmem>>, vector<1x128xf32>
    tpu.vector_store %arg13[%c0_52, %c0_53], %119 {strides = array<i32>} : memref<1x128xf32, #tpu.memory_space<vmem>>, vector<1x128xf32>,
    return
  }
  func.func @transform_0(%arg0: i32) -> (i32, i32) {
    %c0_i32 = arith.constant 0 : i32
    %c0_i32_0 = arith.constant 0 : i32
    return %arg0, %c0_i32 : i32, i32
  }
  func.func @transform_1(%arg0: i32) -> (i32, i32) {
    %c0_i32 = arith.constant 0 : i32
    %c0_i32_0 = arith.constant 0 : i32
    %c0_i32_1 = arith.constant 0 : i32
    return %c0_i32, %c0_i32_0 : i32, i32
  }
  func.func @transform_2(%arg0: i32) -> (i32, i32) {
    %c0_i32 = arith.constant 0 : i32
    %c0_i32_0 = arith.constant 0 : i32
    %c0_i32_1 = arith.constant 0 : i32
    return %c0_i32, %c0_i32_0 : i32, i32
  }
  func.func @transform_3(%arg0: i32) -> (i32, i32) {
    %c0_i32 = arith.constant 0 : i32
    %c0_i32_0 = arith.constant 0 : i32
    %c0_i32_1 = arith.constant 0 : i32
    return %c0_i32, %c0_i32_0 : i32, i32
  }
  func.func @transform_4(%arg0: i32) -> (i32, i32) {
    %c0_i32 = arith.constant 0 : i32
    %c0_i32_0 = arith.constant 0 : i32
    %c0_i32_1 = arith.constant 0 : i32
    return %c0_i32, %c0_i32_0 : i32, i32
  }
  func.func @transform_5(%arg0: i32) -> (i32, i32) {
    %c0_i32 = arith.constant 0 : i32
    %c0_i32_0 = arith.constant 0 : i32
    %c0_i32_1 = arith.constant 0 : i32
    return %c0_i32, %c0_i32_0 : i32, i32
  }
  func.func @transform_6(%arg0: i32) -> (i32, i32) {
    %c0_i32 = arith.constant 0 : i32
    %c0_i32_0 = arith.constant 0 : i32
    %c0_i32_1 = arith.constant 0 : i32
    return %c0_i32, %c0_i32_0 : i32, i32
  }
  func.func @transform_7(%arg0: i32) -> (i32, i32) {
    %c0_i32 = arith.constant 0 : i32
    %c0_i32_0 = arith.constant 0 : i32
    %c0_i32_1 = arith.constant 0 : i32
    return %c0_i32, %c0_i32_0 : i32, i32
  }
  func.func @transform_8(%arg0: i32) -> (i32, i32) {
    %c0_i32 = arith.constant 0 : i32
    %c0_i32_0 = arith.constant 0 : i32
    %c0_i32_1 = arith.constant 0 : i32
    return %c0_i32, %c0_i32_0 : i32, i32
  }
  func.func @transform_9(%arg0: i32) -> (i32, i32) {
    %c0_i32 = arith.constant 0 : i32
    %c0_i32_0 = arith.constant 0 : i32
    %c0_i32_1 = arith.constant 0 : i32
    return %c0_i32, %c0_i32_0 : i32, i32
  }
  func.func @transform_10(%arg0: i32) -> (i32, i32) {
    %c0_i32 = arith.constant 0 : i32
    %c0_i32_0 = arith.constant 0 : i32
    return %arg0, %c0_i32 : i32, i32
  }
  func.func @transform_11(%arg0: i32) -> (i32, i32) {
    %c0_i32 = arith.constant 0 : i32
    %c0_i32_0 = arith.constant 0 : i32
    return %arg0, %c0_i32 : i32, i32
  }
  func.func @transform_12(%arg0: i32) -> (i32, i32) {
    %c0_i32 = arith.constant 0 : i32
    %c0_i32_0 = arith.constant 0 : i32
    %c0_i32_1 = arith.constant 0 : i32
    return %c0_i32, %c0_i32_0 : i32, i32
  }
}

</mosaic_0001>

<bundles_post_ra>
// kernel: _forward_arrays.1
= control target key start
LH: loop header
LB: loop body
LE: loop exit
PB: predicated region body
PF: predicated region fallthrough
CT: control target
= control target key end

     0   :  { %v13027_v0 = vmov 1   ;;  %v13025_v1 = vmov 0   ;;  %vm1833_vm0 = vcmask 261120   ;;  %vm3381_vm1 = vcmask 68672   ;;  %s7328_s27 = smov 7   ;;  %s7329_s28 = smov 120   ;;  %s13012_s0 = inlined_call_operand.vmem [shape: f32[512,4], index: 0, kind: input, shape index: {}]   ;;  %s13013_s1 = inlined_call_operand.vmem [shape: f32[4,32], index: 1, kind: input, shape index: {}]   ;;  %s13014_s2 = inlined_call_operand.vmem [shape: f32[1,32], index: 2, kind: input, shape index: {}]   ;;  %s13015_s3 = inlined_call_operand.vmem [shape: bf16[32,32], index: 3, kind: input, shape index: {}]   ;;  %s13016_s4 = inlined_call_operand.vmem [shape: f32[1,32], index: 4, kind: input, shape index: {}]   ;;  %s13017_s9 = inlined_call_operand.vmem [shape: f32[1,32], index: 9, kind: input, shape index: {}]   ;;  %s13018_s5 = inlined_call_operand.vmem [shape: bf16[32,32], index: 5, kind: input, shape index: {}]   ;;  %s13019_s8 = inlined_call_operand.vmem [shape: f32[1,128], index: 8, kind: input, shape index: {}]   ;;  %s13020_s6 = inlined_call_operand.vmem [shape: f32[1,32], index: 6, kind: input, shape index: {}]   ;;  %s13021_s7 = inlined_call_operand.vmem [shape: bf16[32,128], index: 7, kind: input, shape index: {}]   ;;  %s13022_s11 = inlined_call_operand.vmem [shape: bf16[512,128], index: 11, kind: output, shape index: {0}]   ;;  %s13023_s10 = inlined_call_operand.vmem [shape: f32[512,2], index: 10, kind: input, shape index: {}]   ;;  %s13024_s12 = inlined_call_operand.vmem [shape: f32[1,128], index: 12, kind: output, shape index: {1}]  }
   0x1   :  { %6965 = vset.pattern.permute.xlu0 %v13027_v0  ;;  %6962 = vset.pattern.permute.xlu2 %v13025_v1  ;;  %v7401_v2 = vld [vmem:[%s13012_s0 + $0x20] sm:$0xff]  ;;  %v7406_v3 = vld [vmem:[%s13012_s0 + $0x10] sm:$0xff]  ;;  %v7415_v4 = vld [vmem:[%s13012_s0 + $0x28] sm:$0xff]  ;;  %vm3446_vm2 = vcmask 64512  }
   0x2   :  { %6961 = vset.pattern.permute.xlu1 %v13025_v1  ;;  %129 = vperm.xlu2 %6962, %v7401_v2   ;;  %v7420_v5 = vld [vmem:[%s13012_s0 + $0x38] sm:$0xff]  ;;  %v7433_v7 = vld [vmem:[%s13012_s0 + $0x40] sm:$0xff]  ;;  %v7438_v8 = vld [vmem:[%s13012_s0 + $0x50] sm:$0xff] }
   0x3   :  { %569 = vperm.xlu0 %6965, %v7406_v3   ;;  %119 = vperm.xlu1 %6961, %v7406_v3   ;;  %v7425_v6 = vld [vmem:[%s13012_s0 + $0x18] sm:$0xff]  ;;  %v7451_v10 = vld [vmem:[%s13012_s0 + $0x68] sm:$0xff]  ;;  %v7459_v11 = vld [vmem:[%s13012_s0 + $0x70] sm:$0xff] }
   0x4   :  { %v7446_v9 = vld [vmem:[%s13012_s0 + $0x58] sm:$0xff]  ;;  %v7464_v12 = vld [vmem:[%s13012_s0 + $0x80] sm:$0xff]  ;;  %v7472_v13 = vld [vmem:[%s13012_s0 + $0x88] sm:$0xff] }
   0x5   :  { %v7477_v14 = vld [vmem:[%s13012_s0 + $0x98] sm:$0xff]  ;;  %v7485_v15 = vld [vmem:[%s13012_s0 + $0xa0] sm:$0xff]  ;;  %v7490_v16 = vld [vmem:[%s13012_s0 + $0xb0] sm:$0xff] }
   0x6   :  { %v7498_v17 = vld [vmem:[%s13012_s0 + $0xb8] sm:$0xff]  ;;  %v7503_v18 = vld [vmem:[%s13012_s0 + $0xc8] sm:$0xff]  ;;  %v7511_v19 = vld [vmem:[%s13012_s0 + $0xd0] sm:$0xff] }
   0x7   :  { %v7516_v20 = vld [vmem:[%s13012_s0 + $0xe0] sm:$0xff]  ;;  %v7524_v21 = vld [vmem:[%s13012_s0 + $0xe8] sm:$0xff]  ;;  %v7529_v22 = vld [vmem:[%s13012_s0 + $0xf8] sm:$0xff] }
   0x8   :  { %v7537_v23 = vld [vmem:[%s13012_s0 + $0x100] sm:$0xff]  ;;  %v7542_v24 = vld [vmem:[%s13012_s0 + $0x110] sm:$0xff]  ;;  %v7550_v25 = vld [vmem:[%s13012_s0 + $0x118] sm:$0xff] }
   0x9   :  { %v7555_v26 = vld [vmem:[%s13012_s0 + $0x128] sm:$0xff]  ;;  %v7565_v28 = vld [vmem:[%s13012_s0 + $0x130] sm:$0xff]  ;;  %v7570_v29 = vld [vmem:[%s13012_s0 + $0x140] sm:$0xff] }
   0xa   :  { %134 = vperm.xlu2 %6962, %v7415_v4   ;;  %v7580_v31 = vld [vmem:[%s13012_s0 + $0x148] sm:$0xff]  ;;  %v7585_v32 = vld [vmem:[%s13012_s0 + $0x158] sm:$0xff]  ;;  %v7595_v34 = vld [vmem:[%s13012_s0 + $0x160] sm:$0xff] }
   0xb   :  { %589 = vperm.xlu0 %6965, %v7420_v5   ;;  %124 = vperm.xlu1 %6961, %v7425_v6   ;;  %13340 = vst [vmem:[#allocation4_spill] sm:$0xff] %v7580_v31  ;;  %v7600_v35 = vld [vmem:[%s13012_s0 + $0x170] sm:$0xff]  ;;  %v7614_v39 = vld [vmem:[%s13012_s0 + $0x178] sm:$0xff]  ;;  %v7619_v40 = vld [vmem:[%s13012_s0 + $0x188] sm:$0xff] }
   0xc   :  { %13342 = vst [vmem:[#allocation6_spill] sm:$0xff] %v7595_v34  ;;  %v7633_v44 = vld [vmem:[%s13012_s0 + $0x190] sm:$0xff]  ;;  %v7638_v45 = vld [vmem:[%s13012_s0 + $0x1a0] sm:$0xff]  ;;  %v7652_v49 = vld [vmem:[%s13012_s0 + $0x1a8] sm:$0xff] }
   0xd   :  { %13343 = vst [vmem:[#allocation7_spill] sm:$0xff] %v7600_v35  ;;  %v7657_v50 = vld [vmem:[%s13012_s0 + $0x1b8] sm:$0xff]  ;;  %v7671_v54 = vld [vmem:[%s13012_s0 + $0x1c0] sm:$0xff]  ;;  %v7676_v55 = vld [vmem:[%s13012_s0 + $0x1d0] sm:$0xff] }
   0xe   :  { %13347 = vst [vmem:[#allocation11_spill] sm:$0xff] %v7614_v39  ;;  %v7690_v59 = vld [vmem:[%s13012_s0 + $0x1d8] sm:$0xff]  ;;  %v7695_v60 = vld [vmem:[%s13012_s0 + $0x1e8] sm:$0xff]  ;;  %v7709_v1 = vld [vmem:[%s13012_s0 + $0x1f0] sm:$0xff] }
   0xf   :  { %13348 = vst [vmem:[#allocation12_spill] sm:$0xff] %v7619_v40  ;;  %v7714_v0 = vld [vmem:[%s13012_s0] sm:$0xff] }
  0x10   :  { %13352 = vst [vmem:[#allocation16_spill] sm:$0xff] %v7633_v44 }
  0x11   :  { %13353 = vst [vmem:[#allocation17_spill] sm:$0xff] %v7638_v45 }
  0x12   :  { %149 = vperm.xlu2 %6962, %v7433_v7   ;;  %13357 = vst [vmem:[#allocation21_spill] sm:$0xff] %v7652_v49 }
  0x13   :  { %601 = vperm.xlu0 %6965, %v7438_v8   ;;  %144 = vperm.xlu1 %6961, %v7420_v5   ;;  %13361 = vst [vmem:[#allocation25_spill] sm:$0xff] %v7671_v54 }
  0x1a   :  { %164 = vperm.xlu2 %6962, %v7446_v9  }
  0x1b   :  { %613 = vperm.xlu0 %6965, %v7451_v10   ;;  %159 = vperm.xlu1 %6961, %v7438_v8  }
  0x22   :  { %179 = vperm.xlu2 %6962, %v7459_v11  }
  0x23   :  { %625 = vperm.xlu0 %6965, %v7464_v12   ;;  %174 = vperm.xlu1 %6961, %v7451_v10  }
  0x2a   :  { %194 = vperm.xlu2 %6962, %v7472_v13  }
  0x2b   :  { %637 = vperm.xlu0 %6965, %v7477_v14   ;;  %189 = vperm.xlu1 %6961, %v7464_v12  }
  0x32   :  { %209 = vperm.xlu2 %6962, %v7485_v15  }
  0x33   :  { %649 = vperm.xlu0 %6965, %v7490_v16   ;;  %204 = vperm.xlu1 %6961, %v7477_v14  }
  0x3a   :  { %224 = vperm.xlu2 %6962, %v7498_v17  }
  0x3b   :  { %661 = vperm.xlu0 %6965, %v7503_v18   ;;  %219 = vperm.xlu1 %6961, %v7490_v16  }
  0x42   :  { %239 = vperm.xlu2 %6962, %v7511_v19  }
  0x43   :  { %673 = vperm.xlu0 %6965, %v7516_v20   ;;  %234 = vperm.xlu1 %6961, %v7503_v18  }
  0x4a   :  { %254 = vperm.xlu2 %6962, %v7524_v21  }
  0x4b   :  { %685 = vperm.xlu0 %6965, %v7529_v22   ;;  %249 = vperm.xlu1 %6961, %v7516_v20  }
  0x52   :  { %269 = vperm.xlu2 %6962, %v7537_v23  }
  0x53   :  { %697 = vperm.xlu0 %6965, %v7542_v24   ;;  %264 = vperm.xlu1 %6961, %v7529_v22  }
  0x5a   :  { %284 = vperm.xlu2 %6962, %v7550_v25  }
  0x5b   :  { %709 = vperm.xlu0 %6965, %v7555_v26   ;;  %279 = vperm.xlu1 %6961, %v7542_v24  }
  0x5c   :  { %v7560_v27 = vpop.permute.xlu2 %129 }
  0x5d   :  { %13338 = vst [vmem:[#allocation2_spill] sm:$0xff] %v7560_v27 }
  0x62   :  { %299 = vperm.xlu2 %6962, %v7565_v28  }
  0x63   :  { %721 = vperm.xlu0 %6965, %v7570_v29   ;;  %294 = vperm.xlu1 %6961, %v7555_v26  }
  0x64   :  { %v7575_v30 = vpop.permute.xlu2 %134 }
  0x65   :  { %13339 = vst [vmem:[#allocation3_spill] sm:$0xff] %v7575_v30 }
  0x6a   :  { %314 = vperm.xlu2 %6962, %v7580_v31  }
  0x6b   :  { %733 = vperm.xlu0 %6965, %v7585_v32   ;;  %309 = vperm.xlu1 %6961, %v7570_v29  }
  0x6c   :  { %v7590_v33 = vpop.permute.xlu2 %149 }
  0x6d   :  { %13341 = vst [vmem:[#allocation5_spill] sm:$0xff] %v7590_v33 }
  0x72   :  { %329 = vperm.xlu2 %6962, %v7595_v34  }
  0x73   :  { %745 = vperm.xlu0 %6965, %v7600_v35   ;;  %324 = vperm.xlu1 %6961, %v7585_v32  }
  0x74   :  { %v7605_v36 = vpop.permute.xlu2 %164 }
  0x75   :  { %13344 = vst [vmem:[#allocation8_spill] sm:$0xff] %v7605_v36  ;;  %v7607_v37 = vpop.permute.xlu0 %569  ;;  %v7609_v38 = vpop.permute.xlu1 %119 }
  0x76   :  { %13345 = vst [vmem:[#allocation9_spill] sm:$0xff] %v7607_v37 }
  0x77   :  { %13346 = vst [vmem:[#allocation10_spill] sm:$0xff] %v7609_v38 }
  0x7a   :  { %344 = vperm.xlu2 %6962, %v7614_v39  }
  0x7b   :  { %757 = vperm.xlu0 %6965, %v7619_v40   ;;  %339 = vperm.xlu1 %6961, %v7600_v35  }
  0x7c   :  { %v7624_v41 = vpop.permute.xlu2 %179 }
  0x7d   :  { %13349 = vst [vmem:[#allocation13_spill] sm:$0xff] %v7624_v41  ;;  %v7626_v42 = vpop.permute.xlu0 %589  ;;  %v7628_v43 = vpop.permute.xlu1 %124 }
  0x7e   :  { %13350 = vst [vmem:[#allocation14_spill] sm:$0xff] %v7626_v42 }
  0x7f   :  { %13351 = vst [vmem:[#allocation15_spill] sm:$0xff] %v7628_v43 }
  0x82   :  { %359 = vperm.xlu2 %6962, %v7633_v44  }
  0x83   :  { %769 = vperm.xlu0 %6965, %v7638_v45   ;;  %354 = vperm.xlu1 %6961, %v7619_v40  }
  0x84   :  { %v7643_v46 = vpop.permute.xlu2 %194 }
  0x85   :  { %13354 = vst [vmem:[#allocation18_spill] sm:$0xff] %v7643_v46  ;;  %v7645_v47 = vpop.permute.xlu0 %601  ;;  %v7647_v48 = vpop.permute.xlu1 %144  ;;  %v13371_v46 = vmov 1  }
  0x86   :  { %13355 = vst [vmem:[#allocation19_spill] sm:$0xff] %v7645_v47 }
  0x87   :  { %13356 = vst [vmem:[#allocation20_spill] sm:$0xff] %v7647_v48 }
  0x8a   :  { %374 = vperm.xlu2 %6962, %v7652_v49  }
  0x8b   :  { %781 = vperm.xlu0 %6965, %v7657_v50   ;;  %369 = vperm.xlu1 %6961, %v7638_v45  }
  0x8c   :  { %v7662_v51 = vpop.permute.xlu2 %209 }
  0x8d   :  { %13358 = vst [vmem:[#allocation22_spill] sm:$0xff] %v7662_v51  ;;  %v7664_v52 = vpop.permute.xlu0 %613  ;;  %v7666_v53 = vpop.permute.xlu1 %159 }
  0x8e   :  { %13359 = vst [vmem:[#allocation23_spill] sm:$0xff] %v7664_v52 }
  0x8f   :  { %13360 = vst [vmem:[#allocation24_spill] sm:$0xff] %v7666_v53 }
  0x92   :  { %389 = vperm.xlu2 %6962, %v7671_v54  }
  0x93   :  { %793 = vperm.xlu0 %6965, %v7676_v55   ;;  %384 = vperm.xlu1 %6961, %v7657_v50  }
  0x94   :  { %v7681_v56 = vpop.permute.xlu2 %224 }
  0x95   :  { %13362 = vst [vmem:[#allocation26_spill] sm:$0xff] %v7681_v56  ;;  %v7683_v57 = vpop.permute.xlu0 %625  ;;  %v7685_v58 = vpop.permute.xlu1 %174  ;;  %v13029_v56 = vmov 2  }
  0x96   :  { %13363 = vst [vmem:[#allocation27_spill] sm:$0xff] %v7683_v57  ;;  %v7729_v57 = vld [vmem:[%s13012_s0 + $0x8] sm:$0xff] }
  0x97   :  { %13364 = vst [vmem:[#allocation28_spill] sm:$0xff] %v7685_v58 }
  0x9a   :  { %404 = vperm.xlu2 %6962, %v7690_v59  }
  0x9b   :  { %805 = vperm.xlu0 %6965, %v7695_v60   ;;  %399 = vperm.xlu1 %6961, %v7676_v55  }
  0x9c   :  { %v7700_v61 = vpop.permute.xlu2 %239 }
  0x9d   :  { %13365 = vst [vmem:[#allocation29_spill] sm:$0xff] %v7700_v61  ;;  %v7702_v62 = vpop.permute.xlu0 %637  ;;  %v7704_v63 = vpop.permute.xlu1 %189 }
  0x9e   :  { %13366 = vst [vmem:[#allocation30_spill] sm:$0xff] %v7702_v62 }
  0x9f   :  { %13367 = vst [vmem:[#allocation31_spill] sm:$0xff] %v7704_v63 }
  0xa2   :  { %419 = vperm.xlu2 %6962, %v7709_v1  }
  0xa3   :  { %6966 = vset.pattern.permute.xlu0 %v13029_v56  ;;  %414 = vperm.xlu1 %6961, %v7695_v60  }
  0xa4   :  { %947 = vperm.xlu0 %6966, %v7714_v0   ;;  %v7720_v61 = vpop.permute.xlu2 %254 }
  0xa5   :  { %13368 = vst [vmem:[#allocation32_spill] sm:$0xff] %v7720_v61  ;;  %v7722_v51 = vpop.permute.xlu0 %649  ;;  %v7724_v62 = vpop.permute.xlu1 %204 }
  0xa6   :  { %13369 = vst [vmem:[#allocation33_spill] sm:$0xff] %v7722_v51 }
  0xa7   :  { %13370 = vst [vmem:[#allocation34_spill] sm:$0xff] %v7724_v62 }
  0xaa   :  { %6964 = vset.pattern.permute.xlu2 %v13371_v46 }
  0xab   :  { %6963 = vset.pattern.permute.xlu1 %v13371_v46  ;;  %565 = vperm.xlu2 %6964, %v7729_v57  }
  0xac   :  { %967 = vperm.xlu0 %6966, %v7415_v4   ;;  %561 = vperm.xlu1 %6963, %v7714_v0   ;;  %v7736_v56 = vpop.permute.xlu2 %269 }
  0xad   :  { %13372 = vst [vmem:[#allocation35_spill] sm:$0xff] %v7736_v56  ;;  %v7738_v61 = vpop.permute.xlu0 %661  ;;  %v7740_v51 = vpop.permute.xlu1 %219  ;;  %v7754_v56 = vld [vmem:[%s13012_s0 + $0x30] sm:$0xff] }
  0xae   :  { %13373 = vst [vmem:[#allocation36_spill] sm:$0xff] %v7738_v61 }
  0xaf   :  { %13374 = vst [vmem:[#allocation37_spill] sm:$0xff] %v7740_v51 }
  0xb3   :  { %577 = vperm.xlu2 %6964, %v7401_v2  }
  0xb4   :  { %979 = vperm.xlu0 %6966, %v7433_v7   ;;  %573 = vperm.xlu1 %6963, %v7425_v6   ;;  %v7745_v62 = vpop.permute.xlu2 %284 }
  0xb5   :  { %13375 = vst [vmem:[#allocation38_spill] sm:$0xff] %v7745_v62  ;;  %v7747_v46 = vpop.permute.xlu0 %673  ;;  %v7749_v63 = vpop.permute.xlu1 %234 }
  0xb6   :  { %13376 = vst [vmem:[#allocation39_spill] sm:$0xff] %v7747_v46  ;;  %v7768_v46 = vld [vmem:[%s13012_s0 + $0x48] sm:$0xff] }
  0xb7   :  { %13377 = vst [vmem:[#allocation40_spill] sm:$0xff] %v7749_v63 }
  0xbb   :  { %585 = vperm.xlu2 %6964, %v7754_v56  }
  0xbc   :  { %991 = vperm.xlu0 %6966, %v7446_v9   ;;  %581 = vperm.xlu1 %6963, %v7415_v4   ;;  %v7759_v61 = vpop.permute.xlu2 %299 }
  0xbd   :  { %13378 = vst [vmem:[#allocation41_spill] sm:$0xff] %v7759_v61  ;;  %v7761_v51 = vpop.permute.xlu0 %685  ;;  %v7763_v62 = vpop.permute.xlu1 %249 }
  0xbe   :  { %13379 = vst [vmem:[#allocation42_spill] sm:$0xff] %v7761_v51  ;;  %v7782_v51 = vld [vmem:[%s13012_s0 + $0x60] sm:$0xff] }
  0xbf   :  { %13380 = vst [vmem:[#allocation43_spill] sm:$0xff] %v7763_v62 }
  0xc3   :  { %597 = vperm.xlu2 %6964, %v7768_v46  }
  0xc4   :  { %1003 = vperm.xlu0 %6966, %v7459_v11   ;;  %593 = vperm.xlu1 %6963, %v7433_v7   ;;  %v7773_v63 = vpop.permute.xlu2 %314 }
  0xc5   :  { %13381 = vst [vmem:[#allocation44_spill] sm:$0xff] %v7773_v63  ;;  %v7775_v41 = vpop.permute.xlu0 %697  ;;  %v7777_v61 = vpop.permute.xlu1 %264 }
  0xc6   :  { %13382 = vst [vmem:[#allocation45_spill] sm:$0xff] %v7775_v41  ;;  %v7796_v41 = vld [vmem:[%s13012_s0 + $0x78] sm:$0xff] }
  0xc7   :  { %13383 = vst [vmem:[#allocation46_spill] sm:$0xff] %v7777_v61 }
  0xcb   :  { %609 = vperm.xlu2 %6964, %v7782_v51  }
  0xcc   :  { %1015 = vperm.xlu0 %6966, %v7472_v13   ;;  %605 = vperm.xlu1 %6963, %v7446_v9   ;;  %v7787_v62 = vpop.permute.xlu2 %329 }
  0xcd   :  { %13384 = vst [vmem:[#allocation47_spill] sm:$0xff] %v7787_v62  ;;  %v7789_v52 = vpop.permute.xlu0 %709  ;;  %v7791_v63 = vpop.permute.xlu1 %279 }
  0xce   :  { %13385 = vst [vmem:[#allocation48_spill] sm:$0xff] %v7789_v52  ;;  %v7810_v52 = vld [vmem:[%s13012_s0 + $0x90] sm:$0xff] }
  0xcf   :  { %13386 = vst [vmem:[#allocation49_spill] sm:$0xff] %v7791_v63 }
  0xd3   :  { %621 = vperm.xlu2 %6964, %v7796_v41  }
  0xd4   :  { %1027 = vperm.xlu0 %6966, %v7485_v15   ;;  %617 = vperm.xlu1 %6963, %v7459_v11   ;;  %v7801_v61 = vpop.permute.xlu2 %344 }
  0xd5   :  { %13387 = vst [vmem:[#allocation50_spill] sm:$0xff] %v7801_v61  ;;  %v7803_v58 = vpop.permute.xlu0 %721  ;;  %v7805_v62 = vpop.permute.xlu1 %294 }
  0xd6   :  { %13388 = vst [vmem:[#allocation51_spill] sm:$0xff] %v7803_v58  ;;  %v7824_v58 = vld [vmem:[%s13012_s0 + $0xa8] sm:$0xff] }
  0xd7   :  { %13389 = vst [vmem:[#allocation52_spill] sm:$0xff] %v7805_v62 }
  0xdb   :  { %633 = vperm.xlu2 %6964, %v7810_v52  }
  0xdc   :  { %1039 = vperm.xlu0 %6966, %v7498_v17   ;;  %629 = vperm.xlu1 %6963, %v7472_v13   ;;  %v7815_v63 = vpop.permute.xlu2 %359 }
  0xdd   :  { %13390 = vst [vmem:[#allocation53_spill] sm:$0xff] %v7815_v63  ;;  %v7817_v47 = vpop.permute.xlu0 %733  ;;  %v7819_v61 = vpop.permute.xlu1 %309 }
  0xde   :  { %13391 = vst [vmem:[#allocation54_spill] sm:$0xff] %v7817_v47  ;;  %v7838_v47 = vld [vmem:[%s13012_s0 + $0xc0] sm:$0xff] }
  0xdf   :  { %13392 = vst [vmem:[#allocation55_spill] sm:$0xff] %v7819_v61 }
  0xe3   :  { %645 = vperm.xlu2 %6964, %v7824_v58  }
  0xe4   :  { %1051 = vperm.xlu0 %6966, %v7511_v19   ;;  %641 = vperm.xlu1 %6963, %v7485_v15   ;;  %v7829_v62 = vpop.permute.xlu2 %374 }
  0xe5   :  { %13393 = vst [vmem:[#allocation56_spill] sm:$0xff] %v7829_v62  ;;  %v7831_v36 = vpop.permute.xlu0 %745  ;;  %v7833_v63 = vpop.permute.xlu1 %324 }
  0xe6   :  { %13394 = vst [vmem:[#allocation57_spill] sm:$0xff] %v7831_v36  ;;  %v7852_v36 = vld [vmem:[%s13012_s0 + $0xd8] sm:$0xff] }
  0xe7   :  { %13395 = vst [vmem:[#allocation58_spill] sm:$0xff] %v7833_v63 }
  0xeb   :  { %657 = vperm.xlu2 %6964, %v7838_v47  }
  0xec   :  { %1063 = vperm.xlu0 %6966, %v7524_v21   ;;  %653 = vperm.xlu1 %6963, %v7498_v17   ;;  %v7843_v61 = vpop.permute.xlu2 %389 }
  0xed   :  { %13396 = vst [vmem:[#allocation59_spill] sm:$0xff] %v7843_v61  ;;  %v7845_v53 = vpop.permute.xlu0 %757  ;;  %v7847_v62 = vpop.permute.xlu1 %339 }
  0xee   :  { %13397 = vst [vmem:[#allocation60_spill] sm:$0xff] %v7845_v53 }
  0xef   :  { %13398 = vst [vmem:[#allocation61_spill] sm:$0xff] %v7847_v62  ;;  %v7866_v62 = vld [vmem:[%s13012_s0 + $0xf0] sm:$0xff] }
  0xf3   :  { %669 = vperm.xlu2 %6964, %v7852_v36  }
  0xf4   :  { %1075 = vperm.xlu0 %6966, %v7537_v23   ;;  %665 = vperm.xlu1 %6963, %v7511_v19   ;;  %v7857_v63 = vpop.permute.xlu2 %404 }
  0xf5   :  { %13399 = vst [vmem:[#allocation62_spill] sm:$0xff] %v7857_v63  ;;  %v7859_v33 = vpop.permute.xlu0 %769  ;;  %v7861_v61 = vpop.permute.xlu1 %354 }
  0xf6   :  { %13400 = vst [vmem:[#allocation63_spill] sm:$0xff] %v7859_v33  ;;  %v7880_v33 = vld [vmem:[%s13012_s0 + $0x108] sm:$0xff] }
  0xf7   :  { %13401 = vst [vmem:[#allocation64_spill] sm:$0xff] %v7861_v61 }
  0xfb   :  { %681 = vperm.xlu2 %6964, %v7866_v62  }
  0xfc   :  { %1087 = vperm.xlu0 %6966, %v7550_v25   ;;  %677 = vperm.xlu1 %6963, %v7524_v21   ;;  %v7871_v53 = vpop.permute.xlu2 %419 }
  0xfd   :  { %13402 = vst [vmem:[#allocation65_spill] sm:$0xff] %v7871_v53  ;;  %v7873_v42 = vpop.permute.xlu0 %781  ;;  %v7875_v63 = vpop.permute.xlu1 %369 }
  0xfe   :  { %13403 = vst [vmem:[#allocation66_spill] sm:$0xff] %v7873_v42  ;;  %v7894_v42 = vld [vmem:[%s13012_s0 + $0x120] sm:$0xff] }
  0xff   :  { %13404 = vst [vmem:[#allocation67_spill] sm:$0xff] %v7875_v63 }
 0x103   :  { %693 = vperm.xlu2 %6964, %v7880_v33  }
 0x104   :  { %1099 = vperm.xlu0 %6966, %v7565_v28   ;;  %689 = vperm.xlu1 %6963, %v7537_v23  }
 0x105   :  { %v7885_v61 = vpop.permute.xlu0 %793  ;;  %v7887_v48 = vpop.permute.xlu1 %384 }
 0x106   :  { %13405 = vst [vmem:[#allocation68_spill] sm:$0xff] %v7885_v61  ;;  %v7889_v53 = vpop.permute.xlu2 %565 }
 0x107   :  { %13406 = vst [vmem:[#allocation69_spill] sm:$0xff] %v7887_v48  ;;  %v7908_v48 = vld [vmem:[%s13012_s0 + $0x138] sm:$0xff] }
 0x108   :  { %13407 = vst [vmem:[#allocation70_spill] sm:$0xff] %v7889_v53 }
 0x10b   :  { %705 = vperm.xlu2 %6964, %v7894_v42  }
 0x10c   :  { %1111 = vperm.xlu0 %6966, %v7580_v31   ;;  %701 = vperm.xlu1 %6963, %v7550_v25  }
 0x10d   :  { %v7899_v63 = vpop.permute.xlu0 %805  ;;  %v7901_v30 = vpop.permute.xlu1 %399 }
 0x10e   :  { %13408 = vst [vmem:[#allocation71_spill] sm:$0xff] %v7899_v63  ;;  %v7903_v61 = vpop.permute.xlu2 %577 }
 0x10f   :  { %13409 = vst [vmem:[#allocation72_spill] sm:$0xff] %v7901_v30  ;;  %v7922_v30 = vld [vmem:[%s13012_s0 + $0x150] sm:$0xff] }
 0x110   :  { %13410 = vst [vmem:[#allocation73_spill] sm:$0xff] %v7903_v61 }
 0x113   :  { %717 = vperm.xlu2 %6964, %v7908_v48  }
 0x114   :  { %1123 = vperm.xlu0 %6966, %v7595_v34   ;;  %713 = vperm.xlu1 %6963, %v7565_v28  }
 0x115   :  { %v7913_v27 = vpop.permute.xlu1 %414 }
 0x116   :  { %13411 = vst [vmem:[#allocation74_spill] sm:$0xff] %v7913_v27  ;;  %v7915_v37 = vpop.permute.xlu2 %585  ;;  %v7917_v63 = vpop.permute.xlu0 %947 }
 0x117   :  { %13412 = vst [vmem:[#allocation75_spill] sm:$0xff] %v7915_v37  ;;  %v7936_v37 = vld [vmem:[%s13012_s0 + $0x168] sm:$0xff] }
 0x118   :  { %13413 = vst [vmem:[#allocation76_spill] sm:$0xff] %v7917_v63 }
 0x11b   :  { %729 = vperm.xlu2 %6964, %v7922_v30  }
 0x11c   :  { %1135 = vperm.xlu0 %6966, %v7614_v39   ;;  %725 = vperm.xlu1 %6963, %v7580_v31  }
 0x11e   :  { %v7927_v61 = vpop.permute.xlu2 %597  ;;  %v7929_v43 = vpop.permute.xlu0 %967 }
 0x11f   :  { %13414 = vst [vmem:[#allocation77_spill] sm:$0xff] %v7927_v61  ;;  %v7931_v27 = vpop.permute.xlu1 %561 }
 0x120   :  { %13415 = vst [vmem:[#allocation78_spill] sm:$0xff] %v7929_v43  ;;  %v7950_v43 = vld [vmem:[%s13012_s0 + $0x180] sm:$0xff] }
 0x123   :  { %741 = vperm.xlu2 %6964, %v7936_v37  }
 0x124   :  { %1147 = vperm.xlu0 %6966, %v7633_v44   ;;  %737 = vperm.xlu1 %6963, %v7595_v34  }
 0x126   :  { %v7941_v38 = vpop.permute.xlu2 %609  ;;  %v7943_v31 = vpop.permute.xlu0 %979 }
 0x127   :  { %13416 = vst [vmem:[#allocation79_spill] sm:$0xff] %v7941_v38  ;;  %v7945_v61 = vpop.permute.xlu1 %573 }
 0x128   :  { %13417 = vst [vmem:[#allocation80_spill] sm:$0xff] %v7943_v31  ;;  %v7964_v31 = vld [vmem:[%s13012_s0 + $0x198] sm:$0xff] }
 0x129   :  { %13418 = vst [vmem:[#allocation81_spill] sm:$0xff] %v7945_v61 }
 0x12b   :  { %753 = vperm.xlu2 %6964, %v7950_v43  }
 0x12c   :  { %1159 = vperm.xlu0 %6966, %v7652_v49   ;;  %749 = vperm.xlu1 %6963, %v7614_v39  }
 0x12e   :  { %v7955_v53 = vpop.permute.xlu2 %621  ;;  %v7957_v34 = vpop.permute.xlu0 %991 }
 0x12f   :  { %13419 = vst [vmem:[#allocation82_spill] sm:$0xff] %v7955_v53  ;;  %v7959_v38 = vpop.permute.xlu1 %581 }
 0x130   :  { %13420 = vst [vmem:[#allocation83_spill] sm:$0xff] %v7957_v34  ;;  %v7978_v34 = vld [vmem:[%s13012_s0 + $0x1b0] sm:$0xff] }
 0x131   :  { %13421 = vst [vmem:[#allocation84_spill] sm:$0xff] %v7959_v38 }
 0x133   :  { %765 = vperm.xlu2 %6964, %v7964_v31  }
 0x134   :  { %1171 = vperm.xlu0 %6966, %v7671_v54   ;;  %761 = vperm.xlu1 %6963, %v7633_v44  }
 0x136   :  { %v7969_v61 = vpop.permute.xlu2 %633  ;;  %v7971_v39 = vpop.permute.xlu0 %1003 }
 0x137   :  { %13422 = vst [vmem:[#allocation85_spill] sm:$0xff] %v7969_v61  ;;  %v7973_v53 = vpop.permute.xlu1 %593 }
 0x138   :  { %13423 = vst [vmem:[#allocation86_spill] sm:$0xff] %v7971_v39  ;;  %v7992_v39 = vld [vmem:[%s13012_s0 + $0x1c8] sm:$0xff] }
 0x139   :  { %13424 = vst [vmem:[#allocation87_spill] sm:$0xff] %v7973_v53 }
 0x13b   :  { %777 = vperm.xlu2 %6964, %v7978_v34  }
 0x13c   :  { %1183 = vperm.xlu0 %6966, %v7690_v59   ;;  %773 = vperm.xlu1 %6963, %v7652_v49  }
 0x13e   :  { %v7983_v38 = vpop.permute.xlu2 %645  ;;  %v7985_v44 = vpop.permute.xlu0 %1015 }
 0x13f   :  { %13425 = vst [vmem:[#allocation88_spill] sm:$0xff] %v7983_v38  ;;  %v7987_v61 = vpop.permute.xlu1 %605 }
 0x140   :  { %13426 = vst [vmem:[#allocation89_spill] sm:$0xff] %v7985_v44  ;;  %v8006_v44 = vld [vmem:[%s13012_s0 + $0x1e0] sm:$0xff] }
 0x141   :  { %13427 = vst [vmem:[#allocation90_spill] sm:$0xff] %v7987_v61  ;;  %v13037_v61 = vmov 3  }
 0x143   :  { %789 = vperm.xlu2 %6964, %v7992_v39  }
 0x144   :  { %1195 = vperm.xlu0 %6966, %v7709_v1   ;;  %785 = vperm.xlu1 %6963, %v7671_v54  }
 0x146   :  { %v7997_v53 = vpop.permute.xlu2 %657  ;;  %v7999_v49 = vpop.permute.xlu0 %1027 }
 0x147   :  { %13428 = vst [vmem:[#allocation91_spill] sm:$0xff] %v7997_v53  ;;  %v8001_v38 = vpop.permute.xlu1 %617 }
 0x148   :  { %13429 = vst [vmem:[#allocation92_spill] sm:$0xff] %v7999_v49 }
 0x149   :  { %13430 = vst [vmem:[#allocation93_spill] sm:$0xff] %v8001_v38  ;;  %v8021_v38 = vld [vmem:[%s13012_s0 + $0x1f8] sm:$0xff] }
 0x14b   :  { %801 = vperm.xlu2 %6964, %v8006_v44  }
 0x14c   :  { %6970 = vset.pattern.permute.xlu0 %v13037_v61  ;;  %797 = vperm.xlu1 %6963, %v7690_v59  }
 0x14d   :  { %1337 = vperm.xlu0 %6970, %v7729_v57  }
 0x14e   :  { %v8012_v54 = vpop.permute.xlu2 %669  ;;  %v8014_v53 = vpop.permute.xlu0 %1039 }
 0x14f   :  { %13431 = vst [vmem:[#allocation94_spill] sm:$0xff] %v8012_v54  ;;  %v8016_v49 = vpop.permute.xlu1 %629 }
 0x150   :  { %13432 = vst [vmem:[#allocation95_spill] sm:$0xff] %v8014_v53  ;;  %v13437_v53 = vmov 2  }
 0x151   :  { %13433 = vst [vmem:[#allocation96_spill] sm:$0xff] %v8016_v49 }
 0x153   :  { %813 = vperm.xlu2 %6964, %v8021_v38  }
 0x154   :  { %809 = vperm.xlu1 %6963, %v7709_v1  }
 0x155   :  { %1357 = vperm.xlu0 %6970, %v7754_v56  }
 0x156   :  { %v8026_v59 = vpop.permute.xlu2 %681  ;;  %v8028_v61 = vpop.permute.xlu0 %1051 }
 0x157   :  { %13434 = vst [vmem:[#allocation97_spill] sm:$0xff] %v8026_v59  ;;  %v8030_v54 = vpop.permute.xlu1 %641 }
 0x158   :  { %13435 = vst [vmem:[#allocation98_spill] sm:$0xff] %v8028_v61 }
 0x159   :  { %13436 = vst [vmem:[#allocation99_spill] sm:$0xff] %v8030_v54 }
 0x15b   :  { %6968 = vset.pattern.permute.xlu2 %v13437_v53 }
 0x15c   :  { %6967 = vset.pattern.permute.xlu1 %v13437_v53  ;;  %955 = vperm.xlu2 %6968, %v7406_v3  }
 0x15d   :  { %1369 = vperm.xlu0 %6970, %v7768_v46   ;;  %951 = vperm.xlu1 %6967, %v7729_v57  }
 0x15e   :  { %v8037_v49 = vpop.permute.xlu2 %693  ;;  %v8039_v1 = vpop.permute.xlu0 %1063 }
 0x15f   :  { %13438 = vst [vmem:[#allocation100_spill] sm:$0xff] %v8037_v49  ;;  %v8041_v63 = vpop.permute.xlu1 %653 }
 0x160   :  { %13439 = vst [vmem:[#allocation101_spill] sm:$0xff] %v8039_v1 }
 0x161   :  { %13440 = vst [vmem:[#allocation102_spill] sm:$0xff] %v8041_v63 }
 0x164   :  { %963 = vperm.xlu2 %6968, %v7401_v2  }
 0x165   :  { %1381 = vperm.xlu0 %6970, %v7782_v51   ;;  %959 = vperm.xlu1 %6967, %v7425_v6  }
 0x166   :  { %v8046_v59 = vpop.permute.xlu2 %705  ;;  %v8048_v53 = vpop.permute.xlu0 %1075 }
 0x167   :  { %13441 = vst [vmem:[#allocation103_spill] sm:$0xff] %v8046_v59  ;;  %v8050_v61 = vpop.permute.xlu1 %665 }
 0x168   :  { %13442 = vst [vmem:[#allocation104_spill] sm:$0xff] %v8048_v53 }
 0x169   :  { %13443 = vst [vmem:[#allocation105_spill] sm:$0xff] %v8050_v61 }
 0x16c   :  { %975 = vperm.xlu2 %6968, %v7420_v5  }
 0x16d   :  { %1393 = vperm.xlu0 %6970, %v7796_v41   ;;  %971 = vperm.xlu1 %6967, %v7754_v56  }
 0x16e   :  { %v8055_v49 = vpop.permute.xlu2 %717  ;;  %v8057_v1 = vpop.permute.xlu0 %1087 }
 0x16f   :  { %13444 = vst [vmem:[#allocation106_spill] sm:$0xff] %v8055_v49  ;;  %v8059_v63 = vpop.permute.xlu1 %677 }
 0x170   :  { %13445 = vst [vmem:[#allocation107_spill] sm:$0xff] %v8057_v1 }
 0x171   :  { %13446 = vst [vmem:[#allocation108_spill] sm:$0xff] %v8059_v63 }
 0x174   :  { %987 = vperm.xlu2 %6968, %v7438_v8  }
 0x175   :  { %1405 = vperm.xlu0 %6970, %v7810_v52   ;;  %983 = vperm.xlu1 %6967, %v7768_v46  }
 0x176   :  { %v8064_v59 = vpop.permute.xlu2 %729  ;;  %v8066_v53 = vpop.permute.xlu0 %1099 }
 0x177   :  { %13447 = vst [vmem:[#allocation109_spill] sm:$0xff] %v8064_v59  ;;  %v8068_v61 = vpop.permute.xlu1 %689 }
 0x178   :  { %13448 = vst [vmem:[#allocation110_spill] sm:$0xff] %v8066_v53 }
 0x179   :  { %13449 = vst [vmem:[#allocation111_spill] sm:$0xff] %v8068_v61 }
 0x17c   :  { %999 = vperm.xlu2 %6968, %v7451_v10  }
 0x17d   :  { %1417 = vperm.xlu0 %6970, %v7824_v58   ;;  %995 = vperm.xlu1 %6967, %v7782_v51  }
 0x17e   :  { %v8073_v49 = vpop.permute.xlu2 %741  ;;  %v8075_v1 = vpop.permute.xlu0 %1111 }
 0x17f   :  { %13450 = vst [vmem:[#allocation112_spill] sm:$0xff] %v8073_v49  ;;  %v8077_v63 = vpop.permute.xlu1 %701 }
 0x180   :  { %13451 = vst [vmem:[#allocation113_spill] sm:$0xff] %v8075_v1 }
 0x181   :  { %13452 = vst [vmem:[#allocation114_spill] sm:$0xff] %v8077_v63 }
 0x184   :  { %1011 = vperm.xlu2 %6968, %v7464_v12  }
 0x185   :  { %1429 = vperm.xlu0 %6970, %v7838_v47   ;;  %1007 = vperm.xlu1 %6967, %v7796_v41  }
 0x186   :  { %v8082_v59 = vpop.permute.xlu2 %753  ;;  %v8084_v53 = vpop.permute.xlu0 %1123 }
 0x187   :  { %13453 = vst [vmem:[#allocation115_spill] sm:$0xff] %v8082_v59  ;;  %v8086_v61 = vpop.permute.xlu1 %713 }
 0x188   :  { %13454 = vst [vmem:[#allocation116_spill] sm:$0xff] %v8084_v53 }
 0x189   :  { %13455 = vst [vmem:[#allocation117_spill] sm:$0xff] %v8086_v61 }
 0x18c   :  { %1023 = vperm.xlu2 %6968, %v7477_v14  }
 0x18d   :  { %1441 = vperm.xlu0 %6970, %v7852_v36   ;;  %1019 = vperm.xlu1 %6967, %v7810_v52  }
 0x18e   :  { %v8091_v49 = vpop.permute.xlu2 %765  ;;  %v8093_v1 = vpop.permute.xlu0 %1135 }
 0x18f   :  { %13456 = vst [vmem:[#allocation118_spill] sm:$0xff] %v8091_v49  ;;  %v8095_v63 = vpop.permute.xlu1 %725 }
 0x190   :  { %13457 = vst [vmem:[#allocation119_spill] sm:$0xff] %v8093_v1 }
 0x191   :  { %13458 = vst [vmem:[#allocation120_spill] sm:$0xff] %v8095_v63 }
 0x194   :  { %1035 = vperm.xlu2 %6968, %v7490_v16  }
 0x195   :  { %1453 = vperm.xlu0 %6970, %v7866_v62   ;;  %1031 = vperm.xlu1 %6967, %v7824_v58  }
 0x196   :  { %v8100_v53 = vpop.permute.xlu2 %777  ;;  %v8102_v61 = vpop.permute.xlu0 %1147 }
 0x197   :  { %13459 = vst [vmem:[#allocation121_spill] sm:$0xff] %v8100_v53  ;;  %v8104_v54 = vpop.permute.xlu1 %737 }
 0x198   :  { %13460 = vst [vmem:[#allocation122_spill] sm:$0xff] %v8102_v61 }
 0x199   :  { %13461 = vst [vmem:[#allocation123_spill] sm:$0xff] %v8104_v54 }
 0x19c   :  { %1047 = vperm.xlu2 %6968, %v7503_v18  }
 0x19d   :  { %1465 = vperm.xlu0 %6970, %v7880_v33   ;;  %1043 = vperm.xlu1 %6967, %v7838_v47  }
 0x19e   :  { %v8109_v1 = vpop.permute.xlu2 %789  ;;  %v8111_v63 = vpop.permute.xlu0 %1159 }
 0x19f   :  { %13462 = vst [vmem:[#allocation124_spill] sm:$0xff] %v8109_v1  ;;  %v8113_v49 = vpop.permute.xlu1 %749 }
 0x1a0   :  { %13463 = vst [vmem:[#allocation125_spill] sm:$0xff] %v8111_v63 }
 0x1a1   :  { %13464 = vst [vmem:[#allocation126_spill] sm:$0xff] %v8113_v49 }
 0x1a4   :  { %1059 = vperm.xlu2 %6968, %v7516_v20  }
 0x1a5   :  { %1477 = vperm.xlu0 %6970, %v7894_v42   ;;  %1055 = vperm.xlu1 %6967, %v7852_v36  }
 0x1a6   :  { %v8118_v53 = vpop.permute.xlu2 %801  ;;  %v8120_v54 = vpop.permute.xlu0 %1171 }
 0x1a7   :  { %13465 = vst [vmem:[#allocation127_spill] sm:$0xff] %v8118_v53  ;;  %v8122_v61 = vpop.permute.xlu1 %761 }
 0x1a8   :  { %13466 = vst [vmem:[#allocation128_spill] sm:$0xff] %v8120_v54 }
 0x1a9   :  { %13467 = vst [vmem:[#allocation129_spill] sm:$0xff] %v8122_v61 }
 0x1ac   :  { %1071 = vperm.xlu2 %6968, %v7529_v22  }
 0x1ad   :  { %1489 = vperm.xlu0 %6970, %v7908_v48   ;;  %1067 = vperm.xlu1 %6967, %v7866_v62  }
 0x1ae   :  { %v8127_v1 = vpop.permute.xlu2 %813  ;;  %v8129_v49 = vpop.permute.xlu0 %1183 }
 0x1af   :  { %13468 = vst [vmem:[#allocation130_spill] sm:$0xff] %v8127_v1  ;;  %v8131_v63 = vpop.permute.xlu1 %773 }
 0x1b0   :  { %13469 = vst [vmem:[#allocation131_spill] sm:$0xff] %v8129_v49 }
 0x1b1   :  { %13470 = vst [vmem:[#allocation132_spill] sm:$0xff] %v8131_v63 }
 0x1b4   :  { %1083 = vperm.xlu2 %6968, %v7542_v24  }
 0x1b5   :  { %1501 = vperm.xlu0 %6970, %v7922_v30   ;;  %1079 = vperm.xlu1 %6967, %v7880_v33  }
 0x1b6   :  { %v8136_v53 = vpop.permute.xlu0 %1195  ;;  %v8138_v54 = vpop.permute.xlu2 %955 }
 0x1b7   :  { %13471 = vst [vmem:[#allocation133_spill] sm:$0xff] %v8136_v53  ;;  %v8140_v61 = vpop.permute.xlu1 %785 }
 0x1b8   :  { %13472 = vst [vmem:[#allocation134_spill] sm:$0xff] %v8138_v54 }
 0x1b9   :  { %13473 = vst [vmem:[#allocation135_spill] sm:$0xff] %v8140_v61 }
 0x1bc   :  { %1095 = vperm.xlu2 %6968, %v7555_v26  }
 0x1bd   :  { %1513 = vperm.xlu0 %6970, %v7936_v37   ;;  %1091 = vperm.xlu1 %6967, %v7894_v42  }
 0x1be   :  { %v8145_v1 = vpop.permute.xlu2 %963 }
 0x1bf   :  { %13474 = vst [vmem:[#allocation136_spill] sm:$0xff] %v8145_v1  ;;  %v8147_v49 = vpop.permute.xlu1 %797  ;;  %v8149_v63 = vpop.permute.xlu0 %1337 }
 0x1c0   :  { %13475 = vst [vmem:[#allocation137_spill] sm:$0xff] %v8147_v49 }
 0x1c4   :  { %1107 = vperm.xlu2 %6968, %v7570_v29  }
 0x1c5   :  { %1525 = vperm.xlu0 %6970, %v7950_v43   ;;  %1103 = vperm.xlu1 %6967, %v7908_v48  }
 0x1c6   :  { %v8154_v53 = vpop.permute.xlu2 %975 }
 0x1c7   :  { %13476 = vst [vmem:[#allocation138_spill] sm:$0xff] %v8154_v53  ;;  %v8156_v61 = vpop.permute.xlu1 %809  ;;  %v8158_v59 = vpop.permute.xlu0 %1357 }
 0x1c8   :  { %13477 = vst [vmem:[#allocation139_spill] sm:$0xff] %v8156_v61 }
 0x1c9   :  { %13478 = vst [vmem:[#allocation140_spill] sm:$0xff] %v8158_v59 }
 0x1cc   :  { %1119 = vperm.xlu2 %6968, %v7585_v32  }
 0x1cd   :  { %1537 = vperm.xlu0 %6970, %v7964_v31   ;;  %1115 = vperm.xlu1 %6967, %v7922_v30  }
 0x1ce   :  { %v8163_v49 = vpop.permute.xlu2 %987 }
 0x1cf   :  { %13479 = vst [vmem:[#allocation141_spill] sm:$0xff] %v8163_v49  ;;  %v8165_v1 = vpop.permute.xlu0 %1369  ;;  %v8167_v54 = vpop.permute.xlu1 %951 }
 0x1d0   :  { %13480 = vst [vmem:[#allocation142_spill] sm:$0xff] %v8165_v1 }
 0x1d4   :  { %1131 = vperm.xlu2 %6968, %v7600_v35  }
 0x1d5   :  { %1549 = vperm.xlu0 %6970, %v7978_v34   ;;  %1127 = vperm.xlu1 %6967, %v7936_v37  }
 0x1d6   :  { %v8172_v61 = vpop.permute.xlu2 %999 }
 0x1d7   :  { %13481 = vst [vmem:[#allocation143_spill] sm:$0xff] %v8172_v61  ;;  %v8174_v59 = vpop.permute.xlu0 %1381  ;;  %v8176_v53 = vpop.permute.xlu1 %959 }
 0x1d8   :  { %13482 = vst [vmem:[#allocation144_spill] sm:$0xff] %v8174_v59 }
 0x1dc   :  { %1143 = vperm.xlu2 %6968, %v7619_v40  }
 0x1dd   :  { %1561 = vperm.xlu0 %6970, %v7992_v39   ;;  %1139 = vperm.xlu1 %6967, %v7950_v43  }
 0x1de   :  { %v8181_v49 = vpop.permute.xlu2 %1011 }
 0x1df   :  { %13483 = vst [vmem:[#allocation145_spill] sm:$0xff] %v8181_v49  ;;  %v8183_v1 = vpop.permute.xlu0 %1393  ;;  %v8185_v35 = vpop.permute.xlu1 %971 }
 0x1e0   :  { %13484 = vst [vmem:[#allocation146_spill] sm:$0xff] %v8183_v1 }
 0x1e1   :  { %13485 = vst [vmem:[#allocation147_spill] sm:$0xff] %v8185_v35 }
 0x1e4   :  { %1155 = vperm.xlu2 %6968, %v7638_v45   ;;  %v13491_v45 = vmov 0  }
 0x1e5   :  { %1573 = vperm.xlu0 %6970, %v8006_v44   ;;  %1151 = vperm.xlu1 %6967, %v7964_v31  }
 0x1e6   :  { %v8190_v59 = vpop.permute.xlu2 %1023 }
 0x1e7   :  { %13486 = vst [vmem:[#allocation148_spill] sm:$0xff] %v8190_v59  ;;  %v8192_v61 = vpop.permute.xlu0 %1405  ;;  %v8194_v40 = vpop.permute.xlu1 %983 }
 0x1e8   :  { %13487 = vst [vmem:[#allocation149_spill] sm:$0xff] %v8192_v61 }
 0x1ec   :  { %1167 = vperm.xlu2 %6968, %v7657_v50  }
 0x1ed   :  { %1585 = vperm.xlu0 %6970, %v8021_v38   ;;  %1163 = vperm.xlu1 %6967, %v7978_v34  }
 0x1ee   :  { %v8199_v49 = vpop.permute.xlu2 %1035 }
 0x1ef   :  { %13488 = vst [vmem:[#allocation150_spill] sm:$0xff] %v8199_v49  ;;  %v8201_v1 = vpop.permute.xlu0 %1417  ;;  %v8203_v35 = vpop.permute.xlu1 %995 }
 0x1f0   :  { %13489 = vst [vmem:[#allocation151_spill] sm:$0xff] %v8201_v1 }
 0x1f1   :  { %13490 = vst [vmem:[#allocation152_spill] sm:$0xff] %v8203_v35  ;;  %v13495_v35 = vmov 3  }
 0x1f4   :  { %1179 = vperm.xlu2 %6968, %v7676_v55  }
 0x1f5   :  { %6972 = vset.pattern.permute.xlu0 %v13491_v45  ;;  %1175 = vperm.xlu1 %6967, %v7992_v39  }
 0x1f6   :  { %109 = vperm.xlu0 %6972, %v7714_v0   ;;  %v8209_v61 = vpop.permute.xlu2 %1047 }
 0x1f7   :  { %13492 = vst [vmem:[#allocation153_spill] sm:$0xff] %v8209_v61  ;;  %v8211_v50 = vpop.permute.xlu0 %1429  ;;  %v8213_v59 = vpop.permute.xlu1 %1007 }
 0x1f8   :  { %13493 = vst [vmem:[#allocation154_spill] sm:$0xff] %v8211_v50 }
 0x1fc   :  { %1191 = vperm.xlu2 %6968, %v7695_v60  }
 0x1fd   :  { %1187 = vperm.xlu1 %6967, %v8006_v44  }
 0x1fe   :  { %114 = vperm.xlu0 %6972, %v7729_v57   ;;  %v8218_v49 = vpop.permute.xlu2 %1059 }
 0x1ff   :  { %13494 = vst [vmem:[#allocation155_spill] sm:$0xff] %v8218_v49  ;;  %v8220_v55 = vpop.permute.xlu0 %1441  ;;  %v8222_v1 = vpop.permute.xlu1 %1019 }
 0x204   :  { %6969 = vset.pattern.permute.xlu2 %v13495_v35 }
 0x205   :  { %1199 = vperm.xlu1 %6967, %v8021_v38   ;;  %1333 = vperm.xlu2 %6969, %v7714_v0  }
 0x206   :  { %139 = vperm.xlu0 %6972, %v7754_v56   ;;  %v8228_v50 = vpop.permute.xlu2 %1071 }
 0x207   :  { %v8230_v60 = vpop.permute.xlu0 %1453  ;;  %v8232_v61 = vpop.permute.xlu1 %1031 }
 0x208   :  { %13496 = vst [vmem:[#allocation156_spill] sm:$0xff] %v8230_v60 }
 0x20d   :  { %6971 = vset.pattern.permute.xlu1 %v13495_v35  ;;  %1345 = vperm.xlu2 %6969, %v7425_v6  }
 0x20e   :  { %154 = vperm.xlu0 %6972, %v7768_v46   ;;  %1341 = vperm.xlu1 %6971, %v7406_v3   ;;  %v8238_v57 = vpop.permute.xlu2 %1083 }
 0x20f   :  { %13497 = vst [vmem:[#allocation157_spill] sm:$0xff] %v8238_v57  ;;  %v8240_v49 = vpop.permute.xlu0 %1465  ;;  %v8242_v0 = vpop.permute.xlu1 %1043 }
 0x210   :  { %13498 = vst [vmem:[#allocation158_spill] sm:$0xff] %v8240_v49  ;;  %v13548_v49 = vld [vmem:[#allocation8_spill] sm:$0xff] }
 0x215   :  { %1353 = vperm.xlu2 %6969, %v7415_v4  }
 0x216   :  { %169 = vperm.xlu0 %6972, %v7782_v51   ;;  %1349 = vperm.xlu1 %6971, %v7401_v2   ;;  %v8247_v56 = vpop.permute.xlu2 %1095 }
 0x217   :  { %13499 = vst [vmem:[#allocation159_spill] sm:$0xff] %v8247_v56  ;;  %v8249_v35 = vpop.permute.xlu0 %1477  ;;  %v8251_v6 = vpop.permute.xlu1 %1055 }
 0x218   :  { %13500 = vst [vmem:[#allocation160_spill] sm:$0xff] %v8249_v35 }
 0x21d   :  { %1365 = vperm.xlu2 %6969, %v7433_v7  }
 0x21e   :  { %184 = vperm.xlu0 %6972, %v7796_v41   ;;  %1361 = vperm.xlu1 %6971, %v7420_v5   ;;  %v8256_v3 = vpop.permute.xlu2 %1107 }
 0x21f   :  { %13501 = vst [vmem:[#allocation161_spill] sm:$0xff] %v8256_v3  ;;  %v8258_v46 = vpop.permute.xlu0 %1489  ;;  %v8260_v4 = vpop.permute.xlu1 %1067  ;;  %v13514_v3 = vld [vmem:[#allocation70_spill] sm:$0xff] }
 0x220   :  { %13502 = vst [vmem:[#allocation162_spill] sm:$0xff] %v8258_v46 }
 0x225   :  { %1377 = vperm.xlu2 %6969, %v7446_v9  }
 0x226   :  { %199 = vperm.xlu0 %6972, %v7810_v52   ;;  %1373 = vperm.xlu1 %6971, %v7438_v8   ;;  %v8265_v2 = vpop.permute.xlu2 %1119 }
 0x227   :  { %13503 = vst [vmem:[#allocation163_spill] sm:$0xff] %v8265_v2  ;;  %v8267_v51 = vpop.permute.xlu0 %1501  ;;  %v8269_v7 = vpop.permute.xlu1 %1079  ;;  %v8377_v2 = vld [vmem:[%s13013_s1 + $0x3] ss:$0 sm:$0xff] }
 0x228   :  { %13504 = vst [vmem:[#allocation164_spill] sm:$0xff] %v8267_v51 }
 0x229   :  { %13505 = vst [vmem:[#allocation165_spill] sm:$0xff] %v8269_v7 }
 0x22d   :  { %1389 = vperm.xlu2 %6969, %v7459_v11  }
 0x22e   :  { %214 = vperm.xlu0 %6972, %v7824_v58   ;;  %1385 = vperm.xlu1 %6971, %v7451_v10   ;;  %v8274_v5 = vpop.permute.xlu2 %1131 }
 0x22f   :  { %13506 = vst [vmem:[#allocation166_spill] sm:$0xff] %v8274_v5  ;;  %v8276_v41 = vpop.permute.xlu0 %1513  ;;  %v8278_v9 = vpop.permute.xlu1 %1091  ;;  %v8363_v5 = vld [vmem:[%s13013_s1 + $0x2] ss:$0 sm:$0xff] }
 0x230   :  { %13507 = vst [vmem:[#allocation167_spill] sm:$0xff] %v8276_v41 }
 0x231   :  { %13508 = vst [vmem:[#allocation168_spill] sm:$0xff] %v8278_v9  ;;  %v13519_v9 = vld [vmem:[#allocation6_spill] sm:$0xff] }
 0x235   :  { %1401 = vperm.xlu2 %6969, %v7472_v13  }
 0x236   :  { %229 = vperm.xlu0 %6972, %v7838_v47   ;;  %1397 = vperm.xlu1 %6971, %v7464_v12   ;;  %v8283_v8 = vpop.permute.xlu2 %1143 }
 0x237   :  { %v8285_v52 = vpop.permute.xlu0 %1525  ;;  %v8287_v11 = vpop.permute.xlu1 %1103 }
 0x238   :  { %13509 = vst [vmem:[#allocation169_spill] sm:$0xff] %v8287_v11  ;;  %v13515_v11 = vld [vmem:[#allocation4_spill] sm:$0xff] }
 0x23d   :  { %1413 = vperm.xlu2 %6969, %v7485_v15  }
 0x23e   :  { %244 = vperm.xlu0 %6972, %v7852_v36   ;;  %1409 = vperm.xlu1 %6971, %v7477_v14   ;;  %v8292_v10 = vpop.permute.xlu2 %1155 }
 0x23f   :  { %v8294_v58 = vpop.permute.xlu0 %1537  ;;  %v8296_v13 = vpop.permute.xlu1 %1115 }
 0x240   :  { %13510 = vst [vmem:[#allocation170_spill] sm:$0xff] %v8296_v13  ;;  %v13513_v13 = vld [vmem:[#allocation76_spill] sm:$0xff] }
 0x245   :  { %1425 = vperm.xlu2 %6969, %v7498_v17  }
 0x246   :  { %259 = vperm.xlu0 %6972, %v7866_v62   ;;  %1421 = vperm.xlu1 %6971, %v7490_v16   ;;  %v8301_v12 = vpop.permute.xlu2 %1167 }
 0x247   :  { %v8303_v47 = vpop.permute.xlu0 %1549  ;;  %v8305_v15 = vpop.permute.xlu1 %1127 }
 0x248   :  { %13511 = vst [vmem:[#allocation171_spill] sm:$0xff] %v8305_v15 }
 0x24d   :  { %1437 = vperm.xlu2 %6969, %v7511_v19  }
 0x24e   :  { %274 = vperm.xlu0 %6972, %v7880_v33   ;;  %1433 = vperm.xlu1 %6971, %v7503_v18   ;;  %v8310_v14 = vpop.permute.xlu2 %1179  ;;  %v6428_v18 = vld [vmem:[%s13015_s3 + $0x8] sm:$0xff] }
 0x24f   :  { %v8312_v36 = vpop.permute.xlu0 %1561  ;;  %v8314_v17 = vpop.permute.xlu1 %1139  ;;  %1936 = vmatpush.bf16.msra.mxu0 %v6428_v18  ;;  %6624 = vmatpush.bf16.msra.mxu3 %v6428_v18  ;;  %v8351_v18 = vld [vmem:[%s13014_s2] ss:$0 sm:$0xff] }
 0x255   :  { %1449 = vperm.xlu2 %6969, %v7524_v21   ;;  %v6427_v21 = vld [vmem:[%s13015_s3] sm:$0xff] }
 0x256   :  { %289 = vperm.xlu0 %6972, %v7894_v42   ;;  %1445 = vperm.xlu1 %6971, %v7516_v20   ;;  %v8319_v16 = vpop.permute.xlu2 %1191 }
 0x257   :  { %v8321_v62 = vpop.permute.xlu0 %1573  ;;  %v8323_v19 = vpop.permute.xlu1 %1151  ;;  %1937 = vmatpush.bf16.msra.mxu0 %v6427_v21  ;;  %6625 = vmatpush.bf16.msra.mxu3 %v6427_v21 }
 0x25d   :  { %1461 = vperm.xlu2 %6969, %v7537_v23   ;;  %v8344_v23 = vld [vmem:[%s13013_s1] ss:$0 sm:$0xff] }
 0x25e   :  { %304 = vperm.xlu0 %6972, %v7908_v48   ;;  %1457 = vperm.xlu1 %6971, %v7529_v22  }
 0x25f   :  { %v8334_v20 = vpop.permute.xlu0 %1585  ;;  %v8336_v33 = vpop.permute.xlu1 %1163 }
 0x260   :  { %13512 = vst [vmem:[#allocation172_spill] sm:$0xff] %v8334_v20  ;;  %v1334_v42 = vpop.permute.xlu2 %1333 }
 0x265   :  { %1473 = vperm.xlu2 %6969, %v7550_v25   ;;  %v8357_v25 = vld [vmem:[%s13013_s1 + $0x1] ss:$0 sm:$0xff] }
 0x266   :  { %319 = vperm.xlu0 %6972, %v7922_v30   ;;  %1469 = vperm.xlu1 %6971, %v7542_v24   ;;  %v817_v41 = vmul.f32 %v8357_v25, %v7931_v27 }
 0x267   :  { %v8346_v48 = vpop.permute.xlu1 %1175 }
 0x268   :  { %v110_v22 = vpop.permute.xlu0 %109  ;;  %v1346_v24 = vpop.permute.xlu2 %1345 }
 0x269   :  { %v428_v21 = vmul.f32 %v8344_v23, %v110_v22 }
 0x26b   :  { %v495_v30 = vadd.f32 %v8351_v18, %v428_v21  ;;  %v1203_v21 = vmul.f32 %v8363_v5, %v13513_v13 }
 0x26d   :  { %1485 = vperm.xlu2 %6969, %v7565_v28   ;;  %v881_v22 = vadd.f32 %v817_v41, %v495_v30  ;;  %v818_v28 = vmul.f32 %v8357_v25, %v13514_v3  ;;  %v1204_v30 = vmul.f32 %v8363_v5, %v8167_v54  ;;  %v1590_v3 = vmul.f32 %v8377_v2, %v8149_v63 }
 0x26e   :  { %334 = vperm.xlu0 %6972, %v7936_v37   ;;  %1481 = vperm.xlu1 %6971, %v7555_v26   ;;  %v1589_v37 = vmul.f32 %v8377_v2, %v1334_v42 }
 0x26f   :  { %v8370_v15 = vpop.permute.xlu1 %1187  ;;  %v1267_v26 = vadd.f32 %v1203_v21, %v881_v22 }
 0x270   :  { %v115_v51 = vpop.permute.xlu0 %114  ;;  %v8386_v46 = vpop.permute.xlu2 %1353 }
 0x271   :  { %v429_v27 = vmul.f32 %v8344_v23, %v115_v51  ;;  %v1653_v22 = vadd.f32 %v1589_v37, %v1267_v26  ;;  %v13520_v37 = vld [vmem:[#allocation9_spill] sm:$0xff] }
 0x272   :  { %v819_v26 = vmul.f32 %v8357_v25, %v13520_v37 }
 0x273   :  { %v496_v41 = vadd.f32 %v8351_v18, %v429_v27  ;;  %v13517_v27 = vld [vmem:[#allocation10_spill] sm:$0xff] }
 0x274   :  { %v430_v54 = vmul.f32 %v8344_v23, %v13517_v27 }
 0x275   :  { %v882_v13 = vadd.f32 %v818_v28, %v496_v41  ;;  %1497 = vperm.xlu2 %6969, %v13515_v11   ;;  %v1717_v28 = vmax.f32 %v1653_v22, 0.0  ;;  %v13518_v11 = vld [vmem:[#allocation15_spill] sm:$0xff] }
 0x276   :  { %349 = vperm.xlu0 %6972, %v7950_v43   ;;  %1493 = vperm.xlu1 %6971, %v7570_v29   ;;  %v497_v43 = vadd.f32 %v8351_v18, %v430_v54  ;;  %v431_v29 = vmul.f32 %v8344_v23, %v13518_v11  ;;  %v1592_v11 = vmul.f32 %v8377_v2, %v1346_v24 }
 0x277   :  { %v1268_v51 = vadd.f32 %v1204_v30, %v882_v13  ;;  %v8393_v42 = vpop.permute.xlu1 %1199  ;;  %v13521_v30 = vld [vmem:[#allocation81_spill] sm:$0xff] }
 0x278   :  { %13516 = vst [vmem:[#allocation76_spill] sm:$0xff] %v8393_v42  ;;  %v8395_v21 = vpop.permute.xlu0 %139  ;;  %v820_v13 = vmul.f32 %v8357_v25, %v13521_v30 }
 0x279   :  { %v1654_v35 = vadd.f32 %v1590_v3, %v1268_v51  ;;  %v8411_v51 = vpop.permute.xlu2 %1365 }
 0x27b   :  { %v1718_v41 = vmax.f32 %v1654_v35, 0.0  ;;  %v13522_v35 = vld [vmem:[#allocation134_spill] sm:$0xff] }
 0x27c   :  { %v1205_v3 = vmul.f32 %v8363_v5, %v13522_v35  ;;  %v13523_v35 = vld [vmem:[#allocation11_spill] sm:$0xff] }
 0x27d   :  { %1509 = vperm.xlu2 %6969, %v13519_v9   ;;  %v1781_v63 = vpack.c.bf16 %v1718_v41, %v1717_v28  ;;  %v498_v9 = vadd.f32 %v8351_v18, %v431_v29 }
 0x27e   :  { %364 = vperm.xlu0 %6972, %v7964_v31   ;;  %1505 = vperm.xlu1 %6971, %v7585_v32   ;;  %v883_v31 = vadd.f32 %v819_v26, %v497_v43  ;;  %v1206_v32 = vmul.f32 %v8363_v5, %v8176_v53 }
 0x27f   :  { %6315 = vmatmul.msk.bf16.vlgmr.msra.gmra.mxu0 %vm1833_vm0, %v1781_v63  ;;  %v884_v28 = vadd.f32 %v820_v13, %v498_v9  ;;  %v13524_v63 = vld [vmem:[#allocation7_spill] sm:$0xff] }
 0x280   :  { %v8414_v22 = vpop.permute.xlu0 %154  ;;  %v1342_v27 = vpop.permute.xlu1 %1341  ;;  %v1269_v41 = vadd.f32 %v1205_v3, %v883_v31  ;;  %v13526_v3 = vld [vmem:[#allocation3_spill] sm:$0xff]  ;;  %v13527_v31 = vld [vmem:[#allocation73_spill] sm:$0xff] }
 0x281   :  { %v1591_v54 = vmul.f32 %v8377_v2, %v1342_v27  ;;  %v1270_v37 = vadd.f32 %v1206_v32, %v884_v28  ;;  %v8426_v26 = vpop.permute.xlu2 %1377  ;;  %v13525_v27 = vld [vmem:[#allocation2_spill] sm:$0xff]  ;;  %v433_v24 = vmul.f32 %v8344_v23, %v13526_v3  ;;  %v821_v32 = vmul.f32 %v8357_v25, %v13527_v31  ;;  %v13529_v28 = vld [vmem:[#allocation16_spill] sm:$0xff] }
 0x282   :  { %v432_v13 = vmul.f32 %v8344_v23, %v13525_v27 }
 0x283   :  { %v1655_v30 = vadd.f32 %v1591_v54, %v1269_v41  ;;  %v1656_v29 = vadd.f32 %v1592_v11, %v1270_v37  ;;  %v13530_v11 = vld [vmem:[#allocation12_spill] sm:$0xff] }
 0x284   :  { %v499_v37 = vadd.f32 %v8351_v18, %v432_v13  ;;  %v1594_v13 = vmul.f32 %v8377_v2, %v8386_v46 }
 0x285   :  { %1521 = vperm.xlu2 %6969, %v13523_v35   ;;  %v1719_v53 = vmax.f32 %v1655_v30, 0.0  ;;  %v1720_v9 = vmax.f32 %v1656_v29, 0.0  ;;  %v500_v30 = vadd.f32 %v8351_v18, %v433_v24  ;;  %v13531_v35 = vld [vmem:[#allocation136_spill] sm:$0xff] }
 0x286   :  { %379 = vperm.xlu0 %6972, %v7978_v34   ;;  %1517 = vperm.xlu1 %6971, %v13524_v63   ;;  %v13528_v34 = vld [vmem:[#allocation84_spill] sm:$0xff]  ;;  %v1207_v63 = vmul.f32 %v8363_v5, %v13531_v35  ;;  %v885_v27 = vadd.f32 %v821_v32, %v499_v37  ;;  %v13533_v35 = vld [vmem:[#allocation21_spill] sm:$0xff] }
 0x287   :  { %v822_v54 = vmul.f32 %v8357_v25, %v13528_v34  ;;  %v1782_v41 = vpack.c.bf16 %v1720_v9, %v1719_v53  ;;  %v13532_v9 = vld [vmem:[#allocation78_spill] sm:$0xff]  ;;  %v13534_v32 = vld [vmem:[#allocation17_spill] sm:$0xff]  ;;  %v13535_v37 = vld [vmem:[#allocation20_spill] sm:$0xff] }
 0x288   :  { %v8424_v43 = vpop.permute.xlu0 %169  ;;  %v1350_v56 = vpop.permute.xlu1 %1349  ;;  %v1271_v34 = vadd.f32 %v1207_v63, %v885_v27 }
 0x289   :  { %v886_v3 = vadd.f32 %v822_v54, %v500_v30  ;;  %v1593_v31 = vmul.f32 %v8377_v2, %v1350_v56  ;;  %v8451_v24 = vpop.permute.xlu2 %1389  ;;  %v434_v56 = vmul.f32 %v8344_v23, %v8395_v21  ;;  %v435_v30 = vmul.f32 %v8344_v23, %v13535_v37 }
 0x28d   :  { %1533 = vperm.xlu2 %6969, %v13529_v28  }
 0x28e   :  { %394 = vperm.xlu0 %6972, %v7992_v39   ;;  %1529 = vperm.xlu1 %6971, %v13530_v11   ;;  %v1208_v39 = vmul.f32 %v8363_v5, %v13532_v9  ;;  %v1657_v11 = vadd.f32 %v1593_v31, %v1271_v34  ;;  %v502_v31 = vadd.f32 %v8351_v18, %v435_v30  ;;  %v13537_v34 = vld [vmem:[#allocation25_spill] sm:$0xff]  ;;  %v13540_v30 = vld [vmem:[#allocation147_spill] sm:$0xff] }
 0x28f   :  { %6316 = vmatmul.msk.bf16.gmra.mxu0 %vm1833_vm0, %v1782_v41 }
 0x290   :  { %v8444_v29 = vpop.permute.xlu0 %184  ;;  %v1362_v53 = vpop.permute.xlu1 %1361  ;;  %v1272_v28 = vadd.f32 %v1208_v39, %v886_v3  ;;  %v1721_v46 = vmax.f32 %v1657_v11, 0.0  ;;  %v501_v3 = vadd.f32 %v8351_v18, %v434_v56 }
 0x291   :  { %v8468_v39 = vpop.permute.xlu2 %1401 }
 0x292   :  { %v1658_v54 = vadd.f32 %v1594_v13, %v1272_v28  ;;  %v7241_v13 = vld [vmem:[%s13012_s0 + $0x1b8] sm:$0xff]  ;;  %v13538_v28 = vld [vmem:[#allocation14_spill] sm:$0xff] }
 0x293   :  { %v824_v11 = vmul.f32 %v8357_v25, %v13538_v28 }
 0x294   :  { %v1722_v27 = vmax.f32 %v1658_v54, 0.0 }
 0x295   :  { %1545 = vperm.xlu2 %6969, %v13533_v35   ;;  %v13539_v35 = vld [vmem:[#allocation138_spill] sm:$0xff]  ;;  %v888_v37 = vadd.f32 %v824_v11, %v502_v31  ;;  %v7242_v31 = vld [vmem:[%s13012_s0 + $0x1d8] sm:$0xff] }
 0x296   :  { %409 = vperm.xlu0 %6972, %v8006_v44   ;;  %1541 = vperm.xlu1 %6971, %v13534_v32   ;;  %v13536_v44 = vld [vmem:[#allocation75_spill] sm:$0xff]  ;;  %v1783_v21 = vpack.c.bf16 %v1722_v27, %v1721_v46  ;;  %v1210_v32 = vmul.f32 %v8363_v5, %v13539_v35  ;;  %v1596_v46 = vmul.f32 %v8377_v2, %v1362_v53  ;;  %v7243_v53 = vld [vmem:[%s13012_s0 + $0x1d0] sm:$0xff] }
 0x297   :  { %v823_v9 = vmul.f32 %v8357_v25, %v13536_v44 }
 0x298   :  { %v8458_v41 = vpop.permute.xlu0 %199  ;;  %v8462_v63 = vpop.permute.xlu1 %1373  ;;  %v1274_v44 = vadd.f32 %v1210_v32, %v888_v37  ;;  %v13542_v37 = vld [vmem:[#allocation5_spill] sm:$0xff] }
 0x299   :  { %v887_v54 = vadd.f32 %v823_v9, %v501_v3  ;;  %v437_v3 = vmul.f32 %v8344_v23, %v8414_v22 }
 0x29a   :  { %v1660_v9 = vadd.f32 %v1596_v46, %v1274_v44 }
 0x29b   :  { %v504_v32 = vadd.f32 %v8351_v18, %v437_v3  ;;  %v7245_v3 = vld [vmem:[%s13012_s0 + $0x1e8] sm:$0xff] }
 0x29d   :  { %1557 = vperm.xlu2 %6969, %v13537_v34  }
 0x29e   :  { %424 = vperm.xlu0 %6972, %v8021_v38   ;;  %1553 = vperm.xlu1 %6971, %v7241_v13   ;;  %v1209_v38 = vmul.f32 %v8363_v5, %v13540_v30  ;;  %v13541_v13 = vld [vmem:[#allocation140_spill] sm:$0xff]  ;;  %v436_v30 = vmul.f32 %v8344_v23, %v13542_v37 }
 0x29f   :  { %6317 = vmatmul.msk.bf16.gmra.mxu0 %vm1833_vm0, %v1783_v21  ;;  %v1595_v28 = vmul.f32 %v8377_v2, %v13541_v13  ;;  %v8497_v21 = vpop.permute.xlu2 %1413  ;;  %v13544_v13 = vld [vmem:[#allocation87_spill] sm:$0xff] }
 0x2a0   :  { %v8480_v56 = vpop.permute.xlu0 %214  ;;  %v8485_v27 = vpop.permute.xlu1 %1385  ;;  %v1273_v34 = vadd.f32 %v1209_v38, %v887_v54  ;;  %v1724_v54 = vmax.f32 %v1660_v9, 0.0  ;;  %v13543_v38 = vld [vmem:[#allocation77_spill] sm:$0xff]  ;;  %v503_v9 = vadd.f32 %v8351_v18, %v436_v30  ;;  %v1597_v30 = vmul.f32 %v8377_v2, %v8411_v51 }
 0x2a1   :  { %v826_v46 = vmul.f32 %v8357_v25, %v13543_v38 }
 0x2a2   :  { %v1659_v11 = vadd.f32 %v1595_v28, %v1273_v34  ;;  %v7244_v34 = vld [vmem:[%s13012_s0 + $0x1f0] sm:$0xff] }
 0x2a4   :  { %v1723_v44 = vmax.f32 %v1659_v11, 0.0  ;;  %v1212_v11 = vmul.f32 %v8363_v5, %v8194_v40 }
 0x2a5   :  { %1569 = vperm.xlu2 %6969, %v7242_v31   ;;  %v825_v31 = vmul.f32 %v8357_v25, %v13544_v13 }
 0x2a6   :  { %1565 = vperm.xlu1 %6971, %v7243_v53   ;;  %v890_v53 = vadd.f32 %v826_v46, %v504_v32  ;;  %v1784_v28 = vpack.c.bf16 %v1724_v54, %v1723_v44  ;;  %v13545_v54 = vld [vmem:[#allocation80_spill] sm:$0xff] }
 0x2a7   :  { %v889_v32 = vadd.f32 %v825_v31, %v503_v9  ;;  %v8522_v46 = vpop.permute.xlu2 %1425  ;;  %v1211_v44 = vmul.f32 %v8363_v5, %v13545_v54 }
 0x2a8   :  { %v8499_v35 = vpop.permute.xlu0 %229  ;;  %v8502_v22 = vpop.permute.xlu1 %1397  ;;  %v1276_v38 = vadd.f32 %v1212_v11, %v890_v53 }
 0x2a9   :  { %v1275_v40 = vadd.f32 %v1211_v44, %v889_v32 }
 0x2ab   :  { %v1661_v31 = vadd.f32 %v1597_v30, %v1275_v40  ;;  %v13550_v30 = vld [vmem:[#allocation19_spill] sm:$0xff] }
 0x2ac   :  { %v827_v40 = vmul.f32 %v8357_v25, %v13550_v30 }
 0x2ad   :  { %1581 = vperm.xlu2 %6969, %v7244_v34   ;;  %v13546_v34 = vld [vmem:[#allocation142_spill] sm:$0xff]  ;;  %v1725_v7 = vmax.f32 %v1661_v31, 0.0 }
 0x2ae   :  { %1577 = vperm.xlu1 %6971, %v7245_v3   ;;  %v1598_v3 = vmul.f32 %v8377_v2, %v13546_v34  ;;  %v439_v34 = vmul.f32 %v8344_v23, %v13548_v49 }
 0x2af   :  { %6318 = vmatmul.msk.bf16.gmra.mxu0 %vm1833_vm0, %v1784_v28  ;;  %v13547_v28 = vld [vmem:[#allocation24_spill] sm:$0xff]  ;;  %v8542_v51 = vpop.permute.xlu2 %1437 }
 0x2b0   :  { %v8520_v37 = vpop.permute.xlu0 %244  ;;  %v8524_v13 = vpop.permute.xlu1 %1409  ;;  %v1662_v57 = vadd.f32 %v1598_v3, %v1276_v38  ;;  %v438_v9 = vmul.f32 %v8344_v23, %v13547_v28  ;;  %v13549_v38 = vld [vmem:[#allocation90_spill] sm:$0xff]  ;;  %v506_v3 = vadd.f32 %v8351_v18, %v439_v34  ;;  %v13551_v28 = vld [vmem:[#allocation141_spill] sm:$0xff] }
 0x2b2   :  { %v1726_v54 = vmax.f32 %v1662_v57, 0.0  ;;  %v505_v32 = vadd.f32 %v8351_v18, %v438_v9  ;;  %v1213_v57 = vmul.f32 %v8363_v5, %v13551_v28  ;;  %v1599_v9 = vmul.f32 %v8377_v2, %v8462_v63  ;;  %v13555_v63 = vld [vmem:[#allocation28_spill] sm:$0xff] }
 0x2b4   :  { %v1785_v44 = vpack.c.bf16 %v1726_v54, %v1725_v7  ;;  %v891_v20 = vadd.f32 %v827_v40, %v505_v32  ;;  %v13553_v7 = vld [vmem:[#allocation83_spill] sm:$0xff]  ;;  %v440_v32 = vmul.f32 %v8344_v23, %v8424_v43 }
 0x2b5   :  { %6974 = vset.pattern.permute.xlu2 %v13491_v45  ;;  %v1214_v54 = vmul.f32 %v8363_v5, %v13553_v7 }
 0x2b6   :  { %6973 = vset.pattern.permute.xlu1 %v13491_v45  ;;  %v828_v45 = vmul.f32 %v8357_v25, %v13549_v38  ;;  %v1277_v34 = vadd.f32 %v1213_v57, %v891_v20  ;;  %v1600_v38 = vmul.f32 %v8377_v2, %v8426_v26  ;;  %v507_v57 = vadd.f32 %v8351_v18, %v440_v32 }
 0x2b7   :  { %v8563_v60 = vpop.permute.xlu2 %1449 }
 0x2b8   :  { %v8534_v53 = vpop.permute.xlu0 %259  ;;  %v8538_v11 = vpop.permute.xlu1 %1421  ;;  %v892_v31 = vadd.f32 %v828_v45, %v506_v3  ;;  %v1663_v28 = vadd.f32 %v1599_v9, %v1277_v34  ;;  %v441_v3 = vmul.f32 %v8344_v23, %v13555_v63  ;;  %v13558_v34 = vld [vmem:[#allocation143_spill] sm:$0xff] }
 0x2ba   :  { %v1278_v30 = vadd.f32 %v1214_v54, %v892_v31  ;;  %v1727_v40 = vmax.f32 %v1663_v28, 0.0  ;;  %v508_v26 = vadd.f32 %v8351_v18, %v441_v3  ;;  %v13556_v31 = vld [vmem:[#allocation79_spill] sm:$0xff]  ;;  %v1602_v3 = vmul.f32 %v8377_v2, %v8485_v27 }
 0x2bb   :  { %v829_v9 = vmul.f32 %v8357_v25, %v13556_v31  ;;  %v13557_v54 = vld [vmem:[#allocation23_spill] sm:$0xff] }
 0x2bc   :  { %v830_v43 = vmul.f32 %v8357_v25, %v13557_v54 }
 0x2be   :  { %v894_v28 = vadd.f32 %v830_v43, %v508_v26 }
 0x2bf   :  { %6319 = vmatmul.msk.bf16.gmra.mxu0 %vm1833_vm0, %v1785_v44  ;;  %v1664_v44 = vadd.f32 %v1600_v38, %v1278_v30  ;;  %v1216_v38 = vmul.f32 %v8363_v5, %v13558_v34  ;;  %v893_v30 = vadd.f32 %v829_v9, %v507_v57  ;;  %v8581_v63 = vpop.permute.xlu2 %1461  ;;  %v443_v9 = vmul.f32 %v8344_v23, %v8444_v29 }
 0x2c0   :  { %v8553_v49 = vpop.permute.xlu0 %274  ;;  %v8557_v42 = vpop.permute.xlu1 %1433  ;;  %13559 = vst [vmem:[#allocation10_spill] sm:$0xff] %v8581_v63 }
 0x2c1   :  { %13552 = vst [vmem:[#allocation70_spill] sm:$0xff] %v8553_v49  ;;  %v1728_v20 = vmax.f32 %v1664_v44, 0.0  ;;  %v13560_v44 = vld [vmem:[#allocation152_spill] sm:$0xff]  ;;  %v510_v43 = vadd.f32 %v8351_v18, %v443_v9 }
 0x2c2   :  { %v1215_v32 = vmul.f32 %v8363_v5, %v13560_v44 }
 0x2c3   :  { %v1786_v7 = vpack.c.bf16 %v1728_v20, %v1727_v40  ;;  %v1280_v20 = vadd.f32 %v1216_v38, %v894_v28  ;;  %v13565_v38 = vld [vmem:[#allocation82_spill] sm:$0xff] }
 0x2c4   :  { %v1279_v54 = vadd.f32 %v1215_v32, %v893_v30  ;;  %v832_v30 = vmul.f32 %v8357_v25, %v13565_v38  ;;  %v13567_v32 = vld [vmem:[#allocation93_spill] sm:$0xff]  ;;  %v13569_v38 = vld [vmem:[#allocation86_spill] sm:$0xff] }
 0x2c5   :  { %v831_v29 = vmul.f32 %v8357_v25, %v13567_v32 }
 0x2c7   :  { %v8597_v44 = vpop.permute.xlu2 %1473 }
 0x2c8   :  { %v8567_v45 = vpop.permute.xlu0 %289  ;;  %v8571_v49 = vpop.permute.xlu1 %1445  ;;  %13563 = vst [vmem:[#allocation6_spill] sm:$0xff] %v8597_v44 }
 0x2c9   :  { %13554 = vst [vmem:[#allocation4_spill] sm:$0xff] %v8567_v45  ;;  %v13562_v45 = vld [vmem:[#allocation144_spill] sm:$0xff] }
 0x2ca   :  { %v1601_v57 = vmul.f32 %v8377_v2, %v13562_v45 }
 0x2cc   :  { %v1665_v26 = vadd.f32 %v1601_v57, %v1279_v54  ;;  %v1218_v57 = vmul.f32 %v8363_v5, %v8213_v59  ;;  %v6430_v59 = vld [vmem:[%s13018_s5 + $0x8] sm:$0xff] }
 0x2cd   :  { %2317 = vmatpush.bf16.msra.mxu1 %v6430_v59  ;;  %6626 = vmatpush.bf16.msrb.mxu3 %v6430_v59 }
 0x2ce   :  { %v1729_v45 = vmax.f32 %v1665_v26, 0.0  ;;  %v13570_v26 = vld [vmem:[#allocation146_spill] sm:$0xff] }
 0x2cf   :  { %6320 = vmatmul.msk.bf16.gmra.mxu0 %vm1833_vm0, %v1786_v7  ;;  %v1666_v7 = vadd.f32 %v1602_v3, %v1280_v20  ;;  %v896_v3 = vadd.f32 %v832_v30, %v510_v43  ;;  %v1604_v44 = vmul.f32 %v8377_v2, %v13570_v26  ;;  %v1603_v43 = vmul.f32 %v8377_v2, %v8451_v24 }
 0x2d0   :  { %v8588_v31 = vpop.permute.xlu0 %304  ;;  %v8590_v40 = vpop.permute.xlu1 %1457 }
 0x2d1   :  { %13561 = vst [vmem:[#allocation15_spill] sm:$0xff] %v8588_v31  ;;  %v1730_v34 = vmax.f32 %v1666_v7, 0.0  ;;  %v13564_v31 = vld [vmem:[#allocation13_spill] sm:$0xff] }
 0x2d2   :  { %v442_v63 = vmul.f32 %v8344_v23, %v13564_v31  ;;  %v1282_v31 = vadd.f32 %v1218_v57, %v896_v3  ;;  %v13573_v3 = vld [vmem:[#allocation31_spill] sm:$0xff]  ;;  %v13575_v57 = vld [vmem:[#allocation18_spill] sm:$0xff] }
 0x2d3   :  { %v1787_v20 = vpack.c.bf16 %v1730_v34, %v1729_v45  ;;  %v8621_v34 = vpop.permute.xlu2 %1485  ;;  %v444_v24 = vmul.f32 %v8344_v23, %v13573_v3 }
 0x2d4   :  { %v509_v54 = vadd.f32 %v8351_v18, %v442_v63  ;;  %13571 = vst [vmem:[#allocation134_spill] sm:$0xff] %v8621_v34  ;;  %v1668_v45 = vadd.f32 %v1604_v44, %v1282_v31  ;;  %v13576_v31 = vld [vmem:[#allocation96_spill] sm:$0xff] }
 0x2d5   :  { %v511_v44 = vadd.f32 %v8351_v18, %v444_v24  ;;  %v1605_v24 = vmul.f32 %v8377_v2, %v8502_v22 }
 0x2d6   :  { %v895_v9 = vadd.f32 %v831_v29, %v509_v54  ;;  %v6429_v29 = vld [vmem:[%s13018_s5] sm:$0xff]  ;;  %v1732_v54 = vmax.f32 %v1668_v45, 0.0  ;;  %v13579_v45 = vld [vmem:[#allocation145_spill] sm:$0xff] }
 0x2d7   :  { %2318 = vmatpush.bf16.msra.mxu1 %v6429_v29  ;;  %6627 = vmatpush.bf16.msrb.mxu3 %v6429_v29  ;;  %v1219_v29 = vmul.f32 %v8363_v5, %v13579_v45 }
 0x2d8   :  { %v8599_v27 = vpop.permute.xlu1 %1469  ;;  %v8605_v28 = vpop.permute.xlu0 %319 }
 0x2d9   :  { %13566 = vst [vmem:[#allocation9_spill] sm:$0xff] %v8605_v28  ;;  %v1217_v28 = vmul.f32 %v8363_v5, %v13569_v38  ;;  %v834_v38 = vmul.f32 %v8357_v25, %v13576_v31 }
 0x2db   :  { %v1281_v63 = vadd.f32 %v1217_v28, %v895_v9  ;;  %v445_v28 = vmul.f32 %v8344_v23, %v13575_v57  ;;  %v8640_v26 = vpop.permute.xlu2 %1497 }
 0x2dc   :  { %13577 = vst [vmem:[#allocation2_spill] sm:$0xff] %v8640_v26 }
 0x2dd   :  { %v1667_v32 = vadd.f32 %v1603_v43, %v1281_v63  ;;  %v512_v59 = vadd.f32 %v8351_v18, %v445_v28  ;;  %v13578_v63 = vld [vmem:[#allocation27_spill] sm:$0xff] }
 0x2de   :  { %v833_v3 = vmul.f32 %v8357_v25, %v13578_v63  ;;  %v1606_v63 = vmul.f32 %v8377_v2, %v8468_v39 }
 0x2df   :  { %6321 = vmatmul.msk.bf16.gmra.mxu0 %vm1833_vm0, %v1787_v20  ;;  %v1731_v9 = vmax.f32 %v1667_v32, 0.0  ;;  %v898_v32 = vadd.f32 %v834_v38, %v512_v59  ;;  %v13583_v59 = vld [vmem:[#allocation64_spill] sm:$0xff] }
 0x2e0   :  { %v8613_v7 = vpop.permute.xlu1 %1481  ;;  %v8626_v30 = vpop.permute.xlu0 %334  ;;  %v897_v57 = vadd.f32 %v833_v3, %v511_v44  ;;  %v446_v44 = vmul.f32 %v8344_v23, %v8458_v41  ;;  %v13584_v3 = vld [vmem:[#allocation115_spill] sm:$0xff] }
 0x2e1   :  { %13568 = vst [vmem:[#allocation81_spill] sm:$0xff] %v8613_v7  ;;  %v1788_v43 = vpack.c.bf16 %v1732_v54, %v1731_v9  ;;  %v13581_v9 = vld [vmem:[#allocation89_spill] sm:$0xff] }
 0x2e2   :  { %13572 = vst [vmem:[#allocation11_spill] sm:$0xff] %v8626_v30  ;;  %v1220_v28 = vmul.f32 %v8363_v5, %v13581_v9  ;;  %v1283_v26 = vadd.f32 %v1219_v29, %v897_v57  ;;  %v865_v9 = vmul.f32 %v8357_v25, %v13584_v3  ;;  %v13585_v29 = vld [vmem:[#allocation34_spill] sm:$0xff] }
 0x2e3   :  { %v8660_v22 = vpop.permute.xlu2 %1509  ;;  %v447_v57 = vmul.f32 %v8344_v23, %v13585_v29 }
 0x2e4   :  { %v1284_v45 = vadd.f32 %v1220_v28, %v898_v32  ;;  %13582 = vst [vmem:[#allocation73_spill] sm:$0xff] %v8660_v22 }
 0x2e6   :  { %v1670_v38 = vadd.f32 %v1606_v63, %v1284_v45  ;;  %v1251_v63 = vmul.f32 %v8363_v5, %v8314_v17  ;;  %v1252_v17 = vmul.f32 %v8363_v5, %v8283_v8  ;;  %v1221_v8 = vmul.f32 %v8363_v5, %v8222_v1 }
 0x2e8   :  { %v8633_v20 = vpop.permute.xlu1 %1493  ;;  %v350_v30 = vpop.permute.xlu0 %349 }
 0x2e9   :  { %13574 = vst [vmem:[#allocation7_spill] sm:$0xff] %v8633_v20  ;;  %v476_v54 = vmul.f32 %v8344_v23, %v350_v30  ;;  %v1669_v20 = vadd.f32 %v1605_v24, %v1283_v26  ;;  %v477_v30 = vmul.f32 %v8344_v23, %v13583_v59  ;;  %v8673_v26 = vld [vmem:[%s13016_s4] ss:$0 sm:$0xff]  ;;  %v1734_v24 = vmax.f32 %v1670_v38, 0.0 }
 0x2ea   :  { %v514_v59 = vadd.f32 %v8351_v18, %v447_v57  ;;  %v13589_v57 = vld [vmem:[#allocation30_spill] sm:$0xff] }
 0x2eb   :  { %v1733_v39 = vmax.f32 %v1669_v20, 0.0  ;;  %v544_v28 = vadd.f32 %v8351_v18, %v477_v30  ;;  %v13587_v20 = vld [vmem:[#allocation85_spill] sm:$0xff]  ;;  %v836_v22 = vmul.f32 %v8357_v25, %v13589_v57 }
 0x2ec   :  { %v835_v3 = vmul.f32 %v8357_v25, %v13587_v20  ;;  %v13590_v20 = vld [vmem:[#allocation148_spill] sm:$0xff]  ;;  %v13592_v57 = vld [vmem:[#allocation149_spill] sm:$0xff] }
 0x2ed   :  { %v1789_v38 = vpack.c.bf16 %v1734_v24, %v1733_v39  ;;  %v1637_v39 = vmul.f32 %v8377_v2, %v8285_v52 }
 0x2ef   :  { %6322 = vmatmul.msk.bf16.gmra.mxu0 %vm1833_vm0, %v1788_v43  ;;  %v543_v43 = vadd.f32 %v8351_v18, %v476_v54  ;;  %v513_v54 = vadd.f32 %v8351_v18, %v446_v44  ;;  %v13588_v44 = vld [vmem:[#allocation60_spill] sm:$0xff] }
 0x2f0   :  { %v8650_v31 = vpop.permute.xlu1 %1505  ;;  %v365_v29 = vpop.permute.xlu0 %364  ;;  %v866_v30 = vmul.f32 %v8357_v25, %v13588_v44  ;;  %v900_v44 = vadd.f32 %v836_v22, %v514_v59 }
 0x2f1   :  { %13580 = vst [vmem:[#allocation3_spill] sm:$0xff] %v8650_v31  ;;  %v929_v41 = vadd.f32 %v865_v9, %v543_v43  ;;  %v8686_v43 = vld [vmem:[%s13017_s9] ss:$0 sm:$0xff]  ;;  %v1222_v31 = vmul.f32 %v8363_v5, %v13590_v20  ;;  %v479_v24 = vmul.f32 %v8344_v23, %v365_v29  ;;  %v449_v20 = vmul.f32 %v8344_v23, %v8480_v56 }
 0x2f2   :  { %v930_v7 = vadd.f32 %v866_v30, %v544_v28 }
 0x2f3   :  { %v1315_v9 = vadd.f32 %v1251_v63, %v929_v41  ;;  %v1608_v41 = vmul.f32 %v8377_v2, %v8524_v13  ;;  %v8704_v63 = vpop.permute.xlu2 %1521  ;;  %v1286_v30 = vadd.f32 %v1222_v31, %v900_v44  ;;  %v546_v22 = vadd.f32 %v8351_v18, %v479_v24 }
 0x2f4   :  { %13591 = vst [vmem:[#allocation16_spill] sm:$0xff] %v8704_v63  ;;  %v1607_v13 = vmul.f32 %v8377_v2, %v13592_v57  ;;  %v516_v56 = vadd.f32 %v8351_v18, %v449_v20  ;;  %v1254_v57 = vmul.f32 %v8363_v5, %v8323_v19 }
 0x2f5   :  { %v1672_v63 = vadd.f32 %v1608_v41, %v1286_v30 }
 0x2f7   :  { %v1736_v41 = vmax.f32 %v1672_v63, 0.0 }
 0x2f8   :  { %v8668_v32 = vpop.permute.xlu1 %1517 }
 0x2f9   :  { %13586 = vst [vmem:[#allocation84_spill] sm:$0xff] %v8668_v32 }
 0x2fc   :  { %v1939_v45 = vpop.f32.mrf.mxu0 }
 0x2fd   :  { %v1940_v32 = vadd.f32 %v8673_v26, %v1939_v45  ;;  %v899_v45 = vadd.f32 %v835_v3, %v513_v54  ;;  %v1316_v3 = vadd.f32 %v1252_v17, %v930_v7  ;;  %v13593_v17 = vld [vmem:[#allocation53_spill] sm:$0xff] }
 0x2fe   :  { %v478_v31 = vmul.f32 %v8344_v23, %v13593_v17 }
 0x2ff   :  { %v2099_v34 = vmax.f32 %v1940_v32, 0.0  ;;  %6323 = vmatmul.msk.bf16.gmra.mxu0 %vm1833_vm0, %v1789_v38  ;;  %v1701_v38 = vadd.f32 %v1637_v39, %v1315_v9  ;;  %v1285_v52 = vadd.f32 %v1221_v8, %v899_v45  ;;  %v13594_v9 = vld [vmem:[#allocation118_spill] sm:$0xff] }
 0x300   :  { %v1530_v32 = vpop.permute.xlu1 %1529  ;;  %v868_v45 = vmul.f32 %v8357_v25, %v13594_v9 }
 0x301   :  { %v2993_v54 = vmul.f32 %v8686_v43, %v2099_v34  ;;  %v1638_v28 = vmul.f32 %v8377_v2, %v1530_v32  ;;  %v1765_v24 = vmax.f32 %v1701_v38, 0.0  ;;  %v1671_v8 = vadd.f32 %v1607_v13, %v1285_v52  ;;  %v13596_v38 = vld [vmem:[#allocation22_spill] sm:$0xff]  ;;  %v1534_v13 = vpop.permute.xlu2 %1533 }
 0x302   :  { %v448_v52 = vmul.f32 %v8344_v23, %v13596_v38  ;;  %v13600_v38 = vld [vmem:[#allocation92_spill] sm:$0xff] }
 0x303   :  { %v3057_v29 = vsel %vm1833_vm0, %v2993_v54, 0.0  ;;  %v1702_v59 = vadd.f32 %v1638_v28, %v1316_v3  ;;  %v13595_v54 = vld [vmem:[#allocation129_spill] sm:$0xff]  ;;  %v932_v3 = vadd.f32 %v868_v45, %v546_v22  ;;  %v1735_v63 = vmax.f32 %v1671_v8, 0.0 }
 0x304   :  { %v1941_v1 = vpop.f32.mrf.mxu0  ;;  %3058 = vadd.xlane.f32.xlu1 %v3057_v29  ;;  %v867_v32 = vmul.f32 %v8357_v25, %v13595_v54  ;;  %v1640_v54 = vmul.f32 %v8377_v2, %v8294_v58  ;;  %v515_v8 = vadd.f32 %v8351_v18, %v448_v52  ;;  %v1223_v58 = vmul.f32 %v8363_v5, %v13600_v38  ;;  %v13606_v38 = vld [vmem:[#allocation63_spill] sm:$0xff] }
 0x305   :  { %v1942_v7 = vadd.f32 %v8673_v26, %v1941_v1  ;;  %v1766_v39 = vmax.f32 %v1702_v59, 0.0  ;;  %v545_v1 = vadd.f32 %v8351_v18, %v478_v31  ;;  %v13597_v59 = vld [vmem:[#allocation88_spill] sm:$0xff]  ;;  %v13598_v31 = vld [vmem:[#allocation99_spill] sm:$0xff]  ;;  %v1609_v52 = vmul.f32 %v8377_v2, %v8497_v21 }
 0x306   :  { %v838_v22 = vmul.f32 %v8357_v25, %v13597_v59  ;;  %v837_v19 = vmul.f32 %v8357_v25, %v13598_v31  ;;  %v13601_v59 = vld [vmem:[#allocation151_spill] sm:$0xff] }
 0x307   :  { %v2100_v44 = vmax.f32 %v1942_v7, 0.0  ;;  %v1805_v28 = vpack.c.bf16 %v1766_v39, %v1765_v24  ;;  %v931_v20 = vadd.f32 %v867_v32, %v545_v1  ;;  %v1318_v7 = vadd.f32 %v1254_v57, %v932_v3  ;;  %v13599_v24 = vld [vmem:[#allocation122_spill] sm:$0xff] }
 0x308   :  { %v902_v9 = vadd.f32 %v838_v22, %v516_v56  ;;  %v1790_v39 = vpack.c.bf16 %v1736_v41, %v1735_v63  ;;  %v1224_v32 = vmul.f32 %v8363_v5, %v8232_v61  ;;  %v1610_v22 = vmul.f32 %v8377_v2, %v13601_v59  ;;  %v13607_v59 = vld [vmem:[#allocation26_spill] sm:$0xff] }
 0x309   :  { %v2163_v30 = vpack.c.bf16 %v2100_v44, %v2099_v34  ;;  %v2994_v29 = vmul.f32 %v8686_v43, %v2100_v44  ;;  %6339 = vmatmul.msk.bf16.vlgmr.msra.gmra.mxu3 %vm1833_vm0, %v1805_v28  ;;  %v1253_v44 = vmul.f32 %v8363_v5, %v13599_v24  ;;  %v1639_v28 = vmul.f32 %v8377_v2, %v1534_v13  ;;  %v13602_v13 = vld [vmem:[#allocation67_spill] sm:$0xff] }
 0x30a   :  { %v1288_v41 = vadd.f32 %v1224_v32, %v902_v9 }
 0x30b   :  { %6355 = vmatmul.msk.bf16.vlgmr.msra.gmra.mxu1 %vm1833_vm0, %v2163_v30  ;;  %v3060_v34 = vsel %vm1833_vm0, %v2994_v29, 0.0  ;;  %v1317_v56 = vadd.f32 %v1253_v44, %v931_v20  ;;  %v1704_v30 = vadd.f32 %v1640_v54, %v1318_v7  ;;  %v901_v29 = vadd.f32 %v837_v19, %v515_v8  ;;  %v13603_v19 = vld [vmem:[#allocation56_spill] sm:$0xff]  ;;  %v13605_v8 = vld [vmem:[#allocation37_spill] sm:$0xff] }
 0x30c   :  { %3061 = vadd.xlane.f32.xlu2 %v3060_v34  ;;  %v1944_v17 = vpop.f32.mrf.mxu0  ;;  %v480_v34 = vmul.f32 %v8344_v23, %v13602_v13  ;;  %v1674_v31 = vadd.f32 %v1610_v22, %v1288_v41  ;;  %v481_v9 = vmul.f32 %v8344_v23, %v13603_v19  ;;  %v13604_v44 = vld [vmem:[#allocation132_spill] sm:$0xff]  ;;  %v450_v32 = vmul.f32 %v8344_v23, %v13605_v8 }
 0x30d   :  { %v1945_v45 = vadd.f32 %v8673_v26, %v1944_v17  ;;  %v1703_v57 = vadd.f32 %v1639_v28, %v1317_v56  ;;  %v1768_v20 = vmax.f32 %v1704_v30, 0.0  ;;  %v1287_v7 = vadd.f32 %v1223_v58, %v901_v29  ;;  %v1542_v56 = vpop.permute.xlu1 %1541 }
 0x30e   :  { %v547_v21 = vadd.f32 %v8351_v18, %v480_v34  ;;  %v870_v54 = vmul.f32 %v8357_v25, %v13604_v44  ;;  %v1738_v41 = vmax.f32 %v1674_v31, 0.0  ;;  %v1255_v58 = vmul.f32 %v8363_v5, %v8292_v10  ;;  %v13608_v10 = vld [vmem:[#allocation102_spill] sm:$0xff]  ;;  %v13610_v44 = vld [vmem:[#allocation33_spill] sm:$0xff] }
 0x30f   :  { %v2101_v3 = vmax.f32 %v1945_v45, 0.0  ;;  %6324 = vmatmul.msk.bf16.gmra.mxu0 %vm1833_vm0, %v1790_v39  ;;  %v1767_v45 = vmax.f32 %v1703_v57, 0.0  ;;  %v1673_v39 = vadd.f32 %v1609_v52, %v1287_v7  ;;  %v869_v57 = vmul.f32 %v8357_v25, %v13606_v38 }
 0x310   :  { %v451_v22 = vmul.f32 %v8344_v23, %v13607_v59  ;;  %v517_v7 = vadd.f32 %v8351_v18, %v450_v32  ;;  %v380_v32 = vpop.permute.xlu0 %379  ;;  %v1611_v38 = vmul.f32 %v8377_v2, %v8538_v11 }
 0x311   :  { %v2995_v1 = vmul.f32 %v8686_v43, %v2101_v3  ;;  %v1806_v28 = vpack.c.bf16 %v1768_v20, %v1767_v45  ;;  %v1737_v52 = vmax.f32 %v1673_v39, 0.0  ;;  %v933_v34 = vadd.f32 %v869_v57, %v547_v21 }
 0x312   :  { %v518_v21 = vadd.f32 %v8351_v18, %v451_v22  ;;  %v482_v59 = vmul.f32 %v8344_v23, %v380_v32  ;;  %v13612_v22 = vld [vmem:[#allocation95_spill] sm:$0xff] }
 0x313   :  { %v3063_v61 = vsel %vm1833_vm0, %v2995_v1, 0.0  ;;  %v548_v1 = vadd.f32 %v8351_v18, %v481_v9  ;;  %v1791_v19 = vpack.c.bf16 %v1738_v41, %v1737_v52  ;;  %v13609_v9 = vld [vmem:[#allocation125_spill] sm:$0xff]  ;;  %v1319_v39 = vadd.f32 %v1255_v58, %v933_v34 }
 0x314   :  { %v1946_v63 = vpop.f32.mrf.mxu0  ;;  %3064 = vadd.xlane.f32.xlu0 %v3063_v61  ;;  %v1546_v61 = vpop.permute.xlu2 %1545  ;;  %v1256_v45 = vmul.f32 %v8363_v5, %v13609_v9  ;;  %v1226_v52 = vmul.f32 %v8363_v5, %v13612_v22  ;;  %v13613_v34 = vld [vmem:[#allocation69_spill] sm:$0xff] }
 0x315   :  { %v1947_v17 = vadd.f32 %v8673_v26, %v1946_v63  ;;  %v934_v13 = vadd.f32 %v870_v54, %v548_v1  ;;  %v1641_v63 = vmul.f32 %v8377_v2, %v1542_v56  ;;  %v839_v54 = vmul.f32 %v8357_v25, %v13610_v44  ;;  %v1554_v32 = vpop.permute.xlu1 %1553 }
 0x317   :  { %v2102_v24 = vmax.f32 %v1947_v17, 0.0  ;;  %v840_v17 = vmul.f32 %v8357_v25, %v13608_v10  ;;  %v903_v1 = vadd.f32 %v839_v54, %v517_v7  ;;  %v13615_v54 = vld [vmem:[#allocation40_spill] sm:$0xff] }
 0x319   :  { %v2164_v30 = vpack.c.bf16 %v2102_v24, %v2101_v3  ;;  %v2996_v29 = vmul.f32 %v8686_v43, %v2102_v24  ;;  %6340 = vmatmul.msk.bf16.gmra.mxu3 %vm1833_vm0, %v1806_v28  ;;  %v1642_v24 = vmul.f32 %v8377_v2, %v1546_v61  ;;  %v13611_v28 = vld [vmem:[#allocation150_spill] sm:$0xff]  ;;  %v904_v41 = vadd.f32 %v840_v17, %v518_v21 }
 0x31a   :  { %v1225_v8 = vmul.f32 %v8363_v5, %v13611_v28  ;;  %v453_v28 = vmul.f32 %v8344_v23, %v13615_v54 }
 0x31b   :  { %6356 = vmatmul.msk.bf16.gmra.mxu1 %vm1833_vm0, %v2164_v30  ;;  %v3066_v3 = vsel %vm1833_vm0, %v2996_v29, 0.0  ;;  %v1320_v30 = vadd.f32 %v1256_v45, %v934_v13  ;;  %v1705_v29 = vadd.f32 %v1641_v63, %v1319_v39  ;;  %v483_v63 = vmul.f32 %v8344_v23, %v13613_v34  ;;  %v395_v34 = vpop.permute.xlu0 %394 }
 0x31c   :  { %3067 = vadd.xlane.f32.xlu2 %v3066_v3  ;;  %v1949_v20 = vpop.f32.mrf.mxu0  ;;  %v1289_v61 = vadd.f32 %v1225_v8, %v903_v1  ;;  %v1612_v3 = vmul.f32 %v8377_v2, %v8522_v46  ;;  %v1290_v11 = vadd.f32 %v1226_v52, %v904_v41  ;;  %v452_v45 = vmul.f32 %v8344_v23, %v8499_v35  ;;  %v13616_v41 = vld [vmem:[#allocation66_spill] sm:$0xff] }
 0x31d   :  { %v1950_v31 = vadd.f32 %v8673_v26, %v1949_v20  ;;  %v1706_v58 = vadd.f32 %v1642_v24, %v1320_v30  ;;  %v1769_v20 = vmax.f32 %v1705_v29, 0.0  ;;  %v550_v39 = vadd.f32 %v8351_v18, %v483_v63  ;;  %v13614_v24 = vld [vmem:[#allocation121_spill] sm:$0xff] }
 0x31e   :  { %v1675_v10 = vadd.f32 %v1611_v38, %v1289_v61  ;;  %v1676_v9 = vadd.f32 %v1612_v3, %v1290_v11  ;;  %v871_v21 = vmul.f32 %v8357_v25, %v13614_v24  ;;  %v872_v1 = vmul.f32 %v8357_v25, %v13616_v41  ;;  %v13617_v3 = vld [vmem:[#allocation91_spill] sm:$0xff] }
 0x31f   :  { %v2103_v56 = vmax.f32 %v1950_v31, 0.0  ;;  %6325 = vmatmul.msk.bf16.gmra.mxu0 %vm1833_vm0, %v1791_v19  ;;  %v1770_v31 = vmax.f32 %v1706_v58, 0.0  ;;  %v549_v19 = vadd.f32 %v8351_v18, %v482_v59  ;;  %v1258_v35 = vmul.f32 %v8363_v5, %v8301_v12 }
 0x320   :  { %v1739_v8 = vmax.f32 %v1675_v10, 0.0  ;;  %v519_v58 = vadd.f32 %v8351_v18, %v452_v45  ;;  %v936_v22 = vadd.f32 %v872_v1, %v550_v39  ;;  %v1644_v52 = vmul.f32 %v8377_v2, %v1554_v32  ;;  %v13618_v10 = vld [vmem:[#allocation36_spill] sm:$0xff]  ;;  %v13620_v1 = vld [vmem:[#allocation154_spill] sm:$0xff] }
 0x321   :  { %v2997_v57 = vmul.f32 %v8686_v43, %v2103_v56  ;;  %v1807_v44 = vpack.c.bf16 %v1770_v31, %v1769_v20  ;;  %v935_v38 = vadd.f32 %v871_v21, %v549_v19  ;;  %v520_v12 = vadd.f32 %v8351_v18, %v453_v28  ;;  %v13619_v31 = vld [vmem:[#allocation153_spill] sm:$0xff] }
 0x322   :  { %v1643_v45 = vmul.f32 %v8377_v2, %v8303_v47  ;;  %v1227_v21 = vmul.f32 %v8363_v5, %v8242_v0  ;;  %v455_v0 = vmul.f32 %v8344_v23, %v8520_v37 }
 0x323   :  { %v3069_v13 = vsel %vm1833_vm0, %v2997_v57, 0.0  ;;  %v1740_v57 = vmax.f32 %v1676_v9, 0.0 }
 0x324   :  { %v1951_v7 = vpop.f32.mrf.mxu0  ;;  %3070 = vadd.xlane.f32.xlu1 %v3069_v13  ;;  %v841_v13 = vmul.f32 %v8357_v25, %v13617_v3 }
 0x325   :  { %v1952_v17 = vadd.f32 %v8673_v26, %v1951_v7  ;;  %v1792_v20 = vpack.c.bf16 %v1740_v57, %v1739_v8  ;;  %v1322_v7 = vadd.f32 %v1258_v35, %v936_v22  ;;  %v1613_v35 = vmul.f32 %v8377_v2, %v13620_v1  ;;  %v13621_v57 = vld [vmem:[#allocation59_spill] sm:$0xff] }
 0x326   :  { %v905_v19 = vadd.f32 %v841_v13, %v519_v58  ;;  %v484_v58 = vmul.f32 %v8344_v23, %v13621_v57  ;;  %v13628_v57 = vld [vmem:[#allocation98_spill] sm:$0xff] }
 0x327   :  { %v2104_v46 = vmax.f32 %v1952_v17, 0.0  ;;  %v842_v17 = vmul.f32 %v8357_v25, %v13618_v10  ;;  %v1708_v39 = vadd.f32 %v1644_v52, %v1322_v7  ;;  %v1260_v10 = vmul.f32 %v8363_v5, %v8346_v48  ;;  %v13626_v48 = vld [vmem:[#allocation105_spill] sm:$0xff] }
 0x328   :  { %v1291_v32 = vadd.f32 %v1227_v21, %v905_v19 }
 0x329   :  { %v2165_v30 = vpack.c.bf16 %v2104_v46, %v2103_v56  ;;  %v2998_v29 = vmul.f32 %v8686_v43, %v2104_v46  ;;  %6341 = vmatmul.msk.bf16.gmra.mxu3 %vm1833_vm0, %v1807_v44  ;;  %v1257_v56 = vmul.f32 %v8363_v5, %v8336_v33  ;;  %v1228_v33 = vmul.f32 %v8363_v5, %v13619_v31  ;;  %v8865_v5 = vld [vmem:[%s13013_s1 + $0x1] ss:$0 sm:$0xff] }
 0x32a   :  { %v485_v46 = vmul.f32 %v8344_v23, %v395_v34  ;;  %v906_v24 = vadd.f32 %v842_v17, %v520_v12  ;;  %v1614_v44 = vmul.f32 %v8377_v2, %v8557_v42  ;;  %v1772_v47 = vmax.f32 %v1708_v39, 0.0  ;;  %v13623_v12 = vld [vmem:[#allocation135_spill] sm:$0xff]  ;;  %v13624_v17 = vld [vmem:[#allocation29_spill] sm:$0xff] }
 0x32b   :  { %6357 = vmatmul.msk.bf16.gmra.mxu1 %vm1833_vm0, %v2165_v30  ;;  %v3072_v59 = vsel %vm1833_vm0, %v2998_v29, 0.0  ;;  %v1321_v11 = vadd.f32 %v1257_v56, %v935_v38  ;;  %v1677_v52 = vadd.f32 %v1613_v35, %v1291_v32  ;;  %v873_v3 = vmul.f32 %v8357_v25, %v13623_v12 }
 0x32c   :  { %3073 = vadd.xlane.f32.xlu2 %v3072_v59  ;;  %v1954_v61 = vpop.f32.mrf.mxu0  ;;  %v1292_v8 = vadd.f32 %v1228_v33, %v906_v24  ;;  %v552_v29 = vadd.f32 %v8351_v18, %v485_v46  ;;  %v13622_v59 = vld [vmem:[#allocation124_spill] sm:$0xff]  ;;  %v454_v31 = vmul.f32 %v8344_v23, %v13624_v17  ;;  %v13625_v33 = vld [vmem:[#allocation94_spill] sm:$0xff]  ;;  %v1558_v46 = vpop.permute.xlu2 %1557  ;;  %v843_v23 = vmul.f32 %v8865_v5, %v13626_v48  ;;  %v13631_v17 = vld [vmem:[#allocation137_spill] sm:$0xff] }
 0x32d   :  { %v1955_v63 = vadd.f32 %v8673_v26, %v1954_v61  ;;  %v1707_v28 = vadd.f32 %v1643_v45, %v1321_v11  ;;  %v874_v22 = vmul.f32 %v8357_v25, %v13622_v59  ;;  %v551_v11 = vadd.f32 %v8351_v18, %v484_v58  ;;  %v8895_v59 = vld [vmem:[%s13013_s1 + $0x3] ss:$0 sm:$0xff]  ;;  %v13633_v48 = vld [vmem:[#allocation68_spill] sm:$0xff] }
 0x32e   :  { %v1678_v38 = vadd.f32 %v1614_v44, %v1292_v8  ;;  %v844_v19 = vmul.f32 %v8357_v25, %v13625_v33  ;;  %v1741_v45 = vmax.f32 %v1677_v52, 0.0  ;;  %v1646_v32 = vmul.f32 %v8377_v2, %v8312_v36  ;;  %v8905_v52 = vld [vmem:[%s13013_s1] ss:$0 sm:$0xff] }
 0x32f   :  { %v2105_v9 = vmax.f32 %v1955_v63, 0.0  ;;  %6326 = vmatmul.msk.bf16.gmra.mxu0 %vm1833_vm0, %v1792_v20  ;;  %v1771_v56 = vmax.f32 %v1707_v28, 0.0  ;;  %v938_v13 = vadd.f32 %v874_v22, %v552_v29  ;;  %v522_v63 = vadd.f32 %v8351_v18, %v455_v0  ;;  %v13627_v28 = vld [vmem:[#allocation128_spill] sm:$0xff]  ;;  %v8883_v29 = vld [vmem:[%s13014_s2] ss:$0 sm:$0xff] }
 0x330   :  { %v1742_v37 = vmax.f32 %v1678_v38, 0.0  ;;  %v937_v39 = vadd.f32 %v873_v3, %v551_v11  ;;  %v1615_v22 = vmul.f32 %v8895_v59, %v8542_v51 }
 0x331   :  { %v2999_v54 = vmul.f32 %v8686_v43, %v2105_v9  ;;  %v1808_v34 = vpack.c.bf16 %v1772_v47, %v1771_v56  ;;  %v1324_v24 = vadd.f32 %v1260_v10, %v938_v13  ;;  %v908_v21 = vadd.f32 %v844_v19, %v522_v63  ;;  %v13632_v19 = vld [vmem:[#allocation43_spill] sm:$0xff] }
 0x332   :  { %v1793_v25 = vpack.c.bf16 %v1742_v37, %v1741_v45  ;;  %v521_v47 = vadd.f32 %v8883_v29, %v454_v31  ;;  %v13630_v37 = vld [vmem:[#allocation62_spill] sm:$0xff]  ;;  %v876_v31 = vmul.f32 %v8865_v5, %v13631_v17  ;;  %v456_v45 = vmul.f32 %v8905_v52, %v13632_v19 }
 0x333   :  { %v3075_v30 = vsel %vm1833_vm0, %v2999_v54, 0.0  ;;  %v8873_v54 = vld [vmem:[%s13013_s1 + $0x2] ss:$0 sm:$0xff]  ;;  %v1710_v0 = vadd.f32 %v1646_v32, %v1324_v24  ;;  %v487_v51 = vmul.f32 %v8905_v52, %v13630_v37 }
 0x334   :  { %v1956_v41 = vpop.f32.mrf.mxu0  ;;  %3076 = vadd.xlane.f32.xlu0 %v3075_v30  ;;  %v1259_v8 = vmul.f32 %v8873_v54, %v13627_v28  ;;  %v1645_v30 = vmul.f32 %v8377_v2, %v1558_v46  ;;  %v907_v38 = vadd.f32 %v843_v23, %v521_v47  ;;  %v1229_v58 = vmul.f32 %v8873_v54, %v13628_v57  ;;  %v1566_v46 = vpop.permute.xlu1 %1565 }
 0x335   :  { %v1957_v42 = vadd.f32 %v8673_v26, %v1956_v41  ;;  %v1230_v41 = vmul.f32 %v8873_v54, %v8251_v6  ;;  %v1616_v6 = vmul.f32 %v8895_v59, %v8220_v55  ;;  %v1774_v13 = vmax.f32 %v1710_v0, 0.0 }
 0x336   :  { %v1323_v35 = vadd.f32 %v1259_v8, %v937_v39  ;;  %v875_v23 = vmul.f32 %v8865_v5, %v13633_v48  ;;  %v1570_v8 = vpop.permute.xlu2 %1569 }
 0x337   :  { %v2106_v61 = vmax.f32 %v1957_v42, 0.0  ;;  %v1294_v42 = vadd.f32 %v1230_v41, %v908_v21  ;;  %v1261_v21 = vmul.f32 %v8873_v54, %v8310_v14  ;;  %v1647_v41 = vmul.f32 %v8895_v59, %v1566_v46  ;;  %v13635_v14 = vld [vmem:[#allocation108_spill] sm:$0xff] }
 0x338   :  { %v1709_v2 = vadd.f32 %v1645_v30, %v1323_v35  ;;  %v523_v35 = vadd.f32 %v8883_v29, %v456_v45  ;;  %v846_v0 = vmul.f32 %v8865_v5, %v13635_v14  ;;  %v13640_v45 = vld [vmem:[#allocation74_spill] sm:$0xff] }
 0x339   :  { %v2166_v20 = vpack.c.bf16 %v2106_v61, %v2105_v9  ;;  %v3000_v7 = vmul.f32 %v8686_v43, %v2106_v61  ;;  %6342 = vmatmul.msk.bf16.gmra.mxu3 %vm1833_vm0, %v1808_v34  ;;  %v13629_v61 = vld [vmem:[#allocation72_spill] sm:$0xff]  ;;  %v1293_v34 = vadd.f32 %v1229_v58, %v907_v38  ;;  %v1680_v63 = vadd.f32 %v1616_v6, %v1294_v42 }
 0x33a   :  { %v486_v12 = vmul.f32 %v8905_v52, %v13629_v61  ;;  %v1648_v58 = vmul.f32 %v8895_v59, %v1570_v8  ;;  %v13638_v61 = vld [vmem:[#allocation155_spill] sm:$0xff]  ;;  %v489_v46 = vmul.f32 %v8905_v52, %v13640_v45 }
 0x33b   :  { %6358 = vmatmul.msk.bf16.gmra.mxu1 %vm1833_vm0, %v2166_v20  ;;  %v3078_v9 = vsel %vm1833_vm0, %v3000_v7, 0.0  ;;  %v1773_v20 = vmax.f32 %v1709_v2, 0.0  ;;  %v1679_v7 = vadd.f32 %v1615_v22, %v1293_v34  ;;  %v1744_v24 = vmax.f32 %v1680_v63, 0.0  ;;  %v13637_v22 = vld [vmem:[#allocation39_spill] sm:$0xff] }
 0x33c   :  { %v1959_v18 = vpop.f32.mrf.mxu0  ;;  %3079 = vadd.xlane.f32.xlu1 %v3078_v9  ;;  %v553_v10 = vadd.f32 %v8883_v29, %v486_v12  ;;  %v1231_v12 = vmul.f32 %v8873_v54, %v13638_v61  ;;  %v13644_v61 = vld [vmem:[#allocation97_spill] sm:$0xff] }
 0x33d   :  { %v1960_v44 = vadd.f32 %v8673_v26, %v1959_v18  ;;  %v1809_v33 = vpack.c.bf16 %v1774_v13, %v1773_v20  ;;  %v554_v18 = vadd.f32 %v8883_v29, %v487_v51  ;;  %v1743_v28 = vmax.f32 %v1679_v7, 0.0 }
 0x33e   :  { %v939_v47 = vadd.f32 %v875_v23, %v553_v10  ;;  %v1617_v51 = vmul.f32 %v8895_v59, %v8571_v49  ;;  %v13639_v10 = vld [vmem:[#allocation101_spill] sm:$0xff] }
 0x33f   :  { %v2107_v1 = vmax.f32 %v1960_v44, 0.0  ;;  %6327 = vmatmul.msk.bf16.gmra.mxu0 %vm1833_vm0, %v1793_v25  ;;  %v13634_v25 = vld [vmem:[#allocation32_spill] sm:$0xff]  ;;  %v940_v30 = vadd.f32 %v876_v31, %v554_v18  ;;  %v1794_v42 = vpack.c.bf16 %v1744_v24, %v1743_v28  ;;  %v1232_v17 = vmul.f32 %v8873_v54, %v13639_v10  ;;  %v13641_v28 = vld [vmem:[#allocation127_spill] sm:$0xff] }
 0x340   :  { %v457_v44 = vmul.f32 %v8905_v52, %v13634_v25  ;;  %v1325_v57 = vadd.f32 %v1261_v21, %v939_v47  ;;  %v458_v25 = vmul.f32 %v8905_v52, %v8534_v53  ;;  %v877_v8 = vmul.f32 %v8865_v5, %v13641_v28 }
 0x341   :  { %v3001_v36 = vmul.f32 %v8686_v43, %v2107_v1  ;;  %v1264_v53 = vmul.f32 %v8873_v54, %v8319_v16 }
 0x342   :  { %v524_v6 = vadd.f32 %v8883_v29, %v457_v44  ;;  %v1711_v63 = vadd.f32 %v1647_v41, %v1325_v57  ;;  %v556_v44 = vadd.f32 %v8883_v29, %v489_v46 }
 0x343   :  { %v3081_v56 = vsel %vm1833_vm0, %v3001_v36, 0.0  ;;  %v13636_v36 = vld [vmem:[#allocation131_spill] sm:$0xff] }
 0x344   :  { %v1961_v3 = vpop.f32.mrf.mxu0  ;;  %3082 = vadd.xlane.f32.xlu2 %v3081_v56  ;;  %v1262_v2 = vmul.f32 %v8873_v54, %v13636_v36  ;;  %v845_v56 = vmul.f32 %v8865_v5, %v13637_v22 }
 0x345   :  { %v1962_v55 = vadd.f32 %v8673_v26, %v1961_v3  ;;  %v410_v3 = vpop.permute.xlu0 %409 }
 0x346   :  { %v1326_v34 = vadd.f32 %v1262_v2, %v940_v30  ;;  %v909_v37 = vadd.f32 %v845_v56, %v523_v35  ;;  %v13642_v30 = vld [vmem:[#allocation46_spill] sm:$0xff]  ;;  %v525_v2 = vadd.f32 %v8883_v29, %v458_v25  ;;  %v13648_v25 = vld [vmem:[#allocation65_spill] sm:$0xff] }
 0x347   :  { %v2108_v11 = vmax.f32 %v1962_v55, 0.0  ;;  %v910_v55 = vadd.f32 %v846_v0, %v524_v6  ;;  %v459_v47 = vmul.f32 %v8905_v52, %v13642_v30  ;;  %v13643_v0 = vld [vmem:[#allocation71_spill] sm:$0xff]  ;;  %v1263_v6 = vmul.f32 %v8873_v54, %v8370_v15 }
 0x348   :  { %v1712_v7 = vadd.f32 %v1648_v58, %v1326_v34  ;;  %v1295_v31 = vadd.f32 %v1231_v12, %v909_v37  ;;  %v847_v12 = vmul.f32 %v8865_v5, %v13644_v61  ;;  %v13645_v37 = vld [vmem:[#allocation42_spill] sm:$0xff]  ;;  %v1234_v15 = vmul.f32 %v8873_v54, %v8228_v50 }
 0x349   :  { %v2167_v9 = vpack.c.bf16 %v2108_v11, %v2107_v1  ;;  %v3002_v39 = vmul.f32 %v8686_v43, %v2108_v11  ;;  %6343 = vmatmul.msk.bf16.gmra.mxu3 %vm1833_vm0, %v1809_v33  ;;  %v488_v11 = vmul.f32 %v8905_v52, %v410_v3  ;;  %v1618_v33 = vmul.f32 %v8895_v59, %v8563_v60 }
 0x34a   :  { %v1296_v49 = vadd.f32 %v1232_v17, %v910_v55  ;;  %v1681_v24 = vadd.f32 %v1617_v51, %v1295_v31  ;;  %v1776_v48 = vmax.f32 %v1712_v7, 0.0  ;;  %v526_v16 = vadd.f32 %v8883_v29, %v459_v47  ;;  %v13650_v47 = vld [vmem:[#allocation139_spill] sm:$0xff] }
 0x34b   :  { %6359 = vmatmul.msk.bf16.gmra.mxu1 %vm1833_vm0, %v2167_v9  ;;  %v3084_v32 = vsel %vm1833_vm0, %v3002_v39, 0.0  ;;  %v1775_v9 = vmax.f32 %v1711_v63, 0.0  ;;  %v555_v23 = vadd.f32 %v8883_v29, %v488_v11  ;;  %v848_v51 = vmul.f32 %v8865_v5, %v13645_v37 }
 0x34c   :  { %3085 = vadd.xlane.f32.xlu0 %v3084_v32  ;;  %v1964_v1 = vpop.f32.mrf.mxu0  ;;  %v1682_v21 = vadd.f32 %v1618_v33, %v1296_v49  ;;  %v1745_v41 = vmax.f32 %v1681_v24, 0.0  ;;  %v1649_v11 = vmul.f32 %v8895_v59, %v8321_v62  ;;  %v1233_v33 = vmul.f32 %v8873_v54, %v8260_v4 }
 0x34d   :  { %v1965_v38 = vadd.f32 %v8673_v26, %v1964_v1  ;;  %v1810_v32 = vpack.c.bf16 %v1776_v48, %v1775_v9  ;;  %v1578_v1 = vpop.permute.xlu1 %1577  ;;  %v912_v31 = vadd.f32 %v848_v51, %v526_v16  ;;  %v1582_v16 = vpop.permute.xlu2 %1581 }
 0x34e   :  { %v1746_v36 = vmax.f32 %v1682_v21, 0.0  ;;  %v1650_v22 = vmul.f32 %v8895_v59, %v1578_v1 }
 0x34f   :  { %v2109_v13 = vmax.f32 %v1965_v38, 0.0  ;;  %6328 = vmatmul.msk.bf16.gmra.mxu0 %vm1833_vm0, %v1794_v42  ;;  %v878_v38 = vmul.f32 %v8865_v5, %v13643_v0  ;;  %v941_v42 = vadd.f32 %v877_v8, %v555_v23  ;;  %v1298_v46 = vadd.f32 %v1234_v15, %v912_v31  ;;  %v13647_v23 = vld [vmem:[#allocation70_spill] sm:$0xff]  ;;  %v13655_v15 = vld [vmem:[#allocation133_spill] sm:$0xff] }
 0x350   :  { %v1795_v3 = vpack.c.bf16 %v1746_v36, %v1745_v41  ;;  %v461_v4 = vmul.f32 %v8905_v52, %v13647_v23  ;;  %v879_v41 = vmul.f32 %v8865_v5, %v13650_v47  ;;  %v13651_v36 = vld [vmem:[#allocation76_spill] sm:$0xff]  ;;  %v13657_v31 = vld [vmem:[#allocation165_spill] sm:$0xff] }
 0x351   :  { %v3003_v20 = vmul.f32 %v8686_v43, %v2109_v13  ;;  %v942_v58 = vadd.f32 %v878_v38, %v556_v44  ;;  %v1327_v55 = vadd.f32 %v1263_v6, %v941_v42  ;;  %v13649_v44 = vld [vmem:[#allocation130_spill] sm:$0xff]  ;;  %v13653_v6 = vld [vmem:[#allocation100_spill] sm:$0xff] }
 0x352   :  { %v880_v28 = vmul.f32 %v8865_v5, %v13649_v44 }
 0x353   :  { %v3087_v19 = vsel %vm1833_vm0, %v3003_v20, 0.0  ;;  %v1328_v63 = vadd.f32 %v1264_v53, %v942_v58  ;;  %v911_v20 = vadd.f32 %v847_v12, %v525_v2  ;;  %v1713_v50 = vadd.f32 %v1649_v11, %v1327_v55 }
 0x354   :  { %v1966_v39 = vpop.f32.mrf.mxu0  ;;  %3088 = vadd.xlane.f32.xlu1 %v3087_v19  ;;  %v1620_v19 = vmul.f32 %v8895_v59, %v8590_v40  ;;  %v1266_v2 = vmul.f32 %v8873_v54, %v13651_v36 }
 0x355   :  { %v1967_v18 = vadd.f32 %v8673_v26, %v1966_v39  ;;  %v1714_v17 = vadd.f32 %v1650_v22, %v1328_v63  ;;  %v1297_v9 = vadd.f32 %v1233_v33, %v911_v20  ;;  %v1777_v8 = vmax.f32 %v1713_v50, 0.0 }
 0x356   :  { %v1684_v21 = vadd.f32 %v1620_v19, %v1298_v46  ;;  %v850_v22 = vmul.f32 %v8865_v5, %v13653_v6  ;;  %v1265_v20 = vmul.f32 %v8873_v54, %v13655_v15  ;;  %v1236_v33 = vmul.f32 %v8873_v54, %v13657_v31 }
 0x357   :  { %v2110_v60 = vmax.f32 %v1967_v18, 0.0  ;;  %v1778_v62 = vmax.f32 %v1714_v17, 0.0  ;;  %v13646_v18 = vld [vmem:[#allocation156_spill] sm:$0xff]  ;;  %v1623_v15 = vmul.f32 %v8895_v59, %v8599_v27 }
 0x358   :  { %v1619_v48 = vmul.f32 %v8895_v59, %v13646_v18  ;;  %v1748_v0 = vmax.f32 %v1684_v21, 0.0 }
 0x359   :  { %v2168_v35 = vpack.c.bf16 %v2110_v60, %v2109_v13  ;;  %v3004_v14 = vmul.f32 %v8686_v43, %v2110_v60  ;;  %6344 = vmatmul.msk.bf16.gmra.mxu3 %vm1833_vm0, %v1810_v32  ;;  %v425_v13 = vpop.permute.xlu0 %424  ;;  %v490_v60 = vmul.f32 %v8905_v52, %v13648_v25  ;;  %v6431_v25 = vld [vmem:[%s13021_s7] sm:$0xff] }
 0x35a   :  { %v491_v10 = vmul.f32 %v8905_v52, %v425_v13  ;;  %v1683_v32 = vadd.f32 %v1619_v48, %v1297_v9  ;;  %v13659_v48 = vld [vmem:[#allocation158_spill] sm:$0xff] }
 0x35b   :  { %6360 = vmatmul.msk.bf16.gmra.mxu1 %vm1833_vm0, %v2168_v35  ;;  %v3090_v57 = vsel %vm1833_vm0, %v3004_v14, 0.0  ;;  %v1811_v35 = vpack.c.bf16 %v1778_v62, %v1777_v8  ;;  %v528_v14 = vadd.f32 %v8883_v29, %v461_v4  ;;  %v557_v42 = vadd.f32 %v8883_v29, %v490_v60  ;;  %v13660_v4 = vld [vmem:[#allocation10_spill] sm:$0xff] }
 0x35c   :  { %3091 = vadd.xlane.f32.xlu2 %v3090_v57  ;;  %v1969_v56 = vpop.f32.mrf.mxu0  ;;  %v558_v49 = vadd.f32 %v8883_v29, %v491_v10  ;;  %v13652_v57 = vld [vmem:[#allocation35_spill] sm:$0xff]  ;;  %v1651_v10 = vmul.f32 %v8895_v59, %v1582_v16  ;;  %v1622_v23 = vmul.f32 %v8895_v59, %v13659_v48  ;;  %v1621_v21 = vmul.f32 %v8895_v59, %v13660_v4 }
 0x35d   :  { %v1970_v34 = vadd.f32 %v8673_v26, %v1969_v56  ;;  %v460_v58 = vmul.f32 %v8905_v52, %v13652_v57  ;;  %v1747_v56 = vmax.f32 %v1683_v32, 0.0  ;;  %v943_v12 = vadd.f32 %v879_v41, %v557_v42  ;;  %v13662_v42 = vld [vmem:[#allocation38_spill] sm:$0xff] }
 0x35e   :  { %v944_v1 = vadd.f32 %v880_v28, %v558_v49  ;;  %v914_v55 = vadd.f32 %v850_v22, %v528_v14  ;;  %v463_v36 = vmul.f32 %v8905_v52, %v13662_v42  ;;  %v13663_v22 = vld [vmem:[#allocation114_spill] sm:$0xff] }
 0x35f   :  { %v2111_v7 = vmax.f32 %v1970_v34, 0.0  ;;  %6329 = vmatmul.msk.bf16.gmra.mxu0 %vm1833_vm0, %v1795_v3  ;;  %v13654_v34 = vld [vmem:[#allocation111_spill] sm:$0xff]  ;;  %v1796_v37 = vpack.c.bf16 %v1748_v0, %v1747_v56  ;;  %v527_v17 = vadd.f32 %v8883_v29, %v460_v58  ;;  %v1329_v50 = vadd.f32 %v1265_v20, %v943_v12 }
 0x360   :  { %v1330_v3 = vadd.f32 %v1266_v2, %v944_v1  ;;  %v849_v63 = vmul.f32 %v8865_v5, %v13654_v34  ;;  %v852_v56 = vmul.f32 %v8865_v5, %v13663_v22  ;;  %v530_v12 = vadd.f32 %v8883_v29, %v463_v36  ;;  %v13665_v34 = vld [vmem:[#allocation157_spill] sm:$0xff] }
 0x361   :  { %v3005_v45 = vmul.f32 %v8686_v43, %v2111_v7  ;;  %v1715_v62 = vadd.f32 %v1651_v10, %v1329_v50 }
 0x362   :  { %v913_v9 = vadd.f32 %v849_v63, %v527_v17  ;;  %v1237_v63 = vmul.f32 %v8873_v54, %v13665_v34  ;;  %v13667_v17 = vld [vmem:[#allocation6_spill] sm:$0xff]  ;;  %v13675_v34 = vld [vmem:[#allocation160_spill] sm:$0xff] }
 0x363   :  { %v3093_v39 = vsel %vm1833_vm0, %v3005_v45, 0.0  ;;  %v6432_v45 = vld [vmem:[%s13021_s7 + $0x8] sm:$0xff]  ;;  %v1624_v31 = vmul.f32 %v8895_v59, %v13667_v17 }
 0x364   :  { %v1971_v24 = vpop.f32.mrf.mxu0  ;;  %3094 = vadd.xlane.f32.xlu0 %v3093_v39  ;;  %v1300_v39 = vadd.f32 %v1236_v33, %v914_v55  ;;  %2698 = vmatpush.bf16.msra.mxu2 %v6432_v45 }
 0x365   :  { %v1972_v40 = vadd.f32 %v8673_v26, %v1971_v24  ;;  %6628 = vmatpush.bf16.msra.mxu3 %v6432_v45  ;;  %v13658_v24 = vld [vmem:[#allocation104_spill] sm:$0xff] }
 0x366   :  { %v1235_v18 = vmul.f32 %v8873_v54, %v13658_v24  ;;  %v1686_v8 = vadd.f32 %v1622_v23, %v1300_v39  ;;  %v13668_v39 = vld [vmem:[#allocation4_spill] sm:$0xff] }
 0x367   :  { %v2112_v30 = vmax.f32 %v1972_v40, 0.0  ;;  %v464_v27 = vmul.f32 %v8905_v52, %v13668_v39 }
 0x368   :  { %v1299_v28 = vadd.f32 %v1235_v18, %v913_v9  ;;  %2699 = vmatpush.bf16.msra.mxu2 %v6431_v25 }
 0x369   :  { %v2169_v38 = vpack.c.bf16 %v2112_v30, %v2111_v7  ;;  %v3006_v53 = vmul.f32 %v8686_v43, %v2112_v30  ;;  %6345 = vmatmul.msk.bf16.gmra.mxu3 %vm1833_vm0, %v1811_v35  ;;  %v13656_v7 = vld [vmem:[#allocation172_spill] sm:$0xff]  ;;  %v1779_v30 = vmax.f32 %v1715_v62, 0.0  ;;  %v13661_v35 = vld [vmem:[#allocation49_spill] sm:$0xff] }
 0x36a   :  { %v1652_v11 = vmul.f32 %v8895_v59, %v13656_v7  ;;  %6629 = vmatpush.bf16.msra.mxu3 %v6431_v25  ;;  %v1685_v47 = vadd.f32 %v1621_v21, %v1299_v28  ;;  %v462_v14 = vmul.f32 %v8905_v52, %v13661_v35  ;;  %v13666_v7 = vld [vmem:[#allocation107_spill] sm:$0xff]  ;;  %v13669_v62 = vld [vmem:[#allocation52_spill] sm:$0xff]  ;;  %v9079_v25 = vld [vmem:[%s13020_s6] ss:$0 sm:$0xff] }
 0x36b   :  { %6361 = vmatmul.msk.bf16.gmra.mxu1 %vm1833_vm0, %v2169_v38  ;;  %v3096_v61 = vsel %vm1833_vm0, %v3006_v53, 0.0  ;;  %v1750_v53 = vmax.f32 %v1686_v8, 0.0  ;;  %v465_v24 = vmul.f32 %v8905_v52, %v13669_v62  ;;  %v13670_v8 = vld [vmem:[#allocation103_spill] sm:$0xff] }
 0x36c   :  { %v1974_v13 = vpop.f32.mrf.mxu0  ;;  %3097 = vadd.xlane.f32.xlu1 %v3096_v61  ;;  %v1716_v46 = vadd.f32 %v1652_v11, %v1330_v3  ;;  %v1749_v2 = vmax.f32 %v1685_v47, 0.0  ;;  %v529_v6 = vadd.f32 %v8883_v29, %v462_v14  ;;  %v13664_v3 = vld [vmem:[#allocation45_spill] sm:$0xff]  ;;  %v1238_v11 = vmul.f32 %v8873_v54, %v13666_v7  ;;  %v13672_v14 = vld [vmem:[#allocation159_spill] sm:$0xff] }
 0x36d   :  { %v1975_v51 = vadd.f32 %v8673_v26, %v1974_v13  ;;  %v851_v13 = vmul.f32 %v8865_v5, %v13664_v3 }
 0x36e   :  { %v1780_v44 = vmax.f32 %v1716_v46, 0.0  ;;  %v1797_v61 = vpack.c.bf16 %v1750_v53, %v1749_v2 }
 0x36f   :  { %v2113_v19 = vmax.f32 %v1975_v51, 0.0  ;;  %6330 = vmatmul.msk.bf16.gmra.mxu0 %vm1833_vm0, %v1796_v37  ;;  %v916_v37 = vadd.f32 %v852_v56, %v530_v12  ;;  %v915_v51 = vadd.f32 %v851_v13, %v529_v6  ;;  %v13674_v6 = vld [vmem:[#allocation81_spill] sm:$0xff] }
 0x370   :  { %v1812_v1 = vpack.c.bf16 %v1780_v44, %v1779_v30  ;;  %v532_v44 = vadd.f32 %v8883_v29, %v465_v24  ;;  %v13677_v24 = vld [vmem:[#allocation41_spill] sm:$0xff] }
 0x371   :  { %v3007_v49 = vmul.f32 %v8686_v43, %v2113_v19  ;;  %v1301_v10 = vadd.f32 %v1237_v63, %v915_v51  ;;  %v1302_v45 = vadd.f32 %v1238_v11, %v916_v37  ;;  %v1625_v63 = vmul.f32 %v8895_v59, %v13675_v34  ;;  %v13676_v51 = vld [vmem:[#allocation15_spill] sm:$0xff] }
 0x373   :  { %v3099_v40 = vsel %vm1833_vm0, %v3007_v49, 0.0  ;;  %v1687_v50 = vadd.f32 %v1623_v15, %v1301_v10  ;;  %v1688_v9 = vadd.f32 %v1624_v31, %v1302_v45  ;;  %v467_v15 = vmul.f32 %v8905_v52, %v13676_v51 }
 0x374   :  { %v1976_v60 = vpop.f32.mrf.mxu0  ;;  %3100 = vadd.xlane.f32.xlu2 %v3099_v40  ;;  %v531_v40 = vadd.f32 %v8883_v29, %v464_v27  ;;  %v9123_v27 = vld [vmem:[%s13017_s9] ss:$0 sm:$0xff] }
 0x375   :  { %v1977_v32 = vadd.f32 %v8673_v26, %v1976_v60  ;;  %v1751_v48 = vmax.f32 %v1687_v50, 0.0  ;;  %v1752_v21 = vmax.f32 %v1688_v9, 0.0 }
 0x377   :  { %v2114_v41 = vmax.f32 %v1977_v32, 0.0  ;;  %v853_v32 = vmul.f32 %v8865_v5, %v13670_v8  ;;  %v1798_v30 = vpack.c.bf16 %v1752_v21, %v1751_v48  ;;  %v13678_v48 = vld [vmem:[#allocation106_spill] sm:$0xff] }
 0x379   :  { %v2170_v0 = vpack.c.bf16 %v2114_v41, %v2113_v19  ;;  %v3008_v38 = vmul.f32 %v8686_v43, %v2114_v41  ;;  %6346 = vmatmul.msk.bf16.gmra.mxu3 %vm1833_vm0, %v1812_v1  ;;  %v13671_v1 = vld [vmem:[#allocation48_spill] sm:$0xff] }
 0x37a   :  { %v854_v35 = vmul.f32 %v8865_v5, %v13671_v1 }
 0x37b   :  { %6362 = vmatmul.msk.bf16.gmra.mxu1 %vm1833_vm0, %v2170_v0  ;;  %v3102_v57 = vsel %vm1833_vm0, %v3008_v38, 0.0  ;;  %v1240_v0 = vmul.f32 %v8873_v54, %v13672_v14  ;;  %v917_v38 = vadd.f32 %v853_v32, %v531_v40 }
 0x37c   :  { %3103 = vadd.xlane.f32.xlu0 %v3102_v57  ;;  %v1979_v58 = vpop.f32.mrf.mxu0  ;;  %v918_v36 = vadd.f32 %v854_v35, %v532_v44  ;;  %v13673_v57 = vld [vmem:[#allocation168_spill] sm:$0xff] }
 0x37d   :  { %v1980_v16 = vadd.f32 %v8673_v26, %v1979_v58  ;;  %v1239_v58 = vmul.f32 %v8873_v54, %v13673_v57 }
 0x37f   :  { %v2115_v55 = vmax.f32 %v1980_v16, 0.0  ;;  %6331 = vmatmul.msk.bf16.gmra.mxu0 %vm1833_vm0, %v1797_v61  ;;  %v1304_v16 = vadd.f32 %v1240_v0, %v918_v36  ;;  %v1303_v61 = vadd.f32 %v1239_v58, %v917_v38  ;;  %v13682_v58 = vld [vmem:[#allocation162_spill] sm:$0xff] }
 0x381   :  { %v3009_v20 = vmul.f32 %v8686_v43, %v2115_v55  ;;  %v1689_v31 = vadd.f32 %v1625_v63, %v1303_v61 }
 0x383   :  { %v3105_v33 = vsel %vm1833_vm0, %v3009_v20, 0.0 }
 0x384   :  { %v1981_v19 = vpop.f32.mrf.mxu0  ;;  %3106 = vadd.xlane.f32.xlu1 %v3105_v33 }
 0x385   :  { %v1982_v46 = vadd.f32 %v8673_v26, %v1981_v19 }
 0x387   :  { %v2116_v49 = vmax.f32 %v1982_v46, 0.0  ;;  %v534_v46 = vadd.f32 %v8883_v29, %v467_v15 }
 0x388   :  { %v2320_v18 = vpop.f32.mrf.mxu1 }
 0x389   :  { %v2171_v23 = vpack.c.bf16 %v2116_v49, %v2115_v55  ;;  %v3010_v4 = vmul.f32 %v8686_v43, %v2116_v49  ;;  %v2321_v53 = vadd.f32 %v9079_v25, %v2320_v18  ;;  %v9105_v55 = vld [vmem:[%s13016_s4] ss:$0 sm:$0xff]  ;;  %v466_v18 = vmul.f32 %v8905_v52, %v13677_v24 }
 0x38b   :  { %6363 = vmatmul.msk.bf16.gmra.mxu1 %vm1833_vm0, %v2171_v23  ;;  %v3108_v60 = vsel %vm1833_vm0, %v3010_v4, 0.0  ;;  %v2480_v12 = vmax.f32 %v2321_v53, 0.0  ;;  %v856_v23 = vmul.f32 %v8865_v5, %v13678_v48  ;;  %v1753_v4 = vmax.f32 %v1689_v31, 0.0 }
 0x38c   :  { %3109 = vadd.xlane.f32.xlu2 %v3108_v60  ;;  %v1984_v28 = vpop.f32.mrf.mxu0  ;;  %v2059_v41 = vpop.f32.mrf.mxu3  ;;  %v13679_v60 = vld [vmem:[#allocation117_spill] sm:$0xff] }
 0x38d   :  { %v1985_v47 = vadd.f32 %v8673_v26, %v1984_v28  ;;  %v1626_v26 = vmul.f32 %v8895_v59, %v13674_v6  ;;  %v9108_v37 = vadd.f32 %v9105_v55, %v2059_v41  ;;  %v855_v44 = vmul.f32 %v8865_v5, %v13679_v60  ;;  %v13680_v41 = vld [vmem:[#allocation169_spill] sm:$0xff] }
 0x38e   :  { %v920_v28 = vadd.f32 %v856_v23, %v534_v46  ;;  %v1242_v1 = vmul.f32 %v8873_v54, %v13680_v41  ;;  %v1628_v6 = vmul.f32 %v8895_v59, %v13682_v58 }
 0x38f   :  { %v2117_v42 = vmax.f32 %v1985_v47, 0.0  ;;  %6332 = vmatmul.msk.bf16.gmra.mxu0 %vm1833_vm0, %v1798_v30  ;;  %v1690_v20 = vadd.f32 %v1626_v26, %v1304_v16  ;;  %v2147_v19 = vmax.f32 %v9108_v37, 0.0  ;;  %v533_v47 = vadd.f32 %v8883_v29, %v466_v18  ;;  %v13683_v26 = vld [vmem:[#allocation134_spill] sm:$0xff] }
 0x390   :  { %v2322_v2 = vpop.f32.mrf.mxu1  ;;  %v1306_v53 = vadd.f32 %v1242_v1, %v920_v28 }
 0x391   :  { %v3011_v22 = vmul.f32 %v8686_v43, %v2117_v42  ;;  %v2323_v56 = vadd.f32 %v9079_v25, %v2322_v2  ;;  %v1754_v9 = vmax.f32 %v1690_v20, 0.0  ;;  %v919_v38 = vadd.f32 %v855_v44, %v533_v47  ;;  %v13681_v2 = vld [vmem:[#allocation110_spill] sm:$0xff] }
 0x392   :  { %v1241_v57 = vmul.f32 %v8873_v54, %v13681_v2  ;;  %v1692_v34 = vadd.f32 %v1628_v6, %v1306_v53  ;;  %v13689_v53 = vld [vmem:[#allocation7_spill] sm:$0xff] }
 0x393   :  { %v2481_v3 = vmax.f32 %v2323_v56, 0.0  ;;  %v3111_v13 = vsel %vm1833_vm0, %v3011_v22, 0.0  ;;  %v1799_v8 = vpack.c.bf16 %v1754_v9, %v1753_v4  ;;  %v1627_v22 = vmul.f32 %v8895_v59, %v13683_v26  ;;  %v13691_v26 = vld [vmem:[#allocation2_spill] sm:$0xff] }
 0x394   :  { %v1986_v43 = vpop.f32.mrf.mxu0  ;;  %3112 = vadd.xlane.f32.xlu0 %v3111_v13  ;;  %v2061_v11 = vpop.f32.mrf.mxu3  ;;  %v1305_v13 = vadd.f32 %v1241_v57, %v919_v38  ;;  %v13690_v57 = vld [vmem:[#allocation113_spill] sm:$0xff] }
 0x395   :  { %v1987_v7 = vadd.f32 %v9105_v55, %v1986_v43  ;;  %v2544_v10 = vpack.c.bf16 %v2481_v3, %v2480_v12  ;;  %v9114_v17 = vadd.f32 %v9105_v55, %v2061_v11  ;;  %v13684_v11 = vld [vmem:[#allocation55_spill] sm:$0xff]  ;;  %v1244_v58 = vmul.f32 %v8873_v54, %v13690_v57  ;;  %v13697_v57 = vld [vmem:[#allocation170_spill] sm:$0xff] }
 0x396   :  { %v1691_v20 = vadd.f32 %v1627_v22, %v1305_v13  ;;  %v1630_v22 = vmul.f32 %v8895_v59, %v13691_v26 }
 0x397   :  { %v2118_v33 = vmax.f32 %v1987_v7, 0.0  ;;  %6395 = vmatmul.msk.bf16.vlgmr.msra.gmra.mxu2 %vm1833_vm0, %v2544_v10  ;;  %v2148_v45 = vmax.f32 %v9114_v17, 0.0  ;;  %v468_v10 = vmul.f32 %v8905_v52, %v13684_v11 }
 0x398   :  { %v2325_v50 = vpop.f32.mrf.mxu1  ;;  %v1755_v18 = vmax.f32 %v1691_v20, 0.0 }
 0x399   :  { %v2172_v39 = vpack.c.bf16 %v2118_v33, %v2117_v42  ;;  %v3012_v49 = vmul.f32 %v9123_v27, %v2118_v33  ;;  %v2187_v62 = vpack.c.bf16 %v2148_v45, %v2147_v19  ;;  %v2326_v35 = vadd.f32 %v9079_v25, %v2325_v50 }
 0x39a   :  { %v535_v23 = vadd.f32 %v8883_v29, %v468_v10  ;;  %v13692_v10 = vld [vmem:[#allocation9_spill] sm:$0xff] }
 0x39b   :  { %6364 = vmatmul.msk.bf16.gmra.mxu1 %vm1833_vm0, %v2172_v39  ;;  %v3114_v21 = vsel %vm1833_vm0, %v3012_v49, 0.0  ;;  %6379 = vmatmul.msk.bf16.vlgmr.msrb.gmra.mxu3 %vm1833_vm0, %v2187_v62  ;;  %v2482_v56 = vmax.f32 %v2326_v35, 0.0  ;;  %v1756_v39 = vmax.f32 %v1692_v34, 0.0  ;;  %v13685_v62 = vld [vmem:[#allocation44_spill] sm:$0xff] }
 0x39c   :  { %v1989_v40 = vpop.f32.mrf.mxu0  ;;  %3115 = vadd.xlane.f32.xlu1 %v3114_v21  ;;  %v2064_v30 = vpop.f32.mrf.mxu3  ;;  %v469_v24 = vmul.f32 %v8905_v52, %v13685_v62  ;;  %v13686_v21 = vld [vmem:[#allocation120_spill] sm:$0xff] }
 0x39d   :  { %v1990_v32 = vadd.f32 %v9105_v55, %v1989_v40  ;;  %v9155_v12 = vadd.f32 %v9105_v55, %v2064_v30  ;;  %v858_v40 = vmul.f32 %v8865_v5, %v13686_v21  ;;  %v1800_v28 = vpack.c.bf16 %v1756_v39, %v1755_v18  ;;  %v13688_v30 = vld [vmem:[#allocation161_spill] sm:$0xff] }
 0x39e   :  { %v1243_v47 = vmul.f32 %v8873_v54, %v13688_v30  ;;  %v536_v41 = vadd.f32 %v8883_v29, %v469_v24 }
 0x39f   :  { %v2119_v14 = vmax.f32 %v1990_v32, 0.0  ;;  %6333 = vmatmul.msk.bf16.gmra.mxu0 %vm1833_vm0, %v1799_v8  ;;  %v2149_v31 = vmax.f32 %v9155_v12, 0.0  ;;  %v13687_v8 = vld [vmem:[#allocation51_spill] sm:$0xff] }
 0x3a0   :  { %v2327_v0 = vpop.f32.mrf.mxu1  ;;  %v857_v32 = vmul.f32 %v8865_v5, %v13687_v8  ;;  %v922_v38 = vadd.f32 %v858_v40, %v536_v41  ;;  %v13694_v8 = vld [vmem:[#allocation109_spill] sm:$0xff] }
 0x3a1   :  { %v3013_v42 = vmul.f32 %v9123_v27, %v2119_v14  ;;  %v2328_v36 = vadd.f32 %v9079_v25, %v2327_v0 }
 0x3a2   :  { %v1308_v34 = vadd.f32 %v1244_v58, %v922_v38  ;;  %v1245_v58 = vmul.f32 %v8873_v54, %v13697_v57 }
 0x3a3   :  { %v2483_v16 = vmax.f32 %v2328_v36, 0.0  ;;  %v3117_v61 = vsel %vm1833_vm0, %v3013_v42, 0.0  ;;  %v1629_v42 = vmul.f32 %v8895_v59, %v13689_v53 }
 0x3a4   :  { %v1991_v3 = vpop.f32.mrf.mxu0  ;;  %3118 = vadd.xlane.f32.xlu2 %v3117_v61  ;;  %v2066_v43 = vpop.f32.mrf.mxu3  ;;  %v1694_v11 = vadd.f32 %v1630_v22, %v1308_v34 }
 0x3a5   :  { %v1992_v63 = vadd.f32 %v9105_v55, %v1991_v3  ;;  %v2545_v51 = vpack.c.bf16 %v2483_v16, %v2482_v56  ;;  %v9159_v15 = vadd.f32 %v9105_v55, %v2066_v43 }
 0x3a6   :  { %v1758_v21 = vmax.f32 %v1694_v11, 0.0 }
 0x3a7   :  { %v2120_v7 = vmax.f32 %v1992_v63, 0.0  ;;  %6396 = vmatmul.msk.bf16.gmra.mxu2 %vm1833_vm0, %v2545_v51  ;;  %v2150_v33 = vmax.f32 %v9159_v15, 0.0 }
 0x3a8   :  { %v2330_v50 = vpop.f32.mrf.mxu1 }
 0x3a9   :  { %v2173_v46 = vpack.c.bf16 %v2120_v7, %v2119_v14  ;;  %v3014_v9 = vmul.f32 %v9123_v27, %v2120_v7  ;;  %v2188_v49 = vpack.c.bf16 %v2150_v33, %v2149_v31  ;;  %v2331_v1 = vadd.f32 %v9079_v25, %v2330_v50 }
 0x3aa   :  { %v921_v14 = vadd.f32 %v857_v32, %v535_v23  ;;  %v470_v50 = vmul.f32 %v8905_v52, %v13692_v10  ;;  %v859_v32 = vmul.f32 %v8865_v5, %v13694_v8  ;;  %v13700_v10 = vld [vmem:[#allocation11_spill] sm:$0xff] }
 0x3ab   :  { %6365 = vmatmul.msk.bf16.gmra.mxu1 %vm1833_vm0, %v2173_v46  ;;  %v3120_v48 = vsel %vm1833_vm0, %v3014_v9, 0.0  ;;  %6380 = vmatmul.msk.bf16.gmra.mxu3 %vm1833_vm0, %v2188_v49  ;;  %v2484_v56 = vmax.f32 %v2331_v1, 0.0  ;;  %v13693_v9 = vld [vmem:[#allocation58_spill] sm:$0xff] }
 0x3ac   :  { %3121 = vadd.xlane.f32.xlu0 %v3120_v48  ;;  %v1994_v4 = vpop.f32.mrf.mxu0  ;;  %v2069_v44 = vpop.f32.mrf.mxu3  ;;  %v1307_v6 = vadd.f32 %v1243_v47, %v921_v14  ;;  %v471_v39 = vmul.f32 %v8905_v52, %v13693_v9  ;;  %v537_v40 = vadd.f32 %v8883_v29, %v470_v50  ;;  %v13695_v1 = vld [vmem:[#allocation54_spill] sm:$0xff]  ;;  %v13696_v14 = vld [vmem:[#allocation163_spill] sm:$0xff]  ;;  %v473_v50 = vmul.f32 %v8905_v52, %v13700_v10 }
 0x3ad   :  { %v1995_v60 = vadd.f32 %v9105_v55, %v1994_v4  ;;  %v9197_v3 = vadd.f32 %v9105_v55, %v2069_v44 }
 0x3ae   :  { %v1693_v63 = vadd.f32 %v1629_v42, %v1307_v6  ;;  %v538_v44 = vadd.f32 %v8883_v29, %v471_v39  ;;  %v923_v38 = vadd.f32 %v859_v32, %v537_v40  ;;  %v13698_v6 = vld [vmem:[#allocation3_spill] sm:$0xff] }
 0x3af   :  { %v2121_v35 = vmax.f32 %v1995_v60, 0.0  ;;  %6334 = vmatmul.msk.bf16.gmra.mxu0 %vm1833_vm0, %v1800_v28  ;;  %v2151_v49 = vmax.f32 %v9197_v3, 0.0  ;;  %v1632_v26 = vmul.f32 %v8895_v59, %v13698_v6  ;;  %v13704_v6 = vld [vmem:[#allocation171_spill] sm:$0xff] }
 0x3b0   :  { %v2332_v0 = vpop.f32.mrf.mxu1  ;;  %v1757_v18 = vmax.f32 %v1693_v63, 0.0 }
 0x3b1   :  { %v3015_v36 = vmul.f32 %v9123_v27, %v2121_v35  ;;  %v2333_v2 = vadd.f32 %v9079_v25, %v2332_v0  ;;  %v1246_v0 = vmul.f32 %v8873_v54, %v13696_v14 }
 0x3b2   :  { %v1801_v30 = vpack.c.bf16 %v1758_v21, %v1757_v18 }
 0x3b3   :  { %v2485_v16 = vmax.f32 %v2333_v2, 0.0  ;;  %v3123_v61 = vsel %vm1833_vm0, %v3015_v36, 0.0 }
 0x3b4   :  { %v1996_v13 = vpop.f32.mrf.mxu0  ;;  %3124 = vadd.xlane.f32.xlu1 %v3123_v61  ;;  %v2071_v51 = vpop.f32.mrf.mxu3  ;;  %v1309_v61 = vadd.f32 %v1245_v58, %v923_v38  ;;  %v13703_v38 = vld [vmem:[#allocation123_spill] sm:$0xff] }
 0x3b5   :  { %v1997_v43 = vadd.f32 %v9105_v55, %v1996_v13  ;;  %v2546_v20 = vpack.c.bf16 %v2485_v16, %v2484_v56  ;;  %v9201_v7 = vadd.f32 %v9105_v55, %v2071_v51 }
 0x3b7   :  { %v2122_v46 = vmax.f32 %v1997_v43, 0.0  ;;  %6397 = vmatmul.msk.bf16.gmra.mxu2 %vm1833_vm0, %v2546_v20  ;;  %v13051_v62 = vmax.f32 %v9201_v7, 0.0  ;;  %v13699_v43 = vld [vmem:[#allocation164_spill] sm:$0xff] }
 0x3b8   :  { %v2335_v24 = vpop.f32.mrf.mxu1  ;;  %v1631_v51 = vmul.f32 %v8895_v59, %v13699_v43  ;;  %v13705_v43 = vld [vmem:[#allocation116_spill] sm:$0xff] }
 0x3b9   :  { %v2174_v48 = vpack.c.bf16 %v2122_v46, %v2121_v35  ;;  %v3016_v23 = vmul.f32 %v9123_v27, %v2122_v46  ;;  %v2189_v4 = vpack.c.bf16 %v13051_v62, %v2151_v49  ;;  %v860_v35 = vmul.f32 %v8865_v5, %v13695_v1 }
 0x3ba   :  { %v2336_v53 = vadd.f32 %v9079_v25, %v2335_v24 }
 0x3bb   :  { %6366 = vmatmul.msk.bf16.gmra.mxu1 %vm1833_vm0, %v2174_v48  ;;  %v3126_v60 = vsel %vm1833_vm0, %v3016_v23, 0.0  ;;  %6381 = vmatmul.msk.bf16.gmra.mxu3 %vm1833_vm0, %v2189_v4  ;;  %v924_v36 = vadd.f32 %v860_v35, %v538_v44  ;;  %v1695_v48 = vadd.f32 %v1631_v51, %v1309_v61  ;;  %v1247_v51 = vmul.f32 %v8873_v54, %v13705_v43  ;;  %v13712_v43 = vld [vmem:[#allocation166_spill] sm:$0xff] }
 0x3bc   :  { %3127 = vadd.xlane.f32.xlu2 %v3126_v60  ;;  %v1999_v28 = vpop.f32.mrf.mxu0  ;;  %v2074_v41 = vpop.f32.mrf.mxu3  ;;  %v2486_v13 = vmax.f32 %v2336_v53, 0.0  ;;  %v540_v60 = vadd.f32 %v8883_v29, %v473_v50  ;;  %v861_v53 = vmul.f32 %v8865_v5, %v13703_v38  ;;  %v13707_v50 = vld [vmem:[#allocation73_spill] sm:$0xff] }
 0x3bd   :  { %v2000_v47 = vadd.f32 %v9105_v55, %v1999_v28  ;;  %v1310_v16 = vadd.f32 %v1246_v0, %v924_v36  ;;  %v9239_v20 = vadd.f32 %v9105_v55, %v2074_v41  ;;  %v13702_v41 = vld [vmem:[#allocation112_spill] sm:$0xff]  ;;  %v1759_v35 = vmax.f32 %v1695_v48, 0.0 }
 0x3be   :  { %v862_v1 = vmul.f32 %v8865_v5, %v13702_v41  ;;  %v13708_v41 = vld [vmem:[#allocation61_spill] sm:$0xff] }
 0x3bf   :  { %v2123_v42 = vmax.f32 %v2000_v47, 0.0  ;;  %6335 = vmatmul.msk.bf16.gmra.mxu0 %vm1833_vm0, %v1801_v30  ;;  %v1696_v46 = vadd.f32 %v1632_v26, %v1310_v16  ;;  %v2153_v4 = vmax.f32 %v9239_v20, 0.0  ;;  %v13701_v30 = vld [vmem:[#allocation47_spill] sm:$0xff]  ;;  %v1248_v26 = vmul.f32 %v8873_v54, %v13704_v6 }
 0x3c0   :  { %v2337_v2 = vpop.f32.mrf.mxu1  ;;  %v472_v47 = vmul.f32 %v8905_v52, %v13701_v30 }
 0x3c1   :  { %v3017_v22 = vmul.f32 %v9123_v27, %v2123_v42  ;;  %v2338_v56 = vadd.f32 %v9079_v25, %v2337_v2  ;;  %v1760_v44 = vmax.f32 %v1696_v46, 0.0  ;;  %v1633_v46 = vmul.f32 %v8895_v59, %v13707_v50 }
 0x3c2   :  { %v539_v58 = vadd.f32 %v8883_v29, %v472_v47 }
 0x3c3   :  { %v2487_v34 = vmax.f32 %v2338_v56, 0.0  ;;  %v3129_v63 = vsel %vm1833_vm0, %v3017_v22, 0.0  ;;  %v1802_v36 = vpack.c.bf16 %v1760_v44, %v1759_v35 }
 0x3c4   :  { %v2001_v11 = vpop.f32.mrf.mxu0  ;;  %3130 = vadd.xlane.f32.xlu0 %v3129_v63  ;;  %v2076_v39 = vpop.f32.mrf.mxu3  ;;  %v925_v61 = vadd.f32 %v861_v53, %v539_v58 }
 0x3c5   :  { %v2002_v9 = vadd.f32 %v9105_v55, %v2001_v11  ;;  %v2547_v24 = vpack.c.bf16 %v2487_v34, %v2486_v13  ;;  %v9245_v18 = vadd.f32 %v9105_v55, %v2076_v39  ;;  %v13706_v11 = vld [vmem:[#allocation167_spill] sm:$0xff] }
 0x3c6   :  { %v1634_v10 = vmul.f32 %v8895_v59, %v13706_v11 }
 0x3c7   :  { %v2124_v23 = vmax.f32 %v2002_v9, 0.0  ;;  %6398 = vmatmul.msk.bf16.gmra.mxu2 %vm1833_vm0, %v2547_v24  ;;  %v13050_v21 = vmax.f32 %v9245_v18, 0.0 }
 0x3c8   :  { %v2340_v40 = vpop.f32.mrf.mxu1 }
 0x3c9   :  { %v2175_v28 = vpack.c.bf16 %v2124_v23, %v2123_v42  ;;  %v3018_v8 = vmul.f32 %v9123_v27, %v2124_v23  ;;  %v2190_v32 = vpack.c.bf16 %v13050_v21, %v2153_v4  ;;  %v926_v42 = vadd.f32 %v862_v1, %v540_v60 }
 0x3ca   :  { %v2341_v22 = vadd.f32 %v9079_v25, %v2340_v40  ;;  %v1311_v40 = vadd.f32 %v1247_v51, %v925_v61  ;;  %v474_v1 = vmul.f32 %v8905_v52, %v13708_v41  ;;  %v1249_v51 = vmul.f32 %v8873_v54, %v13712_v43  ;;  %v7253_v54 = vld [vmem:[%s13013_s1 + $0x2] ss:$0 sm:$0xff] }
 0x3cb   :  { %6367 = vmatmul.msk.bf16.gmra.mxu1 %vm1833_vm0, %v2175_v28  ;;  %v3132_v14 = vsel %vm1833_vm0, %v3018_v8, 0.0  ;;  %6382 = vmatmul.msk.bf16.gmra.mxu3 %vm1833_vm0, %v2190_v32  ;;  %v1312_v13 = vadd.f32 %v1248_v26, %v926_v42 }
 0x3cc   :  { %v2004_v0 = vpop.f32.mrf.mxu0  ;;  %3133 = vadd.xlane.f32.xlu1 %v3132_v14  ;;  %v2079_v57 = vpop.f32.mrf.mxu3  ;;  %v2488_v9 = vmax.f32 %v2341_v22, 0.0  ;;  %v1697_v30 = vadd.f32 %v1633_v46, %v1311_v40  ;;  %v541_v26 = vadd.f32 %v8883_v29, %v474_v1 }
 0x3cd   :  { %v2005_v2 = vadd.f32 %v9105_v55, %v2004_v0  ;;  %v9281_v48 = vadd.f32 %v9105_v55, %v2079_v57  ;;  %v1698_v60 = vadd.f32 %v1634_v10, %v1312_v13 }
 0x3ce   :  { %v1761_v58 = vmax.f32 %v1697_v30, 0.0 }
 0x3cf   :  { %v2125_v56 = vmax.f32 %v2005_v2, 0.0  ;;  %6336 = vmatmul.msk.bf16.gmra.mxu0 %vm1833_vm0, %v1802_v36  ;;  %v13048_v35 = vmax.f32 %v9281_v48, 0.0  ;;  %v1762_v42 = vmax.f32 %v1698_v60, 0.0  ;;  %v13709_v2 = vld [vmem:[#allocation50_spill] sm:$0xff] }
 0x3d0   :  { %v2342_v16 = vpop.f32.mrf.mxu1  ;;  %v475_v57 = vmul.f32 %v8905_v52, %v13709_v2 }
 0x3d1   :  { %v3019_v34 = vmul.f32 %v9123_v27, %v2125_v56  ;;  %v2343_v63 = vadd.f32 %v9079_v25, %v2342_v16 }
 0x3d2   :  { %v542_v11 = vadd.f32 %v8883_v29, %v475_v57  ;;  %v13714_v29 = vld [vmem:[#allocation119_spill] sm:$0xff] }
 0x3d3   :  { %v2489_v39 = vmax.f32 %v2343_v63, 0.0  ;;  %v3135_v24 = vsel %vm1833_vm0, %v3019_v34, 0.0  ;;  %v1803_v34 = vpack.c.bf16 %v1762_v42, %v1761_v58  ;;  %v13711_v63 = vld [vmem:[#allocation57_spill] sm:$0xff]  ;;  %v1250_v60 = vmul.f32 %v7253_v54, %v13714_v29 }
 0x3d4   :  { %v2006_v23 = vpop.f32.mrf.mxu0  ;;  %3136 = vadd.xlane.f32.xlu2 %v3135_v24  ;;  %v2081_v28 = vpop.f32.mrf.mxu3  ;;  %v863_v52 = vmul.f32 %v8865_v5, %v13711_v63  ;;  %v13713_v24 = vld [vmem:[#allocation84_spill] sm:$0xff] }
 0x3d5   :  { %v2007_v44 = vadd.f32 %v9105_v55, %v2006_v23  ;;  %v2548_v8 = vpack.c.bf16 %v2489_v39, %v2488_v9  ;;  %v9285_v32 = vadd.f32 %v9105_v55, %v2081_v28  ;;  %v1635_v23 = vmul.f32 %v8895_v59, %v13713_v24  ;;  %v13715_v28 = vld [vmem:[#allocation16_spill] sm:$0xff] }
 0x3d6   :  { %v927_v46 = vadd.f32 %v863_v52, %v541_v26 }
 0x3d7   :  { %v2126_v47 = vmax.f32 %v2007_v44, 0.0  ;;  %6399 = vmatmul.msk.bf16.gmra.mxu2 %vm1833_vm0, %v2548_v8  ;;  %v13049_v14 = vmax.f32 %v9285_v32, 0.0  ;;  %v1636_v8 = vmul.f32 %v8895_v59, %v13715_v28 }
 0x3d8   :  { %v2345_v0 = vpop.f32.mrf.mxu1  ;;  %v1313_v44 = vadd.f32 %v1249_v51, %v927_v46 }
 0x3d9   :  { %v2176_v38 = vpack.c.bf16 %v2126_v47, %v2125_v56  ;;  %v3020_v53 = vmul.f32 %v9123_v27, %v2126_v47  ;;  %v2191_v36 = vpack.c.bf16 %v13049_v14, %v13048_v35  ;;  %v13710_v56 = vld [vmem:[#allocation126_spill] sm:$0xff]  ;;  %v2346_v10 = vadd.f32 %v9079_v25, %v2345_v0 }
 0x3da   :  { %v864_v16 = vmul.f32 %v8865_v5, %v13710_v56 }
 0x3db   :  { %6368 = vmatmul.msk.bf16.gmra.mxu1 %vm1833_vm0, %v2176_v38  ;;  %v3138_v6 = vsel %vm1833_vm0, %v3020_v53, 0.0  ;;  %6383 = vmatmul.msk.bf16.gmra.mxu3 %vm1833_vm0, %v2191_v36  ;;  %v2490_v30 = vmax.f32 %v2346_v10, 0.0  ;;  %v1699_v53 = vadd.f32 %v1635_v23, %v1313_v44 }
 0x3dc   :  { %3139 = vadd.xlane.f32.xlu0 %v3138_v6  ;;  %v2009_v22 = vpop.f32.mrf.mxu0  ;;  %v2084_v13 = vpop.f32.mrf.mxu3  ;;  %v928_v39 = vadd.f32 %v864_v16, %v542_v11 }
 0x3dd   :  { %v2010_v61 = vadd.f32 %v9105_v55, %v2009_v22  ;;  %v9325_v1 = vadd.f32 %v9105_v55, %v2084_v13  ;;  %v1763_v56 = vmax.f32 %v1699_v53, 0.0 }
 0x3de   :  { %v1314_v38 = vadd.f32 %v1250_v60, %v928_v39 }
 0x3df   :  { %v2127_v50 = vmax.f32 %v2010_v61, 0.0  ;;  %6337 = vmatmul.msk.bf16.gmra.mxu0 %vm1833_vm0, %v1803_v34  ;;  %v13047_v6 = vmax.f32 %v9325_v1, 0.0 }
 0x3e0   :  { %v2347_v9 = vpop.f32.mrf.mxu1  ;;  %v1700_v58 = vadd.f32 %v1636_v8, %v1314_v38 }
 0x3e1   :  { %v3021_v40 = vmul.f32 %v9123_v27, %v2127_v50  ;;  %v2348_v5 = vadd.f32 %v9079_v25, %v2347_v9 }
 0x3e2   :  { %v1764_v34 = vmax.f32 %v1700_v58, 0.0 }
 0x3e3   :  { %v2491_v47 = vmax.f32 %v2348_v5, 0.0  ;;  %v3141_v41 = vsel %vm1833_vm0, %v3021_v40, 0.0 }
 0x3e4   :  { %v2011_v0 = vpop.f32.mrf.mxu0  ;;  %3142 = vadd.xlane.f32.xlu1 %v3141_v41  ;;  %v2086_v36 = vpop.f32.mrf.mxu3  ;;  %v1804_v43 = vpack.c.bf16 %v1764_v34, %v1763_v56 }
 0x3e5   :  { %v2012_v42 = vadd.f32 %v9105_v55, %v2011_v0  ;;  %v2549_v2 = vpack.c.bf16 %v2491_v47, %v2490_v30  ;;  %v9329_v57 = vadd.f32 %v9105_v55, %v2086_v36 }
 0x3e7   :  { %v2128_v59 = vmax.f32 %v2012_v42, 0.0  ;;  %6400 = vmatmul.msk.bf16.gmra.mxu2 %vm1833_vm0, %v2549_v2  ;;  %v13045_v26 = vmax.f32 %v9329_v57, 0.0 }
 0x3e8   :  { %v2350_v22 = vpop.f32.mrf.mxu1 }
 0x3e9   :  { %v2177_v16 = vpack.c.bf16 %v2128_v59, %v2127_v50  ;;  %v3022_v61 = vmul.f32 %v9123_v27, %v2128_v59  ;;  %v2192_v13 = vpack.c.bf16 %v13045_v26, %v13047_v6  ;;  %v2351_v10 = vadd.f32 %v9079_v25, %v2350_v22 }
 0x3eb   :  { %6369 = vmatmul.msk.bf16.gmra.mxu1 %vm1833_vm0, %v2177_v16  ;;  %v3144_v63 = vsel %vm1833_vm0, %v3022_v61, 0.0  ;;  %6384 = vmatmul.msk.bf16.gmra.mxu3 %vm1833_vm0, %v2192_v13  ;;  %v2492_v24 = vmax.f32 %v2351_v10, 0.0 }
 0x3ec   :  { %3145 = vadd.xlane.f32.xlu2 %v3144_v63  ;;  %v2014_v52 = vpop.f32.mrf.mxu0  ;;  %v2089_v11 = vpop.f32.mrf.mxu3 }
 0x3ed   :  { %v2015_v51 = vadd.f32 %v9105_v55, %v2014_v52  ;;  %v9349_v5 = vadd.f32 %v9105_v55, %v2089_v11 }
 0x3ef   :  { %v2129_v50 = vmax.f32 %v2015_v51, 0.0  ;;  %6338 = vmatmul.msk.bf16.gmra.mxu0 %vm1833_vm0, %v1804_v43  ;;  %v13046_v30 = vmax.f32 %v9349_v5, 0.0 }
 0x3f0   :  { %v2352_v46 = vpop.f32.mrf.mxu1 }
 0x3f1   :  { %v3023_v9 = vmul.f32 %v9123_v27, %v2129_v50  ;;  %v2353_v39 = vadd.f32 %v9079_v25, %v2352_v46 }
 0x3f3   :  { %v2493_v23 = vmax.f32 %v2353_v39, 0.0  ;;  %v3147_v40 = vsel %vm1833_vm0, %v3023_v9, 0.0 }
 0x3f4   :  { %v2016_v54 = vpop.f32.mrf.mxu0  ;;  %3148 = vadd.xlane.f32.xlu0 %v3147_v40  ;;  %v2091_v60 = vpop.f32.mrf.mxu3 }
 0x3f5   :  { %v2017_v29 = vadd.f32 %v9105_v55, %v2016_v54  ;;  %v2550_v44 = vpack.c.bf16 %v2493_v23, %v2492_v24  ;;  %v9353_v28 = vadd.f32 %v9105_v55, %v2091_v60 }
 0x3f7   :  { %v2130_v8 = vmax.f32 %v2017_v29, 0.0  ;;  %6401 = vmatmul.msk.bf16.gmra.mxu2 %vm1833_vm0, %v2550_v44  ;;  %v13044_v47 = vmax.f32 %v9353_v28, 0.0 }
 0x3f8   :  { %v2355_v41 = vpop.f32.mrf.mxu1 }
 0x3f9   :  { %v2178_v0 = vpack.c.bf16 %v2130_v8, %v2129_v50  ;;  %v3024_v38 = vmul.f32 %v9123_v27, %v2130_v8  ;;  %v2193_v53 = vpack.c.bf16 %v13044_v47, %v13046_v30  ;;  %v2356_v59 = vadd.f32 %v9079_v25, %v2355_v41 }
 0x3fb   :  { %6370 = vmatmul.msk.bf16.gmra.mxu1 %vm1833_vm0, %v2178_v0  ;;  %v3150_v42 = vsel %vm1833_vm0, %v3024_v38, 0.0  ;;  %6385 = vmatmul.msk.bf16.gmra.mxu3 %vm1833_vm0, %v2193_v53  ;;  %v2494_v13 = vmax.f32 %v2356_v59, 0.0 }
 0x3fc   :  { %v2019_v36 = vpop.f32.mrf.mxu0  ;;  %3151 = vadd.xlane.f32.xlu1 %v3150_v42  ;;  %v2094_v58 = vpop.f32.mrf.mxu3 }
 0x3fd   :  { %v2020_v2 = vadd.f32 %v9105_v55, %v2019_v36  ;;  %v9372_v52 = vadd.f32 %v9105_v55, %v2094_v58 }
 0x3ff   :  { %v2131_v22 = vmax.f32 %v2020_v2, 0.0  ;;  %v13042_v9 = vmax.f32 %v9372_v52, 0.0 }
 0x400   :  { %v2357_v56 = vpop.f32.mrf.mxu1 }
 0x401   :  { %v3025_v16 = vmul.f32 %v9123_v27, %v2131_v22  ;;  %v2358_v61 = vadd.f32 %v9079_v25, %v2357_v56 }
 0x403   :  { %v2495_v34 = vmax.f32 %v2358_v61, 0.0  ;;  %v3153_v63 = vsel %vm1833_vm0, %v3025_v16, 0.0 }
 0x404   :  { %v2021_v43 = vpop.f32.mrf.mxu0  ;;  %3154 = vadd.xlane.f32.xlu2 %v3153_v63  ;;  %v2096_v11 = vpop.f32.mrf.mxu3 }
 0x405   :  { %v2022_v51 = vadd.f32 %v9105_v55, %v2021_v43  ;;  %v2551_v10 = vpack.c.bf16 %v2495_v34, %v2494_v13  ;;  %v9376_v50 = vadd.f32 %v9105_v55, %v2096_v11  ;;  %v9403_v11 = vld [vmem:[%s13019_s8] ss:$0 sm:$0xff] }
 0x407   :  { %v2132_v46 = vmax.f32 %v2022_v51, 0.0  ;;  %6402 = vmatmul.msk.bf16.gmra.mxu2 %vm1833_vm0, %v2551_v10  ;;  %v13043_v39 = vmax.f32 %v9376_v50, 0.0  ;;  %v3059_v10 = vpop.xlane.xlu1 %3058 }
 0x408   :  { %v2360_v24 = vpop.f32.mrf.mxu1 }
 0x409   :  { %v2179_v23 = vpack.c.bf16 %v2132_v46, %v2131_v22  ;;  %v3026_v40 = vmul.f32 %v9123_v27, %v2132_v46  ;;  %v2194_v54 = vpack.c.bf16 %v13043_v39, %v13042_v9  ;;  %v2361_v8 = vadd.f32 %v9079_v25, %v2360_v24  ;;  %v3062_v24 = vpop.xlane.xlu2 %3061 }
 0x40b   :  { %6371 = vmatmul.msk.bf16.gmra.mxu1 %vm1833_vm0, %v2179_v23  ;;  %v3156_v29 = vsel %vm1833_vm0, %v3026_v40, 0.0  ;;  %6386 = vmatmul.msk.bf16.gmra.mxu3 %vm1833_vm0, %v2194_v54  ;;  %v2496_v42 = vmax.f32 %v2361_v8, 0.0  ;;  %v9409_v23 = vld [vmem:[%s13019_s8] ss:$0 sm:$0xff]  ;;  %v9414_v8 = vadd.f32 %v9403_v11, %v3059_v10 }
 0x40c   :  { %3157 = vadd.xlane.f32.xlu0 %v3156_v29  ;;  %v2024_v60 = vpop.f32.mrf.mxu0 }
 0x40d   :  { %v2025_v44 = vadd.f32 %v9105_v55, %v2024_v60  ;;  %13716 = vst [vmem:[#allocation12_spill] sm:$0xff] %v9414_v8 }
 0x40f   :  { %v2133_v41 = vmax.f32 %v2025_v44, 0.0 }
 0x410   :  { %v2362_v0 = vpop.f32.mrf.mxu1 }
 0x411   :  { %v3027_v38 = vmul.f32 %v9123_v27, %v2133_v41  ;;  %v2363_v53 = vadd.f32 %v9079_v25, %v2362_v0 }
 0x413   :  { %v2497_v36 = vmax.f32 %v2363_v53, 0.0  ;;  %v3159_v2 = vsel %vm1833_vm0, %v3027_v38, 0.0 }
 0x414   :  { %v2026_v58 = vpop.f32.mrf.mxu0  ;;  %3160 = vadd.xlane.f32.xlu1 %v3159_v2 }
 0x415   :  { %v2027_v59 = vadd.f32 %v9105_v55, %v2026_v58  ;;  %v2552_v22 = vpack.c.bf16 %v2497_v36, %v2496_v42 }
 0x417   :  { %v2134_v56 = vmax.f32 %v2027_v59, 0.0  ;;  %6403 = vmatmul.msk.bf16.gmra.mxu2 %vm1833_vm0, %v2552_v22 }
 0x418   :  { %v2365_v16 = vpop.f32.mrf.mxu1 }
 0x419   :  { %v2180_v61 = vpack.c.bf16 %v2134_v56, %v2133_v41  ;;  %v3028_v13 = vmul.f32 %v9123_v27, %v2134_v56  ;;  %v2366_v46 = vadd.f32 %v9079_v25, %v2365_v16  ;;  %v9417_v41 = vadd.f32 %v9403_v11, %v3062_v24 }
 0x41a   :  { %v2701_v34 = vpop.f32.mrf.mxu2  ;;  %v3317_v16 = vpack.c.bf16 %v9414_v8, %v9414_v8 }
 0x41b   :  { %6372 = vmatmul.msk.bf16.gmra.mxu1 %vm1833_vm0, %v2180_v61  ;;  %v3162_v63 = vsel %vm1833_vm0, %v3028_v13, 0.0  ;;  %13717 = vst [vmem:[#allocation136_spill] sm:$0xff] %v9417_v41  ;;  %v2498_v0 = vmax.f32 %v2366_v46, 0.0  ;;  %v9420_v53 = vadd.f32 %v9409_v23, %v2701_v34  ;;  %v3318_v13 = vpack.c.bf16 %v9417_v41, %v9417_v41 }
 0x41c   :  { %3163 = vadd.xlane.f32.xlu2 %v3162_v63  ;;  %v2029_v43 = vpop.f32.mrf.mxu0 }
 0x41d   :  { %v2030_v51 = vadd.f32 %v9105_v55, %v2029_v43  ;;  %13718 = vst [vmem:[#allocation78_spill] sm:$0xff] %v9420_v53 }
 0x41e   :  { %v2440_v54 = vpop.f32.mrf.mxu3 }
 0x41f   :  { %v2135_v40 = vmax.f32 %v2030_v51, 0.0  ;;  %v2441_v61 = vadd.f32 %v9079_v25, %v2440_v54 }
 0x420   :  { %v2367_v29 = vpop.f32.mrf.mxu1 }
 0x421   :  { %v3029_v60 = vmul.f32 %v9123_v27, %v2135_v40  ;;  %v2368_v44 = vadd.f32 %v9079_v25, %v2367_v29  ;;  %v2528_v24 = vmax.f32 %v2441_v61, 0.0 }
 0x422   :  { %v2703_v38 = vpop.f32.mrf.mxu2 }
 0x423   :  { %v2499_v42 = vmax.f32 %v2368_v44, 0.0  ;;  %v9423_v36 = vadd.f32 %v9409_v23, %v2703_v38  ;;  %v3165_v2 = vsel %vm1833_vm0, %v3029_v60, 0.0 }
 0x424   :  { %v2031_v58 = vpop.f32.mrf.mxu0  ;;  %3166 = vadd.xlane.f32.xlu0 %v3165_v2  ;;  %v3068_v2 = vpop.xlane.xlu2 %3067 }
 0x425   :  { %13719 = vst [vmem:[#allocation21_spill] sm:$0xff] %v9423_v36  ;;  %v6436_v59 = vpack.c.bf16 %v9423_v36, %v9420_v53  ;;  %v2032_v22 = vadd.f32 %v9105_v55, %v2031_v58  ;;  %v2553_v56 = vpack.c.bf16 %v2499_v42, %v2498_v0 }
 0x426   :  { %v2442_v63 = vpop.f32.mrf.mxu3 }
 0x427   :  { %6437 = vst [vmem:[%s13022_s11] sm:$0xff] %v6436_v59   ;;  %v2136_v34 = vmax.f32 %v2032_v22, 0.0  ;;  %6404 = vmatmul.msk.bf16.gmra.mxu2 %vm1833_vm0, %v2553_v56  ;;  %v2443_v43 = vadd.f32 %v9079_v25, %v2442_v63 }
 0x428   :  { %v2370_v51 = vpop.f32.mrf.mxu1  ;;  %3382 = vst.msk [vmem:[%s13022_s11] sm:$0xf] %vm3381_vm1, %v3317_v16 }
 0x429   :  { %v2181_v10 = vpack.c.bf16 %v2136_v34, %v2135_v40  ;;  %v3030_v46 = vmul.f32 %v9123_v27, %v2136_v34  ;;  %3383 = vst.msk [vmem:[%s13022_s11 + $0x4] sm:$0xf] %vm3381_vm1, %v3318_v13  ;;  %v2529_v54 = vmax.f32 %v2443_v43, 0.0  ;;  %v3065_v40 = vpop.xlane.xlu0 %3064  ;;  %v2371_v42 = vadd.f32 %v9079_v25, %v2370_v51 }
 0x42a   :  { %v2706_v29 = vpop.f32.mrf.mxu2  ;;  %v9456_v61 = vadd.f32 %v9403_v11, %v3065_v40  ;;  %v9459_v13 = vadd.f32 %v9403_v11, %v3068_v2 }
 0x42b   :  { %6373 = vmatmul.msk.bf16.gmra.mxu1 %vm1833_vm0, %v2181_v10  ;;  %v3168_v60 = vsel %vm1833_vm0, %v3030_v46, 0.0  ;;  %v2568_v44 = vpack.c.bf16 %v2529_v54, %v2528_v24  ;;  %v2500_v34 = vmax.f32 %v2371_v42, 0.0  ;;  %v9462_v43 = vadd.f32 %v9409_v23, %v2706_v29 }
 0x42c   :  { %v2034_v0 = vpop.f32.mrf.mxu0  ;;  %3169 = vadd.xlane.f32.xlu1 %v3168_v60  ;;  %13720 = vst [vmem:[#allocation17_spill] sm:$0xff] %v9456_v61 }
 0x42d   :  { %v2035_v38 = vadd.f32 %v9105_v55, %v2034_v0  ;;  %6419 = vmatmul.msk.bf16.vlgmr.msra.gmra.mxu3 %vm1833_vm0, %v2568_v44  ;;  %13721 = vst [vmem:[#allocation20_spill] sm:$0xff] %v9459_v13  ;;  %v3319_v0 = vpack.c.bf16 %v9456_v61, %v9456_v61 }
 0x42e   :  { %v2445_v59 = vpop.f32.mrf.mxu3  ;;  %13722 = vst [vmem:[#allocation75_spill] sm:$0xff] %v9462_v43 }
 0x42f   :  { %v2137_v58 = vmax.f32 %v2035_v38, 0.0  ;;  %v2446_v29 = vadd.f32 %v9079_v25, %v2445_v59  ;;  %v3320_v38 = vpack.c.bf16 %v9459_v13, %v9459_v13 }
 0x430   :  { %v2372_v22 = vpop.f32.mrf.mxu1 }
 0x431   :  { %v3031_v56 = vmul.f32 %v9123_v27, %v2137_v58  ;;  %v2373_v16 = vadd.f32 %v9079_v25, %v2372_v22 }
 0x432   :  { %v2708_v63 = vpop.f32.mrf.mxu2 }
 0x433   :  { %v2501_v51 = vmax.f32 %v2373_v16, 0.0  ;;  %v9465_v10 = vadd.f32 %v9409_v23, %v2708_v63  ;;  %v3171_v46 = vsel %vm1833_vm0, %v3031_v56, 0.0  ;;  %v2530_v16 = vmax.f32 %v2446_v29, 0.0 }
 0x434   :  { %v2036_v24 = vpop.f32.mrf.mxu0  ;;  %3172 = vadd.xlane.f32.xlu2 %v3171_v46 }
 0x435   :  { %13723 = vst [vmem:[#allocation25_spill] sm:$0xff] %v9465_v10  ;;  %v6441_v54 = vpack.c.bf16 %v9465_v10, %v9462_v43  ;;  %v2037_v60 = vadd.f32 %v9105_v55, %v2036_v24  ;;  %v2554_v44 = vpack.c.bf16 %v2501_v51, %v2500_v34 }
 0x436   :  { %v2447_v42 = vpop.f32.mrf.mxu3 }
 0x437   :  { %6593 = vst [vmem:[%s13022_s11 + $0x8] sm:$0xff] %v6441_v54   ;;  %v2138_v40 = vmax.f32 %v2037_v60, 0.0  ;;  %6405 = vmatmul.msk.bf16.gmra.mxu2 %vm1833_vm0, %v2554_v44  ;;  %v2448_v2 = vadd.f32 %v9079_v25, %v2447_v42  ;;  %v3074_v44 = vpop.xlane.xlu2 %3073 }
 0x438   :  { %v2375_v22 = vpop.f32.mrf.mxu1  ;;  %3384 = vst.msk [vmem:[%s13022_s11 + $0x8] sm:$0xf] %vm3381_vm1, %v3319_v0 }
 0x439   :  { %v2182_v59 = vpack.c.bf16 %v2138_v40, %v2137_v58  ;;  %v3032_v56 = vmul.f32 %v9123_v27, %v2138_v40  ;;  %3385 = vst.msk [vmem:[%s13022_s11 + $0xc] sm:$0xf] %vm3381_vm1, %v3320_v38  ;;  %v2531_v34 = vmax.f32 %v2448_v2, 0.0  ;;  %v3071_v58 = vpop.xlane.xlu1 %3070  ;;  %v2376_v60 = vadd.f32 %v9079_v25, %v2375_v22 }
 0x43a   :  { %v2711_v63 = vpop.f32.mrf.mxu2  ;;  %v9498_v2 = vadd.f32 %v9403_v11, %v3071_v58 }
 0x43b   :  { %6374 = vmatmul.msk.bf16.gmra.mxu1 %vm1833_vm0, %v2182_v59  ;;  %v3174_v51 = vsel %vm1833_vm0, %v3032_v56, 0.0  ;;  %v2569_v46 = vpack.c.bf16 %v2531_v34, %v2530_v16  ;;  %v9501_v59 = vadd.f32 %v9403_v11, %v3074_v44  ;;  %v2502_v56 = vmax.f32 %v2376_v60, 0.0 }
 0x43c   :  { %3175 = vadd.xlane.f32.xlu0 %v3174_v51  ;;  %v2039_v24 = vpop.f32.mrf.mxu0  ;;  %13724 = vst [vmem:[#allocation14_spill] sm:$0xff] %v9498_v2  ;;  %v9504_v22 = vadd.f32 %v9409_v23, %v2711_v63  ;;  %v3321_v60 = vpack.c.bf16 %v9498_v2, %v9498_v2 }
 0x43d   :  { %v2040_v54 = vadd.f32 %v9105_v55, %v2039_v24  ;;  %6420 = vmatmul.msk.bf16.gmra.mxu3 %vm1833_vm0, %v2569_v46  ;;  %13725 = vst [vmem:[#allocation138_spill] sm:$0xff] %v9501_v59 }
 0x43e   :  { %v2450_v38 = vpop.f32.mrf.mxu3  ;;  %13726 = vst [vmem:[#allocation147_spill] sm:$0xff] %v9504_v22 }
 0x43f   :  { %v2139_v0 = vmax.f32 %v2040_v54, 0.0  ;;  %v2451_v63 = vadd.f32 %v9079_v25, %v2450_v38 }
 0x440   :  { %v2377_v29 = vpop.f32.mrf.mxu1 }
 0x441   :  { %v3033_v40 = vmul.f32 %v9123_v27, %v2139_v0  ;;  %v2378_v42 = vadd.f32 %v9079_v25, %v2377_v29  ;;  %v3322_v29 = vpack.c.bf16 %v9501_v59, %v9501_v59 }
 0x442   :  { %v2713_v16 = vpop.f32.mrf.mxu2 }
 0x443   :  { %v2503_v34 = vmax.f32 %v2378_v42, 0.0  ;;  %v9507_v51 = vadd.f32 %v9409_v23, %v2713_v16  ;;  %v3177_v46 = vsel %vm1833_vm0, %v3033_v40, 0.0 }
 0x444   :  { %v2041_v24 = vpop.f32.mrf.mxu0  ;;  %3178 = vadd.xlane.f32.xlu1 %v3177_v46 }
 0x445   :  { %v6446_v54 = vpack.c.bf16 %v9507_v51, %v9504_v22  ;;  %v2042_v58 = vadd.f32 %v9105_v55, %v2041_v24  ;;  %v2555_v44 = vpack.c.bf16 %v2503_v34, %v2502_v56  ;;  %v2532_v34 = vmax.f32 %v2451_v63, 0.0  ;;  %v3080_v63 = vpop.xlane.xlu1 %3079 }
 0x446   :  { %v2452_v42 = vpop.f32.mrf.mxu3 }
 0x447   :  { %6594 = vst [vmem:[%s13022_s11 + $0x10] sm:$0xff] %v6446_v54   ;;  %v2140_v40 = vmax.f32 %v2042_v58, 0.0  ;;  %6406 = vmatmul.msk.bf16.gmra.mxu2 %vm1833_vm0, %v2555_v44  ;;  %v2453_v16 = vadd.f32 %v9079_v25, %v2452_v42 }
 0x448   :  { %v2380_v46 = vpop.f32.mrf.mxu1  ;;  %3386 = vst.msk [vmem:[%s13022_s11 + $0x10] sm:$0xf] %vm3381_vm1, %v3321_v60 }
 0x449   :  { %v2183_v38 = vpack.c.bf16 %v2140_v40, %v2139_v0  ;;  %v3034_v56 = vmul.f32 %v9123_v27, %v2140_v40  ;;  %3387 = vst.msk [vmem:[%s13022_s11 + $0x14] sm:$0xf] %vm3381_vm1, %v3322_v29  ;;  %v2533_v24 = vmax.f32 %v2453_v16, 0.0  ;;  %v3077_v0 = vpop.xlane.xlu0 %3076  ;;  %v9538_v40 = vld [vmem:[%s13020_s6] ss:$0 sm:$0xff] }
 0x44a   :  { %v2716_v54 = vpop.f32.mrf.mxu2  ;;  %v2381_v29 = vadd.f32 %v9538_v40, %v2380_v46 }
 0x44b   :  { %6375 = vmatmul.msk.bf16.gmra.mxu1 %vm1833_vm0, %v2183_v38  ;;  %v3180_v25 = vsel %vm1833_vm0, %v3034_v56, 0.0  ;;  %v2570_v58 = vpack.c.bf16 %v2533_v24, %v2532_v34  ;;  %v9548_v24 = vadd.f32 %v9403_v11, %v3080_v63  ;;  %v9551_v46 = vadd.f32 %v9409_v23, %v2716_v54 }
 0x44c   :  { %3181 = vadd.xlane.f32.xlu2 %v3180_v25  ;;  %v2044_v44 = vpop.f32.mrf.mxu0  ;;  %v2504_v25 = vmax.f32 %v2381_v29, 0.0  ;;  %v9562_v29 = vld [vmem:[%s13016_s4] ss:$0 sm:$0xff] }
 0x44d   :  { %v2045_v60 = vadd.f32 %v9105_v55, %v2044_v44  ;;  %6421 = vmatmul.msk.bf16.gmra.mxu3 %vm1833_vm0, %v2570_v58  ;;  %v9545_v55 = vadd.f32 %v9403_v11, %v3077_v0  ;;  %13728 = vst [vmem:[#allocation5_spill] sm:$0xff] %v9548_v24 }
 0x44e   :  { %v2455_v16 = vpop.f32.mrf.mxu3  ;;  %13729 = vst [vmem:[#allocation77_spill] sm:$0xff] %v9551_v46 }
 0x44f   :  { %v2141_v42 = vmax.f32 %v2045_v60, 0.0  ;;  %13727 = vst [vmem:[#allocation140_spill] sm:$0xff] %v9545_v55  ;;  %v3323_v63 = vpack.c.bf16 %v9545_v55, %v9545_v55 }
 0x450   :  { %v2382_v38 = vpop.f32.mrf.mxu1 }
 0x451   :  { %v3035_v56 = vmul.f32 %v9123_v27, %v2141_v42  ;;  %v2383_v34 = vadd.f32 %v9538_v40, %v2382_v38 }
 0x452   :  { %v2718_v44 = vpop.f32.mrf.mxu2 }
 0x453   :  { %v2505_v58 = vmax.f32 %v2383_v34, 0.0  ;;  %v9554_v60 = vadd.f32 %v9409_v23, %v2718_v44  ;;  %v3183_v9 = vsel %vm1833_vm0, %v3035_v56, 0.0  ;;  %v2456_v34 = vadd.f32 %v9538_v40, %v2455_v16 }
 0x454   :  { %v2046_v39 = vpop.f32.mrf.mxu0  ;;  %3184 = vadd.xlane.f32.xlu0 %v3183_v9  ;;  %v3324_v56 = vpack.c.bf16 %v9548_v24, %v9548_v24 }
 0x455   :  { %13730 = vst [vmem:[#allocation87_spill] sm:$0xff] %v9554_v60  ;;  %v2556_v38 = vpack.c.bf16 %v2505_v58, %v2504_v25  ;;  %v6451_v0 = vpack.c.bf16 %v9554_v60, %v9551_v46  ;;  %v2047_v54 = vadd.f32 %v9562_v29, %v2046_v39 }
 0x456   :  { %v2457_v25 = vpop.f32.mrf.mxu3 }
 0x457   :  { %6595 = vst [vmem:[%s13022_s11 + $0x18] sm:$0xff] %v6451_v0   ;;  %v2142_v9 = vmax.f32 %v2047_v54, 0.0  ;;  %6407 = vmatmul.msk.bf16.gmra.mxu2 %vm1833_vm0, %v2556_v38  ;;  %v2458_v44 = vadd.f32 %v9538_v40, %v2457_v25  ;;  %v2534_v0 = vmax.f32 %v2456_v34, 0.0 }
 0x458   :  { %v2385_v58 = vpop.f32.mrf.mxu1  ;;  %3388 = vst.msk [vmem:[%s13022_s11 + $0x18] sm:$0xf] %vm3381_vm1, %v3323_v63 }
 0x459   :  { %v2184_v39 = vpack.c.bf16 %v2142_v9, %v2141_v42  ;;  %v3036_v16 = vmul.f32 %v9123_v27, %v2142_v9  ;;  %3389 = vst.msk [vmem:[%s13022_s11 + $0x1c] sm:$0xf] %vm3381_vm1, %v3324_v56  ;;  %v2535_v54 = vmax.f32 %v2458_v44, 0.0  ;;  %v3083_v42 = vpop.xlane.xlu2 %3082  ;;  %v2386_v27 = vadd.f32 %v9538_v40, %v2385_v58  ;;  %v3086_v9 = vpop.xlane.xlu0 %3085  ;;  %v9592_v44 = vld [vmem:[%s13017_s9] ss:$0 sm:$0xff] }
 0x45a   :  { %v2721_v47 = vpop.f32.mrf.mxu2  ;;  %v9600_v58 = vadd.f32 %v9403_v11, %v3086_v9 }
 0x45b   :  { %6376 = vmatmul.msk.bf16.gmra.mxu1 %vm1833_vm0, %v2184_v39  ;;  %v3186_v38 = vsel %vm1833_vm0, %v3036_v16, 0.0  ;;  %v2571_v25 = vpack.c.bf16 %v2535_v54, %v2534_v0  ;;  %v2506_v0 = vmax.f32 %v2386_v27, 0.0 }
 0x45c   :  { %v2049_v26 = vpop.f32.mrf.mxu0  ;;  %3187 = vadd.xlane.f32.xlu1 %v3186_v38  ;;  %13732 = vst [vmem:[#allocation142_spill] sm:$0xff] %v9600_v58  ;;  %v9603_v38 = vadd.f32 %v9409_v23, %v2721_v47 }
 0x45d   :  { %v2050_v63 = vadd.f32 %v9562_v29, %v2049_v26  ;;  %6422 = vmatmul.msk.bf16.gmra.mxu3 %vm1833_vm0, %v2571_v25  ;;  %v9597_v26 = vadd.f32 %v9403_v11, %v3083_v42 }
 0x45e   :  { %v2460_v56 = vpop.f32.mrf.mxu3  ;;  %13733 = vst [vmem:[#allocation24_spill] sm:$0xff] %v9603_v38 }
 0x45f   :  { %v2143_v30 = vmax.f32 %v2050_v63, 0.0  ;;  %13731 = vst [vmem:[#allocation80_spill] sm:$0xff] %v9597_v26  ;;  %v3325_v27 = vpack.c.bf16 %v9597_v26, %v9597_v26  ;;  %v2461_v47 = vadd.f32 %v9538_v40, %v2460_v56 }
 0x460   :  { %v2387_v34 = vpop.f32.mrf.mxu1 }
 0x461   :  { %v3037_v39 = vmul.f32 %v9592_v44, %v2143_v30  ;;  %v2388_v16 = vadd.f32 %v9538_v40, %v2387_v34 }
 0x462   :  { %v2723_v54 = vpop.f32.mrf.mxu2 }
 0x463   :  { %v2507_v25 = vmax.f32 %v2388_v16, 0.0  ;;  %v9606_v63 = vadd.f32 %v9409_v23, %v2723_v54  ;;  %v3189_v6 = vsel %vm1833_vm0, %v3037_v39, 0.0  ;;  %v3326_v16 = vpack.c.bf16 %v9600_v58, %v9600_v58 }
 0x464   :  { %v2051_v35 = vpop.f32.mrf.mxu0  ;;  %3190 = vadd.xlane.f32.xlu2 %v3189_v6 }
 0x465   :  { %13734 = vst [vmem:[#allocation8_spill] sm:$0xff] %v9606_v63  ;;  %v2557_v34 = vpack.c.bf16 %v2507_v25, %v2506_v0  ;;  %v6456_v42 = vpack.c.bf16 %v9606_v63, %v9603_v38  ;;  %v2052_v9 = vadd.f32 %v9562_v29, %v2051_v35  ;;  %v2536_v25 = vmax.f32 %v2461_v47, 0.0  ;;  %v3092_v47 = vpop.xlane.xlu2 %3091 }
 0x466   :  { %v2462_v6 = vpop.f32.mrf.mxu3  ;;  %v9645_v37 = vadd.f32 %v9403_v11, %v3092_v47 }
 0x467   :  { %6596 = vst [vmem:[%s13022_s11 + $0x20] sm:$0xff] %v6456_v42   ;;  %v2144_v39 = vmax.f32 %v2052_v9, 0.0  ;;  %6408 = vmatmul.msk.bf16.gmra.mxu2 %vm1833_vm0, %v2557_v34  ;;  %v2463_v0 = vadd.f32 %v9538_v40, %v2462_v6 }
 0x468   :  { %v2390_v54 = vpop.f32.mrf.mxu1  ;;  %3390 = vst.msk [vmem:[%s13022_s11 + $0x20] sm:$0xf] %vm3381_vm1, %v3325_v27 }
 0x469   :  { %v2185_v35 = vpack.c.bf16 %v2144_v39, %v2143_v30  ;;  %v3038_v56 = vmul.f32 %v9592_v44, %v2144_v39  ;;  %3391 = vst.msk [vmem:[%s13022_s11 + $0x24] sm:$0xf] %vm3381_vm1, %v3326_v16  ;;  %v2537_v42 = vmax.f32 %v2463_v0, 0.0  ;;  %v3041_v30 = vmul.f32 %v9592_v44, %v2147_v19  ;;  %v3089_v39 = vpop.xlane.xlu1 %3088 }
 0x46a   :  { %v2726_v9 = vpop.f32.mrf.mxu2  ;;  %v2391_v21 = vadd.f32 %v9538_v40, %v2390_v54  ;;  %13736 = vst [vmem:[#allocation19_spill] sm:$0xff] %v9645_v37 }
 0x46b   :  { %6377 = vmatmul.msk.bf16.gmra.mxu1 %vm1833_vm0, %v2185_v35  ;;  %v3192_v34 = vsel %vm1833_vm0, %v3038_v56, 0.0  ;;  %v2572_v6 = vpack.c.bf16 %v2537_v42, %v2536_v25  ;;  %v9642_v42 = vadd.f32 %v9403_v11, %v3089_v39  ;;  %v3201_v54 = vsel %vm1833_vm0, %v3041_v30, 0.0 }
 0x46c   :  { %3193 = vadd.xlane.f32.xlu0 %v3192_v34  ;;  %v2054_v14 = vpop.f32.mrf.mxu0  ;;  %v2508_v19 = vmax.f32 %v2391_v21, 0.0  ;;  %v9649_v34 = vadd.f32 %v9409_v23, %v2726_v9 }
 0x46d   :  { %v2055_v27 = vadd.f32 %v9562_v29, %v2054_v14  ;;  %6423 = vmatmul.msk.bf16.gmra.mxu3 %vm1833_vm0, %v2572_v6  ;;  %13735 = vst [vmem:[#allocation90_spill] sm:$0xff] %v9642_v42  ;;  %v3327_v30 = vpack.c.bf16 %v9642_v42, %v9642_v42 }
 0x46e   :  { %v2465_v0 = vpop.f32.mrf.mxu3  ;;  %13737 = vst [vmem:[#allocation141_spill] sm:$0xff] %v9649_v34 }
 0x46f   :  { %v2145_v16 = vmax.f32 %v2055_v27, 0.0  ;;  %v2466_v9 = vadd.f32 %v9538_v40, %v2465_v0  ;;  %v3044_v0 = vmul.f32 %v9592_v44, %v2150_v33 }
 0x470   :  { %v2392_v35 = vpop.f32.mrf.mxu1 }
 0x471   :  { %v3039_v56 = vmul.f32 %v9592_v44, %v2145_v16  ;;  %v2393_v25 = vadd.f32 %v9538_v40, %v2392_v35  ;;  %v2538_v17 = vmax.f32 %v2466_v9, 0.0  ;;  %v3098_v9 = vpop.xlane.xlu1 %3097 }
 0x472   :  { %v2728_v14 = vpop.f32.mrf.mxu2  ;;  %v9703_v3 = vadd.f32 %v9403_v11, %v3098_v9 }
 0x473   :  { %v2509_v6 = vmax.f32 %v2393_v25, 0.0  ;;  %v9652_v27 = vadd.f32 %v9409_v23, %v2728_v14  ;;  %v3195_v62 = vsel %vm1833_vm0, %v3039_v56, 0.0  ;;  %v3328_v25 = vpack.c.bf16 %v9645_v37, %v9645_v37 }
 0x474   :  { %v2056_v35 = vpop.f32.mrf.mxu0  ;;  %3196 = vadd.xlane.f32.xlu1 %v3195_v62  ;;  %3202 = vadd.xlane.f32.xlu0 %v3201_v54  ;;  %13740 = vst [vmem:[#allocation79_spill] sm:$0xff] %v9703_v3 }
 0x475   :  { %13738 = vst [vmem:[#allocation83_spill] sm:$0xff] %v9652_v27  ;;  %v2558_v39 = vpack.c.bf16 %v2509_v6, %v2508_v19  ;;  %v6461_v47 = vpack.c.bf16 %v9652_v27, %v9649_v34  ;;  %v2057_v21 = vadd.f32 %v9562_v29, %v2056_v35  ;;  %v3042_v29 = vmul.f32 %v9592_v44, %v2148_v45 }
 0x476   :  { %v2467_v56 = vpop.f32.mrf.mxu3 }
 0x477   :  { %6597 = vst [vmem:[%s13022_s11 + $0x28] sm:$0xff] %v6461_v47   ;;  %v2146_v62 = vmax.f32 %v2057_v21, 0.0  ;;  %6409 = vmatmul.msk.bf16.gmra.mxu2 %vm1833_vm0, %v2558_v39  ;;  %v2468_v19 = vadd.f32 %v9538_v40, %v2467_v56  ;;  %v3204_v33 = vsel %vm1833_vm0, %v3042_v29, 0.0  ;;  %v3043_v47 = vmul.f32 %v9592_v44, %v2149_v31 }
 0x478   :  { %v2395_v14 = vpop.f32.mrf.mxu1  ;;  %3392 = vst.msk [vmem:[%s13022_s11 + $0x28] sm:$0xf] %vm3381_vm1, %v3327_v30  ;;  %v3045_v21 = vmul.f32 %v9592_v44, %v2151_v49  ;;  %v3095_v30 = vpop.xlane.xlu0 %3094  ;;  %v3047_v56 = vmul.f32 %v9592_v44, %v2153_v4 }
 0x479   :  { %v2186_v54 = vpack.c.bf16 %v2146_v62, %v2145_v16  ;;  %v3040_v6 = vmul.f32 %v9592_v44, %v2146_v62  ;;  %3393 = vst.msk [vmem:[%s13022_s11 + $0x2c] sm:$0xf] %vm3381_vm1, %v3328_v25  ;;  %v2539_v45 = vmax.f32 %v2468_v19, 0.0  ;;  %v3210_v16 = vsel %vm1833_vm0, %v3044_v0, 0.0 }
 0x47a   :  { %v2731_v35 = vpop.f32.mrf.mxu2  ;;  %v2396_v25 = vadd.f32 %v9538_v40, %v2395_v14  ;;  %v9700_v31 = vadd.f32 %v9403_v11, %v3095_v30  ;;  %v3207_v19 = vsel %vm1833_vm0, %v3043_v47, 0.0  ;;  %v3213_v0 = vsel %vm1833_vm0, %v3045_v21, 0.0 }
 0x47b   :  { %6378 = vmatmul.msk.bf16.gmra.mxu1 %vm1833_vm0, %v2186_v54  ;;  %v3198_v15 = vsel %vm1833_vm0, %v3040_v6, 0.0  ;;  %v2573_v39 = vpack.c.bf16 %v2539_v45, %v2538_v17  ;;  %v9708_v54 = vadd.f32 %v9409_v23, %v2731_v35  ;;  %v3219_v6 = vsel %vm1833_vm0, %v3047_v56, 0.0 }
 0x47c   :  { %3199 = vadd.xlane.f32.xlu2 %v3198_v15  ;;  %3205 = vadd.xlane.f32.xlu1 %v3204_v33  ;;  %13739 = vst [vmem:[#allocation28_spill] sm:$0xff] %v9700_v31  ;;  %v2510_v14 = vmax.f32 %v2396_v25, 0.0  ;;  %v3329_v15 = vpack.c.bf16 %v9700_v31, %v9700_v31  ;;  %v3330_v35 = vpack.c.bf16 %v9703_v3, %v9703_v3  ;;  %v13744_v21 = vmax.f32 %v9245_v18, 0.0 }
 0x47d   :  { %3211 = vadd.xlane.f32.xlu0 %v3210_v16  ;;  %6424 = vmatmul.msk.bf16.gmra.mxu3 %vm1833_vm0, %v2573_v39  ;;  %13741 = vst [vmem:[#allocation23_spill] sm:$0xff] %v9708_v54  ;;  %v13743_v16 = vmax.f32 %v9201_v7, 0.0 }
 0x47e   :  { %v2470_v62 = vpop.f32.mrf.mxu3  ;;  %v3048_v30 = vmul.f32 %v9592_v44, %v13744_v21 }
 0x47f   :  { %v2471_v33 = vadd.f32 %v9538_v40, %v2470_v62  ;;  %v3046_v47 = vmul.f32 %v9592_v44, %v13743_v16  ;;  %v13745_v62 = vmax.f32 %v9285_v32, 0.0 }
 0x480   :  { %v2397_v29 = vpop.f32.mrf.mxu1 }
 0x481   :  { %v2398_v12 = vadd.f32 %v9538_v40, %v2397_v29  ;;  %v3050_v56 = vmul.f32 %v9592_v44, %v13745_v62  ;;  %v2540_v7 = vmax.f32 %v2471_v33, 0.0 }
 0x482   :  { %v2733_v49 = vpop.f32.mrf.mxu2 }
 0x483   :  { %v2511_v20 = vmax.f32 %v2398_v12, 0.0  ;;  %v9711_v4 = vadd.f32 %v9409_v23, %v2733_v49  ;;  %v3216_v12 = vsel %vm1833_vm0, %v3046_v47, 0.0  ;;  %v3222_v49 = vsel %vm1833_vm0, %v3048_v30, 0.0 }
 0x484   :  { %3208 = vadd.xlane.f32.xlu2 %v3207_v19  ;;  %3214 = vadd.xlane.f32.xlu1 %v3213_v0  ;;  %v3228_v19 = vsel %vm1833_vm0, %v3050_v56, 0.0  ;;  %v13746_v0 = vmax.f32 %v9281_v48, 0.0 }
 0x485   :  { %13742 = vst [vmem:[#allocation143_spill] sm:$0xff] %v9711_v4  ;;  %v2559_v17 = vpack.c.bf16 %v2511_v20, %v2510_v14  ;;  %v6466_v45 = vpack.c.bf16 %v9711_v4, %v9708_v54  ;;  %3220 = vadd.xlane.f32.xlu0 %v3219_v6  ;;  %v13747_v20 = vmax.f32 %v9325_v1, 0.0 }
 0x486   :  { %v2472_v39 = vpop.f32.mrf.mxu3  ;;  %v3049_v14 = vmul.f32 %v9592_v44, %v13746_v0 }
 0x487   :  { %6598 = vst [vmem:[%s13022_s11 + $0x30] sm:$0xff] %v6466_v45   ;;  %6410 = vmatmul.msk.bf16.gmra.mxu2 %vm1833_vm0, %v2559_v17  ;;  %v2473_v9 = vadd.f32 %v9538_v40, %v2472_v39  ;;  %v3051_v6 = vmul.f32 %v9592_v44, %v13747_v20  ;;  %v3101_v17 = vpop.xlane.xlu2 %3100  ;;  %v3104_v45 = vpop.xlane.xlu0 %3103  ;;  %v13753_v20 = vmax.f32 %v9329_v57, 0.0 }
 0x488   :  { %v2400_v25 = vpop.f32.mrf.mxu1  ;;  %3394 = vst.msk [vmem:[%s13022_s11 + $0x30] sm:$0xf] %vm3381_vm1, %v3329_v15  ;;  %v9759_v47 = vadd.f32 %v9403_v11, %v3101_v17  ;;  %v9762_v1 = vadd.f32 %v9403_v11, %v3104_v45  ;;  %v3225_v30 = vsel %vm1833_vm0, %v3049_v14, 0.0  ;;  %v13754_v17 = vmax.f32 %v9353_v28, 0.0 }
 0x489   :  { %3395 = vst.msk [vmem:[%s13022_s11 + $0x34] sm:$0xf] %vm3381_vm1, %v3330_v35  ;;  %v2541_v18 = vmax.f32 %v2473_v9, 0.0  ;;  %v2401_v15 = vadd.f32 %v9538_v40, %v2400_v25  ;;  %v13748_v35 = vmax.f32 %v9349_v5, 0.0  ;;  %v3231_v9 = vsel %vm1833_vm0, %v3051_v6, 0.0 }
 0x48a   :  { %v2736_v29 = vpop.f32.mrf.mxu2  ;;  %13749 = vst [vmem:[#allocation152_spill] sm:$0xff] %v9759_v47  ;;  %v3052_v6 = vmul.f32 %v9592_v44, %v13753_v20  ;;  %v3054_v45 = vmul.f32 %v9592_v44, %v13754_v17  ;;  %v3447_v20 = vsel %vm3446_vm2, %v9420_v53, -inf }
 0x48b   :  { %v2574_v32 = vpack.c.bf16 %v2541_v18, %v2540_v7  ;;  %v3053_v39 = vmul.f32 %v9592_v44, %v13748_v35  ;;  %13750 = vst [vmem:[#allocation144_spill] sm:$0xff] %v9762_v1  ;;  %v2512_v25 = vmax.f32 %v2401_v15, 0.0  ;;  %v9767_v62 = vadd.f32 %v9409_v23, %v2736_v29 }
 0x48c   :  { %3217 = vadd.xlane.f32.xlu2 %v3216_v12  ;;  %3223 = vadd.xlane.f32.xlu1 %v3222_v49  ;;  %v3331_v49 = vpack.c.bf16 %v9759_v47, %v9759_v47  ;;  %v13755_v35 = vmax.f32 %v9376_v50, 0.0  ;;  %v3483_v47 = vsel %vm3446_vm2, %v9708_v54, -inf }
 0x48d   :  { %3229 = vadd.xlane.f32.xlu0 %v3228_v19  ;;  %6425 = vmatmul.msk.bf16.gmra.mxu3 %vm1833_vm0, %v2574_v32  ;;  %13751 = vst [vmem:[#allocation13_spill] sm:$0xff] %v9767_v62  ;;  %v3237_v7 = vsel %vm1833_vm0, %v3053_v39, 0.0  ;;  %v3107_v32 = vpop.xlane.xlu1 %3106  ;;  %v3332_v19 = vpack.c.bf16 %v9762_v1, %v9762_v1 }
 0x48e   :  { %v2475_v33 = vpop.f32.mrf.mxu3  ;;  %v3056_v39 = vmul.f32 %v9592_v44, %v13755_v35 }
 0x48f   :  { %v2476_v29 = vadd.f32 %v9538_v40, %v2475_v33  ;;  %v9780_v0 = vpop.xlane.xlu0 %3112 }
 0x490   :  { %v2402_v16 = vpop.f32.mrf.mxu1 }
 0x491   :  { %v2403_v48 = vadd.f32 %v9538_v40, %v2402_v16  ;;  %v2542_v57 = vmax.f32 %v2476_v29, 0.0 }
 0x492   :  { %v2738_v21 = vpop.f32.mrf.mxu2 }
 0x493   :  { %v2513_v5 = vmax.f32 %v2403_v48, 0.0  ;;  %v9770_v56 = vadd.f32 %v9409_v23, %v2738_v21  ;;  %v3234_v48 = vsel %vm1833_vm0, %v3052_v6, 0.0  ;;  %v3240_v21 = vsel %vm1833_vm0, %v3054_v45, 0.0 }
 0x494   :  { %3226 = vadd.xlane.f32.xlu2 %v3225_v30  ;;  %3232 = vadd.xlane.f32.xlu1 %v3231_v9  ;;  %v3246_v30 = vsel %vm1833_vm0, %v3056_v39, 0.0  ;;  %v13756_v9 = vmax.f32 %v9372_v52, 0.0 }
 0x495   :  { %13752 = vst [vmem:[#allocation82_spill] sm:$0xff] %v9770_v56  ;;  %v2560_v18 = vpack.c.bf16 %v2513_v5, %v2512_v25  ;;  %v6471_v12 = vpack.c.bf16 %v9770_v56, %v9767_v62  ;;  %3238 = vadd.xlane.f32.xlu0 %v3237_v7  ;;  %v3110_v5 = vpop.xlane.xlu2 %3109  ;;  %v3116_v7 = vpop.xlane.xlu1 %3115 }
 0x496   :  { %v2477_v14 = vpop.f32.mrf.mxu3  ;;  %v3055_v25 = vmul.f32 %v9592_v44, %v13756_v9  ;;  %v3456_v9 = vsel %vm3446_vm2, %v9465_v10, -inf }
 0x497   :  { %6599 = vst [vmem:[%s13022_s11 + $0x38] sm:$0xff] %v6471_v12   ;;  %6411 = vmatmul.msk.bf16.gmra.mxu2 %vm1833_vm0, %v2560_v18  ;;  %v2478_v15 = vadd.f32 %v9538_v40, %v2477_v14  ;;  %v9811_v18 = vpop.xlane.xlu0 %3121  ;;  %v9819_v14 = vadd.f32 %v9403_v11, %v3110_v5 }
 0x498   :  { %v2405_v33 = vpop.f32.mrf.mxu1  ;;  %3396 = vst.msk [vmem:[%s13022_s11 + $0x38] sm:$0xf] %vm3381_vm1, %v3331_v49  ;;  %v3243_v44 = vsel %vm1833_vm0, %v3055_v25, 0.0  ;;  %v3462_v25 = vsel %vm3446_vm2, %v9507_v51, -inf }
 0x499   :  { %3397 = vst.msk [vmem:[%s13022_s11 + $0x3c] sm:$0xf] %vm3381_vm1, %v3332_v19  ;;  %v2543_v28 = vmax.f32 %v2478_v15, 0.0  ;;  %v2406_v12 = vadd.f32 %v9538_v40, %v2405_v33  ;;  %v9816_v19 = vadd.f32 %v9403_v11, %v3107_v32  ;;  %v3453_v32 = vsel %vm3446_vm2, %v9462_v43, -inf }
 0x49a   :  { %v2741_v16 = vpop.f32.mrf.mxu2  ;;  %13758 = vst [vmem:[#allocation86_spill] sm:$0xff] %v9819_v14 }
 0x49b   :  { %v2575_v50 = vpack.c.bf16 %v2543_v28, %v2542_v57  ;;  %13757 = vst [vmem:[#allocation93_spill] sm:$0xff] %v9816_v19  ;;  %v2514_v6 = vmax.f32 %v2406_v12, 0.0  ;;  %v9825_v17 = vadd.f32 %v9409_v23, %v2741_v16  ;;  %v3333_v39 = vpack.c.bf16 %v9816_v19, %v9816_v19 }
 0x49c   :  { %3235 = vadd.xlane.f32.xlu2 %v3234_v48  ;;  %3241 = vadd.xlane.f32.xlu1 %v3240_v21  ;;  %v3334_v28 = vpack.c.bf16 %v9819_v14, %v9819_v14 }
 0x49d   :  { %3247 = vadd.xlane.f32.xlu0 %v3246_v30  ;;  %6426 = vmatmul.msk.bf16.gmra.mxu3 %vm1833_vm0, %v2575_v50  ;;  %13759 = vst [vmem:[#allocation146_spill] sm:$0xff] %v9825_v17  ;;  %v9836_v57 = vpop.xlane.xlu2 %3118  ;;  %v9840_v16 = vpop.xlane.xlu1 %3124  ;;  %v3450_v30 = vsel %vm3446_vm2, %v9423_v36, -inf }
 0x49e   :  { %v9940_v14 = vadd.f32 %v9403_v11, %v9836_v57  ;;  %v10009_v13 = vadd.f32 %v9403_v11, %v9840_v16  ;;  %v10025_v16 = vld [vmem:[%s13019_s8] ss:$0 sm:$0xff] }
 0x49f   :  { %v9842_v48 = vpop.xlane.xlu0 %3130 }
 0x4a0   :  { %v2407_v49 = vpop.f32.mrf.mxu1  ;;  %13767 = vst [vmem:[#allocation115_spill] sm:$0xff] %v9940_v14 }
 0x4a1   :  { %v2408_v29 = vadd.f32 %v9538_v40, %v2407_v49  ;;  %13773 = vst [vmem:[#allocation149_spill] sm:$0xff] %v10009_v13 }
 0x4a2   :  { %v2743_v52 = vpop.f32.mrf.mxu2 }
 0x4a3   :  { %v2515_v45 = vmax.f32 %v2408_v29, 0.0  ;;  %v9828_v15 = vadd.f32 %v9409_v23, %v2743_v52 }
 0x4a4   :  { %3244 = vadd.xlane.f32.xlu2 %v3243_v44  ;;  %3448 = vmax.xlane.f32.xlu1 %v3447_v20 }
 0x4a5   :  { %13760 = vst [vmem:[#allocation31_spill] sm:$0xff] %v9828_v15  ;;  %v2561_v33 = vpack.c.bf16 %v2515_v45, %v2514_v6  ;;  %v6476_v35 = vpack.c.bf16 %v9828_v15, %v9825_v17  ;;  %3454 = vmax.xlane.f32.xlu0 %v3453_v32  ;;  %v9862_v5 = vpop.xlane.xlu2 %3127  ;;  %v9864_v12 = vpop.xlane.xlu1 %3133  ;;  %v9872_v6 = vadd.f32 %v9403_v11, %v9780_v0  ;;  %v3471_v0 = vsel %vm3446_vm2, %v9603_v38, -inf }
 0x4a6   :  { %v9875_v45 = vadd.f32 %v9403_v11, %v3116_v7 }
 0x4a7   :  { %6600 = vst [vmem:[%s13022_s11 + $0x40] sm:$0xff] %v6476_v35   ;;  %6412 = vmatmul.msk.bf16.gmra.mxu2 %vm1833_vm0, %v2561_v33  ;;  %v9866_v49 = vpop.xlane.xlu0 %3139  ;;  %v3459_v33 = vsel %vm3446_vm2, %v9504_v22, -inf  ;;  %v3465_v35 = vsel %vm3446_vm2, %v9551_v46, -inf }
 0x4a8   :  { %v2410_v21 = vpop.f32.mrf.mxu1  ;;  %3398 = vst.msk [vmem:[%s13022_s11 + $0x40] sm:$0xf] %vm3381_vm1, %v3333_v39 }
 0x4a9   :  { %3399 = vst.msk [vmem:[%s13022_s11 + $0x44] sm:$0xf] %vm3381_vm1, %v3334_v28  ;;  %v2411_v29 = vadd.f32 %v9538_v40, %v2410_v21 }
 0x4aa   :  { %v2746_v50 = vpop.f32.mrf.mxu2  ;;  %13761 = vst [vmem:[#allocation18_spill] sm:$0xff] %v9872_v6 }
 0x4ab   :  { %13762 = vst [vmem:[#allocation96_spill] sm:$0xff] %v9875_v45  ;;  %v2516_v39 = vmax.f32 %v2411_v29, 0.0  ;;  %v9882_v28 = vadd.f32 %v9409_v23, %v2746_v50  ;;  %v3336_v50 = vpack.c.bf16 %v9875_v45, %v9875_v45 }
 0x4ac   :  { %3451 = vmax.xlane.f32.xlu2 %v3450_v30  ;;  %3457 = vmax.xlane.f32.xlu1 %v3456_v9 }
 0x4ad   :  { %3463 = vmax.xlane.f32.xlu0 %v3462_v25  ;;  %13763 = vst [vmem:[#allocation27_spill] sm:$0xff] %v9882_v28  ;;  %v3335_v25 = vpack.c.bf16 %v9872_v6, %v9872_v6  ;;  %v9893_v29 = vpop.xlane.xlu2 %3136  ;;  %v3501_v8 = vsel %vm3446_vm2, %v9882_v28, -inf }
 0x4b0   :  { %v2412_v52 = vpop.f32.mrf.mxu1  ;;  %v2821_v20 = vpop.f32.mrf.mxu3 }
 0x4b1   :  { %v2413_v44 = vadd.f32 %v9538_v40, %v2412_v52  ;;  %v9897_v52 = vpop.xlane.xlu1 %3142 }
 0x4b2   :  { %v2748_v32 = vpop.f32.mrf.mxu2 }
 0x4b3   :  { %v2517_v21 = vmax.f32 %v2413_v44, 0.0  ;;  %v9885_v30 = vadd.f32 %v9409_v23, %v2748_v32  ;;  %v9899_v44 = vpop.xlane.xlu0 %3148 }
 0x4b4   :  { %3460 = vmax.xlane.f32.xlu2 %v3459_v33  ;;  %3466 = vmax.xlane.f32.xlu1 %v3465_v35  ;;  %v9914_v35 = vadd.f32 %v9409_v23, %v2821_v20 }
 0x4b5   :  { %13764 = vst [vmem:[#allocation145_spill] sm:$0xff] %v9885_v30  ;;  %v2562_v7 = vpack.c.bf16 %v2517_v21, %v2516_v39  ;;  %v6481_v9 = vpack.c.bf16 %v9885_v30, %v9882_v28  ;;  %3472 = vmax.xlane.f32.xlu0 %v3471_v0  ;;  %v3468_v0 = vsel %vm3446_vm2, %v9554_v60, -inf  ;;  %v9927_v20 = vpop.xlane.xlu2 %3145 }
 0x4b6   :  { %13765 = vst [vmem:[#allocation89_spill] sm:$0xff] %v9914_v35 }
 0x4b7   :  { %6601 = vst [vmem:[%s13022_s11 + $0x48] sm:$0xff] %v6481_v9   ;;  %6413 = vmatmul.msk.bf16.gmra.mxu2 %vm1833_vm0, %v2562_v7  ;;  %v3474_v7 = vsel %vm3446_vm2, %v9606_v63, -inf }
 0x4b8   :  { %v2415_v32 = vpop.f32.mrf.mxu1  ;;  %3400 = vst.msk [vmem:[%s13022_s11 + $0x48] sm:$0xf] %vm3381_vm1, %v3335_v25  ;;  %v2823_v33 = vpop.f32.mrf.mxu3  ;;  %v3480_v25 = vsel %vm3446_vm2, %v9652_v27, -inf }
 0x4b9   :  { %3401 = vst.msk [vmem:[%s13022_s11 + $0x4c] sm:$0xf] %vm3381_vm1, %v3336_v50  ;;  %v9917_v39 = vadd.f32 %v9409_v23, %v2823_v33  ;;  %v9932_v50 = vpop.xlane.xlu1 %3151  ;;  %v2416_v6 = vadd.f32 %v9538_v40, %v2415_v32 }
 0x4ba   :  { %v2751_v21 = vpop.f32.mrf.mxu2 }
 0x4bb   :  { %13766 = vst [vmem:[#allocation64_spill] sm:$0xff] %v9917_v39  ;;  %v6556_v9 = vpack.c.bf16 %v9917_v39, %v9914_v35  ;;  %v9934_v33 = vpop.xlane.xlu0 %3157  ;;  %v2518_v32 = vmax.f32 %v2416_v6, 0.0  ;;  %v9951_v58 = vadd.f32 %v9409_v23, %v2751_v21  ;;  %v3337_v6 = vpack.c.bf16 %v9940_v14, %v9940_v14 }
 0x4bc   :  { %3469 = vmax.xlane.f32.xlu2 %v3468_v0  ;;  %3475 = vmax.xlane.f32.xlu1 %v3474_v7 }
 0x4bd   :  { %3481 = vmax.xlane.f32.xlu0 %v3480_v25  ;;  %6616 = vst [vmem:[%s13022_s11 + $0xc0] sm:$0xff] %v6556_v9   ;;  %v9944_v25 = vadd.f32 %v9403_v11, %v9811_v18  ;;  %v3477_v9 = vsel %vm3446_vm2, %v9649_v34, -inf  ;;  %v3489_v18 = vsel %vm3446_vm2, %v9767_v62, -inf  ;;  %v9962_v26 = vpop.xlane.xlu2 %3154 }
 0x4be   :  { %13769 = vst [vmem:[#allocation85_spill] sm:$0xff] %v9951_v58 }
 0x4bf   :  { %13768 = vst [vmem:[#allocation34_spill] sm:$0xff] %v9944_v25  ;;  %v3338_v21 = vpack.c.bf16 %v9944_v25, %v9944_v25 }
 0x4c0   :  { %v2417_v1 = vpop.f32.mrf.mxu1  ;;  %v2826_v7 = vpop.f32.mrf.mxu3 }
 0x4c1   :  { %v2418_v0 = vadd.f32 %v9538_v40, %v2417_v1 }
 0x4c2   :  { %v2753_v31 = vpop.f32.mrf.mxu2 }
 0x4c3   :  { %v2519_v1 = vmax.f32 %v2418_v0, 0.0  ;;  %v9954_v37 = vadd.f32 %v9409_v23, %v2753_v31  ;;  %v9966_v31 = vpop.xlane.xlu1 %3160  ;;  %v9968_v0 = vpop.xlane.xlu0 %3166 }
 0x4c4   :  { %3478 = vmax.xlane.f32.xlu2 %v3477_v9  ;;  %3484 = vmax.xlane.f32.xlu1 %v3483_v47 }
 0x4c5   :  { %13770 = vst [vmem:[#allocation60_spill] sm:$0xff] %v9954_v37  ;;  %v2563_v57 = vpack.c.bf16 %v2519_v1, %v2518_v32  ;;  %v6486_v55 = vpack.c.bf16 %v9954_v37, %v9951_v58  ;;  %3490 = vmax.xlane.f32.xlu0 %v3489_v18  ;;  %v9983_v32 = vadd.f32 %v9409_v23, %v2826_v7  ;;  %v3486_v18 = vsel %vm3446_vm2, %v9711_v4, -inf  ;;  %v9996_v7 = vpop.xlane.xlu2 %3163 }
 0x4c7   :  { %6602 = vst [vmem:[%s13022_s11 + $0x50] sm:$0xff] %v6486_v55   ;;  %6414 = vmatmul.msk.bf16.gmra.mxu2 %vm1833_vm0, %v2563_v57  ;;  %v3492_v57 = vsel %vm3446_vm2, %v9770_v56, -inf }
 0x4c8   :  { %v2420_v47 = vpop.f32.mrf.mxu1  ;;  %3402 = vst.msk [vmem:[%s13022_s11 + $0x50] sm:$0xf] %vm3381_vm1, %v3337_v6  ;;  %v2828_v9 = vpop.f32.mrf.mxu3 }
 0x4c9   :  { %3403 = vst.msk [vmem:[%s13022_s11 + $0x54] sm:$0xf] %vm3381_vm1, %v3338_v21  ;;  %v9986_v1 = vadd.f32 %v9409_v23, %v2828_v9  ;;  %v3498_v21 = vsel %vm3446_vm2, %v9828_v15, -inf  ;;  %v2421_v14 = vadd.f32 %v9538_v40, %v2420_v47 }
 0x4ca   :  { %13771 = vst [vmem:[#allocation30_spill] sm:$0xff] %v9983_v32  ;;  %v2756_v55 = vpop.f32.mrf.mxu2 }
 0x4cb   :  { %13772 = vst [vmem:[#allocation148_spill] sm:$0xff] %v9986_v1  ;;  %v6561_v6 = vpack.c.bf16 %v9986_v1, %v9983_v32  ;;  %v10001_v9 = vpop.xlane.xlu1 %3169  ;;  %v10003_v25 = vpop.xlane.xlu0 %3175  ;;  %v2520_v47 = vmax.f32 %v2421_v14, 0.0  ;;  %v10020_v45 = vadd.f32 %v9409_v23, %v2756_v55  ;;  %v3339_v23 = vpack.c.bf16 %v10009_v13, %v10009_v13 }
 0x4cc   :  { %3487 = vmax.xlane.f32.xlu2 %v3486_v18  ;;  %3493 = vmax.xlane.f32.xlu1 %v3492_v57  ;;  %v3510_v13 = vsel %vm3446_vm2, %v9954_v37, -inf }
 0x4cd   :  { %3499 = vmax.xlane.f32.xlu0 %v3498_v21  ;;  %6617 = vst [vmem:[%s13022_s11 + $0xc8] sm:$0xff] %v6561_v6   ;;  %v10013_v21 = vadd.f32 %v9403_v11, %v9862_v5  ;;  %v3495_v6 = vsel %vm3446_vm2, %v9825_v17, -inf  ;;  %v3507_v5 = vsel %vm3446_vm2, %v9951_v58, -inf  ;;  %v10036_v55 = vpop.xlane.xlu2 %3172  ;;  %v3513_v2 = vsel %vm3446_vm2, %v10020_v45, -inf }
 0x4ce   :  { %13775 = vst [vmem:[#allocation118_spill] sm:$0xff] %v10020_v45 }
 0x4cf   :  { %13774 = vst [vmem:[#allocation53_spill] sm:$0xff] %v10013_v21 }
 0x4d0   :  { %v2422_v59 = vpop.f32.mrf.mxu1  ;;  %v2831_v57 = vpop.f32.mrf.mxu3 }
 0x4d1   :  { %v2423_v18 = vadd.f32 %v9538_v40, %v2422_v59 }
 0x4d2   :  { %v2758_v61 = vpop.f32.mrf.mxu2 }
 0x4d3   :  { %v2521_v59 = vmax.f32 %v2423_v18, 0.0  ;;  %v10028_v11 = vadd.f32 %v10025_v16, %v2758_v61  ;;  %v3340_v18 = vpack.c.bf16 %v10013_v21, %v10013_v21  ;;  %v10040_v61 = vpop.xlane.xlu1 %3178 }
 0x4d4   :  { %3496 = vmax.xlane.f32.xlu2 %v3495_v6  ;;  %3502 = vmax.xlane.f32.xlu1 %v3501_v8  ;;  %v10042_v6 = vpop.xlane.xlu0 %3184 }
 0x4d5   :  { %13776 = vst [vmem:[#allocation129_spill] sm:$0xff] %v10028_v11  ;;  %v2564_v19 = vpack.c.bf16 %v2521_v59, %v2520_v47  ;;  %v6491_v14 = vpack.c.bf16 %v10028_v11, %v10020_v45  ;;  %3508 = vmax.xlane.f32.xlu0 %v3507_v5  ;;  %v10057_v59 = vadd.f32 %v10025_v16, %v2831_v57  ;;  %v10070_v57 = vpop.xlane.xlu2 %3181 }
 0x4d7   :  { %6603 = vst [vmem:[%s13022_s11 + $0x58] sm:$0xff] %v6491_v14   ;;  %6415 = vmatmul.msk.bf16.gmra.mxu2 %vm1833_vm0, %v2564_v19  ;;  %v3504_v19 = vsel %vm3446_vm2, %v9885_v30, -inf }
 0x4d8   :  { %v2425_v8 = vpop.f32.mrf.mxu1  ;;  %3404 = vst.msk [vmem:[%s13022_s11 + $0x58] sm:$0xf] %vm3381_vm1, %v3339_v23  ;;  %v2833_v47 = vpop.f32.mrf.mxu3 }
 0x4d9   :  { %3405 = vst.msk [vmem:[%s13022_s11 + $0x5c] sm:$0xf] %vm3381_vm1, %v3340_v18  ;;  %v10060_v5 = vadd.f32 %v10025_v16, %v2833_v47  ;;  %v3516_v18 = vsel %vm3446_vm2, %v10028_v11, -inf  ;;  %v2426_v21 = vadd.f32 %v9538_v40, %v2425_v8 }
 0x4da   :  { %13777 = vst [vmem:[#allocation22_spill] sm:$0xff] %v10057_v59  ;;  %v2761_v14 = vpop.f32.mrf.mxu2 }
 0x4db   :  { %13778 = vst [vmem:[#allocation88_spill] sm:$0xff] %v10060_v5  ;;  %v6566_v23 = vpack.c.bf16 %v10060_v5, %v10057_v59  ;;  %v10075_v47 = vpop.xlane.xlu1 %3187  ;;  %v10079_v3 = vadd.f32 %v10025_v16, %v2761_v14  ;;  %v2522_v41 = vmax.f32 %v2426_v21, 0.0 }
 0x4dc   :  { %3505 = vmax.xlane.f32.xlu2 %v3504_v19  ;;  %3511 = vmax.xlane.f32.xlu1 %v3510_v13 }
 0x4dd   :  { %3517 = vmax.xlane.f32.xlu0 %v3516_v18  ;;  %6618 = vst [vmem:[%s13022_s11 + $0xd0] sm:$0xff] %v6566_v23   ;;  %v10087_v18 = vld [vmem:[%s13019_s8] ss:$0 sm:$0xff]  ;;  %v3519_v37 = vsel %vm3446_vm2, %v10079_v3, -inf  ;;  %v10108_v58 = vpop.xlane.xlu2 %3190 }
 0x4de   :  { %13779 = vst [vmem:[#allocation99_spill] sm:$0xff] %v10079_v3  ;;  %v10091_v23 = vadd.f32 %v10087_v18, %v9842_v48  ;;  %v10095_v8 = vadd.f32 %v10087_v18, %v9864_v12 }
 0x4df   :  { %v10081_v42 = vpop.xlane.xlu0 %3193 }
 0x4e0   :  { %v2427_v13 = vpop.f32.mrf.mxu1  ;;  %v2836_v24 = vpop.f32.mrf.mxu3  ;;  %13780 = vst [vmem:[#allocation122_spill] sm:$0xff] %v10091_v23  ;;  %v3341_v12 = vpack.c.bf16 %v10091_v23, %v10091_v23  ;;  %v3342_v21 = vpack.c.bf16 %v10095_v8, %v10095_v8 }
 0x4e1   :  { %v2428_v19 = vadd.f32 %v9538_v40, %v2427_v13  ;;  %13781 = vst [vmem:[#allocation92_spill] sm:$0xff] %v10095_v8 }
 0x4e2   :  { %v2763_v14 = vpop.f32.mrf.mxu2 }
 0x4e3   :  { %v2523_v13 = vmax.f32 %v2428_v19, 0.0  ;;  %v10100_v11 = vadd.f32 %v10025_v16, %v2763_v14  ;;  %v10130_v14 = vadd.f32 %v10025_v16, %v2836_v24 }
 0x4e4   :  { %3514 = vmax.xlane.f32.xlu2 %v3513_v2  ;;  %3520 = vmax.xlane.f32.xlu1 %v3519_v37 }
 0x4e5   :  { %13782 = vst [vmem:[#allocation151_spill] sm:$0xff] %v10100_v11  ;;  %v2565_v48 = vpack.c.bf16 %v2523_v13, %v2522_v41  ;;  %v6496_v30 = vpack.c.bf16 %v10100_v11, %v10079_v3 }
 0x4e6   :  { %13784 = vst [vmem:[#allocation56_spill] sm:$0xff] %v10130_v14 }
 0x4e7   :  { %6604 = vst [vmem:[%s13022_s11 + $0x60] sm:$0xff] %v6496_v30   ;;  %6416 = vmatmul.msk.bf16.gmra.mxu2 %vm1833_vm0, %v2565_v48  ;;  %v3203_v2 = vpop.xlane.xlu0 %3202  ;;  %v10116_v37 = vpop.xlane.xlu1 %3196 }
 0x4e8   :  { %v10119_v41 = vadd.f32 %v10087_v18, %v3203_v2  ;;  %3406 = vst.msk [vmem:[%s13022_s11 + $0x60] sm:$0xf] %vm3381_vm1, %v3341_v12  ;;  %v2430_v19 = vpop.f32.mrf.mxu1  ;;  %v2838_v30 = vpop.f32.mrf.mxu3  ;;  %v3522_v12 = vsel %vm3446_vm2, %v10100_v11, -inf }
 0x4e9   :  { %3407 = vst.msk [vmem:[%s13022_s11 + $0x64] sm:$0xf] %vm3381_vm1, %v3342_v21  ;;  %v10135_v48 = vadd.f32 %v10025_v16, %v2838_v30  ;;  %v2431_v30 = vadd.f32 %v9538_v40, %v2430_v19  ;;  %v10169_v19 = vadd.f32 %v10087_v18, %v9866_v49 }
 0x4ea   :  { %13783 = vst [vmem:[#allocation67_spill] sm:$0xff] %v10119_v41  ;;  %v3365_v13 = vpack.c.bf16 %v10119_v41, %v10119_v41  ;;  %v2766_v2 = vpop.f32.mrf.mxu2 }
 0x4eb   :  { %13785 = vst [vmem:[#allocation132_spill] sm:$0xff] %v10135_v48  ;;  %v10138_v8 = vadd.f32 %v10025_v16, %v2766_v2  ;;  %v6571_v24 = vpack.c.bf16 %v10135_v48, %v10130_v14  ;;  %v2524_v28 = vmax.f32 %v2431_v30, 0.0 }
 0x4ec   :  { %3430 = vst.msk [vmem:[%s13022_s11 + $0xc0] sm:$0xf] %vm3381_vm1, %v3365_v13  ;;  %3523 = vmax.xlane.f32.xlu2 %v3522_v12 }
 0x4ed   :  { %13786 = vst [vmem:[#allocation37_spill] sm:$0xff] %v10138_v8  ;;  %v3525_v21 = vsel %vm3446_vm2, %v10138_v8, -inf }
 0x4ee   :  { %6619 = vst [vmem:[%s13022_s11 + $0xd8] sm:$0xff] %v6571_v24   ;;  %3526 = vmax.xlane.f32.xlu0 %v3525_v21  ;;  %v10165_v24 = vadd.f32 %v10087_v18, %v9893_v29 }
 0x4ef   :  { %v10154_v2 = vpop.xlane.xlu2 %3199  ;;  %v3206_v41 = vpop.xlane.xlu1 %3205  ;;  %13790 = vst [vmem:[#allocation125_spill] sm:$0xff] %v10169_v19 }
 0x4f0   :  { %v3212_v23 = vpop.xlane.xlu0 %3211  ;;  %v10157_v13 = vadd.f32 %v10087_v18, %v3206_v41  ;;  %v2432_v11 = vpop.f32.mrf.mxu1  ;;  %13789 = vst [vmem:[#allocation102_spill] sm:$0xff] %v10165_v24  ;;  %v3343_v30 = vpack.c.bf16 %v10165_v24, %v10165_v24 }
 0x4f1   :  { %v10160_v12 = vadd.f32 %v10087_v18, %v3212_v23  ;;  %v2433_v3 = vadd.f32 %v9538_v40, %v2432_v11  ;;  %v2841_v45 = vpop.f32.mrf.mxu3 }
 0x4f2   :  { %13787 = vst [vmem:[#allocation63_spill] sm:$0xff] %v10157_v13  ;;  %v3366_v21 = vpack.c.bf16 %v10157_v13, %v10157_v13  ;;  %v2768_v41 = vpop.f32.mrf.mxu2  ;;  %v10216_v13 = vadd.f32 %v10025_v16, %v2841_v45 }
 0x4f3   :  { %13788 = vst [vmem:[#allocation26_spill] sm:$0xff] %v10160_v12  ;;  %v3368_v23 = vpack.c.bf16 %v10160_v12, %v10160_v12  ;;  %v2525_v17 = vmax.f32 %v2433_v3, 0.0  ;;  %v10176_v11 = vadd.f32 %v10025_v16, %v2768_v41  ;;  %v3344_v41 = vpack.c.bf16 %v10169_v19, %v10169_v19 }
 0x4f4   :  { %3431 = vst.msk [vmem:[%s13022_s11 + $0xc4] sm:$0xf] %vm3381_vm1, %v3366_v21 }
 0x4f5   :  { %13791 = vst [vmem:[#allocation33_spill] sm:$0xff] %v10176_v11  ;;  %v2566_v49 = vpack.c.bf16 %v2525_v17, %v2524_v28  ;;  %v6501_v29 = vpack.c.bf16 %v10176_v11, %v10138_v8  ;;  %v3528_v3 = vsel %vm3446_vm2, %v10176_v11, -inf }
 0x4f6   :  { %3433 = vst.msk [vmem:[%s13022_s11 + $0xcc] sm:$0xf] %vm3381_vm1, %v3368_v23  ;;  %3529 = vmax.xlane.f32.xlu1 %v3528_v3 }
 0x4f7   :  { %6605 = vst [vmem:[%s13022_s11 + $0x68] sm:$0xff] %v6501_v29   ;;  %6417 = vmatmul.msk.bf16.gmra.mxu2 %vm1833_vm0, %v2566_v49  ;;  %v3209_v17 = vpop.xlane.xlu2 %3208  ;;  %v3215_v28 = vpop.xlane.xlu1 %3214 }
 0x4f8   :  { %3408 = vst.msk [vmem:[%s13022_s11 + $0x68] sm:$0xf] %vm3381_vm1, %v3343_v30  ;;  %v10203_v21 = vadd.f32 %v10087_v18, %v3209_v17  ;;  %v3221_v23 = vpop.xlane.xlu0 %3220  ;;  %v10206_v3 = vadd.f32 %v10087_v18, %v3215_v28  ;;  %v2435_v12 = vpop.f32.mrf.mxu1 }
 0x4f9   :  { %3409 = vst.msk [vmem:[%s13022_s11 + $0x6c] sm:$0xf] %vm3381_vm1, %v3344_v41  ;;  %v10213_v49 = vadd.f32 %v10087_v18, %v3221_v23  ;;  %v2843_v29 = vpop.f32.mrf.mxu3 }
 0x4fa   :  { %13792 = vst [vmem:[#allocation150_spill] sm:$0xff] %v10203_v21  ;;  %v3367_v30 = vpack.c.bf16 %v10203_v21, %v10203_v21  ;;  %v3369_v17 = vpack.c.bf16 %v10206_v3, %v10206_v3  ;;  %v10223_v28 = vadd.f32 %v10025_v16, %v2843_v29  ;;  %v2771_v19 = vpop.f32.mrf.mxu2 }
 0x4fb   :  { %13793 = vst [vmem:[#allocation95_spill] sm:$0xff] %v10206_v3  ;;  %v3371_v41 = vpack.c.bf16 %v10213_v49, %v10213_v49  ;;  %v10228_v23 = vadd.f32 %v10025_v16, %v2771_v19  ;;  %v2436_v19 = vadd.f32 %v9538_v40, %v2435_v12  ;;  %v7259_v40 = vld [vmem:[%s13020_s6] ss:$0 sm:$0xff] }
 0x4fc   :  { %13794 = vst [vmem:[#allocation69_spill] sm:$0xff] %v10213_v49  ;;  %v6576_v45 = vpack.c.bf16 %v10223_v28, %v10216_v13 }
 0x4fd   :  { %13795 = vst [vmem:[#allocation121_spill] sm:$0xff] %v10216_v13  ;;  %v3531_v29 = vsel %vm3446_vm2, %v10228_v23, -inf  ;;  %v2526_v8 = vmax.f32 %v2436_v19, 0.0 }
 0x4fe   :  { %13796 = vst [vmem:[#allocation40_spill] sm:$0xff] %v10223_v28  ;;  %3532 = vmax.xlane.f32.xlu2 %v3531_v29  ;;  %v10268_v29 = vadd.f32 %v10087_v18, %v9927_v20 }
 0x4ff   :  { %3432 = vst.msk [vmem:[%s13022_s11 + $0xc8] sm:$0xf] %vm3381_vm1, %v3367_v30  ;;  %v3218_v30 = vpop.xlane.xlu2 %3217  ;;  %v3224_v49 = vpop.xlane.xlu1 %3223 }
 0x500   :  { %3436 = vst.msk [vmem:[%s13022_s11 + $0xd8] sm:$0xf] %vm3381_vm1, %v3371_v41  ;;  %v10251_v3 = vadd.f32 %v10087_v18, %v3218_v30  ;;  %v3230_v41 = vpop.xlane.xlu0 %3229  ;;  %v10254_v21 = vadd.f32 %v10087_v18, %v3224_v49  ;;  %v2437_v24 = vpop.f32.mrf.mxu1 }
 0x501   :  { %3434 = vst.msk [vmem:[%s13022_s11 + $0xd0] sm:$0xf] %vm3381_vm1, %v3369_v17  ;;  %v10257_v11 = vadd.f32 %v10087_v18, %v3230_v41  ;;  %v2438_v12 = vadd.f32 %v7259_v40, %v2437_v24  ;;  %v2846_v17 = vpop.f32.mrf.mxu3 }
 0x502   :  { %6620 = vst [vmem:[%s13022_s11 + $0xe0] sm:$0xff] %v6576_v45   ;;  %v10264_v45 = vadd.f32 %v10087_v18, %v9897_v52  ;;  %v3370_v49 = vpack.c.bf16 %v10251_v3, %v10251_v3  ;;  %v3372_v30 = vpack.c.bf16 %v10254_v21, %v10254_v21  ;;  %v2773_v41 = vpop.f32.mrf.mxu2 }
 0x503   :  { %13797 = vst [vmem:[#allocation66_spill] sm:$0xff] %v10251_v3  ;;  %v3374_v24 = vpack.c.bf16 %v10257_v11, %v10257_v11  ;;  %v2527_v40 = vmax.f32 %v2438_v12, 0.0  ;;  %v10277_v15 = vadd.f32 %v10025_v16, %v2773_v41 }
 0x504   :  { %13798 = vst [vmem:[#allocation91_spill] sm:$0xff] %v10254_v21  ;;  %v3345_v12 = vpack.c.bf16 %v10264_v45, %v10264_v45 }
 0x505   :  { %13799 = vst [vmem:[#allocation36_spill] sm:$0xff] %v10257_v11  ;;  %v2567_v52 = vpack.c.bf16 %v2527_v40, %v2526_v8  ;;  %v6506_v20 = vpack.c.bf16 %v10277_v15, %v10228_v23  ;;  %v3534_v19 = vsel %vm3446_vm2, %v10277_v15, -inf }
 0x506   :  { %13800 = vst [vmem:[#allocation153_spill] sm:$0xff] %v10264_v45  ;;  %3535 = vmax.xlane.f32.xlu0 %v3534_v19 }
 0x507   :  { %13801 = vst [vmem:[#allocation154_spill] sm:$0xff] %v10268_v29  ;;  %6418 = vmatmul.msk.bf16.gmra.mxu2 %vm1833_vm0, %v2567_v52  ;;  %v3227_v8 = vpop.xlane.xlu2 %3226  ;;  %v3233_v41 = vpop.xlane.xlu1 %3232  ;;  %v10318_v52 = vadd.f32 %v10025_v16, %v2846_v17 }
 0x508   :  { %13802 = vst [vmem:[#allocation59_spill] sm:$0xff] %v10277_v15 }
 0x509   :  { %3435 = vst.msk [vmem:[%s13022_s11 + $0xd4] sm:$0xf] %vm3381_vm1, %v3370_v49  ;;  %v3346_v49 = vpack.c.bf16 %v10268_v29, %v10268_v29  ;;  %v2848_v40 = vpop.f32.mrf.mxu3 }
 0x50a   :  { %3439 = vst.msk [vmem:[%s13022_s11 + $0xe4] sm:$0xf] %vm3381_vm1, %v3374_v24  ;;  %v10308_v24 = vadd.f32 %v10087_v18, %v3227_v8  ;;  %v10323_v19 = vadd.f32 %v10025_v16, %v2848_v40 }
 0x50b   :  { %3437 = vst.msk [vmem:[%s13022_s11 + $0xdc] sm:$0xf] %vm3381_vm1, %v3372_v30  ;;  %v10315_v30 = vadd.f32 %v10087_v18, %v3233_v41 }
 0x50c   :  { %6606 = vst [vmem:[%s13022_s11 + $0x70] sm:$0xff] %v6506_v20   ;;  %v3373_v20 = vpack.c.bf16 %v10308_v24, %v10308_v24 }
 0x50d   :  { %3410 = vst.msk [vmem:[%s13022_s11 + $0x70] sm:$0xf] %vm3381_vm1, %v3345_v12  ;;  %v2776_v12 = vpop.f32.mrf.mxu2  ;;  %v3375_v17 = vpack.c.bf16 %v10315_v30, %v10315_v30 }
 0x50e   :  { %13803 = vst [vmem:[#allocation124_spill] sm:$0xff] %v10308_v24  ;;  %v10326_v8 = vadd.f32 %v10025_v16, %v2776_v12 }
 0x50f   :  { %3411 = vst.msk [vmem:[%s13022_s11 + $0x74] sm:$0xf] %vm3381_vm1, %v3346_v49  ;;  %v6581_v49 = vpack.c.bf16 %v10323_v19, %v10318_v52  ;;  %v3236_v40 = vpop.xlane.xlu2 %3235 }
 0x510   :  { %13804 = vst [vmem:[#allocation135_spill] sm:$0xff] %v10315_v30  ;;  %v3537_v41 = vsel %vm3446_vm2, %v10326_v8, -inf  ;;  %v10350_v30 = vadd.f32 %v10087_v18, %v9899_v44 }
 0x511   :  { %13805 = vst [vmem:[#allocation29_spill] sm:$0xff] %v10318_v52  ;;  %3538 = vmax.xlane.f32.xlu1 %v3537_v41  ;;  %v2851_v12 = vpop.f32.mrf.mxu3 }
 0x512   :  { %13806 = vst [vmem:[#allocation94_spill] sm:$0xff] %v10323_v19  ;;  %v10391_v3 = vadd.f32 %v10025_v16, %v2851_v12 }
 0x513   :  { %13807 = vst [vmem:[#allocation105_spill] sm:$0xff] %v10326_v8 }
 0x514   :  { %3438 = vst.msk [vmem:[%s13022_s11 + $0xe0] sm:$0xf] %vm3381_vm1, %v3373_v20  ;;  %v10346_v20 = vadd.f32 %v10087_v18, %v3236_v40  ;;  %v3347_v40 = vpack.c.bf16 %v10350_v30, %v10350_v30 }
 0x515   :  { %6621 = vst [vmem:[%s13022_s11 + $0xe8] sm:$0xff] %v6581_v49   ;;  %v2778_v24 = vpop.f32.mrf.mxu2  ;;  %v10356_v49 = vadd.f32 %v10087_v18, %v9932_v50 }
 0x516   :  { %3440 = vst.msk [vmem:[%s13022_s11 + $0xe8] sm:$0xf] %vm3381_vm1, %v3375_v17  ;;  %v3376_v11 = vpack.c.bf16 %v10346_v20, %v10346_v20  ;;  %v10359_v41 = vadd.f32 %v10025_v16, %v2778_v24  ;;  %v3242_v24 = vpop.xlane.xlu1 %3241 }
 0x517   :  { %13808 = vst [vmem:[#allocation128_spill] sm:$0xff] %v10346_v20  ;;  %v3239_v20 = vpop.xlane.xlu0 %3238  ;;  %v3348_v50 = vpack.c.bf16 %v10356_v49, %v10356_v49  ;;  %v10388_v21 = vadd.f32 %v10087_v18, %v3242_v24 }
 0x518   :  { %13809 = vst [vmem:[#allocation98_spill] sm:$0xff] %v10350_v30  ;;  %v6511_v44 = vpack.c.bf16 %v10359_v41, %v10326_v8  ;;  %v3540_v17 = vsel %vm3446_vm2, %v10359_v41, -inf  ;;  %v3245_v30 = vpop.xlane.xlu2 %3244 }
 0x519   :  { %13810 = vst [vmem:[#allocation72_spill] sm:$0xff] %v10356_v49  ;;  %3541 = vmax.xlane.f32.xlu2 %v3540_v17  ;;  %v2853_v17 = vpop.f32.mrf.mxu3  ;;  %v3378_v12 = vpack.c.bf16 %v10388_v21, %v10388_v21 }
 0x51a   :  { %13811 = vst [vmem:[#allocation62_spill] sm:$0xff] %v10359_v41 }
 0x51b   :  { %3441 = vst.msk [vmem:[%s13022_s11 + $0xec] sm:$0xf] %vm3381_vm1, %v3376_v11  ;;  %v10381_v11 = vadd.f32 %v10087_v18, %v3239_v20 }
 0x51c   :  { %6607 = vst [vmem:[%s13022_s11 + $0x78] sm:$0xff] %v6511_v44   ;;  %v10394_v44 = vadd.f32 %v10025_v16, %v2853_v17  ;;  %v10420_v17 = vadd.f32 %v10087_v18, %v9962_v26 }
 0x51d   :  { %3412 = vst.msk [vmem:[%s13022_s11 + $0x78] sm:$0xf] %vm3381_vm1, %v3347_v40  ;;  %v2781_v49 = vpop.f32.mrf.mxu2 }
 0x51e   :  { %13812 = vst [vmem:[#allocation137_spill] sm:$0xff] %v10381_v11  ;;  %v10397_v40 = vadd.f32 %v10025_v16, %v2781_v49  ;;  %v6586_v20 = vpack.c.bf16 %v10394_v44, %v10391_v3 }
 0x51f   :  { %3413 = vst.msk [vmem:[%s13022_s11 + $0x7c] sm:$0xf] %vm3381_vm1, %v3348_v50  ;;  %v3377_v50 = vpack.c.bf16 %v10381_v11, %v10381_v11  ;;  %v3248_v45 = vpop.xlane.xlu0 %3247 }
 0x520   :  { %13813 = vst [vmem:[#allocation43_spill] sm:$0xff] %v10388_v21  ;;  %v3543_v24 = vsel %vm3446_vm2, %v10397_v40, -inf }
 0x521   :  { %13814 = vst [vmem:[#allocation68_spill] sm:$0xff] %v10391_v3  ;;  %3544 = vmax.xlane.f32.xlu0 %v3543_v24  ;;  %v2856_v49 = vpop.f32.mrf.mxu3 }
 0x522   :  { %13815 = vst [vmem:[#allocation32_spill] sm:$0xff] %v10394_v44 }
 0x523   :  { %13816 = vst [vmem:[#allocation108_spill] sm:$0xff] %v10397_v40 }
 0x524   :  { %6622 = vst [vmem:[%s13022_s11 + $0xf0] sm:$0xff] %v6586_v20   ;;  %v10424_v20 = vadd.f32 %v10087_v18, %v9934_v33  ;;  %v10445_v33 = vadd.f32 %v10087_v18, %v3245_v30 }
 0x525   :  { %3442 = vst.msk [vmem:[%s13022_s11 + $0xf0] sm:$0xf] %vm3381_vm1, %v3377_v50  ;;  %v2783_v21 = vpop.f32.mrf.mxu2 }
 0x526   :  { %3443 = vst.msk [vmem:[%s13022_s11 + $0xf4] sm:$0xf] %vm3381_vm1, %v3378_v12  ;;  %v10427_v24 = vadd.f32 %v10025_v16, %v2783_v21  ;;  %v3349_v12 = vpack.c.bf16 %v10420_v17, %v10420_v17  ;;  %v3350_v26 = vpack.c.bf16 %v10424_v20, %v10424_v20 }
 0x527   :  { %13817 = vst [vmem:[#allocation131_spill] sm:$0xff] %v10420_v17 }
 0x528   :  { %13818 = vst [vmem:[#allocation39_spill] sm:$0xff] %v10424_v20  ;;  %v6516_v50 = vpack.c.bf16 %v10427_v24, %v10397_v40  ;;  %v3546_v11 = vsel %vm3446_vm2, %v10427_v24, -inf  ;;  %v10455_v20 = vadd.f32 %v10025_v16, %v2856_v49 }
 0x529   :  { %13819 = vst [vmem:[#allocation155_spill] sm:$0xff] %v10427_v24  ;;  %3547 = vmax.xlane.f32.xlu1 %v3546_v11  ;;  %v2858_v21 = vpop.f32.mrf.mxu3  ;;  %v10452_v11 = vadd.f32 %v10087_v18, %v3248_v45 }
 0x52a   :  { %6608 = vst [vmem:[%s13022_s11 + $0x80] sm:$0xff] %v6516_v50   ;;  %v10458_v50 = vadd.f32 %v10025_v16, %v2858_v21 }
 0x52b   :  { %3414 = vst.msk [vmem:[%s13022_s11 + $0x80] sm:$0xf] %vm3381_vm1, %v3349_v12  ;;  %v3380_v49 = vpack.c.bf16 %v10452_v11, %v10452_v11 }
 0x52c   :  { %13820 = vst [vmem:[#allocation101_spill] sm:$0xff] %v10445_v33  ;;  %v6591_v30 = vpack.c.bf16 %v10458_v50, %v10455_v20 }
 0x52d   :  { %3415 = vst.msk [vmem:[%s13022_s11 + $0x84] sm:$0xf] %vm3381_vm1, %v3350_v26  ;;  %v2786_v17 = vpop.f32.mrf.mxu2  ;;  %v3379_v26 = vpack.c.bf16 %v10445_v33, %v10445_v33 }
 0x52e   :  { %13821 = vst [vmem:[#allocation74_spill] sm:$0xff] %v10452_v11  ;;  %v10461_v12 = vadd.f32 %v10025_v16, %v2786_v17  ;;  %v10484_v17 = vadd.f32 %v10087_v18, %v9966_v31  ;;  %v10488_v11 = vadd.f32 %v10087_v18, %v9996_v7 }
 0x52f   :  { %13822 = vst [vmem:[#allocation127_spill] sm:$0xff] %v10455_v20 }
 0x530   :  { %13823 = vst [vmem:[#allocation46_spill] sm:$0xff] %v10458_v50  ;;  %v3549_v45 = vsel %vm3446_vm2, %v10461_v12, -inf  ;;  %v3352_v31 = vpack.c.bf16 %v10488_v11, %v10488_v11 }
 0x531   :  { %13824 = vst [vmem:[#allocation71_spill] sm:$0xff] %v10461_v12  ;;  %3550 = vmax.xlane.f32.xlu2 %v3549_v45 }
 0x532   :  { %6623 = vst [vmem:[%s13022_s11 + $0xf8] sm:$0xff] %v6591_v30  }
 0x533   :  { %3444 = vst.msk [vmem:[%s13022_s11 + $0xf8] sm:$0xf] %vm3381_vm1, %v3379_v26 }
 0x534   :  { %3445 = vst.msk [vmem:[%s13022_s11 + $0xfc] sm:$0xf] %vm3381_vm1, %v3380_v49  ;;  %v3351_v49 = vpack.c.bf16 %v10484_v17, %v10484_v17 }
 0x535   :  { %13825 = vst [vmem:[#allocation97_spill] sm:$0xff] %v10484_v17  ;;  %v2788_v21 = vpop.f32.mrf.mxu2 }
 0x536   :  { %13826 = vst [vmem:[#allocation42_spill] sm:$0xff] %v10488_v11  ;;  %v10491_v30 = vadd.f32 %v10025_v16, %v2788_v21 }
 0x538   :  { %13827 = vst [vmem:[#allocation156_spill] sm:$0xff] %v10491_v30  ;;  %v6521_v26 = vpack.c.bf16 %v10491_v30, %v10461_v12  ;;  %v3552_v45 = vsel %vm3446_vm2, %v10491_v30, -inf }
 0x539   :  { %3553 = vmax.xlane.f32.xlu0 %v3552_v45 }
 0x53a   :  { %6609 = vst [vmem:[%s13022_s11 + $0x88] sm:$0xff] %v6521_v26   ;;  %v10519_v26 = vadd.f32 %v10087_v18, %v9968_v0 }
 0x53b   :  { %3416 = vst.msk [vmem:[%s13022_s11 + $0x88] sm:$0xf] %vm3381_vm1, %v3351_v49  ;;  %v10523_v49 = vadd.f32 %v10087_v18, %v10001_v9 }
 0x53c   :  { %3417 = vst.msk [vmem:[%s13022_s11 + $0x8c] sm:$0xf] %vm3381_vm1, %v3352_v31 }
 0x53d   :  { %v2791_v7 = vpop.f32.mrf.mxu2  ;;  %13829 = vst [vmem:[#allocation65_spill] sm:$0xff] %v10519_v26  ;;  %v3354_v0 = vpack.c.bf16 %v10523_v49, %v10523_v49 }
 0x53e   :  { %v10513_v21 = vadd.f32 %v10025_v16, %v2791_v7  ;;  %13830 = vst [vmem:[#allocation130_spill] sm:$0xff] %v10523_v49 }
 0x540   :  { %13828 = vst [vmem:[#allocation70_spill] sm:$0xff] %v10513_v21  ;;  %v3555_v45 = vsel %vm3446_vm2, %v10513_v21, -inf }
 0x541   :  { %3556 = vmax.xlane.f32.xlu1 %v3555_v45  ;;  %v3353_v45 = vpack.c.bf16 %v10519_v26, %v10519_v26 }
 0x545   :  { %v2793_v33 = vpop.f32.mrf.mxu2 }
 0x546   :  { %v10526_v17 = vadd.f32 %v10025_v16, %v2793_v33 }
 0x548   :  { %13831 = vst [vmem:[#allocation139_spill] sm:$0xff] %v10526_v17  ;;  %v6526_v31 = vpack.c.bf16 %v10526_v17, %v10513_v21  ;;  %v3558_v7 = vsel %vm3446_vm2, %v10526_v17, -inf }
 0x549   :  { %3559 = vmax.xlane.f32.xlu2 %v3558_v7 }
 0x54a   :  { %6610 = vst [vmem:[%s13022_s11 + $0x90] sm:$0xff] %v6526_v31   ;;  %v10554_v31 = vadd.f32 %v10087_v18, %v10036_v55 }
 0x54b   :  { %3418 = vst.msk [vmem:[%s13022_s11 + $0x90] sm:$0xf] %vm3381_vm1, %v3353_v45  ;;  %v10558_v45 = vadd.f32 %v10087_v18, %v10003_v25 }
 0x54c   :  { %3419 = vst.msk [vmem:[%s13022_s11 + $0x94] sm:$0xf] %vm3381_vm1, %v3354_v0 }
 0x54d   :  { %v2796_v9 = vpop.f32.mrf.mxu2  ;;  %13833 = vst [vmem:[#allocation35_spill] sm:$0xff] %v10554_v31  ;;  %v3356_v55 = vpack.c.bf16 %v10558_v45, %v10558_v45 }
 0x54e   :  { %v10548_v33 = vadd.f32 %v10025_v16, %v2796_v9  ;;  %13834 = vst [vmem:[#allocation100_spill] sm:$0xff] %v10558_v45 }
 0x550   :  { %13832 = vst [vmem:[#allocation76_spill] sm:$0xff] %v10548_v33  ;;  %v3561_v7 = vsel %vm3446_vm2, %v10548_v33, -inf }
 0x551   :  { %3562 = vmax.xlane.f32.xlu0 %v3561_v7  ;;  %v3355_v7 = vpack.c.bf16 %v10554_v31, %v10554_v31 }
 0x555   :  { %v2798_v49 = vpop.f32.mrf.mxu2 }
 0x556   :  { %v10561_v26 = vadd.f32 %v10025_v16, %v2798_v49 }
 0x558   :  { %13835 = vst [vmem:[#allocation111_spill] sm:$0xff] %v10561_v26  ;;  %v6531_v0 = vpack.c.bf16 %v10561_v26, %v10548_v33  ;;  %v3564_v9 = vsel %vm3446_vm2, %v10561_v26, -inf }
 0x559   :  { %3565 = vmax.xlane.f32.xlu1 %v3564_v9 }
 0x55a   :  { %6611 = vst [vmem:[%s13022_s11 + $0x98] sm:$0xff] %v6531_v0   ;;  %v10589_v0 = vadd.f32 %v10087_v18, %v10040_v61 }
 0x55b   :  { %3420 = vst.msk [vmem:[%s13022_s11 + $0x98] sm:$0xf] %vm3381_vm1, %v3355_v7  ;;  %v10593_v7 = vadd.f32 %v10087_v18, %v10070_v57 }
 0x55c   :  { %3421 = vst.msk [vmem:[%s13022_s11 + $0x9c] sm:$0xf] %vm3381_vm1, %v3356_v55 }
 0x55d   :  { %v2801_v25 = vpop.f32.mrf.mxu2  ;;  %13837 = vst [vmem:[#allocation172_spill] sm:$0xff] %v10589_v0  ;;  %v3358_v61 = vpack.c.bf16 %v10593_v7, %v10593_v7 }
 0x55e   :  { %v10583_v49 = vadd.f32 %v10025_v16, %v2801_v25  ;;  %13838 = vst [vmem:[#allocation165_spill] sm:$0xff] %v10593_v7  ;;  %v10630_v7 = vadd.f32 %v10087_v18, %v10075_v47  ;;  %v10650_v47 = vpop.xlane.xlu2 %3451 }
 0x55f   :  { %13845 = vst [vmem:[#allocation45_spill] sm:$0xff] %v10650_v47  ;;  %vm3642_vm5 = vcmp.ge.f32.partialorder %v9423_v36, %v10650_v47 }
 0x560   :  { %13836 = vst [vmem:[#allocation133_spill] sm:$0xff] %v10583_v49  ;;  %v3567_v9 = vsel %vm3446_vm2, %v10583_v49, -inf }
 0x561   :  { %3568 = vmax.xlane.f32.xlu2 %v3567_v9  ;;  %v3357_v9 = vpack.c.bf16 %v10589_v0, %v10589_v0  ;;  %v10622_v0 = vpop.xlane.xlu1 %3448  ;;  %13843 = vst [vmem:[#allocation38_spill] sm:$0xff] %v10630_v7 }
 0x562   :  { %13841 = vst [vmem:[#allocation10_spill] sm:$0xff] %v10622_v0  ;;  %vm3641_vm3 = vcmp.ge.f32.partialorder %v9420_v53, %v10622_v0 }
 0x565   :  { %v2803_v45 = vpop.f32.mrf.mxu2 }
 0x566   :  { %v10596_v31 = vadd.f32 %v10025_v16, %v2803_v45 }
 0x568   :  { %13839 = vst [vmem:[#allocation104_spill] sm:$0xff] %v10596_v31  ;;  %v6536_v55 = vpack.c.bf16 %v10596_v31, %v10583_v49  ;;  %v3570_v25 = vsel %vm3446_vm2, %v10596_v31, -inf }
 0x569   :  { %3571 = vmax.xlane.f32.xlu0 %v3570_v25 }
 0x56a   :  { %6612 = vst [vmem:[%s13022_s11 + $0xa0] sm:$0xff] %v6536_v55   ;;  %v10626_v55 = vadd.f32 %v10087_v18, %v10042_v6  ;;  %v3360_v6 = vpack.c.bf16 %v10630_v7, %v10630_v7 }
 0x56b   :  { %3422 = vst.msk [vmem:[%s13022_s11 + $0xa0] sm:$0xf] %vm3381_vm1, %v3357_v9 }
 0x56c   :  { %3423 = vst.msk [vmem:[%s13022_s11 + $0xa4] sm:$0xf] %vm3381_vm1, %v3358_v61  ;;  %v3359_v11 = vpack.c.bf16 %v10626_v55, %v10626_v55 }
 0x56d   :  { %v2806_v57 = vpop.f32.mrf.mxu2  ;;  %13842 = vst [vmem:[#allocation49_spill] sm:$0xff] %v10626_v55  ;;  %v10667_v55 = vpop.xlane.xlu0 %3454 }
 0x56e   :  { %v10618_v45 = vadd.f32 %v10025_v16, %v2806_v57  ;;  %13849 = vst [vmem:[#allocation4_spill] sm:$0xff] %v10667_v55  ;;  %vm3643_vm4 = vcmp.ge.f32.partialorder %v9462_v43, %v10667_v55 }
 0x570   :  { %13840 = vst [vmem:[#allocation158_spill] sm:$0xff] %v10618_v45  ;;  %v3573_v25 = vsel %vm3446_vm2, %v10618_v45, -inf }
 0x571   :  { %3574 = vmax.xlane.f32.xlu1 %v3573_v25 }
 0x575   :  { %v2808_v9 = vpop.f32.mrf.mxu2 }
 0x576   :  { %v10633_v61 = vadd.f32 %v10025_v16, %v2808_v9 }
 0x578   :  { %13844 = vst [vmem:[#allocation114_spill] sm:$0xff] %v10633_v61  ;;  %v6541_v57 = vpack.c.bf16 %v10633_v61, %v10618_v45  ;;  %v3576_v25 = vsel %vm3446_vm2, %v10633_v61, -inf  ;;  %v10673_v61 = vpop.xlane.xlu2 %3460 }
 0x579   :  { %3577 = vmax.xlane.f32.xlu2 %v3576_v25  ;;  %v10656_v25 = vpop.xlane.xlu1 %3457  ;;  %13851 = vst [vmem:[#allocation103_spill] sm:$0xff] %v10673_v61  ;;  %vm3645_vm8 = vcmp.ge.f32.partialorder %v9504_v22, %v10673_v61 }
 0x57a   :  { %6613 = vst [vmem:[%s13022_s11 + $0xa8] sm:$0xff] %v6541_v57   ;;  %vm3644_vm6 = vcmp.ge.f32.partialorder %v9465_v10, %v10656_v25 }
 0x57b   :  { %3424 = vst.msk [vmem:[%s13022_s11 + $0xa8] sm:$0xf] %vm3381_vm1, %v3359_v11  ;;  %v10665_v11 = vadd.f32 %v10087_v18, %v10108_v58 }
 0x57c   :  { %3425 = vst.msk [vmem:[%s13022_s11 + $0xac] sm:$0xf] %vm3381_vm1, %v3360_v6  ;;  %v10671_v6 = vadd.f32 %v10087_v18, %v10081_v42 }
 0x57d   :  { %v2811_v9 = vpop.f32.mrf.mxu2  ;;  %13846 = vst [vmem:[#allocation157_spill] sm:$0xff] %v10656_v25  ;;  %v3361_v49 = vpack.c.bf16 %v10665_v11, %v10665_v11 }
 0x57e   :  { %v10659_v7 = vadd.f32 %v10025_v16, %v2811_v9  ;;  %13848 = vst [vmem:[#allocation6_spill] sm:$0xff] %v10665_v11  ;;  %v3362_v42 = vpack.c.bf16 %v10671_v6, %v10671_v6  ;;  %v10702_v11 = vpop.xlane.xlu0 %3463 }
 0x57f   :  { %13850 = vst [vmem:[#allocation52_spill] sm:$0xff] %v10671_v6  ;;  %vm3646_vm7 = vcmp.ge.f32.partialorder %v9507_v51, %v10702_v11 }
 0x580   :  { %13847 = vst [vmem:[#allocation107_spill] sm:$0xff] %v10659_v7  ;;  %v3579_v57 = vsel %vm3446_vm2, %v10659_v7, -inf  ;;  %v10704_v6 = vpop.xlane.xlu2 %3469 }
 0x581   :  { %3580 = vmax.xlane.f32.xlu0 %v3579_v57  ;;  %v10678_v45 = vpop.xlane.xlu1 %3466  ;;  %13855 = vst [vmem:[#allocation81_spill] sm:$0xff] %v10702_v11  ;;  %vm3648_vm11 = vcmp.ge.f32.partialorder %v9554_v60, %v10704_v6 }
 0x582   :  { %13853 = vst [vmem:[#allocation159_spill] sm:$0xff] %v10678_v45  ;;  %vm3647_vm9 = vcmp.ge.f32.partialorder %v9551_v46, %v10678_v45 }
 0x583   :  { %13856 = vst [vmem:[#allocation160_spill] sm:$0xff] %v10704_v6 }
 0x585   :  { %v2813_v29 = vpop.f32.mrf.mxu2 }
 0x586   :  { %v10676_v9 = vadd.f32 %v10025_v16, %v2813_v29 }
 0x588   :  { %13852 = vst [vmem:[#allocation48_spill] sm:$0xff] %v10676_v9  ;;  %v6546_v57 = vpack.c.bf16 %v10676_v9, %v10659_v7  ;;  %v3582_v58 = vsel %vm3446_vm2, %v10676_v9, -inf  ;;  %v3591_v9 = vsel %vm3446_vm2, %v9914_v35, -inf  ;;  %v10718_v7 = vadd.f32 %v10087_v18, %v10154_v2  ;;  %v10731_v35 = vpop.xlane.xlu0 %3472  ;;  %v10737_v2 = vpop.xlane.xlu2 %3478 }
 0x589   :  { %3583 = vmax.xlane.f32.xlu1 %v3582_v58  ;;  %13861 = vst [vmem:[#allocation169_spill] sm:$0xff] %v10731_v35  ;;  %vm3649_vm10 = vcmp.ge.f32.partialorder %v9603_v38, %v10731_v35  ;;  %vm3651_vm14 = vcmp.ge.f32.partialorder %v9649_v34, %v10737_v2 }
 0x58a   :  { %6614 = vst [vmem:[%s13022_s11 + $0xb0] sm:$0xff] %v6546_v57  }
 0x58b   :  { %3426 = vst.msk [vmem:[%s13022_s11 + $0xb0] sm:$0xf] %vm3381_vm1, %v3361_v49  ;;  %v10710_v49 = vpop.xlane.xlu1 %3475 }
 0x58c   :  { %3427 = vst.msk [vmem:[%s13022_s11 + $0xb4] sm:$0xf] %vm3381_vm1, %v3362_v42  ;;  %v10714_v42 = vadd.f32 %v10087_v18, %v10116_v37  ;;  %v3364_v18 = vpack.c.bf16 %v10718_v7, %v10718_v7  ;;  %vm3650_vm12 = vcmp.ge.f32.partialorder %v9606_v63, %v10710_v49 }
 0x58d   :  { %v2816_v29 = vpop.f32.mrf.mxu2  ;;  %13857 = vst [vmem:[#allocation15_spill] sm:$0xff] %v10710_v49 }
 0x58e   :  { %v10700_v58 = vadd.f32 %v10025_v16, %v2816_v29  ;;  %13858 = vst [vmem:[#allocation41_spill] sm:$0xff] %v10714_v42  ;;  %v3363_v37 = vpack.c.bf16 %v10714_v42, %v10714_v42  ;;  %v3612_v42 = vsel %vm3446_vm2, %v10135_v48, -inf }
 0x58f   :  { %13859 = vst [vmem:[#allocation106_spill] sm:$0xff] %v10718_v7 }
 0x590   :  { %13854 = vst [vmem:[#allocation168_spill] sm:$0xff] %v10700_v58  ;;  %v3585_v57 = vsel %vm3446_vm2, %v10700_v58, -inf }
 0x591   :  { %3586 = vmax.xlane.f32.xlu2 %v3585_v57  ;;  %3592 = vmax.xlane.f32.xlu1 %v3591_v9  ;;  %v3594_v57 = vsel %vm3446_vm2, %v9917_v39, -inf  ;;  %13862 = vst [vmem:[#allocation110_spill] sm:$0xff] %v10737_v2 }
 0x595   :  { %v2818_v29 = vpop.f32.mrf.mxu2 }
 0x596   :  { %v10721_v31 = vadd.f32 %v10025_v16, %v2818_v29  ;;  %v3600_v16 = vsel %vm3446_vm2, %v9986_v1, -inf  ;;  %v10746_v29 = vpop.xlane.xlu1 %3484  ;;  %v3624_v1 = vsel %vm3446_vm2, %v10323_v19, -inf }
 0x597   :  { %13863 = vst [vmem:[#allocation162_spill] sm:$0xff] %v10746_v29  ;;  %vm3653_vm15 = vcmp.ge.f32.partialorder %v9708_v54, %v10746_v29 }
 0x598   :  { %13860 = vst [vmem:[#allocation117_spill] sm:$0xff] %v10721_v31  ;;  %v6551_v26 = vpack.c.bf16 %v10721_v31, %v10700_v58  ;;  %v3588_v9 = vsel %vm3446_vm2, %v10721_v31, -inf }
 0x599   :  { %3589 = vmax.xlane.f32.xlu0 %v3588_v9  ;;  %3595 = vmax.xlane.f32.xlu2 %v3594_v57  ;;  %v3597_v9 = vsel %vm3446_vm2, %v9983_v32, -inf  ;;  %v3603_v57 = vsel %vm3446_vm2, %v10057_v59, -inf  ;;  %v3615_v59 = vsel %vm3446_vm2, %v10216_v13, -inf  ;;  %v3630_v13 = vsel %vm3446_vm2, %v10394_v44, -inf }
 0x59a   :  { %6615 = vst [vmem:[%s13022_s11 + $0xb8] sm:$0xff] %v6551_v26   ;;  %3601 = vmax.xlane.f32.xlu1 %v3600_v16  ;;  %v3609_v26 = vsel %vm3446_vm2, %v10130_v14, -inf  ;;  %v10760_v16 = vpop.xlane.xlu2 %3487 }
 0x59b   :  { %3428 = vst.msk [vmem:[%s13022_s11 + $0xb8] sm:$0xf] %vm3381_vm1, %v3363_v37  ;;  %v10758_v37 = vpop.xlane.xlu0 %3481 }
 0x59c   :  { %3429 = vst.msk [vmem:[%s13022_s11 + $0xbc] sm:$0xf] %vm3381_vm1, %v3364_v18  ;;  %v3606_v18 = vsel %vm3446_vm2, %v10060_v5, -inf  ;;  %v3621_v5 = vsel %vm3446_vm2, %v10318_v52, -inf  ;;  %vm3652_vm13 = vcmp.ge.f32.partialorder %v9652_v27, %v10758_v37  ;;  %vm3654_vm1 = vcmp.ge.f32.partialorder %v9711_v4, %v10760_v16  ;;  %v13893_v4 = vld [vmem:[#allocation85_spill] sm:$0xff] }
 0x59d   :  { %13864 = vst [vmem:[#allocation134_spill] sm:$0xff] %v10758_v37 }
 0x59e   :  { %13865 = vst [vmem:[#allocation55_spill] sm:$0xff] %v10760_v16  ;;  %v10762_v7 = vpop.xlane.xlu1 %3493 }
 0x59f   :  { %13866 = vst [vmem:[#allocation44_spill] sm:$0xff] %v10762_v7 }
 0x5a1   :  { %3598 = vmax.xlane.f32.xlu0 %v3597_v9  ;;  %3604 = vmax.xlane.f32.xlu2 %v3603_v57  ;;  %v3618_v9 = vsel %vm3446_vm2, %v10223_v28, -inf }
 0x5a2   :  { %3610 = vmax.xlane.f32.xlu1 %v3609_v26  ;;  %v10772_v26 = vpop.xlane.xlu2 %3496 }
 0x5a3   :  { %v10770_v57 = vpop.xlane.xlu0 %3490  ;;  %13868 = vst [vmem:[#allocation51_spill] sm:$0xff] %v10772_v26 }
 0x5a4   :  { %13867 = vst [vmem:[#allocation120_spill] sm:$0xff] %v10770_v57  ;;  %vm3655_vm0 = vcmp.ge.f32.partialorder %v9767_v62, %v10770_v57  ;;  %v13887_v62 = vld [vmem:[#allocation31_spill] sm:$0xff] }
 0x5a6   :  { %v10774_v14 = vpop.xlane.xlu1 %3502 }
 0x5a7   :  { %13869 = vst [vmem:[#allocation161_spill] sm:$0xff] %v10774_v14 }
 0x5a9   :  { %3607 = vmax.xlane.f32.xlu0 %v3606_v18  ;;  %3613 = vmax.xlane.f32.xlu2 %v3612_v42  ;;  %v3627_v42 = vsel %vm3446_vm2, %v10391_v3, -inf  ;;  %v3639_v18 = vlaneseq }
 0x5aa   :  { %3619 = vmax.xlane.f32.xlu1 %v3618_v9  ;;  %v10786_v48 = vpop.xlane.xlu2 %3505 }
 0x5ab   :  { %v10782_v9 = vand.u32 127, %v3639_v18  ;;  %v10784_v28 = vpop.xlane.xlu0 %3499  ;;  %13872 = vst [vmem:[#allocation2_spill] sm:$0xff] %v10786_v48 }
 0x5ac   :  { %13871 = vst [vmem:[#allocation113_spill] sm:$0xff] %v10784_v28 }
 0x5ad   :  { %13870 = vst [vmem:[#allocation7_spill] sm:$0xff] %v10782_v9 }
 0x5b1   :  { %3616 = vmax.xlane.f32.xlu0 %v3615_v59  ;;  %3622 = vmax.xlane.f32.xlu2 %v3621_v5  ;;  %v3636_v59 = vsel %vm3446_vm2, %v10458_v50, -inf  ;;  %v10795_v5 = vcvt.s32.f32 %v10782_v9 }
 0x5b2   :  { %3628 = vmax.xlane.f32.xlu1 %v3627_v42  ;;  %v10797_v42 = vpop.xlane.xlu1 %3511  ;;  %v10811_v44 = vpop.xlane.xlu2 %3514 }
 0x5b3   :  { %13873 = vst [vmem:[#allocation9_spill] sm:$0xff] %v10797_v42  ;;  %v3706_v18 = vsel %vm3641_vm3, %v10795_v5, 8.0  ;;  %v10808_v9 = vpop.xlane.xlu0 %3508  ;;  %vm3656_vm3 = vcmp.ge.f32.partialorder %v9770_v56, %v10762_v7  ;;  %v13890_v7 = vld [vmem:[#allocation146_spill] sm:$0xff] }
 0x5b4   :  { %v3770_v50 = vsel %vm3446_vm2, %v3706_v18, inf  ;;  %13874 = vst [vmem:[#allocation58_spill] sm:$0xff] %v10808_v9  ;;  %v3707_v18 = vsel %vm3642_vm5, %v10795_v5, 8.0  ;;  %vm3657_vm5 = vcmp.ge.f32.partialorder %v13890_v7, %v10772_v26  ;;  %v13899_v7 = vld [vmem:[#allocation129_spill] sm:$0xff] }
 0x5b5   :  { %13875 = vst [vmem:[#allocation109_spill] sm:$0xff] %v10811_v44 }
 0x5b9   :  { %3625 = vmax.xlane.f32.xlu0 %v3624_v1  ;;  %3631 = vmax.xlane.f32.xlu2 %v3630_v13  ;;  %v3708_v1 = vsel %vm3643_vm4, %v10795_v5, 8.0  ;;  %v3633_v13 = vsel %vm3446_vm2, %v10455_v20, -inf  ;;  %vm3658_vm4 = vcmp.ge.f32.partialorder %v13887_v62, %v10784_v28  ;;  %v13891_v62 = vld [vmem:[#allocation27_spill] sm:$0xff] }
 0x5ba   :  { %3637 = vmax.xlane.f32.xlu1 %v3636_v59  ;;  %v3776_v59 = vsel %vm3446_vm2, %v3708_v1, inf  ;;  %v10819_v43 = vpop.xlane.xlu1 %3520  ;;  %v3773_v1 = vsel %vm3446_vm2, %v3707_v18, inf  ;;  %v10835_v25 = vpop.xlane.xlu2 %3523 }
 0x5bb   :  { %13876 = vst [vmem:[#allocation54_spill] sm:$0xff] %v10819_v43  ;;  %v10831_v10 = vpop.xlane.xlu0 %3517 }
 0x5bc   :  { %13877 = vst [vmem:[#allocation163_spill] sm:$0xff] %v10831_v10 }
 0x5bd   :  { %13878 = vst [vmem:[#allocation170_spill] sm:$0xff] %v10835_v25 }
 0x5c1   :  { %3634 = vmax.xlane.f32.xlu0 %v3633_v13  ;;  %3771 = vmin.xlane.f32.xlu2 %v3770_v50  ;;  %v3709_v13 = vsel %vm3644_vm6, %v10795_v5, 8.0  ;;  %v3711_v50 = vsel %vm3646_vm7, %v10795_v5, 8.0  ;;  %vm3659_vm6 = vcmp.ge.f32.partialorder %v13891_v62, %v10774_v14  ;;  %vm3661_vm7 = vcmp.ge.f32.partialorder %v13893_v4, %v10808_v9  ;;  %v13896_v14 = vld [vmem:[#allocation145_spill] sm:$0xff]  ;;  %v13897_v4 = vld [vmem:[#allocation60_spill] sm:$0xff] }
 0x5c2   :  { %3777 = vmin.xlane.f32.xlu1 %v3776_v59  ;;  %v3779_v59 = vsel %vm3446_vm2, %v3709_v13, inf  ;;  %v3785_v55 = vsel %vm3446_vm2, %v3711_v50, inf  ;;  %v10837_v18 = vpop.xlane.xlu1 %3529  ;;  %v3710_v13 = vsel %vm3645_vm8, %v10795_v5, 8.0  ;;  %v3712_v50 = vsel %vm3647_vm9, %v10795_v5, 8.0  ;;  %v10853_v38 = vpop.xlane.xlu2 %3532 }
 0x5c3   :  { %13879 = vst [vmem:[#allocation3_spill] sm:$0xff] %v10837_v18  ;;  %v10849_v45 = vpop.xlane.xlu0 %3526  ;;  %vm3660_vm8 = vcmp.ge.f32.partialorder %v13896_v14, %v10786_v48  ;;  %vm3662_vm9 = vcmp.ge.f32.partialorder %v13897_v4, %v10797_v42  ;;  %v13902_v42 = vld [vmem:[#allocation118_spill] sm:$0xff]  ;;  %v13905_v14 = vld [vmem:[#allocation37_spill] sm:$0xff] }
 0x5c4   :  { %13880 = vst [vmem:[#allocation164_spill] sm:$0xff] %v10849_v45 }
 0x5c5   :  { %13881 = vst [vmem:[#allocation11_spill] sm:$0xff] %v10853_v38 }
 0x5c9   :  { %3774 = vmin.xlane.f32.xlu0 %v3773_v1  ;;  %3780 = vmin.xlane.f32.xlu2 %v3779_v59  ;;  %v3782_v1 = vsel %vm3446_vm2, %v3710_v13, inf  ;;  %v3788_v59 = vsel %vm3446_vm2, %v3712_v50, inf  ;;  %v3713_v50 = vsel %vm3648_vm11, %v10795_v5, 8.0  ;;  %vm3663_vm11 = vcmp.ge.f32.partialorder %v13902_v42, %v10811_v44 }
 0x5ca   :  { %3786 = vmin.xlane.f32.xlu1 %v3785_v55  ;;  %v3714_v55 = vsel %vm3649_vm10, %v10795_v5, 8.0  ;;  %v10855_v13 = vpop.xlane.xlu1 %3538  ;;  %v10871_v27 = vpop.xlane.xlu2 %3541  ;;  %vm3664_vm10 = vcmp.ge.f32.partialorder %v13899_v7, %v10831_v10  ;;  %v13903_v7 = vld [vmem:[#allocation99_spill] sm:$0xff] }
 0x5cb   :  { %v3794_v46 = vsel %vm3446_vm2, %v3714_v55, inf  ;;  %13882 = vst [vmem:[#allocation47_spill] sm:$0xff] %v10855_v13  ;;  %v3715_v55 = vsel %vm3650_vm12, %v10795_v5, 8.0  ;;  %v10867_v49 = vpop.xlane.xlu0 %3535  ;;  %vm3665_vm12 = vcmp.ge.f32.partialorder %v13903_v7, %v10819_v43 }
 0x5cc   :  { %13883 = vst [vmem:[#allocation112_spill] sm:$0xff] %v10867_v49 }
 0x5cd   :  { %13884 = vst [vmem:[#allocation123_spill] sm:$0xff] %v10871_v27 }
 0x5d1   :  { %3783 = vmin.xlane.f32.xlu0 %v3782_v1  ;;  %3789 = vmin.xlane.f32.xlu2 %v3788_v59  ;;  %v3791_v1 = vsel %vm3446_vm2, %v3713_v50, inf  ;;  %v3797_v59 = vsel %vm3446_vm2, %v3715_v55, inf  ;;  %v3716_v55 = vsel %vm3651_vm14, %v10795_v5, 8.0 }
 0x5d2   :  { %3795 = vmin.xlane.f32.xlu1 %v3794_v46  ;;  %v3717_v46 = vsel %vm3652_vm13, %v10795_v5, 8.0  ;;  %v10873_v50 = vpop.xlane.xlu1 %3547  ;;  %v10889_v57 = vpop.xlane.xlu2 %3550  ;;  %vm3667_vm13 = vcmp.ge.f32.partialorder %v13905_v14, %v10849_v45  ;;  %v13908_v14 = vld [vmem:[#allocation151_spill] sm:$0xff]  ;;  %v13909_v45 = vld [vmem:[#allocation33_spill] sm:$0xff] }
 0x5d3   :  { %v3803_v63 = vsel %vm3446_vm2, %v3717_v46, inf  ;;  %13885 = vst [vmem:[#allocation171_spill] sm:$0xff] %v10873_v50  ;;  %v3718_v46 = vsel %vm3653_vm15, %v10795_v5, 8.0  ;;  %v10885_v29 = vpop.xlane.xlu0 %3544  ;;  %vm3666_vm14 = vcmp.ge.f32.partialorder %v13908_v14, %v10835_v25  ;;  %vm3668_vm15 = vcmp.ge.f32.partialorder %v13909_v45, %v10837_v18 }
 0x5d4   :  { %13886 = vst [vmem:[#allocation116_spill] sm:$0xff] %v10885_v29 }
 0x5d5   :  { %13888 = vst [vmem:[#allocation167_spill] sm:$0xff] %v10889_v57 }
 0x5d9   :  { %3792 = vmin.xlane.f32.xlu0 %v3791_v1  ;;  %3798 = vmin.xlane.f32.xlu2 %v3797_v59  ;;  %v3800_v1 = vsel %vm3446_vm2, %v3716_v55, inf  ;;  %v3806_v59 = vsel %vm3446_vm2, %v3718_v46, inf  ;;  %v3719_v46 = vsel %vm3654_vm1, %v10795_v5, 8.0  ;;  %vm3669_vm1 = vcmp.ge.f32.partialorder %v10228_v23, %v10853_v38 }
 0x5da   :  { %3804 = vmin.xlane.f32.xlu1 %v3803_v63  ;;  %v3720_v63 = vsel %vm3655_vm0, %v10795_v5, 8.0  ;;  %v10891_v55 = vpop.xlane.xlu1 %3556  ;;  %v10907_v16 = vpop.xlane.xlu2 %3559  ;;  %vm3670_vm0 = vcmp.ge.f32.partialorder %v10277_v15, %v10867_v49 }
 0x5db   :  { %v3812_v54 = vsel %vm3446_vm2, %v3720_v63, inf  ;;  %13889 = vst [vmem:[#allocation73_spill] sm:$0xff] %v10891_v55  ;;  %v3721_v63 = vsel %vm3656_vm3, %v10795_v5, 8.0  ;;  %v10903_v28 = vpop.xlane.xlu0 %3553  ;;  %vm3671_vm3 = vcmp.ge.f32.partialorder %v10326_v8, %v10855_v13 }
 0x5dc   :  { %13892 = vst [vmem:[#allocation61_spill] sm:$0xff] %v10903_v28 }
 0x5dd   :  { %13894 = vst [vmem:[#allocation50_spill] sm:$0xff] %v10907_v16 }
 0x5e1   :  { %3801 = vmin.xlane.f32.xlu0 %v3800_v1  ;;  %3807 = vmin.xlane.f32.xlu2 %v3806_v59  ;;  %v3809_v1 = vsel %vm3446_vm2, %v3719_v46, inf  ;;  %v3815_v59 = vsel %vm3446_vm2, %v3721_v63, inf  ;;  %v3722_v63 = vsel %vm3657_vm5, %v10795_v5, 8.0  ;;  %vm3672_vm5 = vcmp.ge.f32.partialorder %v10359_v41, %v10871_v27 }
 0x5e2   :  { %3813 = vmin.xlane.f32.xlu1 %v3812_v54  ;;  %v3723_v54 = vsel %vm3658_vm4, %v10795_v5, 8.0  ;;  %v10909_v46 = vpop.xlane.xlu1 %3565  ;;  %v10925_v26 = vpop.xlane.xlu2 %3568  ;;  %vm3673_vm4 = vcmp.ge.f32.partialorder %v10397_v40, %v10885_v29 }
 0x5e3   :  { %v3821_v56 = vsel %vm3446_vm2, %v3723_v54, inf  ;;  %13895 = vst [vmem:[#allocation126_spill] sm:$0xff] %v10909_v46  ;;  %v3724_v54 = vsel %vm3659_vm6, %v10795_v5, 8.0  ;;  %v10921_v9 = vpop.xlane.xlu0 %3562  ;;  %vm3674_vm6 = vcmp.ge.f32.partialorder %v10427_v24, %v10873_v50 }
 0x5e4   :  { %13898 = vst [vmem:[#allocation57_spill] sm:$0xff] %v10921_v9 }
 0x5e5   :  { %13900 = vst [vmem:[#allocation166_spill] sm:$0xff] %v10925_v26 }
 0x5e9   :  { %3810 = vmin.xlane.f32.xlu0 %v3809_v1  ;;  %3816 = vmin.xlane.f32.xlu2 %v3815_v59  ;;  %v3818_v1 = vsel %vm3446_vm2, %v3722_v63, inf  ;;  %v3824_v59 = vsel %vm3446_vm2, %v3724_v54, inf  ;;  %v3725_v54 = vsel %vm3660_vm8, %v10795_v5, 8.0  ;;  %vm3675_vm8 = vcmp.ge.f32.partialorder %v10461_v12, %v10889_v57 }
 0x5ea   :  { %3822 = vmin.xlane.f32.xlu1 %v3821_v56  ;;  %v3726_v56 = vsel %vm3661_vm7, %v10795_v5, 8.0  ;;  %v10927_v63 = vpop.xlane.xlu1 %3574  ;;  %vm3676_vm7 = vcmp.ge.f32.partialorder %v10491_v30, %v10903_v28 }
 0x5eb   :  { %v3830_v62 = vsel %vm3446_vm2, %v3726_v56, inf  ;;  %13901 = vst [vmem:[#allocation84_spill] sm:$0xff] %v10927_v63  ;;  %v3727_v56 = vsel %vm3662_vm9, %v10795_v5, 8.0  ;;  %v10939_v10 = vpop.xlane.xlu0 %3571  ;;  %vm3677_vm9 = vcmp.ge.f32.partialorder %v10513_v21, %v10891_v55 }
 0x5ec   :  { %13904 = vst [vmem:[#allocation119_spill] sm:$0xff] %v10939_v10  ;;  %v10943_v48 = vpop.xlane.xlu2 %3577 }
 0x5ed   :  { %13906 = vst [vmem:[#allocation16_spill] sm:$0xff] %v10943_v48 }
 0x5f1   :  { %3819 = vmin.xlane.f32.xlu0 %v3818_v1  ;;  %3825 = vmin.xlane.f32.xlu2 %v3824_v59  ;;  %v3827_v1 = vsel %vm3446_vm2, %v3725_v54, inf  ;;  %v3833_v59 = vsel %vm3446_vm2, %v3727_v56, inf  ;;  %v3728_v56 = vsel %vm3663_vm11, %v10795_v5, 8.0  ;;  %vm3678_vm11 = vcmp.ge.f32.partialorder %v10526_v17, %v10907_v16 }
 0x5f2   :  { %3831 = vmin.xlane.f32.xlu1 %v3830_v62  ;;  %v3729_v62 = vsel %vm3664_vm10, %v10795_v5, 8.0  ;;  %vm3679_vm10 = vcmp.ge.f32.partialorder %v10548_v33, %v10921_v9  ;;  %v13922_v33 = vld [vmem:[#allocation111_spill] sm:$0xff]  ;;  %v13923_v9 = vld [vmem:[#allocation104_spill] sm:$0xff] }
 0x5f3   :  { %v3839_v4 = vsel %vm3446_vm2, %v3729_v62, inf  ;;  %v3730_v62 = vsel %vm3665_vm12, %v10795_v5, 8.0  ;;  %vm3680_vm12 = vcmp.ge.f32.partialorder %v13922_v33, %v10909_v46  ;;  %v13929_v46 = vld [vmem:[#allocation107_spill] sm:$0xff] }
 0x5f4   :  { %v10957_v43 = vpop.xlane.xlu0 %3580 }
 0x5f5   :  { %13910 = vst [vmem:[#allocation174_spill] sm:$0xff] %v10957_v43 }
 0x5f9   :  { %3828 = vmin.xlane.f32.xlu0 %v3827_v1  ;;  %3834 = vmin.xlane.f32.xlu2 %v3833_v59  ;;  %v3836_v1 = vsel %vm3446_vm2, %v3728_v56, inf  ;;  %v3842_v59 = vsel %vm3446_vm2, %v3730_v62, inf  ;;  %v3731_v62 = vsel %vm3666_vm14, %v10795_v5, 8.0 }
 0x5fa   :  { %3840 = vmin.xlane.f32.xlu1 %v3839_v4  ;;  %v3732_v4 = vsel %vm3667_vm13, %v10795_v5, 8.0  ;;  %vm3682_vm13 = vcmp.ge.f32.partialorder %v13923_v9, %v10939_v10  ;;  %v13927_v9 = vld [vmem:[#allocation133_spill] sm:$0xff]  ;;  %v13928_v10 = vld [vmem:[#allocation158_spill] sm:$0xff] }
 0x5fb   :  { %v3848_v7 = vsel %vm3446_vm2, %v3732_v4, inf  ;;  %v3733_v4 = vsel %vm3668_vm15, %v10795_v5, 8.0  ;;  %vm3681_vm14 = vcmp.ge.f32.partialorder %v13927_v9, %v10925_v26  ;;  %vm3683_vm15 = vcmp.ge.f32.partialorder %v13928_v10, %v10927_v63 }
 0x5fc   :  { %v10945_v54 = vpop.xlane.xlu1 %3583 }
 0x5fd   :  { %13907 = vst [vmem:[#allocation173_spill] sm:$0xff] %v10945_v54 }
 0x601   :  { %3837 = vmin.xlane.f32.xlu0 %v3836_v1  ;;  %3843 = vmin.xlane.f32.xlu2 %v3842_v59  ;;  %v3845_v1 = vsel %vm3446_vm2, %v3731_v62, inf  ;;  %v3851_v59 = vsel %vm3446_vm2, %v3733_v4, inf  ;;  %v3734_v4 = vsel %vm3669_vm1, %v10795_v5, 8.0 }
 0x602   :  { %3849 = vmin.xlane.f32.xlu1 %v3848_v7  ;;  %v3735_v7 = vsel %vm3670_vm0, %v10795_v5, 8.0  ;;  %vm3685_vm0 = vcmp.ge.f32.partialorder %v13929_v46, %v10957_v43  ;;  %v13933_v46 = vld [vmem:[#allocation114_spill] sm:$0xff]  ;;  %v13934_v43 = vld [vmem:[#allocation48_spill] sm:$0xff] }
 0x603   :  { %v3857_v45 = vsel %vm3446_vm2, %v3735_v7, inf  ;;  %v3736_v7 = vsel %vm3671_vm3, %v10795_v5, 8.0  ;;  %vm3684_vm1 = vcmp.ge.f32.partialorder %v13933_v46, %v10943_v48  ;;  %vm3686_vm3 = vcmp.ge.f32.partialorder %v13934_v43, %v10945_v54 }
 0x604   :  { %v10961_v42 = vpop.xlane.xlu2 %3586  ;;  %v10963_v56 = vpop.xlane.xlu1 %3592 }
 0x605   :  { %13911 = vst [vmem:[#allocation175_spill] sm:$0xff] %v10961_v42 }
 0x606   :  { %13912 = vst [vmem:[#allocation176_spill] sm:$0xff] %v10963_v56 }
 0x609   :  { %3846 = vmin.xlane.f32.xlu0 %v3845_v1  ;;  %3852 = vmin.xlane.f32.xlu2 %v3851_v59  ;;  %v3854_v1 = vsel %vm3446_vm2, %v3734_v4, inf  ;;  %v3860_v59 = vsel %vm3446_vm2, %v3736_v7, inf  ;;  %v3737_v7 = vsel %vm3672_vm5, %v10795_v5, 8.0  ;;  %vm4026_vm5 = vcmask 76872  }
 0x60a   :  { %3858 = vmin.xlane.f32.xlu1 %v3857_v45  ;;  %v3738_v45 = vsel %vm3673_vm4, %v10795_v5, 8.0 }
 0x60b   :  { %v3866_v8 = vsel %vm3446_vm2, %v3738_v45, inf  ;;  %v3739_v45 = vsel %vm3674_vm6, %v10795_v5, 8.0  ;;  %vm3687_vm6 = vcmp.ge.f32.partialorder %v10700_v58, %v10961_v42 }
 0x60c   :  { %v10977_v15 = vpop.xlane.xlu0 %3589  ;;  %v10979_v49 = vpop.xlane.xlu2 %3595 }
 0x60d   :  { %13913 = vst [vmem:[#allocation177_spill] sm:$0xff] %v10977_v15  ;;  %v10981_v62 = vpop.xlane.xlu1 %3601  ;;  %vm3688_vm4 = vcmp.ge.f32.partialorder %v10721_v31, %v10977_v15 }
 0x60e   :  { %13914 = vst [vmem:[#allocation178_spill] sm:$0xff] %v10979_v49 }
 0x60f   :  { %13915 = vst [vmem:[#allocation179_spill] sm:$0xff] %v10981_v62 }
 0x611   :  { %3855 = vmin.xlane.f32.xlu0 %v3854_v1  ;;  %3861 = vmin.xlane.f32.xlu2 %v3860_v59  ;;  %v3863_v1 = vsel %vm3446_vm2, %v3737_v7, inf  ;;  %v3869_v59 = vsel %vm3446_vm2, %v3739_v45, inf  ;;  %v3740_v45 = vsel %vm3675_vm8, %v10795_v5, 8.0 }
 0x612   :  { %3867 = vmin.xlane.f32.xlu1 %v3866_v8  ;;  %v3741_v8 = vsel %vm3676_vm7, %v10795_v5, 8.0 }
 0x613   :  { %v3875_v24 = vsel %vm3446_vm2, %v3741_v8, inf  ;;  %v3742_v8 = vsel %vm3677_vm9, %v10795_v5, 8.0  ;;  %vm3690_vm9 = vcmp.ge.f32.partialorder %v9917_v39, %v10979_v49 }
 0x614   :  { %v10995_v40 = vpop.xlane.xlu0 %3598  ;;  %v10997_v29 = vpop.xlane.xlu2 %3604 }
 0x615   :  { %13916 = vst [vmem:[#allocation180_spill] sm:$0xff] %v10995_v40  ;;  %v10999_v4 = vpop.xlane.xlu1 %3610  ;;  %vm3691_vm8 = vcmp.ge.f32.partialorder %v9983_v32, %v10995_v40 }
 0x616   :  { %13917 = vst [vmem:[#allocation181_spill] sm:$0xff] %v10997_v29 }
 0x617   :  { %13918 = vst [vmem:[#allocation182_spill] sm:$0xff] %v10999_v4 }
 0x619   :  { %3864 = vmin.xlane.f32.xlu0 %v3863_v1  ;;  %3870 = vmin.xlane.f32.xlu2 %v3869_v59  ;;  %v3872_v1 = vsel %vm3446_vm2, %v3740_v45, inf  ;;  %v3878_v59 = vsel %vm3446_vm2, %v3742_v8, inf  ;;  %v3743_v8 = vsel %vm3678_vm11, %v10795_v5, 8.0 }
 0x61a   :  { %3876 = vmin.xlane.f32.xlu1 %v3875_v24  ;;  %v3744_v24 = vsel %vm3679_vm10, %v10795_v5, 8.0 }
 0x61b   :  { %v3884_v21 = vsel %vm3446_vm2, %v3744_v24, inf  ;;  %v3745_v24 = vsel %vm3680_vm12, %v10795_v5, 8.0 }
 0x61c   :  { %v11013_v30 = vpop.xlane.xlu0 %3607  ;;  %v11015_v28 = vpop.xlane.xlu2 %3613 }
 0x61d   :  { %13919 = vst [vmem:[#allocation183_spill] sm:$0xff] %v11013_v30  ;;  %v11017_v7 = vpop.xlane.xlu1 %3619 }
 0x61e   :  { %13920 = vst [vmem:[#allocation184_spill] sm:$0xff] %v11015_v28 }
 0x61f   :  { %13921 = vst [vmem:[#allocation185_spill] sm:$0xff] %v11017_v7 }
 0x621   :  { %3873 = vmin.xlane.f32.xlu0 %v3872_v1  ;;  %3879 = vmin.xlane.f32.xlu2 %v3878_v59  ;;  %v3881_v1 = vsel %vm3446_vm2, %v3743_v8, inf  ;;  %v3887_v59 = vsel %vm3446_vm2, %v3745_v24, inf  ;;  %v3746_v24 = vsel %vm3681_vm14, %v10795_v5, 8.0 }
 0x622   :  { %3885 = vmin.xlane.f32.xlu1 %v3884_v21  ;;  %v3747_v21 = vsel %vm3682_vm13, %v10795_v5, 8.0 }
 0x623   :  { %v3893_v33 = vsel %vm3446_vm2, %v3747_v21, inf  ;;  %v3748_v21 = vsel %vm3683_vm15, %v10795_v5, 8.0 }
 0x624   :  { %v11031_v55 = vpop.xlane.xlu0 %3616  ;;  %v11033_v50 = vpop.xlane.xlu2 %3622 }
 0x625   :  { %13924 = vst [vmem:[#allocation186_spill] sm:$0xff] %v11031_v55  ;;  %v11035_v45 = vpop.xlane.xlu1 %3628 }
 0x626   :  { %13925 = vst [vmem:[#allocation187_spill] sm:$0xff] %v11033_v50 }
 0x627   :  { %13926 = vst [vmem:[#allocation188_spill] sm:$0xff] %v11035_v45 }
 0x629   :  { %3882 = vmin.xlane.f32.xlu0 %v3881_v1  ;;  %3888 = vmin.xlane.f32.xlu2 %v3887_v59  ;;  %v3890_v1 = vsel %vm3446_vm2, %v3746_v24, inf  ;;  %v3896_v59 = vsel %vm3446_vm2, %v3748_v21, inf }
 0x62a   :  { %3894 = vmin.xlane.f32.xlu1 %v3893_v33  ;;  %v3750_v33 = vsel %vm3685_vm0, %v10795_v5, 8.0 }
 0x62b   :  { %v3902_v10 = vsel %vm3446_vm2, %v3750_v33, inf  ;;  %v3751_v33 = vsel %vm3686_vm3, %v10795_v5, 8.0  ;;  %vm3699_vm3 = vcmp.ge.f32.partialorder %v10318_v52, %v11033_v50 }
 0x62c   :  { %v11049_v17 = vpop.xlane.xlu0 %3625  ;;  %v11051_v16 = vpop.xlane.xlu2 %3631  ;;  %v3905_v31 = vsel %vm3446_vm2, %v3751_v33, inf  ;;  %v3752_v33 = vsel %vm3687_vm6, %v10795_v5, 8.0 }
 0x62d   :  { %13930 = vst [vmem:[#allocation189_spill] sm:$0xff] %v11049_v17  ;;  %v11053_v8 = vpop.xlane.xlu1 %3637 }
 0x62e   :  { %13931 = vst [vmem:[#allocation190_spill] sm:$0xff] %v11051_v16 }
 0x62f   :  { %13932 = vst [vmem:[#allocation191_spill] sm:$0xff] %v11053_v8 }
 0x631   :  { %3891 = vmin.xlane.f32.xlu0 %v3890_v1  ;;  %3897 = vmin.xlane.f32.xlu2 %v3896_v59  ;;  %v3749_v1 = vsel %vm3684_vm1, %v10795_v5, 8.0  ;;  %v3753_v59 = vsel %vm3688_vm4, %v10795_v5, 8.0  ;;  %vm3700_vm1 = vcmp.ge.f32.partialorder %v10323_v19, %v11049_v17  ;;  %vm3701_vm4 = vcmp.ge.f32.partialorder %v10391_v3, %v11035_v45  ;;  %v13944_v3 = vld [vmem:[#allocation4_spill] sm:$0xff]  ;;  %v13945_v45 = vld [vmem:[#allocation75_spill] sm:$0xff] }
 0x632   :  { %3903 = vmin.xlane.f32.xlu1 %v3902_v10  ;;  %v3911_v15 = vsel %vm3446_vm2, %v3753_v59, inf  ;;  %v4221_v19 = vsub.f32 %v13945_v45, %v13944_v3  ;;  %v13949_v45 = vld [vmem:[#allocation25_spill] sm:$0xff] }
 0x634   :  { %v11067_v63 = vpop.xlane.xlu0 %3634  ;;  %v3772_v24 = vpop.xlane.xlu2 %3771 }
 0x635   :  { %13935 = vst [vmem:[#allocation192_spill] sm:$0xff] %v11067_v63  ;;  %v3962_v9 = vpack.c.bf16 %v3772_v24, %v3772_v24  ;;  %v3778_v21 = vpop.xlane.xlu1 %3777  ;;  %v3899_v24 = vsel %vm3446_vm2, %v3749_v1, inf  ;;  %vm3703_vm6 = vcmp.ge.f32.partialorder %v10455_v20, %v11067_v63 }
 0x636   :  { %v3964_v10 = vpack.c.bf16 %v3778_v21, %v3778_v21  ;;  %v13936_v21 = vld [vmem:[#allocation89_spill] sm:$0xff] }
 0x637   :  { %4027 = vst.msk [vmem:[%s13022_s11] sm:$0xf] %vm4026_vm5, %v3962_v9  ;;  %vm3689_vm7 = vcmp.ge.f32.partialorder %v13936_v21, %v10963_v56 }
 0x638   :  { %4029 = vst.msk [vmem:[%s13022_s11 + $0x8] sm:$0xf] %vm4026_vm5, %v3964_v10  ;;  %v3754_v59 = vsel %vm3689_vm7, %v10795_v5, 8.0 }
 0x639   :  { %3900 = vmin.xlane.f32.xlu0 %v3899_v24  ;;  %3906 = vmin.xlane.f32.xlu2 %v3905_v31  ;;  %v3908_v24 = vsel %vm3446_vm2, %v3752_v33, inf }
 0x63a   :  { %3912 = vmin.xlane.f32.xlu1 %v3911_v15  ;;  %v3756_v15 = vsel %vm3691_vm8, %v10795_v5, 8.0 }
 0x63c   :  { %v3775_v9 = vpop.xlane.xlu0 %3774  ;;  %v3781_v10 = vpop.xlane.xlu2 %3780 }
 0x63d   :  { %v3963_v43 = vpack.c.bf16 %v3775_v9, %v3775_v9  ;;  %v3965_v1 = vpack.c.bf16 %v3781_v10, %v3781_v10  ;;  %v3787_v54 = vpop.xlane.xlu1 %3786  ;;  %v3914_v9 = vsel %vm3446_vm2, %v3754_v59, inf  ;;  %v13938_v10 = vld [vmem:[#allocation88_spill] sm:$0xff] }
 0x63e   :  { %v3967_v31 = vpack.c.bf16 %v3787_v54, %v3787_v54  ;;  %v3920_v54 = vsel %vm3446_vm2, %v3756_v15, inf  ;;  %vm3694_vm11 = vcmp.ge.f32.partialorder %v13938_v10, %v11013_v30 }
 0x63f   :  { %4028 = vst.msk [vmem:[%s13022_s11 + $0x4] sm:$0xf] %vm4026_vm5, %v3963_v43  ;;  %v13937_v43 = vld [vmem:[#allocation148_spill] sm:$0xff] }
 0x640   :  { %4030 = vst.msk [vmem:[%s13022_s11 + $0xc] sm:$0xf] %vm4026_vm5, %v3965_v1  ;;  %vm3692_vm10 = vcmp.ge.f32.partialorder %v13937_v43, %v10981_v62 }
 0x641   :  { %4032 = vst.msk [vmem:[%s13022_s11 + $0x14] sm:$0xf] %vm4026_vm5, %v3967_v31  ;;  %3909 = vmin.xlane.f32.xlu0 %v3908_v24  ;;  %3915 = vmin.xlane.f32.xlu2 %v3914_v9  ;;  %v3755_v31 = vsel %vm3690_vm9, %v10795_v5, 8.0  ;;  %v3757_v15 = vsel %vm3692_vm10, %v10795_v5, 8.0  ;;  %v3759_v9 = vsel %vm3694_vm11, %v10795_v5, 8.0 }
 0x642   :  { %3921 = vmin.xlane.f32.xlu1 %v3920_v54  ;;  %v3917_v54 = vsel %vm3446_vm2, %v3755_v31, inf }
 0x644   :  { %v3784_v1 = vpop.xlane.xlu0 %3783  ;;  %v3790_v33 = vpop.xlane.xlu2 %3789 }
 0x645   :  { %v3966_v59 = vpack.c.bf16 %v3784_v1, %v3784_v1  ;;  %v3968_v32 = vpack.c.bf16 %v3790_v33, %v3790_v33  ;;  %v3796_v40 = vpop.xlane.xlu1 %3795  ;;  %v3923_v1 = vsel %vm3446_vm2, %v3757_v15, inf  ;;  %v13939_v33 = vld [vmem:[#allocation22_spill] sm:$0xff] }
 0x646   :  { %v3970_v24 = vpack.c.bf16 %v3796_v40, %v3796_v40  ;;  %v3929_v40 = vsel %vm3446_vm2, %v3759_v9, inf  ;;  %vm3693_vm12 = vcmp.ge.f32.partialorder %v13939_v33, %v10997_v29 }
 0x647   :  { %4031 = vst.msk [vmem:[%s13022_s11 + $0x10] sm:$0xf] %vm4026_vm5, %v3966_v59  ;;  %v13940_v59 = vld [vmem:[#allocation56_spill] sm:$0xff] }
 0x648   :  { %4033 = vst.msk [vmem:[%s13022_s11 + $0x18] sm:$0xf] %vm4026_vm5, %v3968_v32  ;;  %vm3695_vm13 = vcmp.ge.f32.partialorder %v13940_v59, %v10999_v4  ;;  %v13941_v32 = vld [vmem:[#allocation121_spill] sm:$0xff] }
 0x649   :  { %4035 = vst.msk [vmem:[%s13022_s11 + $0x20] sm:$0xf] %vm4026_vm5, %v3970_v24  ;;  %3918 = vmin.xlane.f32.xlu0 %v3917_v54  ;;  %3924 = vmin.xlane.f32.xlu2 %v3923_v1  ;;  %vm3697_vm14 = vcmp.ge.f32.partialorder %v13941_v32, %v11031_v55  ;;  %v3758_v24 = vsel %vm3693_vm12, %v10795_v5, 8.0  ;;  %v3760_v9 = vsel %vm3695_vm13, %v10795_v5, 8.0 }
 0x64a   :  { %3930 = vmin.xlane.f32.xlu1 %v3929_v40  ;;  %v3762_v1 = vsel %vm3697_vm14, %v10795_v5, 8.0  ;;  %v3926_v40 = vsel %vm3446_vm2, %v3758_v24, inf }
 0x64c   :  { %v3793_v31 = vpop.xlane.xlu0 %3792  ;;  %v3799_v15 = vpop.xlane.xlu2 %3798 }
 0x64d   :  { %v3969_v10 = vpack.c.bf16 %v3793_v31, %v3793_v31  ;;  %v3971_v30 = vpack.c.bf16 %v3799_v15, %v3799_v15  ;;  %v3805_v43 = vpop.xlane.xlu1 %3804  ;;  %v3932_v31 = vsel %vm3446_vm2, %v3760_v9, inf  ;;  %v13943_v15 = vld [vmem:[#allocation40_spill] sm:$0xff] }
 0x64e   :  { %v3973_v54 = vpack.c.bf16 %v3805_v43, %v3805_v43  ;;  %v3938_v43 = vsel %vm3446_vm2, %v3762_v1, inf  ;;  %vm3698_vm0 = vcmp.ge.f32.partialorder %v13943_v15, %v11017_v7 }
 0x64f   :  { %4034 = vst.msk [vmem:[%s13022_s11 + $0x1c] sm:$0xf] %vm4026_vm5, %v3969_v10  ;;  %v13942_v10 = vld [vmem:[#allocation132_spill] sm:$0xff]  ;;  %v3763_v1 = vsel %vm3698_vm0, %v10795_v5, 8.0 }
 0x650   :  { %4036 = vst.msk [vmem:[%s13022_s11 + $0x24] sm:$0xf] %vm4026_vm5, %v3971_v30  ;;  %vm3696_vm15 = vcmp.ge.f32.partialorder %v13942_v10, %v11015_v28 }
 0x651   :  { %4038 = vst.msk [vmem:[%s13022_s11 + $0x2c] sm:$0xf] %vm4026_vm5, %v3973_v54  ;;  %3927 = vmin.xlane.f32.xlu0 %v3926_v40  ;;  %3933 = vmin.xlane.f32.xlu2 %v3932_v31  ;;  %v3761_v54 = vsel %vm3696_vm15, %v10795_v5, 8.0  ;;  %v3765_v31 = vsel %vm3700_vm1, %v10795_v5, 8.0 }
 0x652   :  { %3939 = vmin.xlane.f32.xlu1 %v3938_v43  ;;  %v4220_v43 = vsub.f32 %v9423_v36, %v10650_v47  ;;  %v3768_v36 = vsel %vm3703_vm6, %v10795_v5, 8.0 }
 0x654   :  { %v3802_v30 = vpop.xlane.xlu0 %3801  ;;  %v3808_v24 = vpop.xlane.xlu2 %3807 }
 0x655   :  { %v3972_v9 = vpack.c.bf16 %v3802_v30, %v3802_v30  ;;  %v3974_v32 = vpack.c.bf16 %v3808_v24, %v3808_v24  ;;  %v3814_v55 = vpop.xlane.xlu1 %3813  ;;  %v3935_v30 = vsel %vm3446_vm2, %v3761_v54, inf  ;;  %v3941_v24 = vsel %vm3446_vm2, %v3763_v1, inf }
 0x656   :  { %v3976_v40 = vpack.c.bf16 %v3814_v55, %v3814_v55  ;;  %v3947_v55 = vsel %vm3446_vm2, %v3765_v31, inf  ;;  %v3766_v31 = vsel %vm3701_vm4, %v10795_v5, 8.0 }
 0x657   :  { %4037 = vst.msk [vmem:[%s13022_s11 + $0x28] sm:$0xf] %vm4026_vm5, %v3972_v9 }
 0x658   :  { %4039 = vst.msk [vmem:[%s13022_s11 + $0x30] sm:$0xf] %vm4026_vm5, %v3974_v32  ;;  %v4285_v32 = vmul.f32 1.442695, %v4220_v43  ;;  %v4223_v43 = vsub.f32 %v9504_v22, %v10673_v61 }
 0x659   :  { %4041 = vst.msk [vmem:[%s13022_s11 + $0x38] sm:$0xf] %vm4026_vm5, %v3976_v40  ;;  %3936 = vmin.xlane.f32.xlu0 %v3935_v30  ;;  %3942 = vmin.xlane.f32.xlu2 %v3941_v24  ;;  %v3764_v30 = vsel %vm3699_vm3, %v10795_v5, 8.0  ;;  %v4219_v24 = vsub.f32 %v9420_v53, %v10622_v0 }
 0x65a   :  { %3948 = vmin.xlane.f32.xlu1 %v3947_v55  ;;  %6985 = vpow2.f32 %v4285_v32  ;;  %v3956_v32 = vsel %vm3446_vm2, %v3768_v36, inf  ;;  %v4291_v61 = vmul.f32 1.442695, %v4223_v43 }
 0x65c   :  { %v3811_v9 = vpop.xlane.xlu0 %3810  ;;  %v3817_v54 = vpop.xlane.xlu2 %3816 }
 0x65d   :  { %v3975_v1 = vpack.c.bf16 %v3811_v9, %v3811_v9  ;;  %v3977_v47 = vpack.c.bf16 %v3817_v54, %v3817_v54  ;;  %v3823_v40 = vpop.xlane.xlu1 %3822  ;;  %v3944_v9 = vsel %vm3446_vm2, %v3764_v30, inf  ;;  %v3950_v54 = vsel %vm3446_vm2, %v3766_v31, inf }
 0x65e   :  { %v3979_v55 = vpack.c.bf16 %v3823_v40, %v3823_v40  ;;  %v13946_v40 = vld [vmem:[#allocation32_spill] sm:$0xff]  ;;  %v4287_v30 = vmul.f32 1.442695, %v4221_v19 }
 0x65f   :  { %4040 = vst.msk [vmem:[%s13022_s11 + $0x34] sm:$0xf] %vm4026_vm5, %v3975_v1  ;;  %v4283_v1 = vmul.f32 1.442695, %v4219_v24  ;;  %vm3702_vm7 = vcmp.ge.f32.partialorder %v13946_v40, %v11051_v16  ;;  %v4224_v24 = vsub.f32 %v9507_v51, %v10702_v11 }
 0x660   :  { %4042 = vst.msk [vmem:[%s13022_s11 + $0x3c] sm:$0xf] %vm4026_vm5, %v3977_v47  ;;  %v13947_v47 = vld [vmem:[#allocation46_spill] sm:$0xff] }
 0x661   :  { %4044 = vst.msk [vmem:[%s13022_s11 + $0x44] sm:$0xf] %vm4026_vm5, %v3979_v55  ;;  %3945 = vmin.xlane.f32.xlu0 %v3944_v9  ;;  %3951 = vmin.xlane.f32.xlu2 %v3950_v54  ;;  %vm3704_vm8 = vcmp.ge.f32.partialorder %v13947_v47, %v11053_v8  ;;  %v3767_v55 = vsel %vm3702_vm7, %v10795_v5, 8.0  ;;  %v6986_v9 = vpop.eup %6985  ;;  %6987 = vpow2.f32 %v4283_v1 }
 0x662   :  { %3957 = vmin.xlane.f32.xlu1 %v3956_v32  ;;  %v3769_v36 = vsel %vm3704_vm8, %v10795_v5, 8.0  ;;  %6989 = vpow2.f32 %v4287_v30  ;;  %v13948_v32 = vld [vmem:[#allocation157_spill] sm:$0xff] }
 0x663   :  { %v4222_v19 = vsub.f32 %v13949_v45, %v13948_v32  ;;  %6991 = vpow2.f32 %v4291_v61  ;;  %v3959_v5 = vsel %vm3446_vm2, %v3769_v36, inf  ;;  %v4293_v61 = vmul.f32 1.442695, %v4224_v24 }
 0x664   :  { %v3820_v31 = vpop.xlane.xlu0 %3819  ;;  %v3826_v3 = vpop.xlane.xlu2 %3825 }
 0x665   :  { %v3978_v0 = vpack.c.bf16 %v3820_v31, %v3820_v31  ;;  %v3980_v22 = vpack.c.bf16 %v3826_v3, %v3826_v3  ;;  %v3832_v53 = vpop.xlane.xlu1 %3831  ;;  %v4226_v3 = vsub.f32 %v9554_v60, %v10704_v6  ;;  %v4289_v43 = vmul.f32 1.442695, %v4222_v19  ;;  %v13950_v60 = vld [vmem:[#allocation24_spill] sm:$0xff] }
 0x666   :  { %v3982_v54 = vpack.c.bf16 %v3832_v53, %v3832_v53  ;;  %v3953_v53 = vsel %vm3446_vm2, %v3767_v55, inf  ;;  %6993 = vpow2.f32 %v4293_v61  ;;  %v4229_v19 = vsub.f32 %v9649_v34, %v10737_v2 }
 0x667   :  { %4043 = vst.msk [vmem:[%s13022_s11 + $0x40] sm:$0xf] %vm4026_vm5, %v3978_v0  ;;  %v4414_v0 = vsel %vm3446_vm2, %v6986_v9, 0.0  ;;  %v6988_v1 = vpop.eup %6987  ;;  %v4297_v30 = vmul.f32 1.442695, %v4226_v3  ;;  %6995 = vpow2.f32 %v4289_v43  ;;  %v13951_v9 = vld [vmem:[#allocation159_spill] sm:$0xff] }
 0x668   :  { %4045 = vst.msk [vmem:[%s13022_s11 + $0x48] sm:$0xf] %vm4026_vm5, %v3980_v22  ;;  %v6990_v6 = vpop.eup %6989  ;;  %v4411_v3 = vsel %vm3446_vm2, %v6988_v1, 0.0 }
 0x669   :  { %4047 = vst.msk [vmem:[%s13022_s11 + $0x50] sm:$0xf] %vm4026_vm5, %v3982_v54  ;;  %3954 = vmin.xlane.f32.xlu0 %v3953_v53  ;;  %3960 = vmin.xlane.f32.xlu2 %v3959_v5  ;;  %v6992_v32 = vpop.eup %6991  ;;  %v4227_v54 = vsub.f32 %v13950_v60, %v10731_v35  ;;  %v13952_v5 = vld [vmem:[#allocation77_spill] sm:$0xff]  ;;  %6997 = vpow2.f32 %v4297_v30 }
 0x66a   :  { %4415 = vadd.xlane.f32.xlu1 %v4414_v0  ;;  %v4225_v24 = vsub.f32 %v13952_v5, %v13951_v9  ;;  %v4417_v0 = vsel %vm3446_vm2, %v6990_v6, 0.0  ;;  %v4423_v61 = vsel %vm3446_vm2, %v6992_v32, 0.0  ;;  %v13953_v9 = vld [vmem:[#allocation83_spill] sm:$0xff] }
 0x66b   :  { %v4299_v43 = vmul.f32 1.442695, %v4227_v54  ;;  %v13954_v32 = vld [vmem:[#allocation15_spill] sm:$0xff] }
 0x66c   :  { %v3829_v31 = vpop.xlane.xlu0 %3828  ;;  %v3835_v22 = vpop.xlane.xlu2 %3834  ;;  %v4295_v30 = vmul.f32 1.442695, %v4225_v24  ;;  %v13956_v24 = vld [vmem:[#allocation55_spill] sm:$0xff] }
 0x66d   :  { %v3981_v55 = vpack.c.bf16 %v3829_v31, %v3829_v31  ;;  %v3983_v11 = vpack.c.bf16 %v3835_v22, %v3835_v22  ;;  %v3841_v36 = vpop.xlane.xlu1 %3840  ;;  %v6994_v31 = vpop.eup %6993  ;;  %v4303_v22 = vmul.f32 1.442695, %v4229_v19  ;;  %6999 = vpow2.f32 %v4299_v43  ;;  %v13957_v19 = vld [vmem:[#allocation143_spill] sm:$0xff] }
 0x66e   :  { %v3985_v53 = vpack.c.bf16 %v3841_v36, %v3841_v36  ;;  %v6996_v36 = vpop.eup %6995  ;;  %7001 = vpow2.f32 %v4295_v30  ;;  %v4426_v43 = vsel %vm3446_vm2, %v6994_v31, 0.0 }
 0x66f   :  { %4046 = vst.msk [vmem:[%s13022_s11 + $0x4c] sm:$0xf] %vm4026_vm5, %v3981_v55  ;;  %v6998_v35 = vpop.eup %6997  ;;  %7003 = vpow2.f32 %v4303_v22 }
 0x670   :  { %4048 = vst.msk [vmem:[%s13022_s11 + $0x54] sm:$0xf] %vm4026_vm5, %v3983_v11  ;;  %v4432_v30 = vsel %vm3446_vm2, %v6998_v35, 0.0  ;;  %v13960_v35 = vld [vmem:[#allocation162_spill] sm:$0xff] }
 0x671   :  { %4050 = vst.msk [vmem:[%s13022_s11 + $0x5c] sm:$0xf] %vm4026_vm5, %v3985_v53  ;;  %4412 = vadd.xlane.f32.xlu0 %v4411_v3  ;;  %4418 = vadd.xlane.f32.xlu2 %v4417_v0  ;;  %v4230_v53 = vsub.f32 %v13953_v9, %v10758_v37  ;;  %v13955_v3 = vld [vmem:[#allocation8_spill] sm:$0xff]  ;;  %v4232_v0 = vsub.f32 %v13957_v19, %v13956_v24 }
 0x672   :  { %4424 = vadd.xlane.f32.xlu1 %v4423_v61  ;;  %v4228_v54 = vsub.f32 %v13955_v3, %v13954_v32  ;;  %v4420_v61 = vsel %vm3446_vm2, %v6996_v36, 0.0  ;;  %v13958_v19 = vld [vmem:[#allocation120_spill] sm:$0xff]  ;;  %v13959_v3 = vld [vmem:[#allocation13_spill] sm:$0xff] }
 0x673   :  { %v4305_v22 = vmul.f32 1.442695, %v4230_v53 }
 0x674   :  { %v3838_v55 = vpop.xlane.xlu0 %3837  ;;  %v3844_v11 = vpop.xlane.xlu2 %3843 }
 0x675   :  { %v3984_v1 = vpack.c.bf16 %v3838_v55, %v3838_v55  ;;  %v3986_v2 = vpack.c.bf16 %v3844_v11, %v3844_v11  ;;  %v3850_v6 = vpop.xlane.xlu1 %3849  ;;  %v4301_v55 = vmul.f32 1.442695, %v4228_v54  ;;  %v7000_v11 = vpop.eup %6999  ;;  %7005 = vpow2.f32 %v4305_v22  ;;  %v13962_v54 = vld [vmem:[#allocation51_spill] sm:$0xff] }
 0x676   :  { %v3988_v34 = vpack.c.bf16 %v3850_v6, %v3850_v6  ;;  %v7002_v24 = vpop.eup %7001  ;;  %v4435_v22 = vsel %vm3446_vm2, %v7000_v11, 0.0 }
 0x677   :  { %4049 = vst.msk [vmem:[%s13022_s11 + $0x58] sm:$0xf] %vm4026_vm5, %v3984_v1  ;;  %v4309_v1 = vmul.f32 1.442695, %v4232_v0  ;;  %v7004_v32 = vpop.eup %7003  ;;  %7007 = vpow2.f32 %v4301_v55  ;;  %v13963_v0 = vld [vmem:[#allocation146_spill] sm:$0xff] }
 0x678   :  { %4051 = vst.msk [vmem:[%s13022_s11 + $0x60] sm:$0xf] %vm4026_vm5, %v3986_v2  ;;  %v4441_v55 = vsel %vm3446_vm2, %v7004_v32, 0.0  ;;  %v13966_v32 = vld [vmem:[#allocation44_spill] sm:$0xff] }
 0x679   :  { %4053 = vst.msk [vmem:[%s13022_s11 + $0x68] sm:$0xf] %vm4026_vm5, %v3988_v34  ;;  %4421 = vadd.xlane.f32.xlu0 %v4420_v61  ;;  %4427 = vadd.xlane.f32.xlu2 %v4426_v43  ;;  %v4233_v34 = vsub.f32 %v13959_v3, %v13958_v19  ;;  %v13961_v61 = vld [vmem:[#allocation23_spill] sm:$0xff]  ;;  %7009 = vpow2.f32 %v4309_v1  ;;  %v4235_v43 = vsub.f32 %v13963_v0, %v13962_v54  ;;  %v13964_v0 = vld [vmem:[#allocation113_spill] sm:$0xff] }
 0x67a   :  { %4433 = vadd.xlane.f32.xlu1 %v4432_v30  ;;  %v4231_v53 = vsub.f32 %v13961_v61, %v13960_v35  ;;  %v4429_v30 = vsel %vm3446_vm2, %v7002_v24, 0.0  ;;  %v13965_v61 = vld [vmem:[#allocation31_spill] sm:$0xff] }
 0x67b   :  { %v4311_v1 = vmul.f32 1.442695, %v4233_v34 }
 0x67c   :  { %v3847_v6 = vpop.xlane.xlu0 %3846  ;;  %v3853_v2 = vpop.xlane.xlu2 %3852 }
 0x67d   :  { %v3987_v36 = vpack.c.bf16 %v3847_v6, %v3847_v6  ;;  %v3989_v37 = vpack.c.bf16 %v3853_v2, %v3853_v2  ;;  %v3859_v31 = vpop.xlane.xlu1 %3858  ;;  %v4307_v6 = vmul.f32 1.442695, %v4231_v53  ;;  %v7006_v2 = vpop.eup %7005  ;;  %7011 = vpow2.f32 %v4311_v1  ;;  %v13968_v53 = vld [vmem:[#allocation2_spill] sm:$0xff] }
 0x67e   :  { %v3991_v9 = vpack.c.bf16 %v3859_v31, %v3859_v31  ;;  %v7008_v54 = vpop.eup %7007  ;;  %v4444_v1 = vsel %vm3446_vm2, %v7006_v2, 0.0 }
 0x67f   :  { %4052 = vst.msk [vmem:[%s13022_s11 + $0x64] sm:$0xf] %vm4026_vm5, %v3987_v36  ;;  %v4315_v36 = vmul.f32 1.442695, %v4235_v43  ;;  %v7010_v35 = vpop.eup %7009  ;;  %7013 = vpow2.f32 %v4307_v6  ;;  %v13969_v43 = vld [vmem:[#allocation145_spill] sm:$0xff] }
 0x680   :  { %4054 = vst.msk [vmem:[%s13022_s11 + $0x6c] sm:$0xf] %vm4026_vm5, %v3989_v37  ;;  %v4450_v6 = vsel %vm3446_vm2, %v7010_v35, 0.0  ;;  %v13972_v35 = vld [vmem:[#allocation161_spill] sm:$0xff] }
 0x681   :  { %4056 = vst.msk [vmem:[%s13022_s11 + $0x74] sm:$0xf] %vm4026_vm5, %v3991_v9  ;;  %4430 = vadd.xlane.f32.xlu0 %v4429_v30  ;;  %4436 = vadd.xlane.f32.xlu2 %v4435_v22  ;;  %v4236_v9 = vsub.f32 %v13965_v61, %v13964_v0  ;;  %v13967_v30 = vld [vmem:[#allocation82_spill] sm:$0xff]  ;;  %7015 = vpow2.f32 %v4315_v36  ;;  %v4238_v22 = vsub.f32 %v13969_v43, %v13968_v53 }
 0x682   :  { %4442 = vadd.xlane.f32.xlu1 %v4441_v55  ;;  %v4234_v34 = vsub.f32 %v13967_v30, %v13966_v32  ;;  %v4438_v55 = vsel %vm3446_vm2, %v7008_v54, 0.0  ;;  %v13970_v43 = vld [vmem:[#allocation58_spill] sm:$0xff]  ;;  %v13971_v30 = vld [vmem:[#allocation85_spill] sm:$0xff] }
 0x683   :  { %v4317_v36 = vmul.f32 1.442695, %v4236_v9 }
 0x684   :  { %v3856_v31 = vpop.xlane.xlu0 %3855  ;;  %v3862_v37 = vpop.xlane.xlu2 %3861 }
 0x685   :  { %v3990_v24 = vpack.c.bf16 %v3856_v31, %v3856_v31  ;;  %v3992_v19 = vpack.c.bf16 %v3862_v37, %v3862_v37  ;;  %v3868_v11 = vpop.xlane.xlu1 %3867  ;;  %v4313_v31 = vmul.f32 1.442695, %v4234_v34  ;;  %v7012_v37 = vpop.eup %7011  ;;  %7017 = vpow2.f32 %v4317_v36  ;;  %v13974_v34 = vld [vmem:[#allocation118_spill] sm:$0xff] }
 0x686   :  { %v3994_v3 = vpack.c.bf16 %v3868_v11, %v3868_v11  ;;  %v7014_v53 = vpop.eup %7013 }
 0x687   :  { %4055 = vst.msk [vmem:[%s13022_s11 + $0x70] sm:$0xf] %vm4026_vm5, %v3990_v24  ;;  %v4321_v24 = vmul.f32 1.442695, %v4238_v22  ;;  %v7016_v32 = vpop.eup %7015  ;;  %7019 = vpow2.f32 %v4313_v31  ;;  %v4241_v22 = vsub.f32 %v13974_v34, %v10811_v44  ;;  %v13976_v34 = vld [vmem:[#allocation129_spill] sm:$0xff] }
 0x688   :  { %4057 = vst.msk [vmem:[%s13022_s11 + $0x78] sm:$0xf] %vm4026_vm5, %v3992_v19  ;;  %v4459_v36 = vsel %vm3446_vm2, %v7016_v32, 0.0  ;;  %v13977_v32 = vld [vmem:[#allocation9_spill] sm:$0xff] }
 0x689   :  { %4059 = vst.msk [vmem:[%s13022_s11 + $0x80] sm:$0xf] %vm4026_vm5, %v3994_v3  ;;  %4439 = vadd.xlane.f32.xlu0 %v4438_v55  ;;  %4445 = vadd.xlane.f32.xlu2 %v4444_v1  ;;  %v4239_v3 = vsub.f32 %v13971_v30, %v13970_v43  ;;  %v13973_v55 = vld [vmem:[#allocation27_spill] sm:$0xff]  ;;  %7021 = vpow2.f32 %v4321_v24  ;;  %v4447_v1 = vsel %vm3446_vm2, %v7014_v53, 0.0 }
 0x68a   :  { %4451 = vadd.xlane.f32.xlu1 %v4450_v6  ;;  %v4237_v9 = vsub.f32 %v13973_v55, %v13972_v35  ;;  %v4453_v6 = vsel %vm3446_vm2, %v7012_v37, 0.0  ;;  %v13975_v35 = vld [vmem:[#allocation163_spill] sm:$0xff] }
 0x68b   :  { %v4323_v31 = vmul.f32 1.442695, %v4239_v3 }
 0x68c   :  { %v3865_v11 = vpop.xlane.xlu0 %3864  ;;  %v3871_v19 = vpop.xlane.xlu2 %3870  ;;  %v4319_v24 = vmul.f32 1.442695, %v4237_v9  ;;  %v4244_v9 = vsub.f32 %v13908_v14, %v10835_v25 }
 0x68d   :  { %v3993_v54 = vpack.c.bf16 %v3865_v11, %v3865_v11  ;;  %v3995_v0 = vpack.c.bf16 %v3871_v19, %v3871_v19  ;;  %v3877_v2 = vpop.xlane.xlu1 %3876  ;;  %v7018_v11 = vpop.eup %7017  ;;  %v4327_v19 = vmul.f32 1.442695, %v4241_v22  ;;  %7023 = vpow2.f32 %v4323_v31 }
 0x68e   :  { %v3997_v61 = vpack.c.bf16 %v3877_v2, %v3877_v2  ;;  %v7020_v2 = vpop.eup %7019  ;;  %7025 = vpow2.f32 %v4319_v24 }
 0x68f   :  { %4058 = vst.msk [vmem:[%s13022_s11 + $0x7c] sm:$0xf] %vm4026_vm5, %v3993_v54  ;;  %v7022_v43 = vpop.eup %7021  ;;  %7027 = vpow2.f32 %v4327_v19  ;;  %v4456_v22 = vsel %vm3446_vm2, %v7020_v2, 0.0 }
 0x690   :  { %4060 = vst.msk [vmem:[%s13022_s11 + $0x84] sm:$0xf] %vm4026_vm5, %v3995_v0 }
 0x691   :  { %4062 = vst.msk [vmem:[%s13022_s11 + $0x8c] sm:$0xf] %vm4026_vm5, %v3997_v61  ;;  %4448 = vadd.xlane.f32.xlu0 %v4447_v1  ;;  %4454 = vadd.xlane.f32.xlu2 %v4453_v6  ;;  %v4242_v61 = vsub.f32 %v13976_v34, %v13975_v35  ;;  %v13978_v1 = vld [vmem:[#allocation60_spill] sm:$0xff]  ;;  %v4462_v6 = vsel %vm3446_vm2, %v7018_v11, 0.0  ;;  %v13979_v35 = vld [vmem:[#allocation54_spill] sm:$0xff] }
 0x692   :  { %4460 = vadd.xlane.f32.xlu1 %v4459_v36  ;;  %v4240_v3 = vsub.f32 %v13978_v1, %v13977_v32  ;;  %v4468_v36 = vsel %vm3446_vm2, %v7022_v43, 0.0  ;;  %v13980_v32 = vld [vmem:[#allocation99_spill] sm:$0xff]  ;;  %v13981_v43 = vld [vmem:[#allocation164_spill] sm:$0xff] }
 0x693   :  { %v4329_v31 = vmul.f32 1.442695, %v4242_v61  ;;  %v7024_v19 = vpop.eup %7023 }
 0x694   :  { %v3874_v54 = vpop.xlane.xlu0 %3873  ;;  %v3880_v0 = vpop.xlane.xlu2 %3879  ;;  %v4325_v24 = vmul.f32 1.442695, %v4240_v3  ;;  %v4247_v3 = vsub.f32 %v10228_v23, %v10853_v38 }
 0x695   :  { %v3996_v53 = vpack.c.bf16 %v3874_v54, %v3874_v54  ;;  %v3998_v44 = vpack.c.bf16 %v3880_v0, %v3880_v0  ;;  %v3886_v37 = vpop.xlane.xlu1 %3885  ;;  %v4333_v54 = vmul.f32 1.442695, %v4244_v9  ;;  %7029 = vpow2.f32 %v4329_v31 }
 0x696   :  { %v4000_v55 = vpack.c.bf16 %v3886_v37, %v3886_v37  ;;  %7031 = vpow2.f32 %v4325_v24 }
 0x697   :  { %4061 = vst.msk [vmem:[%s13022_s11 + $0x88] sm:$0xf] %vm4026_vm5, %v3996_v53  ;;  %v7026_v53 = vpop.eup %7025  ;;  %7033 = vpow2.f32 %v4333_v54 }
 0x698   :  { %4063 = vst.msk [vmem:[%s13022_s11 + $0x90] sm:$0xf] %vm4026_vm5, %v3998_v44  ;;  %v7028_v25 = vpop.eup %7027  ;;  %v4465_v9 = vsel %vm3446_vm2, %v7026_v53, 0.0 }
 0x699   :  { %4065 = vst.msk [vmem:[%s13022_s11 + $0x98] sm:$0xf] %vm4026_vm5, %v4000_v55  ;;  %4457 = vadd.xlane.f32.xlu0 %v4456_v22  ;;  %4463 = vadd.xlane.f32.xlu2 %v4462_v6  ;;  %v4243_v55 = vsub.f32 %v13980_v32, %v13979_v35  ;;  %v13982_v22 = vld [vmem:[#allocation37_spill] sm:$0xff]  ;;  %v4471_v6 = vsel %vm3446_vm2, %v7024_v19, 0.0 }
 0x69a   :  { %4469 = vadd.xlane.f32.xlu1 %v4468_v36  ;;  %v4245_v61 = vsub.f32 %v13982_v22, %v13981_v43  ;;  %v4477_v36 = vsel %vm3446_vm2, %v7028_v25, 0.0  ;;  %v13983_v43 = vld [vmem:[#allocation33_spill] sm:$0xff]  ;;  %v13984_v25 = vld [vmem:[#allocation112_spill] sm:$0xff] }
 0x69b   :  { %v4331_v31 = vmul.f32 1.442695, %v4243_v55  ;;  %v7030_v54 = vpop.eup %7029 }
 0x69c   :  { %v3883_v0 = vpop.xlane.xlu0 %3882  ;;  %v3889_v44 = vpop.xlane.xlu2 %3888  ;;  %v4335_v24 = vmul.f32 1.442695, %v4245_v61  ;;  %v4250_v61 = vsub.f32 %v10359_v41, %v10871_v27 }
 0x69d   :  { %v3999_v2 = vpack.c.bf16 %v3883_v0, %v3883_v0  ;;  %v4001_v37 = vpack.c.bf16 %v3889_v44, %v3889_v44  ;;  %v3895_v11 = vpop.xlane.xlu1 %3894  ;;  %v4339_v0 = vmul.f32 1.442695, %v4247_v3  ;;  %7035 = vpow2.f32 %v4331_v31 }
 0x69e   :  { %v4003_v14 = vpack.c.bf16 %v3895_v11, %v3895_v11  ;;  %7037 = vpow2.f32 %v4335_v24 }
 0x69f   :  { %4064 = vst.msk [vmem:[%s13022_s11 + $0x94] sm:$0xf] %vm4026_vm5, %v3999_v2  ;;  %7039 = vpow2.f32 %v4339_v0 }
 0x6a0   :  { %4066 = vst.msk [vmem:[%s13022_s11 + $0x9c] sm:$0xf] %vm4026_vm5, %v4001_v37  ;;  %v7032_v37 = vpop.eup %7031 }
 0x6a1   :  { %4068 = vst.msk [vmem:[%s13022_s11 + $0xa4] sm:$0xf] %vm4026_vm5, %v4003_v14  ;;  %4466 = vadd.xlane.f32.xlu0 %v4465_v9  ;;  %4472 = vadd.xlane.f32.xlu2 %v4471_v6  ;;  %v7034_v38 = vpop.eup %7033  ;;  %v4246_v14 = vsub.f32 %v13983_v43, %v10837_v18  ;;  %v13985_v9 = vld [vmem:[#allocation59_spill] sm:$0xff]  ;;  %v4474_v3 = vsel %vm3446_vm2, %v7032_v37, 0.0  ;;  %v4480_v6 = vsel %vm3446_vm2, %v7030_v54, 0.0 }
 0x6a2   :  { %4478 = vadd.xlane.f32.xlu1 %v4477_v36  ;;  %v4248_v55 = vsub.f32 %v13985_v9, %v13984_v25  ;;  %v4486_v36 = vsel %vm3446_vm2, %v7034_v38, 0.0  ;;  %v13986_v25 = vld [vmem:[#allocation105_spill] sm:$0xff]  ;;  %v13987_v38 = vld [vmem:[#allocation116_spill] sm:$0xff] }
 0x6a3   :  { %v4337_v31 = vmul.f32 1.442695, %v4246_v14  ;;  %v7036_v0 = vpop.eup %7035 }
 0x6a4   :  { %v3892_v44 = vpop.xlane.xlu0 %3891  ;;  %v3898_v2 = vpop.xlane.xlu2 %3897  ;;  %v4341_v24 = vmul.f32 1.442695, %v4248_v55  ;;  %v4253_v55 = vsub.f32 %v10461_v12, %v10889_v57 }
 0x6a5   :  { %v4002_v53 = vpack.c.bf16 %v3892_v44, %v3892_v44  ;;  %v4004_v11 = vpack.c.bf16 %v3898_v2, %v3898_v2  ;;  %v3904_v19 = vpop.xlane.xlu1 %3903  ;;  %v4345_v44 = vmul.f32 1.442695, %v4250_v61  ;;  %7041 = vpow2.f32 %v4337_v31 }
 0x6a6   :  { %v4006_v35 = vpack.c.bf16 %v3904_v19, %v3904_v19  ;;  %7043 = vpow2.f32 %v4341_v24  ;;  %v4483_v61 = vsel %vm3446_vm2, %v7036_v0, 0.0 }
 0x6a7   :  { %4067 = vst.msk [vmem:[%s13022_s11 + $0xa0] sm:$0xf] %vm4026_vm5, %v4002_v53  ;;  %7045 = vpow2.f32 %v4345_v44 }
 0x6a8   :  { %4069 = vst.msk [vmem:[%s13022_s11 + $0xa8] sm:$0xf] %vm4026_vm5, %v4004_v11  ;;  %v7038_v11 = vpop.eup %7037 }
 0x6a9   :  { %4071 = vst.msk [vmem:[%s13022_s11 + $0xb0] sm:$0xf] %vm4026_vm5, %v4006_v35  ;;  %4475 = vadd.xlane.f32.xlu0 %v4474_v3  ;;  %4481 = vadd.xlane.f32.xlu2 %v4480_v6  ;;  %v7040_v27 = vpop.eup %7039  ;;  %v4249_v35 = vsub.f32 %v13986_v25, %v10855_v13  ;;  %v13988_v3 = vld [vmem:[#allocation108_spill] sm:$0xff]  ;;  %v4489_v6 = vsel %vm3446_vm2, %v7038_v11, 0.0  ;;  %v13990_v13 = vld [vmem:[#allocation155_spill] sm:$0xff] }
 0x6aa   :  { %4487 = vadd.xlane.f32.xlu1 %v4486_v36  ;;  %v4251_v14 = vsub.f32 %v13988_v3, %v13987_v38  ;;  %v4495_v36 = vsel %vm3446_vm2, %v7040_v27, 0.0  ;;  %v13989_v38 = vld [vmem:[#allocation171_spill] sm:$0xff]  ;;  %v13991_v27 = vld [vmem:[#allocation61_spill] sm:$0xff] }
 0x6ab   :  { %v4343_v31 = vmul.f32 1.442695, %v4249_v35  ;;  %v7042_v44 = vpop.eup %7041 }
 0x6ac   :  { %v3901_v2 = vpop.xlane.xlu0 %3900  ;;  %v3907_v53 = vpop.xlane.xlu2 %3906  ;;  %v4347_v24 = vmul.f32 1.442695, %v4251_v14  ;;  %v13993_v14 = vld [vmem:[#allocation50_spill] sm:$0xff] }
 0x6ad   :  { %v4005_v37 = vpack.c.bf16 %v3901_v2, %v3901_v2  ;;  %v4007_v19 = vpack.c.bf16 %v3907_v53, %v3907_v53  ;;  %v3913_v54 = vpop.xlane.xlu1 %3912  ;;  %v4351_v2 = vmul.f32 1.442695, %v4253_v55  ;;  %7047 = vpow2.f32 %v4343_v31  ;;  %v13994_v55 = vld [vmem:[#allocation139_spill] sm:$0xff] }
 0x6ae   :  { %v4009_v18 = vpack.c.bf16 %v3913_v54, %v3913_v54  ;;  %7049 = vpow2.f32 %v4347_v24 }
 0x6af   :  { %4070 = vst.msk [vmem:[%s13022_s11 + $0xac] sm:$0xf] %vm4026_vm5, %v4005_v37  ;;  %7051 = vpow2.f32 %v4351_v2 }
 0x6b0   :  { %4072 = vst.msk [vmem:[%s13022_s11 + $0xb4] sm:$0xf] %vm4026_vm5, %v4007_v19  ;;  %v7044_v19 = vpop.eup %7043 }
 0x6b1   :  { %4074 = vst.msk [vmem:[%s13022_s11 + $0xbc] sm:$0xf] %vm4026_vm5, %v4009_v18  ;;  %4484 = vadd.xlane.f32.xlu0 %v4483_v61  ;;  %4490 = vadd.xlane.f32.xlu2 %v4489_v6  ;;  %v7046_v57 = vpop.eup %7045  ;;  %v4252_v18 = vsub.f32 %v13990_v13, %v13989_v38  ;;  %v13992_v61 = vld [vmem:[#allocation156_spill] sm:$0xff]  ;;  %v4256_v6 = vsub.f32 %v13994_v55, %v13993_v14  ;;  %v4498_v31 = vsel %vm3446_vm2, %v7044_v19, 0.0  ;;  %v13995_v55 = vld [vmem:[#allocation73_spill] sm:$0xff]  ;;  %v13996_v13 = vld [vmem:[#allocation70_spill] sm:$0xff] }
 0x6b2   :  { %4496 = vadd.xlane.f32.xlu1 %v4495_v36  ;;  %v4254_v35 = vsub.f32 %v13992_v61, %v13991_v27  ;;  %v4492_v36 = vsel %vm3446_vm2, %v7042_v44, 0.0  ;;  %v4504_v24 = vsel %vm3446_vm2, %v7046_v57, 0.0  ;;  %v13997_v57 = vld [vmem:[#allocation57_spill] sm:$0xff] }
 0x6b3   :  { %v4349_v2 = vmul.f32 1.442695, %v4252_v18 }
 0x6b4   :  { %v3910_v53 = vpop.xlane.xlu0 %3909  ;;  %v3916_v37 = vpop.xlane.xlu2 %3915 }
 0x6b5   :  { %v4008_v0 = vpack.c.bf16 %v3910_v53, %v3910_v53  ;;  %v4010_v54 = vpack.c.bf16 %v3916_v37, %v3916_v37  ;;  %v3922_v11 = vpop.xlane.xlu1 %3921  ;;  %v4353_v53 = vmul.f32 1.442695, %v4254_v35  ;;  %v7048_v37 = vpop.eup %7047  ;;  %7053 = vpow2.f32 %v4349_v2  ;;  %v13999_v35 = vld [vmem:[#allocation133_spill] sm:$0xff] }
 0x6b6   :  { %v4012_v12 = vpack.c.bf16 %v3922_v11, %v3922_v11  ;;  %v7050_v14 = vpop.eup %7049 }
 0x6b7   :  { %4073 = vst.msk [vmem:[%s13022_s11 + $0xb8] sm:$0xf] %vm4026_vm5, %v4008_v0  ;;  %v4357_v0 = vmul.f32 1.442695, %v4256_v6  ;;  %v7052_v38 = vpop.eup %7051  ;;  %7055 = vpow2.f32 %v4353_v53  ;;  %v4259_v6 = vsub.f32 %v13999_v35, %v10925_v26  ;;  %v14001_v35 = vld [vmem:[#allocation111_spill] sm:$0xff] }
 0x6b8   :  { %4075 = vst.msk [vmem:[%s13022_s11 + $0xc0] sm:$0xf] %vm4026_vm5, %v4010_v54  ;;  %v4513_v2 = vsel %vm3446_vm2, %v7052_v38, 0.0  ;;  %v14002_v38 = vld [vmem:[#allocation119_spill] sm:$0xff] }
 0x6b9   :  { %4077 = vst.msk [vmem:[%s13022_s11 + $0xc8] sm:$0xf] %vm4026_vm5, %v4012_v12  ;;  %4493 = vadd.xlane.f32.xlu0 %v4492_v36  ;;  %4499 = vadd.xlane.f32.xlu2 %v4498_v31  ;;  %v4255_v12 = vsub.f32 %v13996_v13, %v13995_v55  ;;  %v13998_v36 = vld [vmem:[#allocation76_spill] sm:$0xff]  ;;  %7057 = vpow2.f32 %v4357_v0  ;;  %v4501_v31 = vsel %vm3446_vm2, %v7048_v37, 0.0  ;;  %v14000_v55 = vld [vmem:[#allocation126_spill] sm:$0xff] }
 0x6ba   :  { %4505 = vadd.xlane.f32.xlu1 %v4504_v24  ;;  %v4257_v18 = vsub.f32 %v13998_v36, %v13997_v57  ;;  %v4507_v24 = vsel %vm3446_vm2, %v7050_v14, 0.0 }
 0x6bb   :  { %v4355_v53 = vmul.f32 1.442695, %v4255_v12 }
 0x6bc   :  { %v3919_v11 = vpop.xlane.xlu0 %3918  ;;  %v3925_v54 = vpop.xlane.xlu2 %3924  ;;  %v4359_v0 = vmul.f32 1.442695, %v4257_v18  ;;  %v4262_v18 = vsub.f32 %v13933_v46, %v10943_v48 }
 0x6bd   :  { %v4011_v44 = vpack.c.bf16 %v3919_v11, %v3919_v11  ;;  %v4013_v27 = vpack.c.bf16 %v3925_v54, %v3925_v54  ;;  %v3931_v19 = vpop.xlane.xlu1 %3930  ;;  %v7054_v11 = vpop.eup %7053  ;;  %v4363_v54 = vmul.f32 1.442695, %v4259_v6  ;;  %7059 = vpow2.f32 %v4355_v53 }
 0x6be   :  { %v4015_v41 = vpack.c.bf16 %v3931_v19, %v3931_v19  ;;  %v7056_v19 = vpop.eup %7055  ;;  %7061 = vpow2.f32 %v4359_v0  ;;  %v4510_v6 = vsel %vm3446_vm2, %v7054_v11, 0.0 }
 0x6bf   :  { %4076 = vst.msk [vmem:[%s13022_s11 + $0xc4] sm:$0xf] %vm4026_vm5, %v4011_v44  ;;  %v7058_v57 = vpop.eup %7057  ;;  %7063 = vpow2.f32 %v4363_v54 }
 0x6c0   :  { %4078 = vst.msk [vmem:[%s13022_s11 + $0xcc] sm:$0xf] %vm4026_vm5, %v4013_v27 }
 0x6c1   :  { %4080 = vst.msk [vmem:[%s13022_s11 + $0xd4] sm:$0xf] %vm4026_vm5, %v4015_v41  ;;  %4502 = vadd.xlane.f32.xlu0 %v4501_v31  ;;  %4508 = vadd.xlane.f32.xlu2 %v4507_v24  ;;  %v4258_v41 = vsub.f32 %v14001_v35, %v14000_v55  ;;  %v14003_v31 = vld [vmem:[#allocation104_spill] sm:$0xff]  ;;  %v4516_v24 = vsel %vm3446_vm2, %v7056_v19, 0.0  ;;  %v14005_v55 = vld [vmem:[#allocation158_spill] sm:$0xff] }
 0x6c2   :  { %4514 = vadd.xlane.f32.xlu1 %v4513_v2  ;;  %v4260_v12 = vsub.f32 %v14003_v31, %v14002_v38  ;;  %v4522_v2 = vsel %vm3446_vm2, %v7058_v57, 0.0  ;;  %v14004_v38 = vld [vmem:[#allocation84_spill] sm:$0xff]  ;;  %v14006_v57 = vld [vmem:[#allocation174_spill] sm:$0xff] }
 0x6c3   :  { %v4361_v53 = vmul.f32 1.442695, %v4258_v41  ;;  %v7060_v54 = vpop.eup %7059 }
 0x6c4   :  { %v3928_v44 = vpop.xlane.xlu0 %3927  ;;  %v3934_v27 = vpop.xlane.xlu2 %3933  ;;  %v4365_v0 = vmul.f32 1.442695, %v4260_v12  ;;  %v4265_v12 = vsub.f32 %v10700_v58, %v10961_v42 }
 0x6c5   :  { %v4014_v37 = vpack.c.bf16 %v3928_v44, %v3928_v44  ;;  %v4016_v26 = vpack.c.bf16 %v3934_v27, %v3934_v27  ;;  %v3940_v14 = vpop.xlane.xlu1 %3939  ;;  %v4369_v44 = vmul.f32 1.442695, %v4262_v18  ;;  %7065 = vpow2.f32 %v4361_v53 }
 0x6c6   :  { %v4018_v13 = vpack.c.bf16 %v3940_v14, %v3940_v14  ;;  %7067 = vpow2.f32 %v4365_v0  ;;  %v4519_v18 = vsel %vm3446_vm2, %v7060_v54, 0.0 }
 0x6c7   :  { %4079 = vst.msk [vmem:[%s13022_s11 + $0xd0] sm:$0xf] %vm4026_vm5, %v4014_v37  ;;  %v7062_v37 = vpop.eup %7061  ;;  %7069 = vpow2.f32 %v4369_v44 }
 0x6c8   :  { %4081 = vst.msk [vmem:[%s13022_s11 + $0xd8] sm:$0xf] %vm4026_vm5, %v4016_v26  ;;  %v7064_v48 = vpop.eup %7063 }
 0x6c9   :  { %4083 = vst.msk [vmem:[%s13022_s11 + $0xe0] sm:$0xf] %vm4026_vm5, %v4018_v13  ;;  %4511 = vadd.xlane.f32.xlu0 %v4510_v6  ;;  %4517 = vadd.xlane.f32.xlu2 %v4516_v24  ;;  %v4261_v13 = vsub.f32 %v14005_v55, %v14004_v38  ;;  %v14007_v6 = vld [vmem:[#allocation107_spill] sm:$0xff]  ;;  %v4525_v24 = vsel %vm3446_vm2, %v7062_v37, 0.0  ;;  %v14009_v38 = vld [vmem:[#allocation48_spill] sm:$0xff] }
 0x6ca   :  { %4523 = vadd.xlane.f32.xlu1 %v4522_v2  ;;  %v4263_v41 = vsub.f32 %v14007_v6, %v14006_v57  ;;  %v4531_v2 = vsel %vm3446_vm2, %v7064_v48, 0.0  ;;  %v14008_v57 = vld [vmem:[#allocation173_spill] sm:$0xff] }
 0x6cb   :  { %v4367_v53 = vmul.f32 1.442695, %v4261_v13  ;;  %v7066_v44 = vpop.eup %7065  ;;  %v14010_v48 = vld [vmem:[#allocation177_spill] sm:$0xff] }
 0x6cc   :  { %v3937_v27 = vpop.xlane.xlu0 %3936  ;;  %v3943_v26 = vpop.xlane.xlu2 %3942  ;;  %v4371_v0 = vmul.f32 1.442695, %v4263_v41  ;;  %v4268_v41 = vsub.f32 %v9917_v39, %v10979_v49  ;;  %v4149_v39 = vld [vmem:[%s13023_s10 + $0x1d0] sm:$0xff] }
 0x6cd   :  { %v4017_v11 = vpack.c.bf16 %v3937_v27, %v3937_v27  ;;  %v4019_v14 = vpack.c.bf16 %v3943_v26, %v3943_v26  ;;  %v3949_v19 = vpop.xlane.xlu1 %3948  ;;  %v4375_v27 = vmul.f32 1.442695, %v4265_v12  ;;  %7071 = vpow2.f32 %v4367_v53 }
 0x6ce   :  { %v4021_v46 = vpack.c.bf16 %v3949_v19, %v3949_v19  ;;  %7073 = vpow2.f32 %v4371_v0  ;;  %v4528_v12 = vsel %vm3446_vm2, %v7066_v44, 0.0 }
 0x6cf   :  { %4082 = vst.msk [vmem:[%s13022_s11 + $0xdc] sm:$0xf] %vm4026_vm5, %v4017_v11  ;;  %7075 = vpow2.f32 %v4375_v27 }
 0x6d0   :  { %4084 = vst.msk [vmem:[%s13022_s11 + $0xe4] sm:$0xf] %vm4026_vm5, %v4019_v14  ;;  %v7068_v14 = vpop.eup %7067 }
 0x6d1   :  { %4086 = vst.msk [vmem:[%s13022_s11 + $0xec] sm:$0xf] %vm4026_vm5, %v4021_v46  ;;  %4520 = vadd.xlane.f32.xlu0 %v4519_v18  ;;  %4526 = vadd.xlane.f32.xlu2 %v4525_v24  ;;  %v7070_v42 = vpop.eup %7069  ;;  %v4264_v46 = vsub.f32 %v14009_v38, %v14008_v57  ;;  %v14011_v18 = vld [vmem:[#allocation117_spill] sm:$0xff]  ;;  %v4534_v24 = vsel %vm3446_vm2, %v7068_v14, 0.0 }
 0x6d2   :  { %4532 = vadd.xlane.f32.xlu1 %v4531_v2  ;;  %v4266_v13 = vsub.f32 %v14011_v18, %v14010_v48  ;;  %v4540_v2 = vsel %vm3446_vm2, %v7070_v42, 0.0  ;;  %v14012_v42 = vld [vmem:[#allocation180_spill] sm:$0xff] }
 0x6d3   :  { %v4373_v53 = vmul.f32 1.442695, %v4264_v46  ;;  %v7072_v27 = vpop.eup %7071 }
 0x6d4   :  { %v3946_v26 = vpop.xlane.xlu0 %3945  ;;  %v3952_v11 = vpop.xlane.xlu2 %3951  ;;  %v4377_v0 = vmul.f32 1.442695, %v4266_v13  ;;  %v4271_v13 = vsub.f32 %v13939_v33, %v10997_v29 }
 0x6d5   :  { %v4020_v54 = vpack.c.bf16 %v3946_v26, %v3946_v26  ;;  %v4022_v19 = vpack.c.bf16 %v3952_v11, %v3952_v11  ;;  %v3958_v37 = vpop.xlane.xlu1 %3957  ;;  %v4381_v26 = vmul.f32 1.442695, %v4268_v41  ;;  %7077 = vpow2.f32 %v4373_v53 }
 0x6d6   :  { %v4024_v58 = vpack.c.bf16 %v3958_v37, %v3958_v37  ;;  %7079 = vpow2.f32 %v4377_v0  ;;  %v4537_v41 = vsel %vm3446_vm2, %v7072_v27, 0.0  ;;  %v14014_v27 = vld [vmem:[#allocation148_spill] sm:$0xff] }
 0x6d7   :  { %4085 = vst.msk [vmem:[%s13022_s11 + $0xe8] sm:$0xf] %vm4026_vm5, %v4020_v54  ;;  %7081 = vpow2.f32 %v4381_v26 }
 0x6d8   :  { %4087 = vst.msk [vmem:[%s13022_s11 + $0xf0] sm:$0xf] %vm4026_vm5, %v4022_v19  ;;  %v7074_v19 = vpop.eup %7073 }
 0x6d9   :  { %4089 = vst.msk [vmem:[%s13022_s11 + $0xf8] sm:$0xf] %vm4026_vm5, %v4024_v58  ;;  %4529 = vadd.xlane.f32.xlu0 %v4528_v12  ;;  %4535 = vadd.xlane.f32.xlu2 %v4534_v24  ;;  %v7076_v49 = vpop.eup %7075  ;;  %v4267_v58 = vsub.f32 %v13936_v21, %v10963_v56  ;;  %v14013_v12 = vld [vmem:[#allocation30_spill] sm:$0xff]  ;;  %v4543_v24 = vsel %vm3446_vm2, %v7074_v19, 0.0  ;;  %v4270_v19 = vsub.f32 %v14014_v27, %v10981_v62 }
 0x6da   :  { %4541 = vadd.xlane.f32.xlu1 %v4540_v2  ;;  %v4269_v46 = vsub.f32 %v14013_v12, %v14012_v42  ;;  %v4549_v2 = vsel %vm3446_vm2, %v7076_v49, 0.0  ;;  %v14015_v49 = vld [vmem:[#allocation183_spill] sm:$0xff] }
 0x6db   :  { %v4379_v53 = vmul.f32 1.442695, %v4267_v58  ;;  %v7078_v26 = vpop.eup %7077 }
 0x6dc   :  { %v3955_v11 = vpop.xlane.xlu0 %3954  ;;  %v3961_v54 = vpop.xlane.xlu2 %3960  ;;  %v4383_v0 = vmul.f32 1.442695, %v4269_v46  ;;  %v4274_v46 = vsub.f32 %v13942_v10, %v11015_v28 }
 0x6dd   :  { %v4023_v44 = vpack.c.bf16 %v3955_v11, %v3955_v11  ;;  %v4025_v37 = vpack.c.bf16 %v3961_v54, %v3961_v54  ;;  %v11532_v14 = vpop.xlane.xlu1 %4415  ;;  %v4387_v11 = vmul.f32 1.442695, %v4271_v13  ;;  %v7080_v29 = vpop.eup %7079  ;;  %7083 = vpow2.f32 %v4379_v53 }
 0x6de   :  { %7085 = vpow2.f32 %v4383_v0  ;;  %v4546_v13 = vsel %vm3446_vm2, %v7078_v26, 0.0  ;;  %v4385_v53 = vmul.f32 1.442695, %v4270_v19  ;;  %v4393_v0 = vmul.f32 1.442695, %v4274_v46  ;;  %v14018_v26 = vld [vmem:[#allocation186_spill] sm:$0xff] }
 0x6df   :  { %4088 = vst.msk [vmem:[%s13022_s11 + $0xf4] sm:$0xf] %vm4026_vm5, %v4023_v44  ;;  %7087 = vpow2.f32 %v4387_v11 }
 0x6e0   :  { %4090 = vst.msk [vmem:[%s13022_s11 + $0xfc] sm:$0xf] %vm4026_vm5, %v4025_v37  ;;  %v7082_v37 = vpop.eup %7081  ;;  %7089 = vpow2.f32 %v4385_v53 }
 0x6e1   :  { %4538 = vadd.xlane.f32.xlu0 %v4537_v41  ;;  %4544 = vadd.xlane.f32.xlu2 %v4543_v24  ;;  %v14016_v41 = vld [vmem:[#allocation88_spill] sm:$0xff]  ;;  %v4552_v24 = vsel %vm3446_vm2, %v7080_v29, 0.0  ;;  %v4273_v29 = vsub.f32 %v13940_v59, %v10999_v4 }
 0x6e2   :  { %4550 = vadd.xlane.f32.xlu1 %v4549_v2  ;;  %v4272_v58 = vsub.f32 %v14016_v41, %v14015_v49  ;;  %v4558_v2 = vsel %vm3446_vm2, %v7082_v37, 0.0  ;;  %v14019_v37 = vld [vmem:[#allocation121_spill] sm:$0xff] }
 0x6e3   :  { %v7084_v62 = vpop.eup %7083  ;;  %v4275_v19 = vsub.f32 %v14019_v37, %v14018_v26 }
 0x6e4   :  { %v11551_v54 = vpop.xlane.xlu0 %4412  ;;  %v11553_v44 = vpop.xlane.xlu2 %4418  ;;  %v4389_v56 = vmul.f32 1.442695, %v4272_v58  ;;  %v4277_v58 = vsub.f32 %v10318_v52, %v11033_v50  ;;  %v4555_v46 = vsel %vm3446_vm2, %v7084_v62, 0.0  ;;  %v4276_v62 = vsub.f32 %v13943_v15, %v11017_v7 }
 0x6e5   :  { %v11555_v42 = vpop.xlane.xlu1 %4424  ;;  %v7086_v11 = vpop.eup %7085  ;;  %v4395_v53 = vmul.f32 1.442695, %v4275_v19 }
 0x6e6   :  { %v7088_v28 = vpop.eup %7087  ;;  %7091 = vpow2.f32 %v4389_v56  ;;  %v4399_v56 = vmul.f32 1.442695, %v4277_v58 }
 0x6e7   :  { %7093 = vpow2.f32 %v4393_v0  ;;  %v7090_v4 = vpop.eup %7089 }
 0x6e8   :  { %v4564_v19 = vsel %vm3446_vm2, %v7090_v4, 0.0  ;;  %v14027_v4 = vld [vmem:[#allocation188_spill] sm:$0xff] }
 0x6e9   :  { %4547 = vadd.xlane.f32.xlu0 %v4546_v13  ;;  %4553 = vadd.xlane.f32.xlu2 %v4552_v24  ;;  %v4561_v13 = vsel %vm3446_vm2, %v7086_v11, 0.0  ;;  %v4567_v24 = vsel %vm3446_vm2, %v7088_v28, 0.0  ;;  %v14023_v28 = vld [vmem:[#allocation94_spill] sm:$0xff] }
 0x6ea   :  { %4559 = vadd.xlane.f32.xlu1 %v4558_v2  ;;  %v4391_v2 = vmul.f32 1.442695, %v4273_v29  ;;  %v4278_v11 = vsub.f32 %v14023_v28, %v11049_v17  ;;  %v4280_v29 = vsub.f32 %v13946_v40, %v11051_v16 }
 0x6ec   :  { %v11566_v48 = vpop.xlane.xlu0 %4421  ;;  %v11568_v49 = vpop.xlane.xlu2 %4427  ;;  %7095 = vpow2.f32 %v4391_v2 }
 0x6ed   :  { %v11570_v57 = vpop.xlane.xlu1 %4433  ;;  %v7092_v0 = vpop.eup %7091  ;;  %7097 = vpow2.f32 %v4395_v53  ;;  %v4405_v53 = vmul.f32 1.442695, %v4280_v29 }
 0x6ee   :  { %14017 = vst [vmem:[#allocation25_spill] sm:$0xff] %v11570_v57  ;;  %v7094_v50 = vpop.eup %7093  ;;  %7099 = vpow2.f32 %v4399_v56  ;;  %v4570_v58 = vsel %vm3446_vm2, %v7092_v0, 0.0  ;;  %v14028_v0 = vld [vmem:[#allocation68_spill] sm:$0xff]  ;;  %v14082_v57 = vld [vmem:[#allocation78_spill] sm:$0xff] }
 0x6ef   :  { %v4279_v40 = vsub.f32 %v14028_v0, %v14027_v4 }
 0x6f1   :  { %4556 = vadd.xlane.f32.xlu0 %v4555_v46  ;;  %4562 = vadd.xlane.f32.xlu2 %v4561_v13  ;;  %v4576_v46 = vsel %vm3446_vm2, %v7094_v50, 0.0  ;;  %v4397_v13 = vmul.f32 1.442695, %v4276_v62  ;;  %v4281_v50 = vsub.f32 %v10455_v20, %v11067_v63 }
 0x6f2   :  { %4568 = vadd.xlane.f32.xlu1 %v4567_v24  ;;  %v4401_v24 = vmul.f32 1.442695, %v4278_v11  ;;  %v7096_v2 = vpop.eup %7095 }
 0x6f3   :  { %v7098_v56 = vpop.eup %7097  ;;  %7101 = vpow2.f32 %v4397_v13  ;;  %v4573_v62 = vsel %vm3446_vm2, %v7096_v2, 0.0  ;;  %v4282_v2 = vsub.f32 %v13947_v47, %v11053_v8 }
 0x6f4   :  { %v11581_v10 = vpop.xlane.xlu0 %4430  ;;  %v11583_v26 = vpop.xlane.xlu2 %4436  ;;  %7103 = vpow2.f32 %v4401_v24  ;;  %v4579_v11 = vsel %vm3446_vm2, %v7098_v56, 0.0 }
 0x6f5   :  { %14020 = vst [vmem:[#allocation24_spill] sm:$0xff] %v11581_v10  ;;  %v11585_v59 = vpop.xlane.xlu1 %4442  ;;  %v7100_v16 = vpop.eup %7099  ;;  %7105 = vpow2.f32 %v4405_v53 }
 0x6f6   :  { %14021 = vst [vmem:[#allocation77_spill] sm:$0xff] %v11583_v26  ;;  %v4585_v29 = vsel %vm3446_vm2, %v7100_v16, 0.0 }
 0x6f7   :  { %14022 = vst [vmem:[#allocation85_spill] sm:$0xff] %v11585_v59 }
 0x6f9   :  { %4565 = vadd.xlane.f32.xlu0 %v4564_v19  ;;  %4571 = vadd.xlane.f32.xlu2 %v4570_v58  ;;  %v4403_v19 = vmul.f32 1.442695, %v4279_v40  ;;  %v4407_v58 = vmul.f32 1.442695, %v4281_v50  ;;  %v4409_v50 = vmul.f32 1.442695, %v4282_v2 }
 0x6fa   :  { %4577 = vadd.xlane.f32.xlu1 %v4576_v46  ;;  %v7102_v46 = vpop.eup %7101 }
 0x6fb   :  { %v7104_v24 = vpop.eup %7103  ;;  %7107 = vpow2.f32 %v4403_v19  ;;  %v4582_v16 = vsel %vm3446_vm2, %v7102_v46, 0.0 }
 0x6fc   :  { %v11596_v7 = vpop.xlane.xlu0 %4439  ;;  %v11598_v17 = vpop.xlane.xlu2 %4445  ;;  %7109 = vpow2.f32 %v4407_v58  ;;  %v4588_v40 = vsel %vm3446_vm2, %v7104_v24, 0.0 }
 0x6fd   :  { %14024 = vst [vmem:[#allocation129_spill] sm:$0xff] %v11596_v7  ;;  %v11600_v52 = vpop.xlane.xlu1 %4451  ;;  %v7106_v53 = vpop.eup %7105  ;;  %7111 = vpow2.f32 %v4409_v50 }
 0x6fe   :  { %14025 = vst [vmem:[#allocation60_spill] sm:$0xff] %v11598_v17  ;;  %v4594_v56 = vsel %vm3446_vm2, %v7106_v53, 0.0  ;;  %7113 = vlog2.f32 %v11551_v54 }
 0x6ff   :  { %14026 = vst [vmem:[#allocation99_spill] sm:$0xff] %v11600_v52  ;;  %7115 = vlog2.f32 %v11532_v14 }
 0x700   :  { %7117 = vlog2.f32 %v11553_v44 }
 0x701   :  { %4574 = vadd.xlane.f32.xlu0 %v4573_v62  ;;  %4580 = vadd.xlane.f32.xlu2 %v4579_v11  ;;  %v7108_v62 = vpop.eup %7107  ;;  %7119 = vlog2.f32 %v11566_v48 }
 0x702   :  { %4586 = vadd.xlane.f32.xlu1 %v4585_v29  ;;  %v7110_v19 = vpop.eup %7109  ;;  %v4591_v58 = vsel %vm3446_vm2, %v7108_v62, 0.0  ;;  %v4092_v62 = vld [vmem:[%s13023_s10 + $0x8] sm:$0xff]  ;;  %7121 = vlog2.f32 %v11555_v42 }
 0x703   :  { %v4597_v46 = vsel %vm3446_vm2, %v7110_v19, 0.0  ;;  %v7112_v2 = vpop.eup %7111  ;;  %vm6635_vm9 = vcmp.lt.s32.totalorder %v4092_v62, 0  ;;  %7123 = vlog2.f32 %v11568_v49  ;;  %v14108_v49 = vld [vmem:[#allocation45_spill] sm:$0xff] }
 0x704   :  { %v11609_v13 = vpop.xlane.xlu0 %4448  ;;  %v11611_v4 = vpop.xlane.xlu2 %4454 }
 0x705   :  { %14029 = vst [vmem:[#allocation37_spill] sm:$0xff] %v11609_v13  ;;  %v11613_v0 = vpop.xlane.xlu1 %4460 }
 0x706   :  { %14030 = vst [vmem:[#allocation33_spill] sm:$0xff] %v11611_v4 }
 0x707   :  { %14031 = vst [vmem:[#allocation59_spill] sm:$0xff] %v11613_v0 }
 0x709   :  { %4583 = vadd.xlane.f32.xlu0 %v4582_v16  ;;  %4589 = vadd.xlane.f32.xlu2 %v4588_v40  ;;  %v4091_v40 = vld [vmem:[%s13023_s10] sm:$0xff] }
 0x70a   :  { %4595 = vadd.xlane.f32.xlu1 %v4594_v56  ;;  %v4600_v56 = vsel %vm3446_vm2, %v7112_v2, 0.0  ;;  %v6631_v50 = vceil.f32 %v4091_v40  ;;  %v6632_v8 = vfloor.f32 %v4091_v40  ;;  %vm6630_vm5 = vcmp.lt.s32.totalorder %v4091_v40, 0  ;;  %v4093_v40 = vld [vmem:[%s13023_s10 + $0x10] sm:$0xff] }
 0x70b   :  { %v6636_v2 = vceil.f32 %v4092_v62  ;;  %vm6640_vm11 = vcmp.lt.s32.totalorder %v4093_v40, 0 }
 0x70c   :  { %v11620_v11 = vpop.xlane.xlu0 %4457  ;;  %v11622_v29 = vpop.xlane.xlu2 %4463 }
 0x70d   :  { %14032 = vst [vmem:[#allocation105_spill] sm:$0xff] %v11620_v11  ;;  %v11624_v63 = vpop.xlane.xlu1 %4469 }
 0x70e   :  { %14033 = vst [vmem:[#allocation108_spill] sm:$0xff] %v11622_v29  ;;  %v4100_v29 = vld [vmem:[%s13023_s10 + $0x48] sm:$0xff] }
 0x70f   :  { %14034 = vst [vmem:[#allocation156_spill] sm:$0xff] %v11624_v63  ;;  %vm6675_vm14 = vcmp.lt.s32.totalorder %v4100_v29, 0 }
 0x711   :  { %4592 = vadd.xlane.f32.xlu0 %v4591_v58  ;;  %4598 = vadd.xlane.f32.xlu2 %v4597_v46  ;;  %v6633_v46 = vsel %vm6630_vm5, %v6631_v50, %v6632_v8  ;;  %v6642_v8 = vfloor.f32 %v4093_v40  ;;  %v4095_v50 = vld [vmem:[%s13023_s10 + $0x20] sm:$0xff] }
 0x712   :  { %v6634_v63 = vcvt.f32.s32 %v6633_v46  ;;  %vm6650_vm12 = vcmp.lt.s32.totalorder %v4095_v50, 0 }
 0x714   :  { %v11628_v24 = vpop.xlane.xlu0 %4466  ;;  %v11630_v53 = vpop.xlane.xlu2 %4472 }
 0x715   :  { %14035 = vst [vmem:[#allocation76_spill] sm:$0xff] %v11628_v24  ;;  %v11632_v16 = vpop.xlane.xlu1 %4478 }
 0x716   :  { %14036 = vst [vmem:[#allocation111_spill] sm:$0xff] %v11630_v53  ;;  %v6637_v53 = vfloor.f32 %v4092_v62 }
 0x717   :  { %14037 = vst [vmem:[#allocation104_spill] sm:$0xff] %v11632_v16  ;;  %v4094_v16 = vld [vmem:[%s13023_s10 + $0x18] sm:$0xff] }
 0x718   :  { %v6647_v24 = vfloor.f32 %v4094_v16  ;;  %vm6645_vm10 = vcmp.lt.s32.totalorder %v4094_v16, 0 }
 0x719   :  { %4601 = vadd.xlane.f32.xlu0 %v4600_v56  ;;  %v6646_v56 = vceil.f32 %v4094_v16 }
 0x71b   :  { %v6648_v62 = vsel %vm6645_vm10, %v6646_v56, %v6647_v24 }
 0x71c   :  { %v11641_v19 = vpop.xlane.xlu0 %4475  ;;  %v11643_v58 = vpop.xlane.xlu2 %4481 }
 0x71d   :  { %14038 = vst [vmem:[#allocation158_spill] sm:$0xff] %v11641_v19  ;;  %v11645_v47 = vpop.xlane.xlu1 %4487  ;;  %v6638_v19 = vsel %vm6635_vm9, %v6636_v2, %v6637_v53  ;;  %v4096_v53 = vld [vmem:[%s13023_s10 + $0x28] sm:$0xff]  ;;  %v6651_v2 = vceil.f32 %v4095_v50 }
 0x71e   :  { %14039 = vst [vmem:[#allocation107_spill] sm:$0xff] %v11643_v58  ;;  %v6641_v58 = vceil.f32 %v4093_v40  ;;  %v6639_v15 = vcvt.f32.s32 %v6638_v19  ;;  %v6649_v40 = vcvt.f32.s32 %v6648_v62  ;;  %v6657_v0 = vfloor.f32 %v4096_v53 }
 0x71f   :  { %14040 = vst [vmem:[#allocation48_spill] sm:$0xff] %v11645_v47  ;;  %vm6655_vm13 = vcmp.lt.s32.totalorder %v4096_v53, 0  ;;  %v6676_v19 = vceil.f32 %v4100_v29 }
 0x720   :  { %v6643_v16 = vsel %vm6640_vm11, %v6641_v58, %v6642_v8  ;;  %v4097_v58 = vld [vmem:[%s13023_s10 + $0x30] sm:$0xff] }
 0x721   :  { %v6644_v24 = vcvt.f32.s32 %v6643_v16  ;;  %vm6660_vm15 = vcmp.lt.s32.totalorder %v4097_v58, 0 }
 0x723   :  { %4796 = vperm.xlu1 %6973, %v6634_v63   ;;  %v6652_v63 = vfloor.f32 %v4095_v50 }
 0x724   :  { %v11656_v47 = vpop.xlane.xlu0 %4484  ;;  %v11658_v46 = vpop.xlane.xlu2 %4490 }
 0x725   :  { %14041 = vst [vmem:[#allocation117_spill] sm:$0xff] %v11656_v47  ;;  %v11660_v20 = vpop.xlane.xlu1 %4496  ;;  %v6656_v47 = vceil.f32 %v4096_v53  ;;  %v6653_v56 = vsel %vm6650_vm12, %v6651_v2, %v6652_v63  ;;  %v4098_v53 = vld [vmem:[%s13023_s10 + $0x38] sm:$0xff]  ;;  %v6661_v2 = vceil.f32 %v4097_v58 }
 0x726   :  { %14042 = vst [vmem:[#allocation193_spill] sm:$0xff] %v11658_v46  ;;  %vm6665_vm0 = vcmp.lt.s32.totalorder %v4098_v53, 0 }
 0x727   :  { %14043 = vst [vmem:[#allocation194_spill] sm:$0xff] %v11660_v20  ;;  %v6677_v20 = vfloor.f32 %v4100_v29  ;;  %v6658_v62 = vsel %vm6655_vm13, %v6656_v47, %v6657_v0  ;;  %v6662_v29 = vfloor.f32 %v4097_v58 }
 0x728   :  { %v6659_v63 = vcvt.f32.s32 %v6658_v62 }
 0x729   :  { %4799 = vperm.xlu2 %6974, %v6639_v15   ;;  %v6654_v15 = vcvt.f32.s32 %v6653_v56  ;;  %v6678_v16 = vsel %vm6675_vm14, %v6676_v19, %v6677_v20  ;;  %v6663_v0 = vsel %vm6660_vm15, %v6661_v2, %v6662_v29  ;;  %v4099_v20 = vld [vmem:[%s13023_s10 + $0x40] sm:$0xff] }
 0x72a   :  { %v6679_v47 = vcvt.f32.s32 %v6678_v16  ;;  %v6671_v2 = vceil.f32 %v4099_v20  ;;  %v6672_v29 = vfloor.f32 %v4099_v20  ;;  %vm6670_vm3 = vcmp.lt.s32.totalorder %v4099_v20, 0 }
 0x72b   :  { %4805 = vperm.xlu1 %6973, %v6649_v40   ;;  %v4103_v40 = vld [vmem:[%s13023_s10 + $0x60] sm:$0xff] }
 0x72c   :  { %v11671_v8 = vpop.xlane.xlu0 %4493  ;;  %v11673_v50 = vpop.xlane.xlu2 %4499  ;;  %v6692_v56 = vfloor.f32 %v4103_v40  ;;  %vm6690_vm1 = vcmp.lt.s32.totalorder %v4103_v40, 0 }
 0x72d   :  { %14044 = vst [vmem:[#allocation195_spill] sm:$0xff] %v11671_v8  ;;  %v11675_v46 = vpop.xlane.xlu1 %4505  ;;  %4802 = vperm.xlu0 %6972, %v6644_v24   ;;  %v6666_v8 = vceil.f32 %v4098_v53  ;;  %v6691_v24 = vceil.f32 %v4103_v40  ;;  %v4106_v40 = vld [vmem:[%s13023_s10 + $0x78] sm:$0xff] }
 0x72e   :  { %14045 = vst [vmem:[#allocation196_spill] sm:$0xff] %v11673_v50  ;;  %v6667_v50 = vfloor.f32 %v4098_v53  ;;  %v4101_v53 = vld [vmem:[%s13023_s10 + $0x50] sm:$0xff]  ;;  %vm6705_vm6 = vcmp.lt.s32.totalorder %v4106_v40, 0 }
 0x72f   :  { %14046 = vst [vmem:[#allocation197_spill] sm:$0xff] %v11675_v46  ;;  %v6693_v16 = vsel %vm6690_vm1, %v6691_v24, %v6692_v56  ;;  %vm6680_vm4 = vcmp.lt.s32.totalorder %v4101_v53, 0  ;;  %v4102_v24 = vld [vmem:[%s13023_s10 + $0x58] sm:$0xff] }
 0x730   :  { %v6668_v62 = vsel %vm6665_vm0, %v6666_v8, %v6667_v50  ;;  %v6694_v8 = vcvt.f32.s32 %v6693_v16  ;;  %v6673_v50 = vsel %vm6670_vm3, %v6671_v2, %v6672_v29  ;;  %v6686_v2 = vceil.f32 %v4102_v24 }
 0x731   :  { %4808 = vperm.xlu2 %6974, %v6654_v15   ;;  %v6664_v15 = vcvt.f32.s32 %v6663_v0  ;;  %v6707_v0 = vfloor.f32 %v4106_v40  ;;  %v6687_v29 = vfloor.f32 %v4102_v24  ;;  %vm6685_vm7 = vcmp.lt.s32.totalorder %v4102_v24, 0 }
 0x733   :  { %4811 = vperm.xlu1 %6973, %v6659_v63   ;;  %v6669_v63 = vcvt.f32.s32 %v6668_v62 }
 0x734   :  { %v11686_v19 = vpop.xlane.xlu0 %4502  ;;  %v11688_v58 = vpop.xlane.xlu2 %4508 }
 0x735   :  { %14047 = vst [vmem:[#allocation198_spill] sm:$0xff] %v11686_v19  ;;  %v11690_v46 = vpop.xlane.xlu1 %4514  ;;  %4823 = vperm.xlu0 %6972, %v6679_v47   ;;  %v6681_v19 = vceil.f32 %v4101_v53  ;;  %v6706_v47 = vceil.f32 %v4106_v40  ;;  %v4109_v40 = vld [vmem:[%s13023_s10 + $0x90] sm:$0xff] }
 0x736   :  { %14048 = vst [vmem:[#allocation199_spill] sm:$0xff] %v11688_v58  ;;  %v6682_v58 = vfloor.f32 %v4101_v53  ;;  %v4104_v53 = vld [vmem:[%s13023_s10 + $0x68] sm:$0xff]  ;;  %vm6720_vm5 = vcmp.lt.s32.totalorder %v4109_v40, 0 }
 0x737   :  { %14049 = vst [vmem:[#allocation200_spill] sm:$0xff] %v11690_v46  ;;  %v6708_v16 = vsel %vm6705_vm6, %v6706_v47, %v6707_v0  ;;  %vm6695_vm8 = vcmp.lt.s32.totalorder %v4104_v53, 0  ;;  %v4105_v47 = vld [vmem:[%s13023_s10 + $0x70] sm:$0xff] }
 0x738   :  { %v6683_v62 = vsel %vm6680_vm4, %v6681_v19, %v6682_v58  ;;  %v6709_v19 = vcvt.f32.s32 %v6708_v16  ;;  %v6688_v58 = vsel %vm6685_vm7, %v6686_v2, %v6687_v29  ;;  %v6701_v16 = vceil.f32 %v4105_v47 }
 0x739   :  { %4814 = vperm.xlu2 %6974, %v6664_v15   ;;  %v6674_v15 = vcvt.f32.s32 %v6673_v50  ;;  %v6722_v50 = vfloor.f32 %v4109_v40  ;;  %v6702_v2 = vfloor.f32 %v4105_v47  ;;  %vm6700_vm9 = vcmp.lt.s32.totalorder %v4105_v47, 0 }
 0x73b   :  { %4817 = vperm.xlu1 %6973, %v6669_v63   ;;  %v6684_v63 = vcvt.f32.s32 %v6683_v62 }
 0x73c   :  { %v11701_v56 = vpop.xlane.xlu0 %4511  ;;  %v11703_v20 = vpop.xlane.xlu2 %4517 }
 0x73d   :  { %14050 = vst [vmem:[#allocation201_spill] sm:$0xff] %v11701_v56  ;;  %v11705_v46 = vpop.xlane.xlu1 %4523  ;;  %4832 = vperm.xlu0 %6972, %v6694_v8   ;;  %v6696_v56 = vceil.f32 %v4104_v53  ;;  %v6721_v8 = vceil.f32 %v4109_v40  ;;  %v4112_v40 = vld [vmem:[%s13023_s10 + $0xa8] sm:$0xff] }
 0x73e   :  { %14051 = vst [vmem:[#allocation202_spill] sm:$0xff] %v11703_v20  ;;  %v6697_v20 = vfloor.f32 %v4104_v53  ;;  %vm6735_vm11 = vcmp.lt.s32.totalorder %v4112_v40, 0 }
 0x73f   :  { %14052 = vst [vmem:[#allocation203_spill] sm:$0xff] %v11705_v46  ;;  %v6689_v46 = vcvt.f32.s32 %v6688_v58  ;;  %v6723_v53 = vsel %vm6720_vm5, %v6721_v8, %v6722_v50  ;;  %v6737_v58 = vfloor.f32 %v4112_v40  ;;  %v4108_v8 = vld [vmem:[%s13023_s10 + $0x88] sm:$0xff] }
 0x740   :  { %v6698_v62 = vsel %vm6695_vm8, %v6696_v56, %v6697_v20  ;;  %v6724_v56 = vcvt.f32.s32 %v6723_v53  ;;  %v6703_v20 = vsel %vm6700_vm9, %v6701_v16, %v6702_v2  ;;  %v6716_v53 = vceil.f32 %v4108_v8 }
 0x741   :  { %4820 = vperm.xlu2 %6974, %v6674_v15   ;;  %v4107_v15 = vld [vmem:[%s13023_s10 + $0x80] sm:$0xff]  ;;  %v6717_v16 = vfloor.f32 %v4108_v8  ;;  %vm6715_vm12 = vcmp.lt.s32.totalorder %v4108_v8, 0 }
 0x742   :  { %vm6710_vm10 = vcmp.lt.s32.totalorder %v4107_v15, 0 }
 0x743   :  { %4826 = vperm.xlu1 %6973, %v6684_v63   ;;  %v6699_v63 = vcvt.f32.s32 %v6698_v62 }
 0x744   :  { %v11716_v0 = vpop.xlane.xlu0 %4520  ;;  %v11718_v24 = vpop.xlane.xlu2 %4526 }
 0x745   :  { %14053 = vst [vmem:[#allocation204_spill] sm:$0xff] %v11716_v0  ;;  %4841 = vperm.xlu0 %6972, %v6709_v19   ;;  %v11723_v29 = vpop.xlane.xlu1 %4532  ;;  %v6711_v0 = vceil.f32 %v4107_v15  ;;  %v6736_v19 = vceil.f32 %v4112_v40 }
 0x746   :  { %14054 = vst [vmem:[#allocation205_spill] sm:$0xff] %v11718_v24  ;;  %v6712_v24 = vfloor.f32 %v4107_v15 }
 0x747   :  { %14055 = vst [vmem:[#allocation206_spill] sm:$0xff] %v11723_v29  ;;  %v6704_v29 = vcvt.f32.s32 %v6703_v20  ;;  %v6738_v15 = vsel %vm6735_vm11, %v6736_v19, %v6737_v58  ;;  %v4111_v19 = vld [vmem:[%s13023_s10 + $0xa0] sm:$0xff] }
 0x748   :  { %v6713_v62 = vsel %vm6710_vm10, %v6711_v0, %v6712_v24  ;;  %v6739_v0 = vcvt.f32.s32 %v6738_v15  ;;  %v6718_v24 = vsel %vm6715_vm12, %v6716_v53, %v6717_v16  ;;  %v6731_v15 = vceil.f32 %v4111_v19 }
 0x749   :  { %4829 = vperm.xlu2 %6974, %v6689_v46   ;;  %v4110_v46 = vld [vmem:[%s13023_s10 + $0x98] sm:$0xff]  ;;  %v6714_v2 = vcvt.f32.s32 %v6713_v62  ;;  %v6732_v53 = vfloor.f32 %v4111_v19  ;;  %vm6730_vm15 = vcmp.lt.s32.totalorder %v4111_v19, 0 }
 0x74a   :  { %v6726_v40 = vceil.f32 %v4110_v46  ;;  %vm6725_vm13 = vcmp.lt.s32.totalorder %v4110_v46, 0 }
 0x74b   :  { %4835 = vperm.xlu1 %6973, %v6699_v63   ;;  %v4115_v63 = vld [vmem:[%s13023_s10 + $0xc0] sm:$0xff] }
 0x74c   :  { %v11731_v50 = vpop.xlane.xlu0 %4529  ;;  %v11733_v47 = vpop.xlane.xlu2 %4535  ;;  %v6752_v20 = vfloor.f32 %v4115_v63  ;;  %vm6750_vm14 = vcmp.lt.s32.totalorder %v4115_v63, 0 }
 0x74d   :  { %14056 = vst [vmem:[#allocation207_spill] sm:$0xff] %v11731_v50  ;;  %4850 = vperm.xlu0 %6972, %v6724_v56   ;;  %v6727_v50 = vfloor.f32 %v4110_v46  ;;  %v11741_v11 = vpop.xlane.xlu1 %4541  ;;  %v6751_v56 = vceil.f32 %v4115_v63 }
 0x74e   :  { %14057 = vst [vmem:[#allocation208_spill] sm:$0xff] %v11733_v47  ;;  %v6719_v47 = vcvt.f32.s32 %v6718_v24 }
 0x74f   :  { %14058 = vst [vmem:[#allocation209_spill] sm:$0xff] %v11741_v11  ;;  %v6728_v62 = vsel %vm6725_vm13, %v6726_v40, %v6727_v50  ;;  %v6753_v46 = vsel %vm6750_vm14, %v6751_v56, %v6752_v20  ;;  %v6733_v50 = vsel %vm6730_vm15, %v6731_v15, %v6732_v53  ;;  %v4114_v56 = vld [vmem:[%s13023_s10 + $0xb8] sm:$0xff] }
 0x750   :  { %v6729_v16 = vcvt.f32.s32 %v6728_v62  ;;  %v6746_v15 = vceil.f32 %v4114_v56  ;;  %v6747_v53 = vfloor.f32 %v4114_v56  ;;  %vm6745_vm3 = vcmp.lt.s32.totalorder %v4114_v56, 0 }
 0x751   :  { %4838 = vperm.xlu2 %6974, %v6704_v29   ;;  %v4113_v29 = vld [vmem:[%s13023_s10 + $0xb0] sm:$0xff] }
 0x752   :  { %v6741_v63 = vceil.f32 %v4113_v29  ;;  %v6742_v11 = vfloor.f32 %v4113_v29  ;;  %vm6740_vm0 = vcmp.lt.s32.totalorder %v4113_v29, 0  ;;  %v4116_v29 = vld [vmem:[%s13023_s10 + $0xc8] sm:$0xff] }
 0x753   :  { %4844 = vperm.xlu1 %6973, %v6714_v2   ;;  %v4118_v2 = vld [vmem:[%s13023_s10 + $0xd8] sm:$0xff]  ;;  %vm6755_vm4 = vcmp.lt.s32.totalorder %v4116_v29, 0 }
 0x754   :  { %v11746_v58 = vpop.xlane.xlu0 %4538  ;;  %v11748_v8 = vpop.xlane.xlu2 %4544  ;;  %v6766_v40 = vceil.f32 %v4118_v2  ;;  %vm6765_vm1 = vcmp.lt.s32.totalorder %v4118_v2, 0  ;;  %v6743_v62 = vsel %vm6740_vm0, %v6741_v63, %v6742_v11  ;;  %v6748_v11 = vsel %vm6745_vm3, %v6746_v15, %v6747_v53 }
 0x755   :  { %14059 = vst [vmem:[#allocation210_spill] sm:$0xff] %v11746_v58  ;;  %4859 = vperm.xlu0 %6972, %v6739_v0   ;;  %v6767_v0 = vfloor.f32 %v4118_v2  ;;  %v11756_v24 = vpop.xlane.xlu1 %4550  ;;  %v4121_v2 = vld [vmem:[%s13023_s10 + $0xf0] sm:$0xff] }
 0x756   :  { %14060 = vst [vmem:[#allocation211_spill] sm:$0xff] %v11748_v8  ;;  %v6754_v8 = vcvt.f32.s32 %v6753_v46  ;;  %v6782_v63 = vfloor.f32 %v4121_v2  ;;  %vm6780_vm6 = vcmp.lt.s32.totalorder %v4121_v2, 0 }
 0x757   :  { %14061 = vst [vmem:[#allocation212_spill] sm:$0xff] %v11756_v24  ;;  %v6768_v46 = vsel %vm6765_vm1, %v6766_v40, %v6767_v0  ;;  %v6756_v24 = vceil.f32 %v4116_v29 }
 0x759   :  { %4847 = vperm.xlu2 %6974, %v6719_v47   ;;  %v6734_v47 = vcvt.f32.s32 %v6733_v50  ;;  %v4117_v50 = vld [vmem:[%s13023_s10 + $0xd0] sm:$0xff] }
 0x75a   :  { %v6761_v15 = vceil.f32 %v4117_v50  ;;  %v6762_v53 = vfloor.f32 %v4117_v50  ;;  %vm6760_vm7 = vcmp.lt.s32.totalorder %v4117_v50, 0 }
 0x75b   :  { %4853 = vperm.xlu1 %6973, %v6729_v16   ;;  %v6744_v16 = vcvt.f32.s32 %v6743_v62 }
 0x75c   :  { %v11761_v20 = vpop.xlane.xlu0 %4547  ;;  %v11763_v19 = vpop.xlane.xlu2 %4553 }
 0x75d   :  { %14062 = vst [vmem:[#allocation213_spill] sm:$0xff] %v11761_v20  ;;  %4868 = vperm.xlu0 %6972, %v6754_v8   ;;  %v6757_v20 = vfloor.f32 %v4116_v29  ;;  %v6781_v8 = vceil.f32 %v4121_v2  ;;  %v11776_v56 = vpop.xlane.xlu1 %4559  ;;  %v4119_v29 = vld [vmem:[%s13023_s10 + $0xe0] sm:$0xff]  ;;  %v4124_v2 = vld [vmem:[%s13023_s10 + $0x108] sm:$0xff] }
 0x75e   :  { %14063 = vst [vmem:[#allocation214_spill] sm:$0xff] %v11763_v19  ;;  %v6769_v19 = vcvt.f32.s32 %v6768_v46  ;;  %vm6770_vm8 = vcmp.lt.s32.totalorder %v4119_v29, 0  ;;  %vm6795_vm5 = vcmp.lt.s32.totalorder %v4124_v2, 0 }
 0x75f   :  { %v6758_v0 = vsel %vm6755_vm4, %v6756_v24, %v6757_v20  ;;  %14065 = vst [vmem:[#allocation216_spill] sm:$0xff] %v11776_v56  ;;  %v6783_v46 = vsel %vm6780_vm6, %v6781_v8, %v6782_v63  ;;  %v6771_v24 = vceil.f32 %v4119_v29  ;;  %v6772_v20 = vfloor.f32 %v4119_v29  ;;  %v4120_v8 = vld [vmem:[%s13023_s10 + $0xe8] sm:$0xff] }
 0x760   :  { %v6797_v56 = vfloor.f32 %v4124_v2  ;;  %v6776_v29 = vceil.f32 %v4120_v8  ;;  %vm6775_vm9 = vcmp.lt.s32.totalorder %v4120_v8, 0 }
 0x761   :  { %4856 = vperm.xlu2 %6974, %v6734_v47   ;;  %v6749_v47 = vcvt.f32.s32 %v6748_v11  ;;  %v6796_v11 = vceil.f32 %v4124_v2  ;;  %v6773_v50 = vsel %vm6770_vm8, %v6771_v24, %v6772_v20 }
 0x762   :  { %v6774_v2 = vcvt.f32.s32 %v6773_v50 }
 0x763   :  { %4862 = vperm.xlu1 %6973, %v6744_v16   ;;  %v6759_v16 = vcvt.f32.s32 %v6758_v0 }
 0x764   :  { %v11774_v40 = vpop.xlane.xlu2 %4562  ;;  %v11778_v62 = vpop.xlane.xlu0 %4556 }
 0x765   :  { %14064 = vst [vmem:[#allocation215_spill] sm:$0xff] %v11774_v40  ;;  %4877 = vperm.xlu0 %6972, %v6769_v19   ;;  %v6784_v40 = vcvt.f32.s32 %v6783_v46  ;;  %v6763_v19 = vsel %vm6760_vm7, %v6761_v15, %v6762_v53  ;;  %v6798_v46 = vsel %vm6795_vm5, %v6796_v11, %v6797_v56  ;;  %v6777_v15 = vfloor.f32 %v4120_v8  ;;  %v11794_v53 = vpop.xlane.xlu1 %4568  ;;  %v4123_v11 = vld [vmem:[%s13023_s10 + $0x100] sm:$0xff] }
 0x766   :  { %14066 = vst [vmem:[#allocation217_spill] sm:$0xff] %v11778_v62  ;;  %v6764_v0 = vcvt.f32.s32 %v6763_v19  ;;  %v6799_v20 = vcvt.f32.s32 %v6798_v46  ;;  %vm6790_vm12 = vcmp.lt.s32.totalorder %v4123_v11, 0 }
 0x767   :  { %14068 = vst [vmem:[#allocation219_spill] sm:$0xff] %v11794_v53  ;;  %v6778_v19 = vsel %vm6775_vm9, %v6776_v29, %v6777_v15  ;;  %v6792_v29 = vfloor.f32 %v4123_v11 }
 0x768   :  { %v6779_v53 = vcvt.f32.s32 %v6778_v19 }
 0x769   :  { %4865 = vperm.xlu2 %6974, %v6749_v47   ;;  %v4122_v47 = vld [vmem:[%s13023_s10 + $0xf8] sm:$0xff] }
 0x76a   :  { %v6786_v24 = vceil.f32 %v4122_v47  ;;  %vm6785_vm10 = vcmp.lt.s32.totalorder %v4122_v47, 0 }
 0x76b   :  { %4871 = vperm.xlu1 %6973, %v6759_v16  }
 0x76c   :  { %v11789_v63 = vpop.xlane.xlu2 %4571  ;;  %v11796_v16 = vpop.xlane.xlu0 %4565 }
 0x76d   :  { %14067 = vst [vmem:[#allocation218_spill] sm:$0xff] %v11789_v63  ;;  %4886 = vperm.xlu0 %6972, %v6784_v40   ;;  %v4127_v63 = vld [vmem:[%s13023_s10 + $0x120] sm:$0xff]  ;;  %v6787_v40 = vfloor.f32 %v4122_v47  ;;  %v6791_v47 = vceil.f32 %v4123_v11 }
 0x76e   :  { %14069 = vst [vmem:[#allocation220_spill] sm:$0xff] %v11796_v16  ;;  %v6811_v62 = vceil.f32 %v4127_v63  ;;  %v6812_v56 = vfloor.f32 %v4127_v63  ;;  %vm6810_vm11 = vcmp.lt.s32.totalorder %v4127_v63, 0  ;;  %v4130_v63 = vld [vmem:[%s13023_s10 + $0x138] sm:$0xff] }
 0x76f   :  { %v6788_v50 = vsel %vm6785_vm10, %v6786_v24, %v6787_v40  ;;  %v11812_v24 = vpop.xlane.xlu1 %4577  ;;  %v6793_v19 = vsel %vm6790_vm12, %v6791_v47, %v6792_v29  ;;  %vm6825_vm14 = vcmp.lt.s32.totalorder %v4130_v63, 0  ;;  %v4133_v29 = vld [vmem:[%s13023_s10 + $0x150] sm:$0xff] }
 0x770   :  { %v6813_v46 = vsel %vm6810_vm11, %v6811_v62, %v6812_v56  ;;  %v6789_v15 = vcvt.f32.s32 %v6788_v50  ;;  %14071 = vst [vmem:[#allocation222_spill] sm:$0xff] %v11812_v24  ;;  %v6827_v62 = vfloor.f32 %v4130_v63  ;;  %v4126_v56 = vld [vmem:[%s13023_s10 + $0x118] sm:$0xff]  ;;  %v6794_v50 = vcvt.f32.s32 %v6793_v19  ;;  %v4128_v24 = vld [vmem:[%s13023_s10 + $0x128] sm:$0xff] }
 0x771   :  { %4874 = vperm.xlu2 %6974, %v6764_v0   ;;  %v4125_v0 = vld [vmem:[%s13023_s10 + $0x110] sm:$0xff]  ;;  %vm6805_vm15 = vcmp.lt.s32.totalorder %v4126_v56, 0  ;;  %vm6815_vm0 = vcmp.lt.s32.totalorder %v4128_v24, 0  ;;  %v6842_v19 = vfloor.f32 %v4133_v29  ;;  %vm6840_vm1 = vcmp.lt.s32.totalorder %v4133_v29, 0 }
 0x772   :  { %v6802_v16 = vfloor.f32 %v4125_v0  ;;  %vm6800_vm13 = vcmp.lt.s32.totalorder %v4125_v0, 0 }
 0x773   :  { %4880 = vperm.xlu1 %6973, %v6774_v2   ;;  %v6801_v2 = vceil.f32 %v4125_v0 }
 0x774   :  { %v11804_v8 = vpop.xlane.xlu2 %4580  ;;  %v11814_v40 = vpop.xlane.xlu0 %4574 }
 0x775   :  { %14070 = vst [vmem:[#allocation221_spill] sm:$0xff] %v11804_v8  ;;  %4895 = vperm.xlu0 %6972, %v6799_v20   ;;  %v6814_v20 = vcvt.f32.s32 %v6813_v46  ;;  %v6826_v8 = vceil.f32 %v4130_v63  ;;  %v6803_v11 = vsel %vm6800_vm13, %v6801_v2, %v6802_v16  ;;  %v6807_v46 = vfloor.f32 %v4126_v56 }
 0x776   :  { %14072 = vst [vmem:[#allocation223_spill] sm:$0xff] %v11814_v40  ;;  %v6804_v47 = vcvt.f32.s32 %v6803_v11  ;;  %v6817_v63 = vfloor.f32 %v4128_v24 }
 0x777   :  { %v6828_v40 = vsel %vm6825_vm14, %v6826_v8, %v6827_v62  ;;  %v11827_v58 = vpop.xlane.xlu1 %4586  ;;  %v4129_v62 = vld [vmem:[%s13023_s10 + $0x130] sm:$0xff] }
 0x778   :  { %v6829_v16 = vcvt.f32.s32 %v6828_v40  ;;  %14074 = vst [vmem:[#allocation225_spill] sm:$0xff] %v11827_v58  ;;  %vm6820_vm3 = vcmp.lt.s32.totalorder %v4129_v62, 0 }
 0x779   :  { %4883 = vperm.xlu2 %6974, %v6779_v53   ;;  %v6806_v53 = vceil.f32 %v4126_v56 }
 0x77b   :  { %4889 = vperm.xlu1 %6973, %v6789_v15   ;;  %v6816_v15 = vceil.f32 %v4128_v24  ;;  %v6808_v2 = vsel %vm6805_vm15, %v6806_v53, %v6807_v46  ;;  %v4131_v24 = vld [vmem:[%s13023_s10 + $0x140] sm:$0xff]  ;;  %v6822_v53 = vfloor.f32 %v4129_v62 }
 0x77c   :  { %v11822_v0 = vpop.xlane.xlu2 %4589  ;;  %v11829_v8 = vpop.xlane.xlu0 %4583  ;;  %v6809_v11 = vcvt.f32.s32 %v6808_v2  ;;  %vm6830_vm4 = vcmp.lt.s32.totalorder %v4131_v24, 0 }
 0x77d   :  { %4904 = vperm.xlu0 %6972, %v6814_v20   ;;  %14073 = vst [vmem:[#allocation224_spill] sm:$0xff] %v11822_v0  ;;  %v6841_v20 = vceil.f32 %v4133_v29  ;;  %v6818_v56 = vsel %vm6815_vm0, %v6816_v15, %v6817_v63  ;;  %v6831_v29 = vceil.f32 %v4131_v24  ;;  %v6832_v0 = vfloor.f32 %v4131_v24 }
 0x77e   :  { %14075 = vst [vmem:[#allocation226_spill] sm:$0xff] %v11829_v8  ;;  %v6819_v46 = vcvt.f32.s32 %v6818_v56 }
 0x77f   :  { %v6843_v40 = vsel %vm6840_vm1, %v6841_v20, %v6842_v19  ;;  %v4132_v20 = vld [vmem:[%s13023_s10 + $0x148] sm:$0xff]  ;;  %v6833_v19 = vsel %vm6830_vm4, %v6831_v29, %v6832_v0 }
 0x780   :  { %v6844_v15 = vcvt.f32.s32 %v6843_v40  ;;  %v6836_v40 = vceil.f32 %v4132_v20  ;;  %vm6835_vm7 = vcmp.lt.s32.totalorder %v4132_v20, 0 }
 0x781   :  { %4892 = vperm.xlu2 %6974, %v6794_v50   ;;  %v6821_v50 = vceil.f32 %v4129_v62  ;;  %v11845_v62 = vpop.xlane.xlu1 %4595 }
 0x782   :  { %14077 = vst [vmem:[#allocation228_spill] sm:$0xff] %v11845_v62 }
 0x783   :  { %4898 = vperm.xlu1 %6973, %v6804_v47   ;;  %v4136_v47 = vld [vmem:[%s13023_s10 + $0x168] sm:$0xff]  ;;  %v6823_v63 = vsel %vm6820_vm3, %v6821_v50, %v6822_v53  ;;  %v6837_v50 = vfloor.f32 %v4132_v20  ;;  %v6834_v53 = vcvt.f32.s32 %v6833_v19 }
 0x784   :  { %v11840_v58 = vpop.xlane.xlu2 %4598  ;;  %v6857_v2 = vfloor.f32 %v4136_v47  ;;  %vm6855_vm6 = vcmp.lt.s32.totalorder %v4136_v47, 0  ;;  %v11847_v56 = vpop.xlane.xlu0 %4592  ;;  %v6824_v8 = vcvt.f32.s32 %v6823_v63 }
 0x785   :  { %4913 = vperm.xlu0 %6972, %v6829_v16   ;;  %14076 = vst [vmem:[#allocation227_spill] sm:$0xff] %v11840_v58  ;;  %v6856_v16 = vceil.f32 %v4136_v47 }
 0x786   :  { %14078 = vst [vmem:[#allocation229_spill] sm:$0xff] %v11847_v56 }
 0x787   :  { %v6858_v24 = vsel %vm6855_vm6, %v6856_v16, %v6857_v2  ;;  %v4135_v16 = vld [vmem:[%s13023_s10 + $0x160] sm:$0xff] }
 0x788   :  { %v6859_v29 = vcvt.f32.s32 %v6858_v24  ;;  %v6851_v24 = vceil.f32 %v4135_v16  ;;  %vm6850_vm9 = vcmp.lt.s32.totalorder %v4135_v16, 0 }
 0x789   :  { %4901 = vperm.xlu2 %6974, %v6809_v11   ;;  %v4134_v11 = vld [vmem:[%s13023_s10 + $0x158] sm:$0xff] }
 0x78a   :  { %v6846_v0 = vceil.f32 %v4134_v11  ;;  %v6847_v47 = vfloor.f32 %v4134_v11  ;;  %vm6845_vm8 = vcmp.lt.s32.totalorder %v4134_v11, 0 }
 0x78b   :  { %4907 = vperm.xlu1 %6973, %v6819_v46   ;;  %v4139_v46 = vld [vmem:[%s13023_s10 + $0x180] sm:$0xff] }
 0x78c   :  { %v6871_v63 = vceil.f32 %v4139_v46  ;;  %v6872_v58 = vfloor.f32 %v4139_v46  ;;  %v11855_v62 = vpop.permute.xlu2 %4799  ;;  %vm6870_vm5 = vcmp.lt.s32.totalorder %v4139_v46, 0  ;;  %v6848_v2 = vsel %vm6845_vm8, %v6846_v0, %v6847_v47  ;;  %v4142_v46 = vld [vmem:[%s13023_s10 + $0x198] sm:$0xff] }
 0x78d   :  { %4922 = vperm.xlu0 %6972, %v6844_v15   ;;  %v6838_v15 = vsel %vm6835_vm7, %v6836_v40, %v6837_v50  ;;  %v6852_v40 = vfloor.f32 %v4135_v16  ;;  %v11865_v50 = vpop.xlane.xlu0 %4601  ;;  %v6886_v56 = vceil.f32 %v4142_v46  ;;  %v6887_v28 = vfloor.f32 %v4142_v46 }
 0x78e   :  { %v6839_v19 = vcvt.f32.s32 %v6838_v15  ;;  %v6873_v11 = vsel %vm6870_vm5, %v6871_v63, %v6872_v58  ;;  %14079 = vst [vmem:[#allocation230_spill] sm:$0xff] %v11865_v50  ;;  %vm6885_vm11 = vcmp.lt.s32.totalorder %v4142_v46, 0  ;;  %v4138_v58 = vld [vmem:[%s13023_s10 + $0x178] sm:$0xff]  ;;  %v4145_v46 = vld [vmem:[%s13023_s10 + $0x1b0] sm:$0xff]  ;;  %vm6920_vm8 = vcmp.lt.s32.totalorder %v4149_v39, 0 }
 0x78f   :  { %v6853_v15 = vsel %vm6850_vm9, %v6851_v24, %v6852_v40  ;;  %v6867_v24 = vfloor.f32 %v4138_v58  ;;  %vm6865_vm12 = vcmp.lt.s32.totalorder %v4138_v58, 0  ;;  %v6901_v4 = vceil.f32 %v4145_v46 }
 0x790   :  { %v6854_v50 = vcvt.f32.s32 %v6853_v15  ;;  %v6902_v33 = vfloor.f32 %v4145_v46  ;;  %vm6900_vm14 = vcmp.lt.s32.totalorder %v4145_v46, 0 }
 0x791   :  { %4910 = vperm.xlu2 %6974, %v6824_v8   ;;  %v4137_v8 = vld [vmem:[%s13023_s10 + $0x170] sm:$0xff] }
 0x792   :  { %v6861_v0 = vceil.f32 %v4137_v8  ;;  %v6862_v47 = vfloor.f32 %v4137_v8  ;;  %vm6860_vm10 = vcmp.lt.s32.totalorder %v4137_v8, 0  ;;  %v6888_v8 = vsel %vm6885_vm11, %v6886_v56, %v6887_v28  ;;  %v4141_v28 = vld [vmem:[%s13023_s10 + $0x190] sm:$0xff] }
 0x793   :  { %4916 = vperm.xlu1 %6973, %v6834_v53   ;;  %v6849_v53 = vcvt.f32.s32 %v6848_v2  ;;  %vm6880_vm15 = vcmp.lt.s32.totalorder %v4141_v28, 0 }
 0x794   :  { %v6863_v63 = vsel %vm6860_vm10, %v6861_v0, %v6862_v47  ;;  %v11873_v16 = vpop.permute.xlu2 %4808 }
 0x795   :  { %v11860_v20 = vpop.permute.xlu1 %4796  ;;  %4931 = vperm.xlu0 %6972, %v6859_v29   ;;  %v6874_v29 = vcvt.f32.s32 %v6873_v11  ;;  %v6866_v11 = vceil.f32 %v4138_v58 }
 0x797   :  { %v6868_v15 = vsel %vm6865_vm12, %v6866_v11, %v6867_v24  ;;  %v6882_v11 = vfloor.f32 %v4141_v28 }
 0x799   :  { %4919 = vperm.xlu2 %6974, %v6839_v19   ;;  %v4140_v19 = vld [vmem:[%s13023_s10 + $0x188] sm:$0xff] }
 0x79a   :  { %v6876_v0 = vceil.f32 %v4140_v19  ;;  %v6877_v47 = vfloor.f32 %v4140_v19  ;;  %vm6875_vm13 = vcmp.lt.s32.totalorder %v4140_v19, 0  ;;  %v6881_v19 = vceil.f32 %v4141_v28 }
 0x79b   :  { %4925 = vperm.xlu1 %6973, %v6849_v53   ;;  %v6864_v53 = vcvt.f32.s32 %v6863_v63  ;;  %v6869_v63 = vcvt.f32.s32 %v6868_v15 }
 0x79c   :  { %v6878_v56 = vsel %vm6875_vm13, %v6876_v0, %v6877_v47  ;;  %v11893_v24 = vpop.permute.xlu2 %4814  ;;  %v4148_v0 = vld [vmem:[%s13023_s10 + $0x1c8] sm:$0xff]  ;;  %v6883_v52 = vsel %vm6880_vm15, %v6881_v19, %v6882_v11 }
 0x79d   :  { %v11875_v2 = vpop.permute.xlu1 %4805  ;;  %4940 = vperm.xlu0 %6972, %v6874_v29   ;;  %v6889_v29 = vcvt.f32.s32 %v6888_v8  ;;  %v6903_v8 = vsel %vm6900_vm14, %v6901_v4, %v6902_v33  ;;  %v6879_v46 = vcvt.f32.s32 %v6878_v56  ;;  %v6916_v13 = vceil.f32 %v4148_v0  ;;  %v4144_v4 = vld [vmem:[%s13023_s10 + $0x1a8] sm:$0xff] }
 0x79e   :  { %v6904_v15 = vcvt.f32.s32 %v6903_v8  ;;  %v6917_v33 = vfloor.f32 %v4148_v0  ;;  %vm6915_vm1 = vcmp.lt.s32.totalorder %v4148_v0, 0  ;;  %v6884_v37 = vcvt.f32.s32 %v6883_v52 }
 0x79f   :  { %v11880_v40 = vpop.permute.xlu0 %4802  ;;  %v6897_v19 = vfloor.f32 %v4144_v4  ;;  %vm6895_vm3 = vcmp.lt.s32.totalorder %v4144_v4, 0 }
 0x7a0   :  { %v6918_v8 = vsel %vm6915_vm1, %v6916_v13, %v6917_v33  ;;  %v4147_v33 = vld [vmem:[%s13023_s10 + $0x1c0] sm:$0xff] }
 0x7a1   :  { %4928 = vperm.xlu2 %6974, %v6854_v50   ;;  %v4143_v50 = vld [vmem:[%s13023_s10 + $0x1a0] sm:$0xff]  ;;  %v6919_v52 = vcvt.f32.s32 %v6918_v8  ;;  %v6912_v8 = vfloor.f32 %v4147_v33  ;;  %vm6910_vm7 = vcmp.lt.s32.totalorder %v4147_v33, 0 }
 0x7a2   :  { %v6891_v47 = vceil.f32 %v4143_v50  ;;  %vm6890_vm0 = vcmp.lt.s32.totalorder %v4143_v50, 0 }
 0x7a3   :  { %4934 = vperm.xlu1 %6973, %v6864_v53  }
 0x7a4   :  { %v11913_v27 = vpop.permute.xlu2 %4820 }
 0x7a5   :  { %v11888_v58 = vpop.permute.xlu1 %4811  ;;  %4949 = vperm.xlu0 %6972, %v6889_v29   ;;  %v6892_v29 = vfloor.f32 %v4143_v50  ;;  %v6896_v50 = vceil.f32 %v4144_v4 }
 0x7a7   :  { %v11895_v53 = vpop.permute.xlu0 %4823  ;;  %v6893_v56 = vsel %vm6890_vm0, %v6891_v47, %v6892_v29 }
 0x7a8   :  { %v6894_v11 = vcvt.f32.s32 %v6893_v56 }
 0x7a9   :  { %4937 = vperm.xlu2 %6974, %v6869_v63   ;;  %v4146_v63 = vld [vmem:[%s13023_s10 + $0x1b8] sm:$0xff] }
 0x7aa   :  { %v6906_v47 = vceil.f32 %v4146_v63  ;;  %v6907_v29 = vfloor.f32 %v4146_v63  ;;  %vm6905_vm4 = vcmp.lt.s32.totalorder %v4146_v63, 0  ;;  %v6911_v63 = vceil.f32 %v4147_v33 }
 0x7ab   :  { %4943 = vperm.xlu1 %6973, %v6879_v46   ;;  %v4151_v46 = vld [vmem:[%s13023_s10 + $0x1e0] sm:$0xff] }
 0x7ac   :  { %v6931_v17 = vceil.f32 %v4151_v46  ;;  %v6932_v13 = vfloor.f32 %v4151_v46  ;;  %vm6930_vm6 = vcmp.lt.s32.totalorder %v4151_v46, 0  ;;  %v6908_v4 = vsel %vm6905_vm4, %v6906_v47, %v6907_v29  ;;  %v11928_v41 = vpop.permute.xlu2 %4829 }
 0x7ad   :  { %v11903_v28 = vpop.permute.xlu1 %4817  ;;  %4958 = vperm.xlu0 %6972, %v6904_v15   ;;  %v6898_v15 = vsel %vm6895_vm3, %v6896_v50, %v6897_v19  ;;  %v6909_v50 = vcvt.f32.s32 %v6908_v4  ;;  %v4154_v19 = vld [vmem:[%s13023_s10 + $0x1f8] sm:$0xff]  ;;  %v6922_v46 = vfloor.f32 %v4149_v39 }
 0x7ae   :  { %v6899_v56 = vcvt.f32.s32 %v6898_v15  ;;  %v6946_v15 = vceil.f32 %v4154_v19  ;;  %v6947_v7 = vfloor.f32 %v4154_v19  ;;  %vm6945_vm5 = vcmp.lt.s32.totalorder %v4154_v19, 0 }
 0x7af   :  { %v11911_v0 = vpop.permute.xlu0 %4832 }
 0x7b0   :  { %v6948_v4 = vsel %vm6945_vm5, %v6946_v15, %v6947_v7 }
 0x7b1   :  { %4946 = vperm.xlu2 %6974, %v6884_v37   ;;  %v6933_v37 = vsel %vm6930_vm6, %v6931_v17, %v6932_v13  ;;  %v4150_v17 = vld [vmem:[%s13023_s10 + $0x1d8] sm:$0xff]  ;;  %v6949_v21 = vcvt.f32.s32 %v6948_v4 }
 0x7b2   :  { %v6934_v47 = vcvt.f32.s32 %v6933_v37  ;;  %v6927_v37 = vfloor.f32 %v4150_v17  ;;  %vm6925_vm9 = vcmp.lt.s32.totalorder %v4150_v17, 0 }
 0x7b3   :  { %4952 = vperm.xlu1 %6973, %v6894_v11   ;;  %v6921_v11 = vceil.f32 %v4149_v39  ;;  %v4152_v39 = vld [vmem:[%s13023_s10 + $0x1e8] sm:$0xff] }
 0x7b4   :  { %v6937_v19 = vfloor.f32 %v4152_v39  ;;  %vm6935_vm10 = vcmp.lt.s32.totalorder %v4152_v39, 0 }
 0x7b5   :  { %4967 = vperm.xlu0 %6972, %v6919_v52   ;;  %v11921_v59 = vpop.permute.xlu1 %4826  ;;  %v6913_v52 = vsel %vm6910_vm7, %v6911_v63, %v6912_v8  ;;  %v6923_v13 = vsel %vm6920_vm8, %v6921_v11, %v6922_v46  ;;  %v4153_v11 = vld [vmem:[%s13023_s10 + $0x1f0] sm:$0xff] }
 0x7b6   :  { %v6914_v33 = vcvt.f32.s32 %v6913_v52  ;;  %v6924_v63 = vcvt.f32.s32 %v6923_v13  ;;  %v6941_v15 = vceil.f32 %v4153_v11  ;;  %vm6940_vm11 = vcmp.lt.s32.totalorder %v4153_v11, 0 }
 0x7b7   :  { %v11926_v29 = vpop.permute.xlu0 %4841 }
 0x7b9   :  { %4955 = vperm.xlu2 %6974, %v6899_v56   ;;  %v6926_v56 = vceil.f32 %v4150_v17  ;;  %v6942_v17 = vfloor.f32 %v4153_v11 }
 0x7bb   :  { %4961 = vperm.xlu1 %6973, %v6909_v50   ;;  %v6936_v50 = vceil.f32 %v4152_v39  ;;  %v6928_v26 = vsel %vm6925_vm9, %v6926_v56, %v6927_v37  ;;  %v6943_v39 = vsel %vm6940_vm11, %v6941_v15, %v6942_v17  ;;  %v14081_v15 = vld [vmem:[#allocation75_spill] sm:$0xff] }
 0x7bc   :  { %v6929_v52 = vcvt.f32.s32 %v6928_v26  ;;  %v6944_v4 = vcvt.f32.s32 %v6943_v39 }
 0x7bd   :  { %4976 = vperm.xlu0 %6972, %v6934_v47   ;;  %v11936_v8 = vpop.permute.xlu1 %4835  ;;  %v6938_v7 = vsel %vm6935_vm10, %v6936_v50, %v6937_v19  ;;  %v11943_v47 = vpop.permute.xlu2 %4838 }
 0x7be   :  { %v6939_v13 = vcvt.f32.s32 %v6938_v7  ;;  %v14080_v7 = vld [vmem:[#allocation7_spill] sm:$0xff] }
 0x7bf   :  { %v11941_v46 = vpop.permute.xlu0 %4850  ;;  %vm4989_vm12 = vcmp.eq.s32.totalorder %v14080_v7, %v11880_v40  ;;  %vm4987_vm13 = vcmp.eq.s32.totalorder %v14080_v7, %v11860_v20  ;;  %vm4992_vm14 = vcmp.eq.s32.totalorder %v14080_v7, %v11888_v58  ;;  %vm4988_vm15 = vcmp.eq.s32.totalorder %v14080_v7, %v11855_v62  ;;  %v14083_v58 = vld [vmem:[#allocation21_spill] sm:$0xff] }
 0x7c0   :  { %v5053_v17 = vsel %vm4989_vm12, %v14081_v15, 0.0  ;;  %v5051_v12 = vsel %vm4987_vm13, %v14082_v57, 0.0  ;;  %v5056_v15 = vsel %vm4992_vm14, %v9507_v51, 0.0  ;;  %vm4990_vm0 = vcmp.eq.s32.totalorder %v14080_v7, %v11875_v2 }
 0x7c1   :  { %4964 = vperm.xlu2 %6974, %v6914_v33   ;;  %v5115_v10 = vsel %vm3446_vm2, %v5051_v12, 0.0  ;;  %vm4995_vm1 = vcmp.eq.s32.totalorder %v14080_v7, %v11913_v27  ;;  %v5054_v12 = vsel %vm4990_vm0, %v13949_v45, 0.0  ;;  %vm4991_vm3 = vcmp.eq.s32.totalorder %v14080_v7, %v11873_v16 }
 0x7c2   :  { %v5124_v2 = vsel %vm3446_vm2, %v5054_v12, 0.0  ;;  %vm4993_vm4 = vcmp.eq.s32.totalorder %v14080_v7, %v11893_v24  ;;  %vm4998_vm6 = vcmp.eq.s32.totalorder %v14080_v7, %v11928_v41  ;;  %vm4994_vm7 = vcmp.eq.s32.totalorder %v14080_v7, %v11903_v28  ;;  %v14085_v24 = vld [vmem:[#allocation83_spill] sm:$0xff]  ;;  %v14087_v28 = vld [vmem:[#allocation8_spill] sm:$0xff] }
 0x7c3   :  { %4970 = vperm.xlu1 %6973, %v6924_v63   ;;  %vm4996_vm8 = vcmp.eq.s32.totalorder %v14080_v7, %v11895_v53  ;;  %vm5001_vm5 = vcmp.eq.s32.totalorder %v14080_v7, %v11943_v47  ;;  %vm4997_vm9 = vcmp.eq.s32.totalorder %v14080_v7, %v11921_v59  ;;  %vm4999_vm10 = vcmp.eq.s32.totalorder %v14080_v7, %v11911_v0 }
 0x7c4   :  { %vm5000_vm12 = vcmp.eq.s32.totalorder %v14080_v7, %v11936_v8  ;;  %vm5002_vm13 = vcmp.eq.s32.totalorder %v14080_v7, %v11926_v29  ;;  %vm5005_vm0 = vcmp.eq.s32.totalorder %v14080_v7, %v11941_v46 }
 0x7c5   :  { %4985 = vperm.xlu0 %6972, %v6949_v21   ;;  %v11945_v33 = vpop.permute.xlu1 %4844  ;;  %v11949_v37 = vpop.permute.xlu2 %4847 }
 0x7c6   :  { %vm5004_vm11 = vcmp.eq.s32.totalorder %v14080_v7, %v11949_v37 }
 0x7c7   :  { %v11947_v56 = vpop.permute.xlu0 %4859 }
 0x7c9   :  { %4973 = vperm.xlu2 %6974, %v6929_v52  }
 0x7cb   :  { %4979 = vperm.xlu1 %6973, %v6939_v13  }
 0x7cd   :  { %v11951_v63 = vpop.permute.xlu1 %4853  ;;  %v11955_v21 = vpop.permute.xlu2 %4856 }
 0x7ce   :  { %vm5007_vm14 = vcmp.eq.s32.totalorder %v14080_v7, %v11955_v21 }
 0x7cf   :  { %v11953_v50 = vpop.permute.xlu0 %4868  ;;  %v5071_v29 = vsel %vm5007_vm14, %v13971_v30, 0.0 }
 0x7d0   :  { %v5175_v21 = vsel %vm3446_vm2, %v5071_v29, 0.0 }
 0x7d1   :  { %4982 = vperm.xlu2 %6974, %v6944_v4   ;;  %v5121_v4 = vsel %vm3446_vm2, %v5053_v17, 0.0  ;;  %v5130_v17 = vsel %vm3446_vm2, %v5056_v15, 0.0  ;;  %v14084_v15 = vld [vmem:[#allocation147_spill] sm:$0xff] }
 0x7d5   :  { %v11957_v26 = vpop.permute.xlu1 %4862  ;;  %v11961_v11 = vpop.permute.xlu2 %4865 }
 0x7d7   :  { %v11959_v19 = vpop.permute.xlu0 %4877 }
 0x7dd   :  { %v11965_v52 = vpop.permute.xlu1 %4871  ;;  %v11970_v39 = vpop.permute.xlu2 %4874 }
 0x7df   :  { %v11968_v13 = vpop.permute.xlu0 %4886 }
 0x7e5   :  { %v11978_v40 = vpop.permute.xlu1 %4880  ;;  %v11990_v57 = vpop.permute.xlu2 %4883 }
 0x7e7   :  { %v11986_v20 = vpop.permute.xlu0 %4895 }
 0x7ed   :  { %v11999_v62 = vpop.permute.xlu1 %4889  ;;  %v12010_v16 = vpop.permute.xlu2 %4892 }
 0x7ef   :  { %5122 = vadd.xlane.f32.xlu0 %v5121_v4  ;;  %v5052_v4 = vsel %vm4988_vm15, %v14083_v58, 0.0  ;;  %v12008_v45 = vpop.permute.xlu0 %4904  ;;  %v5057_v58 = vsel %vm4993_vm4, %v13952_v5, 0.0  ;;  %vm5003_vm15 = vcmp.eq.s32.totalorder %v14080_v7, %v11945_v33  ;;  %v14095_v33 = vld [vmem:[#allocation27_spill] sm:$0xff]  ;;  %vm5008_vm4 = vcmp.eq.s32.totalorder %v14080_v7, %v11947_v56 }
 0x7f0   :  { %v5118_v51 = vsel %vm3446_vm2, %v5052_v4, 0.0  ;;  %v5062_v4 = vsel %vm4998_vm6, %v14085_v24, 0.0  ;;  %v14089_v24 = vld [vmem:[#allocation141_spill] sm:$0xff]  ;;  %vm5013_vm6 = vcmp.eq.s32.totalorder %v14080_v7, %v11970_v39 }
 0x7f1   :  { %v5148_v12 = vsel %vm3446_vm2, %v5062_v4, 0.0  ;;  %v5061_v4 = vsel %vm4997_vm9, %v14089_v24, 0.0  ;;  %v5077_v56 = vsel %vm5013_vm6, %v13982_v22, 0.0  ;;  %vm5012_vm9 = vcmp.eq.s32.totalorder %v14080_v7, %v11965_v52 }
 0x7f2   :  { %v5145_v59 = vsel %vm3446_vm2, %v5061_v4, 0.0  ;;  %v5193_v29 = vsel %vm3446_vm2, %v5077_v56, 0.0 }
 0x7f5   :  { %5116 = vadd.xlane.f32.xlu1 %v5115_v10  ;;  %v5059_v10 = vsel %vm4995_vm1, %v13950_v60, 0.0  ;;  %v12020_v41 = vpop.permute.xlu1 %4898  ;;  %v12032_v53 = vpop.permute.xlu2 %4901  ;;  %vm5010_vm1 = vcmp.eq.s32.totalorder %v14080_v7, %v11961_v11 }
 0x7f6   :  { %v5139_v27 = vsel %vm3446_vm2, %v5059_v10, 0.0  ;;  %v14086_v10 = vld [vmem:[#allocation87_spill] sm:$0xff]  ;;  %v5074_v46 = vsel %vm5010_vm1, %v13976_v34, 0.0  ;;  %vm5022_vm14 = vcmp.eq.s32.totalorder %v14080_v7, %v12032_v53 }
 0x7f7   :  { %5131 = vadd.xlane.f32.xlu0 %v5130_v17  ;;  %v5055_v17 = vsel %vm4991_vm3, %v14084_v15, 0.0  ;;  %v12028_v15 = vpop.permute.xlu0 %4913  ;;  %vm5006_vm3 = vcmp.eq.s32.totalorder %v14080_v7, %v11951_v63  ;;  %v5184_v11 = vsel %vm3446_vm2, %v5074_v46, 0.0 }
 0x7f8   :  { %v5127_v60 = vsel %vm3446_vm2, %v5055_v17, 0.0  ;;  %v14088_v17 = vld [vmem:[#allocation13_spill] sm:$0xff] }
 0x7fa   :  { %5119 = vadd.xlane.f32.xlu2 %v5118_v51  ;;  %v5133_v51 = vsel %vm3446_vm2, %v5057_v58, 0.0 }
 0x7fd   :  { %5125 = vadd.xlane.f32.xlu1 %v5124_v2  ;;  %v5058_v2 = vsel %vm4994_vm7, %v14086_v10, 0.0  ;;  %vm5009_vm7 = vcmp.eq.s32.totalorder %v14080_v7, %v11957_v26 }
 0x7fe   :  { %v5136_v5 = vsel %vm3446_vm2, %v5058_v2, 0.0  ;;  %v14091_v2 = vld [vmem:[#allocation31_spill] sm:$0xff] }
 0x7ff   :  { %5140 = vadd.xlane.f32.xlu0 %v5139_v27  ;;  %v5060_v27 = vsel %vm4996_vm8, %v14087_v28, 0.0  ;;  %v5068_v0 = vsel %vm5004_vm11, %v14091_v2, 0.0  ;;  %vm5011_vm8 = vcmp.eq.s32.totalorder %v14080_v7, %v11953_v50  ;;  %vm5019_vm11 = vcmp.eq.s32.totalorder %v14080_v7, %v12010_v16 }
 0x800   :  { %v5142_v58 = vsel %vm3446_vm2, %v5060_v27, 0.0  ;;  %v12052_v27 = vpop.permute.xlu2 %4910  ;;  %v5166_v37 = vsel %vm3446_vm2, %v5068_v0, 0.0  ;;  %v5069_v0 = vsel %vm5005_vm0, %v14095_v33, 0.0  ;;  %v5075_v22 = vsel %vm5011_vm8, %v13980_v32, 0.0 }
 0x801   :  { %vm5020_vm0 = vcmp.eq.s32.totalorder %v14080_v7, %v11986_v20  ;;  %vm5025_vm1 = vcmp.eq.s32.totalorder %v14080_v7, %v12052_v27  ;;  %vm5026_vm8 = vcmp.eq.s32.totalorder %v14080_v7, %v12028_v15 }
 0x802   :  { %5128 = vadd.xlane.f32.xlu2 %v5127_v60  ;;  %v5065_v60 = vsel %vm5001_vm5, %v14088_v17, 0.0  ;;  %v14092_v17 = vld [vmem:[#allocation143_spill] sm:$0xff]  ;;  %vm5016_vm5 = vcmp.eq.s32.totalorder %v14080_v7, %v11990_v57  ;;  %v5089_v20 = vsel %vm5025_vm1, %v13998_v36, 0.0 }
 0x803   :  { %v5157_v47 = vsel %vm3446_vm2, %v5065_v60, 0.0  ;;  %v5064_v60 = vsel %vm5000_vm12, %v14092_v17, 0.0  ;;  %v14096_v17 = vld [vmem:[#allocation145_spill] sm:$0xff]  ;;  %vm5015_vm12 = vcmp.eq.s32.totalorder %v14080_v7, %v11978_v40  ;;  %v5229_v27 = vsel %vm3446_vm2, %v5089_v20, 0.0 }
 0x804   :  { %v5154_v8 = vsel %vm3446_vm2, %v5064_v60, 0.0  ;;  %v5070_v60 = vsel %vm5006_vm3, %v14096_v17, 0.0  ;;  %vm5021_vm3 = vcmp.eq.s32.totalorder %v14080_v7, %v12020_v41 }
 0x805   :  { %5134 = vadd.xlane.f32.xlu1 %v5133_v51  ;;  %v12042_v51 = vpop.permute.xlu1 %4907  ;;  %v5172_v34 = vsel %vm3446_vm2, %v5070_v60, 0.0  ;;  %v14099_v60 = vld [vmem:[#allocation62_spill] sm:$0xff] }
 0x807   :  { %5149 = vadd.xlane.f32.xlu0 %v5148_v12  ;;  %v14090_v12 = vld [vmem:[#allocation23_spill] sm:$0xff] }
 0x808   :  { %v5063_v10 = vsel %vm4999_vm10, %v14090_v12, 0.0  ;;  %v14094_v12 = vld [vmem:[#allocation146_spill] sm:$0xff]  ;;  %v12074_v2 = vpop.permute.xlu2 %4919  ;;  %vm5014_vm10 = vcmp.eq.s32.totalorder %v14080_v7, %v11959_v19  ;;  %v5083_v19 = vsel %vm5019_vm11, %v13988_v3, 0.0 }
 0x809   :  { %v5151_v28 = vsel %vm3446_vm2, %v5063_v10, 0.0  ;;  %v5067_v10 = vsel %vm5003_vm15, %v14094_v12, 0.0  ;;  %v5080_v12 = vsel %vm5016_vm5, %v13985_v9, 0.0  ;;  %v5078_v9 = vsel %vm5014_vm10, %v13983_v43, 0.0 }
 0x80a   :  { %5137 = vadd.xlane.f32.xlu2 %v5136_v5  ;;  %v12049_v5 = vpop.permute.xlu0 %4922  ;;  %v5163_v30 = vsel %vm3446_vm2, %v5067_v10, 0.0  ;;  %v5187_v10 = vsel %vm3446_vm2, %v5075_v22, 0.0  ;;  %v5202_v57 = vsel %vm3446_vm2, %v5080_v12, 0.0  ;;  %v5196_v46 = vsel %vm3446_vm2, %v5078_v9, 0.0 }
 0x80b   :  { %v5211_v16 = vsel %vm3446_vm2, %v5083_v19, 0.0  ;;  %v5079_v43 = vsel %vm5015_vm12, %v10228_v23, 0.0  ;;  %vm5018_vm15 = vcmp.eq.s32.totalorder %v14080_v7, %v11999_v62  ;;  %v14100_v62 = vld [vmem:[#allocation155_spill] sm:$0xff]  ;;  %vm5028_vm6 = vcmp.eq.s32.totalorder %v14080_v7, %v12074_v2 }
 0x80c   :  { %v5199_v3 = vsel %vm3446_vm2, %v5079_v43, 0.0  ;;  %vm5029_vm10 = vcmp.eq.s32.totalorder %v14080_v7, %v12049_v5 }
 0x80d   :  { %5143 = vadd.xlane.f32.xlu1 %v5142_v58  ;;  %v14093_v58 = vld [vmem:[#allocation82_spill] sm:$0xff]  ;;  %v12062_v24 = vpop.permute.xlu1 %4916 }
 0x80f   :  { %5158 = vadd.xlane.f32.xlu0 %v5157_v47  ;;  %v5066_v47 = vsel %vm5002_vm13, %v14093_v58, 0.0  ;;  %v5072_v58 = vsel %vm5008_vm4, %v13978_v1, 0.0  ;;  %vm5017_vm13 = vcmp.eq.s32.totalorder %v14080_v7, %v11968_v13  ;;  %v5086_v13 = vsel %vm5022_vm14, %v13992_v61, 0.0 }
 0x810   :  { %v5160_v4 = vsel %vm3446_vm2, %v5066_v47, 0.0  ;;  %v12094_v63 = vpop.permute.xlu2 %4928  ;;  %v5178_v47 = vsel %vm3446_vm2, %v5072_v58, 0.0  ;;  %v5081_v40 = vsel %vm5017_vm13, %v13986_v25, 0.0  ;;  %v5220_v53 = vsel %vm3446_vm2, %v5086_v13, 0.0 }
 0x811   :  { %v5205_v17 = vsel %vm3446_vm2, %v5081_v40, 0.0  ;;  %v5082_v25 = vsel %vm5018_vm15, %v14099_v60, 0.0  ;;  %v5084_v58 = vsel %vm5020_vm0, %v14100_v62, 0.0  ;;  %vm5023_vm4 = vcmp.eq.s32.totalorder %v14080_v7, %v12008_v45  ;;  %v14106_v60 = vld [vmem:[#allocation10_spill] sm:$0xff]  ;;  %v14107_v62 = vld [vmem:[#allocation24_spill] sm:$0xff] }
 0x812   :  { %5146 = vadd.xlane.f32.xlu2 %v5145_v59  ;;  %v12070_v59 = vpop.permute.xlu0 %4931  ;;  %v5208_v61 = vsel %vm3446_vm2, %v5082_v25, 0.0  ;;  %v5092_v45 = vsel %vm5028_vm6, %v14003_v31, 0.0  ;;  %vm5031_vm5 = vcmp.eq.s32.totalorder %v14080_v7, %v12094_v63  ;;  %v5090_v31 = vsel %vm5026_vm8, %v14001_v35, 0.0  ;;  %v14104_v63 = vld [vmem:[#allocation133_spill] sm:$0xff] }
 0x813   :  { %v5232_v9 = vsel %vm3446_vm2, %v5090_v31, 0.0  ;;  %vm5032_vm13 = vcmp.eq.s32.totalorder %v14080_v7, %v12070_v59  ;;  %7125 = vlog2.f32 %v14107_v62 }
 0x815   :  { %5152 = vadd.xlane.f32.xlu1 %v5151_v28  ;;  %v12083_v28 = vpop.permute.xlu1 %4925 }
 0x816   :  { %vm5030_vm12 = vcmp.eq.s32.totalorder %v14080_v7, %v12083_v28 }
 0x817   :  { %5167 = vadd.xlane.f32.xlu0 %v5166_v37  ;;  %v5169_v37 = vsel %vm3446_vm2, %v5069_v0, 0.0 }
 0x818   :  { %v12116_v50 = vpop.permute.xlu2 %4937 }
 0x819   :  { %vm5034_vm11 = vcmp.eq.s32.totalorder %v14080_v7, %v12116_v50 }
 0x81a   :  { %5155 = vadd.xlane.f32.xlu2 %v5154_v8  ;;  %v12092_v8 = vpop.permute.xlu0 %4940  ;;  %v5098_v44 = vsel %vm5034_vm11, %v14011_v18, 0.0 }
 0x81b   :  { %v5256_v48 = vsel %vm3446_vm2, %v5098_v44, 0.0  ;;  %vm5035_vm0 = vcmp.eq.s32.totalorder %v14080_v7, %v12092_v8 }
 0x81d   :  { %5161 = vadd.xlane.f32.xlu1 %v5160_v4  ;;  %v12104_v39 = vpop.permute.xlu1 %4934  ;;  %v14097_v4 = vld [vmem:[#allocation118_spill] sm:$0xff] }
 0x81e   :  { %vm5033_vm15 = vcmp.eq.s32.totalorder %v14080_v7, %v12104_v39 }
 0x81f   :  { %5176 = vadd.xlane.f32.xlu0 %v5175_v21  ;;  %v5073_v21 = vsel %vm5009_vm7, %v14097_v4, 0.0  ;;  %vm5024_vm7 = vcmp.eq.s32.totalorder %v14080_v7, %v12042_v51 }
 0x820   :  { %v5181_v1 = vsel %vm3446_vm2, %v5073_v21, 0.0 }
 0x822   :  { %5164 = vadd.xlane.f32.xlu2 %v5163_v30  ;;  %v12112_v26 = vpop.permute.xlu0 %4949  ;;  %v14098_v30 = vld [vmem:[#allocation151_spill] sm:$0xff] }
 0x823   :  { %v5076_v32 = vsel %vm5012_vm9, %v14098_v30, 0.0  ;;  %vm5027_vm9 = vcmp.eq.s32.totalorder %v14080_v7, %v12062_v24  ;;  %v5093_v24 = vsel %vm5029_vm10, %v14005_v55, 0.0  ;;  %vm5038_vm6 = vcmp.eq.s32.totalorder %v14080_v7, %v12112_v26 }
 0x824   :  { %v5190_v52 = vsel %vm3446_vm2, %v5076_v32, 0.0  ;;  %v5091_v19 = vsel %vm5027_vm9, %v14104_v63, 0.0 }
 0x825   :  { %5170 = vadd.xlane.f32.xlu1 %v5169_v37  ;;  %v12126_v33 = vpop.permute.xlu1 %4943  ;;  %v12136_v37 = vpop.permute.xlu2 %4946  ;;  %v5235_v54 = vsel %vm3446_vm2, %v5091_v19, 0.0 }
 0x826   :  { %vm5037_vm14 = vcmp.eq.s32.totalorder %v14080_v7, %v12136_v37  ;;  %v14109_v37 = vld [vmem:[#allocation30_spill] sm:$0xff] }
 0x827   :  { %5185 = vadd.xlane.f32.xlu0 %v5184_v11  ;;  %v5101_v20 = vsel %vm5037_vm14, %v14109_v37, 0.0 }
 0x82a   :  { %5173 = vadd.xlane.f32.xlu2 %v5172_v34  ;;  %v12133_v0 = vpop.permute.xlu0 %4958 }
 0x82d   :  { %5179 = vadd.xlane.f32.xlu1 %v5178_v47  ;;  %v12146_v11 = vpop.permute.xlu1 %4952  ;;  %v12158_v34 = vpop.permute.xlu2 %4955  ;;  %v5214_v47 = vsel %vm3446_vm2, %v5084_v58, 0.0 }
 0x82e   :  { %vm5040_vm1 = vcmp.eq.s32.totalorder %v14080_v7, %v12158_v34  ;;  %vm5039_vm8 = vcmp.eq.s32.totalorder %v14080_v7, %v12146_v11 }
 0x82f   :  { %5194 = vadd.xlane.f32.xlu0 %v5193_v29  ;;  %v14101_v29 = vld [vmem:[#allocation71_spill] sm:$0xff] }
 0x830   :  { %v5085_v4 = vsel %vm5021_vm3, %v14101_v29, 0.0  ;;  %vm5371_vm3 = vcmask 7168  }
 0x831   :  { %v5217_v36 = vsel %vm3446_vm2, %v5085_v4, 0.0 }
 0x832   :  { %5182 = vadd.xlane.f32.xlu2 %v5181_v1  ;;  %v12154_v23 = vpop.permute.xlu0 %4967  ;;  %v14102_v1 = vld [vmem:[#allocation70_spill] sm:$0xff] }
 0x833   :  { %v5087_v22 = vsel %vm5023_vm4, %v14102_v1, 0.0  ;;  %v14111_v1 = vld [vmem:[#allocation25_spill] sm:$0xff]  ;;  %vm5036_vm4 = vcmp.eq.s32.totalorder %v14080_v7, %v12126_v33  ;;  %vm5044_vm11 = vcmp.eq.s32.totalorder %v14080_v7, %v12154_v23 }
 0x834   :  { %v5223_v12 = vsel %vm3446_vm2, %v5087_v22, 0.0  ;;  %7127 = vlog2.f32 %v14111_v1 }
 0x835   :  { %5188 = vadd.xlane.f32.xlu1 %v5187_v10  ;;  %v12167_v56 = vpop.permute.xlu1 %4961  ;;  %v12178_v41 = vpop.permute.xlu2 %4964  ;;  %v5238_v10 = vsel %vm3446_vm2, %v5092_v45, 0.0 }
 0x836   :  { %vm5042_vm10 = vcmp.eq.s32.totalorder %v14080_v7, %v12167_v56 }
 0x837   :  { %5203 = vadd.xlane.f32.xlu0 %v5202_v57  ;;  %v14103_v57 = vld [vmem:[#allocation139_spill] sm:$0xff] }
 0x838   :  { %v5088_v30 = vsel %vm5024_vm7, %v14103_v57, 0.0  ;;  %vm5043_vm7 = vcmp.eq.s32.totalorder %v14080_v7, %v12178_v41 }
 0x839   :  { %v5226_v51 = vsel %vm3446_vm2, %v5088_v30, 0.0 }
 0x83a   :  { %5191 = vadd.xlane.f32.xlu2 %v5190_v52  ;;  %v12176_v21 = vpop.permute.xlu0 %4976  ;;  %v5095_v52 = vsel %vm5031_vm5, %v14007_v6, 0.0  ;;  %vm5041_vm5 = vcmp.eq.s32.totalorder %v14080_v7, %v12133_v0 }
 0x83b   :  { %v5247_v35 = vsel %vm3446_vm2, %v5095_v52, 0.0  ;;  %vm5047_vm14 = vcmp.eq.s32.totalorder %v14080_v7, %v12176_v21 }
 0x83d   :  { %5197 = vadd.xlane.f32.xlu1 %v5196_v46  ;;  %v12188_v2 = vpop.permute.xlu1 %4970  ;;  %v12200_v15 = vpop.permute.xlu2 %4973 }
 0x83e   :  { %v7114_v46 = vpop.eup %7113  ;;  %vm5046_vm9 = vcmp.eq.s32.totalorder %v14080_v7, %v12200_v15 }
 0x83f   :  { %5212 = vadd.xlane.f32.xlu0 %v5211_v16  ;;  %v7116_v5 = vpop.eup %7115  ;;  %v5241_v16 = vsel %vm3446_vm2, %v5093_v24, 0.0  ;;  %v4604_v55 = vmul.f32 0.6931472, %v7114_v46  ;;  %v14115_v46 = vld [vmem:[#allocation89_spill] sm:$0xff] }
 0x840   :  { %v7118_v50 = vpop.eup %7117  ;;  %v4606_v28 = vmul.f32 0.6931472, %v7116_v5  ;;  %v5099_v44 = vsel %vm5035_vm0, %v14115_v46, 0.0 }
 0x841   :  { %v4608_v18 = vmul.f32 0.6931472, %v7118_v50  ;;  %v7120_v13 = vpop.eup %7119  ;;  %v4731_v59 = vadd.f32 %v4604_v55, %v14106_v60  ;;  %v14116_v55 = vld [vmem:[#allocation88_spill] sm:$0xff] }
 0x842   :  { %5200 = vadd.xlane.f32.xlu2 %v5199_v3  ;;  %v12196_v32 = vpop.permute.xlu0 %4985  ;;  %v14105_v3 = vld [vmem:[#allocation114_spill] sm:$0xff]  ;;  %v4732_v58 = vadd.f32 %v4606_v28, %v14108_v49 }
 0x843   :  { %v5094_v40 = vsel %vm5030_vm12, %v14105_v3, 0.0  ;;  %vm5050_vm0 = vcmp.eq.s32.totalorder %v14080_v7, %v12196_v32 }
 0x845   :  { %5206 = vadd.xlane.f32.xlu1 %v5205_v17  ;;  %v12213_v6 = vpop.permute.xlu1 %4979  ;;  %v12223_v43 = vpop.permute.xlu2 %4982  ;;  %v5244_v17 = vsel %vm3446_vm2, %v5094_v40, 0.0  ;;  %v14117_v40 = vld [vmem:[#allocation129_spill] sm:$0xff] }
 0x846   :  { %vm5049_vm12 = vcmp.eq.s32.totalorder %v14080_v7, %v12223_v43 }
 0x847   :  { %5221 = vadd.xlane.f32.xlu0 %v5220_v53  ;;  %v5096_v53 = vsel %vm5032_vm13, %v14009_v38, 0.0  ;;  %vm5045_vm13 = vcmp.eq.s32.totalorder %v14080_v7, %v12188_v2 }
 0x848   :  { %v5250_v38 = vsel %vm3446_vm2, %v5096_v53, 0.0 }
 0x84a   :  { %5209 = vadd.xlane.f32.xlu2 %v5208_v61  ;;  %v7122_v61 = vpop.eup %7121 }
 0x84b   :  { %v4612_v30 = vmul.f32 0.6931472, %v7122_v61 }
 0x84d   :  { %5215 = vadd.xlane.f32.xlu1 %v5214_v47  ;;  %v4610_v47 = vmul.f32 0.6931472, %v7120_v13  ;;  %v5259_v13 = vsel %vm3446_vm2, %v5099_v44, 0.0  ;;  %v14129_v44 = vld [vmem:[#allocation99_spill] sm:$0xff] }
 0x84f   :  { %5230 = vadd.xlane.f32.xlu0 %v5229_v27  ;;  %v14110_v27 = vld [vmem:[#allocation4_spill] sm:$0xff] }
 0x850   :  { %v4733_v29 = vadd.f32 %v4608_v18, %v14110_v27  ;;  %v14118_v18 = vld [vmem:[#allocation81_spill] sm:$0xff] }
 0x852   :  { %5218 = vadd.xlane.f32.xlu2 %v5217_v36  ;;  %v7124_v36 = vpop.eup %7123 }
 0x853   :  { %v4614_v31 = vmul.f32 0.6931472, %v7124_v36 }
 0x855   :  { %5224 = vadd.xlane.f32.xlu1 %v5223_v12  ;;  %v5265_v12 = vsel %vm3446_vm2, %v5101_v20, 0.0  ;;  %v14122_v20 = vld [vmem:[#allocation60_spill] sm:$0xff] }
 0x857   :  { %5239 = vadd.xlane.f32.xlu0 %v5238_v10  ;;  %v14112_v10 = vld [vmem:[#allocation168_spill] sm:$0xff] }
 0x858   :  { %v5097_v57 = vsel %vm5033_vm15, %v14112_v10, 0.0  ;;  %vm5048_vm15 = vcmp.eq.s32.totalorder %v14080_v7, %v12213_v6 }
 0x85a   :  { %5227 = vadd.xlane.f32.xlu2 %v5226_v51  ;;  %v14113_v51 = vld [vmem:[#allocation77_spill] sm:$0xff] }
 0x85b   :  { %7129 = vlog2.f32 %v14113_v51  ;;  %v14125_v51 = vld [vmem:[#allocation121_spill] sm:$0xff] }
 0x85c   :  { %7131 = vlog2.f32 %v14117_v40  ;;  %v14131_v40 = vld [vmem:[#allocation33_spill] sm:$0xff] }
 0x85d   :  { %5233 = vadd.xlane.f32.xlu1 %v5232_v9 }
 0x85f   :  { %5248 = vadd.xlane.f32.xlu0 %v5247_v35  ;;  %v14114_v35 = vld [vmem:[#allocation157_spill] sm:$0xff] }
 0x860   :  { %v4734_v63 = vadd.f32 %v4610_v47, %v14114_v35 }
 0x862   :  { %v5123_v14 = vpop.xlane.xlu0 %5122  ;;  %5236 = vadd.xlane.f32.xlu2 %v5235_v54  ;;  %v7126_v54 = vpop.eup %7125 }
 0x863   :  { %v5309_v45 = vsub.f32 %v4733_v29, %v5123_v14  ;;  %v5253_v14 = vsel %vm3446_vm2, %v5097_v57, 0.0  ;;  %v7128_v3 = vpop.eup %7127  ;;  %v4616_v8 = vmul.f32 0.6931472, %v7126_v54 }
 0x864   :  { %v7130_v60 = vpop.eup %7129  ;;  %v4618_v27 = vmul.f32 0.6931472, %v7128_v3 }
 0x865   :  { %5242 = vadd.xlane.f32.xlu1 %v5241_v16  ;;  %v5375_v5 = vsel %vm5371_vm3, %v5309_v45, 0.0  ;;  %v4620_v29 = vmul.f32 0.6931472, %v7130_v60 }
 0x867   :  { %5257 = vadd.xlane.f32.xlu0 %v5256_v48  ;;  %v5104_v48 = vsel %vm5040_vm1, %v14116_v55, 0.0  ;;  %vm6287_vm1 = vcmp.eq.s32.totalorder %v14080_v7, 1 }
 0x868   :  { %v5117_v42 = vpop.xlane.xlu1 %5116  ;;  %v5274_v61 = vsel %vm3446_vm2, %v5104_v48, 0.0  ;;  %v14130_v48 = vld [vmem:[#allocation22_spill] sm:$0xff] }
 0x869   :  { %v5307_v4 = vsub.f32 %v4731_v59, %v5117_v42  ;;  %v4736_v42 = vadd.f32 %v4614_v31, %v14118_v18  ;;  %v14120_v59 = vld [vmem:[#allocation85_spill] sm:$0xff]  ;;  %v5107_v31 = vsel %vm5043_vm7, %v14125_v51, 0.0  ;;  %v5103_v3 = vsel %vm5039_vm8, %v14130_v48, 0.0  ;;  %v14140_v51 = vld [vmem:[#allocation108_spill] sm:$0xff] }
 0x86a   :  { %v12235_v25 = vpop.xlane.xlu0 %5131  ;;  %5245 = vadd.xlane.f32.xlu2 %v5244_v17  ;;  %v14119_v17 = vld [vmem:[#allocation103_spill] sm:$0xff]  ;;  %7133 = vlog2.f32 %v14120_v59  ;;  %v5271_v59 = vsel %vm3446_vm2, %v5103_v3, 0.0  ;;  %v14144_v48 = vld [vmem:[#allocation76_spill] sm:$0xff] }
 0x86b   :  { %v5372_v52 = vsel %vm5371_vm3, %v5307_v4, 0.0  ;;  %v4735_v53 = vadd.f32 %v4612_v30, %v14119_v17  ;;  %v5312_v33 = vsub.f32 %v4736_v42, %v12235_v25  ;;  %7135 = vlog2.f32 %v14122_v20  ;;  %v7132_v25 = vpop.eup %7131 }
 0x86c   :  { %v4622_v26 = vmul.f32 0.6931472, %v7132_v25 }
 0x86d   :  { %5251 = vadd.xlane.f32.xlu1 %v5250_v38  ;;  %v5120_v22 = vpop.xlane.xlu2 %5119  ;;  %v14123_v38 = vld [vmem:[#allocation159_spill] sm:$0xff]  ;;  %v5381_v10 = vsel %vm5371_vm3, %v5312_v33, 0.0 }
 0x86e   :  { %v5308_v39 = vsub.f32 %v4732_v58, %v5120_v22  ;;  %v14121_v58 = vld [vmem:[#allocation64_spill] sm:$0xff]  ;;  %v4737_v36 = vadd.f32 %v4616_v8, %v14123_v38 }
 0x86f   :  { %5266 = vadd.xlane.f32.xlu0 %v5265_v12  ;;  %v5100_v37 = vsel %vm5036_vm4, %v14121_v58, 0.0  ;;  %v14134_v58 = vld [vmem:[#allocation94_spill] sm:$0xff] }
 0x870   :  { %v5373_v9 = vsel %vm5371_vm3, %v5308_v39, 0.0  ;;  %v5126_v19 = vpop.xlane.xlu1 %5125  ;;  %v5262_v45 = vsel %vm3446_vm2, %v5100_v37, 0.0  ;;  %v14124_v39 = vld [vmem:[#allocation148_spill] sm:$0xff]  ;;  %v5110_v37 = vsel %vm5046_vm9, %v14134_v58, 0.0 }
 0x871   :  { %v5374_v24 = vadd.f32 %v5373_v9, %v5372_v52  ;;  %v5310_v16 = vsub.f32 %v4734_v63, %v5126_v19  ;;  %v5102_v12 = vsel %vm5038_vm6, %v14124_v39, 0.0  ;;  %v7134_v52 = vpop.eup %7133  ;;  %v14126_v9 = vld [vmem:[#allocation37_spill] sm:$0xff] }
 0x872   :  { %v12261_v50 = vpop.xlane.xlu0 %5140  ;;  %5254 = vadd.xlane.f32.xlu2 %v5253_v14  ;;  %7137 = vlog2.f32 %v14126_v9  ;;  %v14127_v63 = vld [vmem:[#allocation169_spill] sm:$0xff]  ;;  %v5268_v54 = vsel %vm3446_vm2, %v5102_v12, 0.0  ;;  %v7136_v46 = vpop.eup %7135  ;;  %v4624_v8 = vmul.f32 0.6931472, %v7134_v52 }
 0x873   :  { %v5376_v28 = vadd.f32 %v5375_v5, %v5374_v24  ;;  %v5377_v62 = vsel %vm5371_vm3, %v5310_v16, 0.0  ;;  %v4739_v19 = vadd.f32 %v4620_v29, %v14127_v63  ;;  %v14128_v24 = vld [vmem:[#allocation160_spill] sm:$0xff]  ;;  %7139 = vlog2.f32 %v14129_v44  ;;  %v14136_v29 = vld [vmem:[#allocation134_spill] sm:$0xff] }
 0x874   :  { %v4738_v14 = vadd.f32 %v4618_v27, %v14128_v24  ;;  %v5283_v5 = vsel %vm3446_vm2, %v5107_v31, 0.0  ;;  %7141 = vlog2.f32 %v14131_v40  ;;  %v4626_v18 = vmul.f32 0.6931472, %v7136_v46  ;;  %v14145_v40 = vld [vmem:[#allocation120_spill] sm:$0xff] }
 0x875   :  { %5260 = vadd.xlane.f32.xlu1 %v5259_v13  ;;  %v5129_v34 = vpop.xlane.xlu2 %5128  ;;  %v5378_v47 = vadd.f32 %v5377_v62, %v5376_v28  ;;  %v5315_v11 = vsub.f32 %v4739_v19, %v12261_v50  ;;  %v14132_v13 = vld [vmem:[#allocation15_spill] sm:$0xff] }
 0x876   :  { %v5311_v49 = vsub.f32 %v4735_v53, %v5129_v34  ;;  %v4740_v17 = vadd.f32 %v4622_v26, %v14132_v13  ;;  %v14133_v34 = vld [vmem:[#allocation56_spill] sm:$0xff]  ;;  %v14141_v26 = vld [vmem:[#allocation162_spill] sm:$0xff] }
 0x877   :  { %5275 = vadd.xlane.f32.xlu0 %v5274_v61  ;;  %v5105_v61 = vsel %vm5041_vm5, %v14133_v34, 0.0  ;;  %v5387_v33 = vsel %vm5371_vm3, %v5315_v11, 0.0  ;;  %v14143_v11 = vld [vmem:[#allocation127_spill] sm:$0xff] }
 0x878   :  { %v5379_v4 = vsel %vm5371_vm3, %v5311_v49, 0.0  ;;  %v5135_v1 = vpop.xlane.xlu1 %5134  ;;  %v7138_v50 = vpop.eup %7137  ;;  %v5277_v38 = vsel %vm3446_vm2, %v5105_v61, 0.0  ;;  %v14149_v61 = vld [vmem:[#allocation111_spill] sm:$0xff] }
 0x879   :  { %v5380_v22 = vadd.f32 %v5379_v4, %v5378_v47  ;;  %v5313_v57 = vsub.f32 %v4737_v36, %v5135_v1  ;;  %v7140_v20 = vpop.eup %7139  ;;  %v14135_v47 = vld [vmem:[#allocation105_spill] sm:$0xff]  ;;  %v4628_v0 = vmul.f32 0.6931472, %v7138_v50  ;;  %v4742_v4 = vadd.f32 %v4626_v18, %v14136_v29  ;;  %v14137_v36 = vld [vmem:[#allocation110_spill] sm:$0xff]  ;;  %v14146_v18 = vld [vmem:[#allocation55_spill] sm:$0xff] }
 0x87a   :  { %v12291_v30 = vpop.xlane.xlu0 %5149  ;;  %5263 = vadd.xlane.f32.xlu2 %v5262_v45  ;;  %7143 = vlog2.f32 %v14135_v47  ;;  %v4741_v1 = vadd.f32 %v4624_v8, %v14137_v36  ;;  %v7142_v25 = vpop.eup %7141  ;;  %v5292_v45 = vsel %vm3446_vm2, %v5110_v37, 0.0  ;;  %v4630_v52 = vmul.f32 0.6931472, %v7140_v20  ;;  %v14150_v20 = vld [vmem:[#allocation44_spill] sm:$0xff] }
 0x87b   :  { %v5382_v35 = vadd.f32 %v5381_v10, %v5380_v22  ;;  %v5383_v16 = vsel %vm5371_vm3, %v5313_v57, 0.0  ;;  %v14138_v22 = vld [vmem:[#allocation59_spill] sm:$0xff]  ;;  %v5318_v56 = vsub.f32 %v4742_v4, %v12291_v30  ;;  %v14139_v10 = vld [vmem:[#allocation132_spill] sm:$0xff]  ;;  %v4632_v9 = vmul.f32 0.6931472, %v7142_v25 }
 0x87c   :  { %7145 = vlog2.f32 %v14138_v22  ;;  %v5106_v57 = vsel %vm5042_vm10, %v14139_v10, 0.0  ;;  %v4743_v63 = vadd.f32 %v4628_v0, %v14141_v26  ;;  %v14151_v4 = vld [vmem:[#allocation68_spill] sm:$0xff] }
 0x87d   :  { %5269 = vadd.xlane.f32.xlu1 %v5268_v54  ;;  %v5138_v41 = vpop.xlane.xlu2 %5137  ;;  %v5384_v28 = vadd.f32 %v5383_v16, %v5382_v35  ;;  %7147 = vlog2.f32 %v14140_v51  ;;  %v5280_v24 = vsel %vm3446_vm2, %v5106_v57, 0.0  ;;  %v5393_v44 = vsel %vm5371_vm3, %v5318_v56, 0.0  ;;  %v14154_v57 = vld [vmem:[#allocation51_spill] sm:$0xff]  ;;  %v14156_v26 = vld [vmem:[#allocation32_spill] sm:$0xff] }
 0x87e   :  { %v5314_v55 = vsub.f32 %v4738_v14, %v5138_v41  ;;  %v14142_v14 = vld [vmem:[#allocation40_spill] sm:$0xff]  ;;  %v5113_v16 = vsel %vm5049_vm12, %v14143_v11, 0.0  ;;  %7149 = vlog2.f32 %v14144_v48 }
 0x87f   :  { %5284 = vadd.xlane.f32.xlu0 %v5283_v5  ;;  %v5108_v46 = vsel %vm5044_vm11, %v14142_v14, 0.0 }
 0x880   :  { %v5385_v42 = vsel %vm5371_vm3, %v5314_v55, 0.0  ;;  %v5144_v53 = vpop.xlane.xlu1 %5143  ;;  %v7144_v30 = vpop.eup %7143  ;;  %v5286_v8 = vsel %vm3446_vm2, %v5108_v46, 0.0  ;;  %v14158_v46 = vld [vmem:[#allocation161_spill] sm:$0xff] }
 0x881   :  { %v5386_v60 = vadd.f32 %v5385_v42, %v5384_v28  ;;  %v5316_v62 = vsub.f32 %v4740_v17, %v5144_v53  ;;  %v4634_v23 = vmul.f32 0.6931472, %v7144_v30  ;;  %v4745_v28 = vadd.f32 %v4632_v9, %v14145_v40  ;;  %v14147_v17 = vld [vmem:[#allocation156_spill] sm:$0xff] }
 0x882   :  { %v12321_v49 = vpop.xlane.xlu0 %5158  ;;  %5272 = vadd.xlane.f32.xlu2 %v5271_v59  ;;  %v7146_v55 = vpop.eup %7145  ;;  %v4744_v42 = vadd.f32 %v4630_v52, %v14146_v18  ;;  %7151 = vlog2.f32 %v14147_v17  ;;  %v5301_v53 = vsel %vm3446_vm2, %v5113_v16, 0.0  ;;  %v14148_v59 = vld [vmem:[#allocation29_spill] sm:$0xff] }
 0x883   :  { %v5388_v27 = vadd.f32 %v5387_v33, %v5386_v60  ;;  %v5389_v39 = vsel %vm5371_vm3, %v5316_v62, 0.0  ;;  %v7148_v13 = vpop.eup %7147  ;;  %v5321_v2 = vsub.f32 %v4745_v28, %v12321_v49  ;;  %v5109_v34 = vsel %vm5045_vm13, %v14148_v59, 0.0 }
 0x884   :  { %7153 = vlog2.f32 %v14149_v61  ;;  %v4636_v62 = vmul.f32 0.6931472, %v7146_v55  ;;  %v4638_v58 = vmul.f32 0.6931472, %v7148_v13  ;;  %v4746_v47 = vadd.f32 %v4634_v23, %v14150_v20  ;;  %v7150_v0 = vpop.eup %7149  ;;  %v14161_v13 = vld [vmem:[#allocation58_spill] sm:$0xff] }
 0x885   :  { %5278 = vadd.xlane.f32.xlu1 %v5277_v38  ;;  %v5147_v15 = vpop.xlane.xlu2 %5146  ;;  %v5390_v31 = vadd.f32 %v5389_v39, %v5388_v27  ;;  %v5289_v49 = vsel %vm3446_vm2, %v5109_v34, 0.0  ;;  %v5111_v38 = vsel %vm5047_vm14, %v14151_v4, 0.0  ;;  %v5399_v36 = vsel %vm5371_vm3, %v5321_v2, 0.0  ;;  %v14153_v39 = vld [vmem:[#allocation113_spill] sm:$0xff] }
 0x886   :  { %v5317_v12 = vsub.f32 %v4741_v1, %v5147_v15  ;;  %v14152_v15 = vld [vmem:[#allocation158_spill] sm:$0xff]  ;;  %v4640_v56 = vmul.f32 0.6931472, %v7150_v0  ;;  %v5295_v10 = vsel %vm3446_vm2, %v5111_v38, 0.0  ;;  %v4747_v21 = vadd.f32 %v4636_v62, %v14154_v57 }
 0x887   :  { %5293 = vadd.xlane.f32.xlu0 %v5292_v45  ;;  %7155 = vlog2.f32 %v14152_v15 }
 0x888   :  { %v5391_v35 = vsel %vm5371_vm3, %v5317_v12, 0.0  ;;  %v5153_v19 = vpop.xlane.xlu1 %5152  ;;  %v7152_v22 = vpop.eup %7151  ;;  %v4748_v12 = vadd.f32 %v4638_v58, %v14153_v39 }
 0x889   :  { %v5392_v54 = vadd.f32 %v5391_v35, %v5390_v31  ;;  %v5319_v41 = vsub.f32 %v4743_v63, %v5153_v19  ;;  %v14155_v31 = vld [vmem:[#allocation104_spill] sm:$0xff]  ;;  %v5112_v63 = vsel %vm5048_vm15, %v14156_v26, 0.0  ;;  %v14157_v19 = vld [vmem:[#allocation107_spill] sm:$0xff] }
 0x88a   :  { %v12351_v5 = vpop.xlane.xlu0 %5167  ;;  %5281 = vadd.xlane.f32.xlu2 %v5280_v24  ;;  %v7154_v51 = vpop.eup %7153  ;;  %7157 = vlog2.f32 %v14155_v31  ;;  %v5298_v55 = vsel %vm3446_vm2, %v5112_v63, 0.0 }
 0x88b   :  { %v5394_v3 = vadd.f32 %v5393_v44, %v5392_v54  ;;  %v5395_v50 = vsel %vm5371_vm3, %v5319_v41, 0.0  ;;  %v5324_v9 = vsub.f32 %v4748_v12, %v12351_v5  ;;  %7159 = vlog2.f32 %v14157_v19  ;;  %v14159_v5 = vld [vmem:[#allocation46_spill] sm:$0xff]  ;;  %v14168_v12 = vld [vmem:[#allocation109_spill] sm:$0xff] }
 0x88c   :  { %v4642_v54 = vmul.f32 0.6931472, %v7152_v22  ;;  %v4644_v24 = vmul.f32 0.6931472, %v7154_v51  ;;  %v4749_v44 = vadd.f32 %v4640_v56, %v14158_v46  ;;  %v5114_v48 = vsel %vm5050_vm0, %v14159_v5, 0.0  ;;  %v7260_v22 = vld [vmem:[%s13023_s10] sm:$0xff] }
 0x88d   :  { %5287 = vadd.xlane.f32.xlu1 %v5286_v8  ;;  %v5156_v43 = vpop.xlane.xlu2 %5155  ;;  %v5396_v33 = vadd.f32 %v5395_v50, %v5394_v3  ;;  %v7156_v11 = vpop.eup %7155  ;;  %v5405_v3 = vsel %vm5371_vm3, %v5324_v9, 0.0  ;;  %v14160_v8 = vld [vmem:[#allocation117_spill] sm:$0xff]  ;;  %v14167_v56 = vld [vmem:[#allocation163_spill] sm:$0xff]  ;;  %v14169_v51 = vld [vmem:[#allocation194_spill] sm:$0xff] }
 0x88e   :  { %v5320_v60 = vsub.f32 %v4744_v42, %v5156_v43  ;;  %7161 = vlog2.f32 %v14160_v8  ;;  %v4646_v42 = vmul.f32 0.6931472, %v7156_v11  ;;  %v4751_v17 = vadd.f32 %v4644_v24, %v14161_v13  ;;  %v7261_v5 = vld [vmem:[%s13023_s10 + $0x18] sm:$0xff] }
 0x88f   :  { %5302 = vadd.xlane.f32.xlu0 %v5301_v53  ;;  %v5304_v43 = vsel %vm3446_vm2, %v5114_v48, 0.0  ;;  %v14162_v53 = vld [vmem:[#allocation2_spill] sm:$0xff]  ;;  %v14175_v13 = vld [vmem:[#allocation197_spill] sm:$0xff]  ;;  %vm6284_vm2 = vcmp.eq.s32.totalorder %v14080_v7, 0 }
 0x890   :  { %v5397_v37 = vsel %vm5371_vm3, %v5320_v60, 0.0  ;;  %v5162_v27 = vpop.xlane.xlu1 %5161  ;;  %v7158_v28 = vpop.eup %7157  ;;  %v4750_v2 = vadd.f32 %v4642_v54, %v14162_v53  ;;  %v14163_v60 = vld [vmem:[#allocation48_spill] sm:$0xff] }
 0x891   :  { %v5398_v29 = vadd.f32 %v5397_v37, %v5396_v33  ;;  %v5322_v1 = vsub.f32 %v4746_v47, %v5162_v27  ;;  %v7160_v50 = vpop.eup %7159  ;;  %7163 = vlog2.f32 %v14163_v60  ;;  %v14164_v33 = vld [vmem:[#allocation193_spill] sm:$0xff]  ;;  %v4648_v58 = vmul.f32 0.6931472, %v7158_v28  ;;  %v14174_v28 = vld [vmem:[#allocation170_spill] sm:$0xff] }
 0x892   :  { %v5177_v25 = vpop.xlane.xlu0 %5176  ;;  %5290 = vadd.xlane.f32.xlu2 %v5289_v49  ;;  %7165 = vlog2.f32 %v14164_v33  ;;  %v4650_v37 = vmul.f32 0.6931472, %v7160_v50  ;;  %v14165_v47 = vld [vmem:[#allocation9_spill] sm:$0xff] }
 0x893   :  { %v5400_v45 = vadd.f32 %v5399_v36, %v5398_v29  ;;  %v5401_v6 = vsel %vm5371_vm3, %v5322_v1, 0.0  ;;  %v5327_v59 = vsub.f32 %v4751_v17, %v5177_v25  ;;  %v4752_v27 = vadd.f32 %v4646_v42, %v14165_v47  ;;  %v14166_v1 = vld [vmem:[#allocation195_spill] sm:$0xff] }
 0x894   :  { %v7162_v29 = vpop.eup %7161  ;;  %7167 = vlog2.f32 %v14166_v1  ;;  %v4754_v39 = vadd.f32 %v4650_v37, %v14167_v56  ;;  %v14180_v1 = vld [vmem:[#allocation11_spill] sm:$0xff] }
 0x895   :  { %5296 = vadd.xlane.f32.xlu1 %v5295_v10  ;;  %v5165_v52 = vpop.xlane.xlu2 %5164  ;;  %v5402_v30 = vadd.f32 %v5401_v6, %v5400_v45  ;;  %v5411_v4 = vsel %vm5371_vm3, %v5327_v59, 0.0  ;;  %v4652_v45 = vmul.f32 0.6931472, %v7162_v29  ;;  %v4753_v10 = vadd.f32 %v4648_v58, %v14168_v12  ;;  %v14170_v6 = vld [vmem:[#allocation196_spill] sm:$0xff]  ;;  %v7262_v29 = vld [vmem:[%s13023_s10 + $0x28] sm:$0xff] }
 0x896   :  { %v5323_v35 = vsub.f32 %v4747_v21, %v5165_v52  ;;  %7169 = vlog2.f32 %v14169_v51  ;;  %v7263_v12 = vld [vmem:[%s13023_s10 + $0x8] sm:$0xff] }
 0x897   :  { %v7164_v15 = vpop.eup %7163  ;;  %7171 = vlog2.f32 %v14170_v6 }
 0x898   :  { %v5403_v14 = vsel %vm5371_vm3, %v5323_v35, 0.0  ;;  %v5171_v41 = vpop.xlane.xlu1 %5170  ;;  %v7166_v57 = vpop.eup %7165  ;;  %v4654_v26 = vmul.f32 0.6931472, %v7164_v15 }
 0x899   :  { %v5404_v16 = vadd.f32 %v5403_v14, %v5402_v30  ;;  %v5325_v23 = vsub.f32 %v4749_v44, %v5171_v41  ;;  %v4656_v63 = vmul.f32 0.6931472, %v7166_v57  ;;  %v14171_v30 = vld [vmem:[#allocation54_spill] sm:$0xff] }
 0x89a   :  { %v5186_v40 = vpop.xlane.xlu0 %5185  ;;  %5299 = vadd.xlane.f32.xlu2 %v5298_v55  ;;  %v4755_v54 = vadd.f32 %v4652_v45, %v14171_v30  ;;  %v7168_v14 = vpop.eup %7167  ;;  %v4756_v8 = vadd.f32 %v4654_v26, %v14174_v28  ;;  %v14181_v45 = vld [vmem:[#allocation200_spill] sm:$0xff]  ;;  %v14182_v57 = vld [vmem:[#allocation202_spill] sm:$0xff] }
 0x89b   :  { %v5406_v18 = vadd.f32 %v5405_v3, %v5404_v16  ;;  %v5407_v34 = vsel %vm5371_vm3, %v5325_v23, 0.0  ;;  %v5330_v31 = vsub.f32 %v4754_v39, %v5186_v40  ;;  %v14172_v16 = vld [vmem:[#allocation198_spill] sm:$0xff]  ;;  %v4658_v3 = vmul.f32 0.6931472, %v7168_v14  ;;  %v14173_v23 = vld [vmem:[#allocation164_spill] sm:$0xff] }
 0x89c   :  { %7173 = vlog2.f32 %v14172_v16  ;;  %v7170_v48 = vpop.eup %7169  ;;  %v4757_v40 = vadd.f32 %v4656_v63, %v14173_v23  ;;  %v14187_v23 = vld [vmem:[#allocation203_spill] sm:$0xff] }
 0x89d   :  { %5305 = vadd.xlane.f32.xlu1 %v5304_v43  ;;  %v5174_v32 = vpop.xlane.xlu2 %5173  ;;  %v5408_v62 = vadd.f32 %v5407_v34, %v5406_v18  ;;  %v5417_v44 = vsel %vm5371_vm3, %v5330_v31, 0.0  ;;  %v7172_v18 = vpop.eup %7171  ;;  %7175 = vlog2.f32 %v14175_v13  ;;  %v14177_v34 = vld [vmem:[#allocation3_spill] sm:$0xff] }
 0x89e   :  { %v5326_v61 = vsub.f32 %v4750_v2, %v5174_v32  ;;  %v14176_v2 = vld [vmem:[#allocation199_spill] sm:$0xff]  ;;  %v4660_v32 = vmul.f32 0.6931472, %v7170_v48  ;;  %v4662_v60 = vmul.f32 0.6931472, %v7172_v18 }
 0x89f   :  { %7177 = vlog2.f32 %v14176_v2  ;;  %v14189_v2 = vld [vmem:[#allocation171_spill] sm:$0xff] }
 0x8a0   :  { %v5409_v20 = vsel %vm5371_vm3, %v5326_v61, 0.0  ;;  %v5180_v0 = vpop.xlane.xlu1 %5179  ;;  %v4758_v61 = vadd.f32 %v4658_v3, %v14177_v34 }
 0x8a1   :  { %v5410_v49 = vadd.f32 %v5409_v20, %v5408_v62  ;;  %v5328_v38 = vsub.f32 %v4752_v27, %v5180_v0  ;;  %v14178_v27 = vld [vmem:[#allocation201_spill] sm:$0xff] }
 0x8a2   :  { %v5195_v36 = vpop.xlane.xlu0 %5194  ;;  %v7174_v62 = vpop.eup %7173  ;;  %7179 = vlog2.f32 %v14178_v27  ;;  %v14191_v27 = vld [vmem:[#allocation61_spill] sm:$0xff] }
 0x8a3   :  { %v5412_v25 = vadd.f32 %v5411_v4, %v5410_v49  ;;  %5572 = vrot.lane.b32.xlu0 %v7260_v22, %s7328_s27  ;;  %v5413_v52 = vsel %vm5371_vm3, %v5328_v38, 0.0  ;;  %v5333_v17 = vsub.f32 %v4757_v40, %v5195_v36  ;;  %v7176_v49 = vpop.eup %7175  ;;  %v4664_v4 = vmul.f32 0.6931472, %v7174_v62  ;;  %v14179_v38 = vld [vmem:[#allocation112_spill] sm:$0xff]  ;;  %v14190_v62 = vld [vmem:[#allocation207_spill] sm:$0xff] }
 0x8a4   :  { %v4760_v36 = vadd.f32 %v4662_v60, %v14179_v38  ;;  %7181 = vlog2.f32 %v14181_v45  ;;  %v4666_v51 = vmul.f32 0.6931472, %v7176_v49  ;;  %v14194_v45 = vld [vmem:[#allocation208_spill] sm:$0xff] }
 0x8a5   :  { %v5183_v21 = vpop.xlane.xlu2 %5182  ;;  %v5414_v35 = vadd.f32 %v5413_v52, %v5412_v25  ;;  %v5423_v37 = vsel %vm5371_vm3, %v5333_v17, 0.0  ;;  %v4759_v25 = vadd.f32 %v4660_v32, %v14180_v1  ;;  %v7178_v22 = vpop.eup %7177  ;;  %7183 = vlog2.f32 %v14182_v57  ;;  %v14195_v57 = vld [vmem:[#allocation73_spill] sm:$0xff] }
 0x8a6   :  { %v5329_v9 = vsub.f32 %v4753_v10, %v5183_v21  ;;  %v4668_v31 = vmul.f32 0.6931472, %v7178_v22  ;;  %v7267_v22 = vld [vmem:[%s13023_s10 + $0x38] sm:$0xff] }
 0x8a8   :  { %v5415_v19 = vsel %vm5371_vm3, %v5329_v9, 0.0  ;;  %v5189_v24 = vpop.xlane.xlu1 %5188  ;;  %v14183_v9 = vld [vmem:[#allocation47_spill] sm:$0xff]  ;;  %v7180_v26 = vpop.eup %7179 }
 0x8a9   :  { %v5416_v46 = vadd.f32 %v5415_v19, %v5414_v35  ;;  %v5331_v41 = vsub.f32 %v4755_v54, %v5189_v24  ;;  %v4761_v6 = vadd.f32 %v4664_v4, %v14183_v9  ;;  %v14184_v24 = vld [vmem:[#allocation204_spill] sm:$0xff] }
 0x8aa   :  { %v5204_v11 = vpop.xlane.xlu0 %5203  ;;  %7185 = vlog2.f32 %v14184_v24  ;;  %v14197_v24 = vld [vmem:[#allocation57_spill] sm:$0xff] }
 0x8ab   :  { %v5418_v55 = vadd.f32 %v5417_v44, %v5416_v46  ;;  %5578 = vrot.lane.b32.xlu0 %v7261_v5, %s7328_s27  ;;  %v5419_v43 = vsel %vm5371_vm3, %v5331_v41, 0.0  ;;  %v5336_v56 = vsub.f32 %v4760_v36, %v5204_v11  ;;  %v7264_v46 = vld [vmem:[%s13023_s10 + $0x40] sm:$0xff]  ;;  %v7182_v44 = vpop.eup %7181  ;;  %v4670_v41 = vmul.f32 0.6931472, %v7180_v26  ;;  %v14185_v11 = vld [vmem:[#allocation116_spill] sm:$0xff] }
 0x8ac   :  { %v4763_v16 = vadd.f32 %v4668_v31, %v14185_v11  ;;  %v7184_v48 = vpop.eup %7183  ;;  %7187 = vlog2.f32 %v14187_v23  ;;  %v4672_v17 = vmul.f32 0.6931472, %v7182_v44  ;;  %v14193_v36 = vld [vmem:[#allocation206_spill] sm:$0xff]  ;;  %v14200_v23 = vld [vmem:[#allocation211_spill] sm:$0xff] }
 0x8ad   :  { %v5192_v42 = vpop.xlane.xlu2 %5191  ;;  %v5420_v50 = vadd.f32 %v5419_v43, %v5418_v55  ;;  %v5429_v19 = vsel %vm5371_vm3, %v5336_v56, 0.0  ;;  %v14186_v55 = vld [vmem:[#allocation123_spill] sm:$0xff]  ;;  %v4674_v43 = vmul.f32 0.6931472, %v7184_v48  ;;  %v14196_v26 = vld [vmem:[#allocation210_spill] sm:$0xff]  ;;  %v7269_v48 = vld [vmem:[%s13023_s10 + $0x50] sm:$0xff] }
 0x8ae   :  { %v5332_v53 = vsub.f32 %v4756_v8, %v5192_v42  ;;  %v4762_v5 = vadd.f32 %v4666_v51, %v14186_v55  ;;  %v7265_v8 = vld [vmem:[%s13023_s10 + $0x20] sm:$0xff]  ;;  %v14188_v42 = vld [vmem:[#allocation205_spill] sm:$0xff] }
 0x8af   :  { %7189 = vlog2.f32 %v14188_v42  ;;  %v14201_v42 = vld [vmem:[#allocation126_spill] sm:$0xff] }
 0x8b0   :  { %v5421_v59 = vsel %vm5371_vm3, %v5332_v53, 0.0  ;;  %v5198_v33 = vpop.xlane.xlu1 %5197  ;;  %v7186_v60 = vpop.eup %7185  ;;  %7191 = vlog2.f32 %v14190_v62  ;;  %v14203_v62 = vld [vmem:[#allocation119_spill] sm:$0xff] }
 0x8b1   :  { %v5422_v58 = vadd.f32 %v5421_v59, %v5420_v50  ;;  %v5334_v20 = vsub.f32 %v4758_v61, %v5198_v33  ;;  %v4764_v50 = vadd.f32 %v4670_v41, %v14189_v2  ;;  %7193 = vlog2.f32 %v14193_v36  ;;  %v14206_v36 = vld [vmem:[#allocation214_spill] sm:$0xff] }
 0x8b2   :  { %v5213_v47 = vpop.xlane.xlu0 %5212  ;;  %7195 = vlog2.f32 %v14194_v45  ;;  %v14207_v45 = vld [vmem:[#allocation84_spill] sm:$0xff] }
 0x8b3   :  { %v5424_v0 = vadd.f32 %v5423_v37, %v5422_v58  ;;  %5582 = vrot.lane.b32.xlu0 %v7262_v29, %s7328_s27  ;;  %v5425_v39 = vsel %vm5371_vm3, %v5334_v20, 0.0  ;;  %v5339_v40 = vsub.f32 %v4763_v16, %v5213_v47  ;;  %v7266_v37 = vld [vmem:[%s13023_s10 + $0x58] sm:$0xff]  ;;  %v7188_v20 = vpop.eup %7187  ;;  %v4676_v47 = vmul.f32 0.6931472, %v7186_v60  ;;  %v14192_v29 = vld [vmem:[#allocation167_spill] sm:$0xff] }
 0x8b4   :  { %v4765_v49 = vadd.f32 %v4672_v17, %v14192_v29  ;;  %7197 = vlog2.f32 %v14196_v26  ;;  %v14199_v16 = vld [vmem:[#allocation209_spill] sm:$0xff]  ;;  %v14209_v26 = vld [vmem:[#allocation174_spill] sm:$0xff] }
 0x8b5   :  { %v5201_v15 = vpop.xlane.xlu2 %5200  ;;  %v5426_v21 = vadd.f32 %v5425_v39, %v5424_v0  ;;  %v5435_v34 = vsel %vm5371_vm3, %v5339_v40, 0.0  ;;  %v4766_v0 = vadd.f32 %v4674_v43, %v14191_v27  ;;  %v7190_v4 = vpop.eup %7189  ;;  %v4678_v39 = vmul.f32 0.6931472, %v7188_v20  ;;  %v14202_v60 = vld [vmem:[#allocation213_spill] sm:$0xff] }
 0x8b6   :  { %5574 = vrot.lane.b32.xlu1 %v7263_v12, %s7328_s27  ;;  %v5335_v10 = vsub.f32 %v4759_v25, %v5201_v15  ;;  %v4680_v12 = vmul.f32 0.6931472, %v7190_v4  ;;  %v7192_v31 = vpop.eup %7191  ;;  %7199 = vlog2.f32 %v14199_v16  ;;  %v7271_v4 = vld [vmem:[%s13023_s10 + $0x68] sm:$0xff] }
 0x8b7   :  { %7201 = vlog2.f32 %v14200_v23  ;;  %v14212_v16 = vld [vmem:[#allocation215_spill] sm:$0xff]  ;;  %v14213_v23 = vld [vmem:[#allocation173_spill] sm:$0xff] }
 0x8b8   :  { %v5427_v52 = vsel %vm5371_vm3, %v5335_v10, 0.0  ;;  %v5207_v35 = vpop.xlane.xlu1 %5206  ;;  %7203 = vlog2.f32 %v14202_v60  ;;  %v14215_v60 = vld [vmem:[#allocation177_spill] sm:$0xff] }
 0x8b9   :  { %v5428_v63 = vadd.f32 %v5427_v52, %v5426_v21  ;;  %v5337_v30 = vsub.f32 %v4761_v6, %v5207_v35  ;;  %v4767_v21 = vadd.f32 %v4676_v47, %v14195_v57 }
 0x8ba   :  { %v5222_v54 = vpop.xlane.xlu0 %5221 }
 0x8bb   :  { %v5430_v14 = vadd.f32 %v5429_v19, %v5428_v63  ;;  %5588 = vrot.lane.b32.xlu0 %v7264_v46, %s7328_s27  ;;  %v5431_v28 = vsel %vm5371_vm3, %v5337_v30, 0.0  ;;  %v5342_v1 = vsub.f32 %v4766_v0, %v5222_v54  ;;  %v7268_v19 = vld [vmem:[%s13023_s10 + $0x70] sm:$0xff]  ;;  %v7194_v30 = vpop.eup %7193  ;;  %v4682_v54 = vmul.f32 0.6931472, %v7192_v31  ;;  %v14198_v46 = vld [vmem:[#allocation50_spill] sm:$0xff]  ;;  %v14208_v31 = vld [vmem:[#allocation217_spill] sm:$0xff] }
 0x8bc   :  { %v4768_v44 = vadd.f32 %v4678_v39, %v14198_v46  ;;  %v7196_v41 = vpop.eup %7195  ;;  %v14205_v0 = vld [vmem:[#allocation212_spill] sm:$0xff] }
 0x8bd   :  { %v5210_v3 = vpop.xlane.xlu2 %5209  ;;  %v5432_v13 = vadd.f32 %v5431_v28, %v5430_v14  ;;  %v5441_v9 = vsel %vm5371_vm3, %v5342_v1, 0.0  ;;  %v4769_v14 = vadd.f32 %v4680_v12, %v14197_v24  ;;  %v4684_v28 = vmul.f32 0.6931472, %v7194_v30  ;;  %v7198_v43 = vpop.eup %7197 }
 0x8be   :  { %5580 = vrot.lane.b32.xlu1 %v7265_v8, %s7328_s27  ;;  %v5338_v18 = vsub.f32 %v4762_v5, %v5210_v3  ;;  %v4686_v8 = vmul.f32 0.6931472, %v7196_v41  ;;  %7205 = vlog2.f32 %v14205_v0  ;;  %v7273_v41 = vld [vmem:[%s13023_s10 + $0x80] sm:$0xff] }
 0x8bf   :  { %7207 = vlog2.f32 %v14206_v36  ;;  %v14218_v0 = vld [vmem:[#allocation218_spill] sm:$0xff]  ;;  %v14219_v36 = vld [vmem:[#allocation176_spill] sm:$0xff] }
 0x8c0   :  { %v5433_v53 = vsel %vm5371_vm3, %v5338_v18, 0.0  ;;  %v5216_v32 = vpop.xlane.xlu1 %5215  ;;  %7209 = vlog2.f32 %v14208_v31 }
 0x8c1   :  { %v5434_v59 = vadd.f32 %v5433_v53, %v5432_v13  ;;  %v5340_v61 = vsub.f32 %v4764_v50, %v5216_v32  ;;  %v4770_v13 = vadd.f32 %v4682_v54, %v14201_v42 }
 0x8c2   :  { %v5231_v33 = vpop.xlane.xlu0 %5230 }
 0x8c3   :  { %v5436_v58 = vadd.f32 %v5435_v34, %v5434_v59  ;;  %5594 = vrot.lane.b32.xlu0 %v7266_v37, %s7328_s27  ;;  %v5437_v25 = vsel %vm5371_vm3, %v5340_v61, 0.0  ;;  %v5345_v55 = vsub.f32 %v4769_v14, %v5231_v33  ;;  %v7270_v34 = vld [vmem:[%s13023_s10 + $0x88] sm:$0xff]  ;;  %v7200_v61 = vpop.eup %7199  ;;  %v4688_v33 = vmul.f32 0.6931472, %v7198_v43  ;;  %v14204_v37 = vld [vmem:[#allocation166_spill] sm:$0xff]  ;;  %v14211_v14 = vld [vmem:[#allocation216_spill] sm:$0xff] }
 0x8c4   :  { %v4771_v20 = vadd.f32 %v4684_v28, %v14204_v37  ;;  %v7202_v47 = vpop.eup %7201  ;;  %7211 = vlog2.f32 %v14211_v14  ;;  %v14224_v14 = vld [vmem:[#allocation221_spill] sm:$0xff] }
 0x8c5   :  { %v5219_v38 = vpop.xlane.xlu2 %5218  ;;  %v5438_v56 = vadd.f32 %v5437_v25, %v5436_v58  ;;  %v5447_v2 = vsel %vm5371_vm3, %v5345_v55, 0.0  ;;  %v4772_v58 = vadd.f32 %v4686_v8, %v14203_v62  ;;  %v4690_v25 = vmul.f32 0.6931472, %v7200_v61  ;;  %v7204_v12 = vpop.eup %7203 }
 0x8c6   :  { %5586 = vrot.lane.b32.xlu1 %v7267_v22, %s7328_s27  ;;  %v5341_v15 = vsub.f32 %v4765_v49, %v5219_v38  ;;  %v4692_v22 = vmul.f32 0.6931472, %v7202_v47  ;;  %7213 = vlog2.f32 %v14212_v16  ;;  %v7275_v47 = vld [vmem:[%s13023_s10 + $0x98] sm:$0xff]  ;;  %v14225_v16 = vld [vmem:[#allocation179_spill] sm:$0xff] }
 0x8c8   :  { %v5439_v10 = vsel %vm5371_vm3, %v5341_v15, 0.0  ;;  %v5225_v51 = vpop.xlane.xlu1 %5224 }
 0x8c9   :  { %v5440_v52 = vadd.f32 %v5439_v10, %v5438_v56  ;;  %v5343_v6 = vsub.f32 %v4767_v21, %v5225_v51  ;;  %v4773_v56 = vadd.f32 %v4688_v33, %v14207_v45 }
 0x8ca   :  { %v5240_v35 = vpop.xlane.xlu0 %5239 }
 0x8cb   :  { %v5442_v63 = vadd.f32 %v5441_v9, %v5440_v52  ;;  %5600 = vrot.lane.b32.xlu0 %v7268_v19, %s7328_s27  ;;  %v5443_v5 = vsel %vm5371_vm3, %v5343_v6, 0.0  ;;  %v5348_v29 = vsub.f32 %v4772_v58, %v5240_v35  ;;  %v7272_v9 = vld [vmem:[%s13023_s10 + $0xa0] sm:$0xff]  ;;  %v7206_v6 = vpop.eup %7205  ;;  %v4694_v35 = vmul.f32 0.6931472, %v7204_v12  ;;  %v14210_v19 = vld [vmem:[#allocation16_spill] sm:$0xff]  ;;  %v14217_v58 = vld [vmem:[#allocation219_spill] sm:$0xff] }
 0x8cc   :  { %v4774_v30 = vadd.f32 %v4690_v25, %v14210_v19  ;;  %v7208_v54 = vpop.eup %7207 }
 0x8cd   :  { %v5228_v11 = vpop.xlane.xlu2 %5227  ;;  %v5444_v40 = vadd.f32 %v5443_v5, %v5442_v63  ;;  %v5453_v57 = vsel %vm5371_vm3, %v5348_v29, 0.0  ;;  %v4775_v63 = vadd.f32 %v4692_v22, %v14209_v26  ;;  %v4696_v5 = vmul.f32 0.6931472, %v7206_v6  ;;  %v7210_v8 = vpop.eup %7209 }
 0x8ce   :  { %5592 = vrot.lane.b32.xlu1 %v7269_v48, %s7328_s27  ;;  %v5344_v3 = vsub.f32 %v4768_v44, %v5228_v11  ;;  %v4698_v48 = vmul.f32 0.6931472, %v7208_v54  ;;  %v7277_v54 = vld [vmem:[%s13023_s10 + $0xb0] sm:$0xff] }
 0x8d0   :  { %v5445_v18 = vsel %vm5371_vm3, %v5344_v3, 0.0  ;;  %v5234_v17 = vpop.xlane.xlu1 %5233 }
 0x8d1   :  { %v5446_v53 = vadd.f32 %v5445_v18, %v5444_v40  ;;  %v5346_v50 = vsub.f32 %v4770_v13, %v5234_v17  ;;  %v4776_v40 = vadd.f32 %v4694_v35, %v14213_v23  ;;  %v14214_v17 = vld [vmem:[#allocation220_spill] sm:$0xff] }
 0x8d2   :  { %v5249_v32 = vpop.xlane.xlu0 %5248  ;;  %7215 = vlog2.f32 %v14214_v17  ;;  %v14227_v17 = vld [vmem:[#allocation183_spill] sm:$0xff] }
 0x8d3   :  { %v5448_v59 = vadd.f32 %v5447_v2, %v5446_v53  ;;  %5606 = vrot.lane.b32.xlu0 %v7270_v34, %s7328_s27  ;;  %v5449_v49 = vsel %vm5371_vm3, %v5346_v50, 0.0  ;;  %v5351_v46 = vsub.f32 %v4775_v63, %v5249_v32  ;;  %v7274_v2 = vld [vmem:[%s13023_s10 + $0xb8] sm:$0xff]  ;;  %v7212_v50 = vpop.eup %7211  ;;  %v4700_v32 = vmul.f32 0.6931472, %v7210_v8  ;;  %v14216_v34 = vld [vmem:[#allocation175_spill] sm:$0xff]  ;;  %v14223_v63 = vld [vmem:[#allocation222_spill] sm:$0xff] }
 0x8d4   :  { %v4777_v61 = vadd.f32 %v4696_v5, %v14216_v34  ;;  %v7214_v33 = vpop.eup %7213  ;;  %7217 = vlog2.f32 %v14217_v58 }
 0x8d5   :  { %v5237_v27 = vpop.xlane.xlu2 %5236  ;;  %v5450_v1 = vadd.f32 %v5449_v49, %v5448_v59  ;;  %v5459_v42 = vsel %vm5371_vm3, %v5351_v46, 0.0  ;;  %v4778_v59 = vadd.f32 %v4698_v48, %v14215_v60  ;;  %7219 = vlog2.f32 %v14218_v0  ;;  %v14229_v60 = vld [vmem:[#allocation225_spill] sm:$0xff]  ;;  %v14231_v0 = vld [vmem:[#allocation182_spill] sm:$0xff] }
 0x8d6   :  { %5598 = vrot.lane.b32.xlu1 %v7271_v4, %s7328_s27  ;;  %v5347_v38 = vsub.f32 %v4771_v20, %v5237_v27  ;;  %v4702_v49 = vmul.f32 0.6931472, %v7212_v50  ;;  %v4704_v4 = vmul.f32 0.6931472, %v7214_v33 }
 0x8d8   :  { %v5451_v15 = vsel %vm5371_vm3, %v5347_v38, 0.0  ;;  %v5243_v39 = vpop.xlane.xlu1 %5242  ;;  %v7216_v22 = vpop.eup %7215 }
 0x8d9   :  { %v5452_v10 = vadd.f32 %v5451_v15, %v5450_v1  ;;  %v5349_v21 = vsub.f32 %v4773_v56, %v5243_v39  ;;  %v4779_v1 = vadd.f32 %v4700_v32, %v14219_v36  ;;  %v14220_v39 = vld [vmem:[#allocation223_spill] sm:$0xff] }
 0x8da   :  { %v5258_v51 = vpop.xlane.xlu0 %5257  ;;  %7221 = vlog2.f32 %v14220_v39  ;;  %v14233_v39 = vld [vmem:[#allocation186_spill] sm:$0xff] }
 0x8db   :  { %v5454_v52 = vadd.f32 %v5453_v57, %v5452_v10  ;;  %5612 = vrot.lane.b32.xlu0 %v7272_v9, %s7328_s27  ;;  %v5455_v44 = vsel %vm5371_vm3, %v5349_v21, 0.0  ;;  %v5354_v37 = vsub.f32 %v4778_v59, %v5258_v51  ;;  %v7276_v10 = vld [vmem:[%s13023_s10 + $0xd0] sm:$0xff]  ;;  %v7218_v57 = vpop.eup %7217  ;;  %v4706_v21 = vmul.f32 0.6931472, %v7216_v22 }
 0x8dc   :  { %v14221_v51 = vld [vmem:[#allocation180_spill] sm:$0xff]  ;;  %v7220_v6 = vpop.eup %7219  ;;  %7223 = vlog2.f32 %v14223_v63 }
 0x8dd   :  { %v5246_v24 = vpop.xlane.xlu2 %5245  ;;  %v5456_v55 = vadd.f32 %v5455_v44, %v5454_v52  ;;  %v5465_v45 = vsel %vm5371_vm3, %v5354_v37, 0.0  ;;  %v4781_v31 = vadd.f32 %v4704_v4, %v14221_v51  ;;  %v14222_v52 = vld [vmem:[#allocation178_spill] sm:$0xff]  ;;  %7225 = vlog2.f32 %v14224_v14 }
 0x8de   :  { %5604 = vrot.lane.b32.xlu1 %v7273_v41, %s7328_s27  ;;  %v5350_v11 = vsub.f32 %v4774_v30, %v5246_v24  ;;  %v4780_v9 = vadd.f32 %v4702_v49, %v14222_v52  ;;  %v4708_v44 = vmul.f32 0.6931472, %v7218_v57  ;;  %v4710_v41 = vmul.f32 0.6931472, %v7220_v6  ;;  %v7281_v6 = vld [vmem:[%s13023_s10 + $0xe0] sm:$0xff] }
 0x8e0   :  { %v5457_v3 = vsel %vm5371_vm3, %v5350_v11, 0.0  ;;  %v5252_v28 = vpop.xlane.xlu1 %5251  ;;  %v7222_v48 = vpop.eup %7221 }
 0x8e1   :  { %v5458_v18 = vadd.f32 %v5457_v3, %v5456_v55  ;;  %v5352_v13 = vsub.f32 %v4776_v40, %v5252_v28  ;;  %v4782_v55 = vadd.f32 %v4706_v21, %v14225_v16  ;;  %v14226_v28 = vld [vmem:[#allocation226_spill] sm:$0xff] }
 0x8e2   :  { %v5267_v53 = vpop.xlane.xlu0 %5266  ;;  %7227 = vlog2.f32 %v14226_v28  ;;  %v14238_v16 = vld [vmem:[#allocation230_spill] sm:$0xff]  ;;  %v14239_v28 = vld [vmem:[#allocation189_spill] sm:$0xff] }
 0x8e3   :  { %v5460_v43 = vadd.f32 %v5459_v42, %v5458_v18  ;;  %5618 = vrot.lane.b32.xlu0 %v7274_v2, %s7328_s27  ;;  %v5461_v20 = vsel %vm5371_vm3, %v5352_v13, 0.0  ;;  %v5357_v19 = vsub.f32 %v4781_v31, %v5267_v53  ;;  %v7278_v18 = vld [vmem:[%s13023_s10 + $0xe8] sm:$0xff]  ;;  %v7224_v42 = vpop.eup %7223  ;;  %v4712_v13 = vmul.f32 0.6931472, %v7222_v48  ;;  %v14228_v53 = vld [vmem:[#allocation181_spill] sm:$0xff]  ;;  %v14235_v31 = vld [vmem:[#allocation228_spill] sm:$0xff] }
 0x8e4   :  { %v4783_v2 = vadd.f32 %v4708_v44, %v14228_v53  ;;  %v7226_v50 = vpop.eup %7225  ;;  %7229 = vlog2.f32 %v14229_v60 }
 0x8e5   :  { %v5255_v62 = vpop.xlane.xlu2 %5254  ;;  %v5462_v29 = vadd.f32 %v5461_v20, %v5460_v43  ;;  %v5471_v23 = vsel %vm5371_vm3, %v5357_v19, 0.0  ;;  %v4784_v43 = vadd.f32 %v4710_v41, %v14227_v17  ;;  %v4714_v20 = vmul.f32 0.6931472, %v7224_v42 }
 0x8e6   :  { %5610 = vrot.lane.b32.xlu1 %v7275_v47, %s7328_s27  ;;  %v5353_v27 = vsub.f32 %v4777_v61, %v5255_v62  ;;  %v7279_v61 = vld [vmem:[%s13023_s10 + $0xc8] sm:$0xff]  ;;  %v14230_v62 = vld [vmem:[#allocation224_spill] sm:$0xff]  ;;  %v4716_v47 = vmul.f32 0.6931472, %v7226_v50 }
 0x8e7   :  { %7231 = vlog2.f32 %v14230_v62 }
 0x8e8   :  { %v5463_v38 = vsel %vm5371_vm3, %v5353_v27, 0.0  ;;  %v5261_v25 = vpop.xlane.xlu1 %5260  ;;  %v7228_v4 = vpop.eup %7227 }
 0x8e9   :  { %v5464_v15 = vadd.f32 %v5463_v38, %v5462_v29  ;;  %v5355_v56 = vsub.f32 %v4779_v1, %v5261_v25  ;;  %v4785_v29 = vadd.f32 %v4712_v13, %v14231_v0  ;;  %v14232_v25 = vld [vmem:[#allocation229_spill] sm:$0xff] }
 0x8ea   :  { %v5276_v35 = vpop.xlane.xlu0 %5275  ;;  %7233 = vlog2.f32 %v14232_v25 }
 0x8eb   :  { %v5466_v12 = vadd.f32 %v5465_v45, %v5464_v15  ;;  %5624 = vrot.lane.b32.xlu0 %v7276_v10, %s7328_s27  ;;  %v5467_v30 = vsel %vm5371_vm3, %v5355_v56, 0.0  ;;  %v5360_v59 = vsub.f32 %v4784_v43, %v5276_v35  ;;  %v7280_v15 = vld [vmem:[%s13023_s10 + $0x100] sm:$0xff]  ;;  %v7230_v45 = vpop.eup %7229  ;;  %v4718_v56 = vmul.f32 0.6931472, %v7228_v4  ;;  %v14234_v10 = vld [vmem:[#allocation184_spill] sm:$0xff] }
 0x8ec   :  { %v4786_v57 = vadd.f32 %v4714_v20, %v14234_v10  ;;  %7235 = vlog2.f32 %v14235_v31  ;;  %v4720_v19 = vmul.f32 0.6931472, %v7230_v45  ;;  %v14242_v4 = vld [vmem:[#allocation192_spill] sm:$0xff] }
 0x8ed   :  { %v5264_v26 = vpop.xlane.xlu2 %5263  ;;  %v5468_v46 = vadd.f32 %v5467_v30, %v5466_v12  ;;  %v5477_v36 = vsel %vm5371_vm3, %v5360_v59, 0.0  ;;  %v4787_v12 = vadd.f32 %v4716_v47, %v14233_v39  ;;  %v7232_v21 = vpop.eup %7231  ;;  %v7285_v45 = vld [vmem:[%s13023_s10 + $0x110] sm:$0xff] }
 0x8ee   :  { %5616 = vrot.lane.b32.xlu1 %v7277_v54, %s7328_s27  ;;  %v5356_v24 = vsub.f32 %v4780_v9, %v5264_v26  ;;  %v14236_v26 = vld [vmem:[#allocation227_spill] sm:$0xff]  ;;  %v4722_v30 = vmul.f32 0.6931472, %v7232_v21 }
 0x8ef   :  { %7237 = vlog2.f32 %v14236_v26 }
 0x8f0   :  { %v5469_v11 = vsel %vm5371_vm3, %v5356_v24, 0.0  ;;  %v5270_v5 = vpop.xlane.xlu1 %5269  ;;  %v14237_v24 = vld [vmem:[#allocation185_spill] sm:$0xff]  ;;  %v7234_v44 = vpop.eup %7233  ;;  %7239 = vlog2.f32 %v14238_v16 }
 0x8f1   :  { %v5470_v3 = vadd.f32 %v5469_v11, %v5468_v46  ;;  %v5358_v40 = vsub.f32 %v4782_v55, %v5270_v5  ;;  %v4788_v14 = vadd.f32 %v4718_v56, %v14237_v24 }
 0x8f2   :  { %v5285_v37 = vpop.xlane.xlu0 %5284 }
 0x8f3   :  { %v5472_v8 = vadd.f32 %v5471_v23, %v5470_v3  ;;  %5630 = vrot.lane.b32.xlu0 %v7278_v18, %s7328_s27  ;;  %v5473_v34 = vsel %vm5371_vm3, %v5358_v40, 0.0  ;;  %v5363_v52 = vsub.f32 %v4787_v12, %v5285_v37  ;;  %v7282_v3 = vld [vmem:[%s13023_s10 + $0x118] sm:$0xff]  ;;  %v7236_v23 = vpop.eup %7235  ;;  %v4724_v40 = vmul.f32 0.6931472, %v7234_v44  ;;  %v14240_v18 = vld [vmem:[#allocation187_spill] sm:$0xff] }
 0x8f4   :  { %v4789_v42 = vadd.f32 %v4720_v19, %v14240_v18  ;;  %v4726_v59 = vmul.f32 0.6931472, %v7236_v23  ;;  %v14244_v12 = vld [vmem:[#allocation191_spill] sm:$0xff]  ;;  %v7288_v19 = vld [vmem:[%s13023_s10 + $0x140] sm:$0xff] }
 0x8f5   :  { %v5273_v32 = vpop.xlane.xlu2 %5272  ;;  %v5474_v58 = vadd.f32 %v5473_v34, %v5472_v8  ;;  %v5483_v55 = vsel %vm5371_vm3, %v5363_v52, 0.0  ;;  %v4790_v8 = vadd.f32 %v4722_v30, %v14239_v28  ;;  %v7238_v13 = vpop.eup %7237 }
 0x8f6   :  { %5622 = vrot.lane.b32.xlu1 %v7279_v61, %s7328_s27  ;;  %v5359_v33 = vsub.f32 %v4783_v2, %v5273_v32  ;;  %v7283_v2 = vld [vmem:[%s13023_s10 + $0xf8] sm:$0xff]  ;;  %v7240_v60 = vpop.eup %7239  ;;  %v4728_v34 = vmul.f32 0.6931472, %v7238_v13  ;;  %v7292_v13 = vld [vmem:[%s13023_s10 + $0x60] sm:$0xff] }
 0x8f8   :  { %v5475_v27 = vsel %vm5371_vm3, %v5359_v33, 0.0  ;;  %v5279_v49 = vpop.xlane.xlu1 %5278  ;;  %v14241_v33 = vld [vmem:[#allocation188_spill] sm:$0xff] }
 0x8f9   :  { %v5476_v38 = vadd.f32 %v5475_v27, %v5474_v58  ;;  %v5361_v1 = vsub.f32 %v4785_v29, %v5279_v49  ;;  %v4791_v62 = vadd.f32 %v4724_v40, %v14241_v33  ;;  %v4730_v27 = vmul.f32 0.6931472, %v7240_v60  ;;  %v7284_v49 = vld [vmem:[%s13023_s10 + $0x130] sm:$0xff]  ;;  %v7291_v40 = vld [vmem:[%s13023_s10 + $0x48] sm:$0xff]  ;;  %v14250_v60 = vld [vmem:[#allocation93_spill] sm:$0xff] }
 0x8fa   :  { %v5294_v41 = vpop.xlane.xlu0 %5293 }
 0x8fb   :  { %v5478_v22 = vadd.f32 %v5477_v36, %v5476_v38  ;;  %5636 = vrot.lane.b32.xlu0 %v7280_v15, %s7328_s27  ;;  %v5479_v9 = vsel %vm5371_vm3, %v5361_v1, 0.0  ;;  %v5366_v43 = vsub.f32 %v4790_v8, %v5294_v41  ;;  %v4793_v38 = vadd.f32 %v4728_v34, %v14242_v4  ;;  %v14243_v36 = vld [vmem:[#allocation190_spill] sm:$0xff]  ;;  %v7299_v4 = vld [vmem:[%s13023_s10 + $0x108] sm:$0xff] }
 0x8fc   :  { %v4792_v1 = vadd.f32 %v4726_v59, %v14243_v36  ;;  %v4794_v10 = vadd.f32 %v4730_v27, %v14244_v12  ;;  %v14246_v41 = vld [vmem:[#allocation14_spill] sm:$0xff]  ;;  %v7297_v27 = vld [vmem:[%s13023_s10 + $0xd8] sm:$0xff] }
 0x8fd   :  { %v5282_v51 = vpop.xlane.xlu2 %5281  ;;  %v5480_v63 = vadd.f32 %v5479_v9, %v5478_v22  ;;  %v5489_v20 = vsel %vm5371_vm3, %v5366_v43, 0.0  ;;  %v14248_v8 = vld [vmem:[#allocation90_spill] sm:$0xff]  ;;  %v14249_v43 = vld [vmem:[#allocation79_spill] sm:$0xff] }
 0x8fe   :  { %5628 = vrot.lane.b32.xlu1 %v7281_v6, %s7328_s27  ;;  %v5362_v35 = vsub.f32 %v4786_v57, %v5282_v51  ;;  %v7286_v6 = vld [vmem:[%s13023_s10 + $0x148] sm:$0xff] }
 0x900   :  { %v5481_v54 = vsel %vm5371_vm3, %v5362_v35, 0.0  ;;  %v5288_v46 = vpop.xlane.xlu1 %5287 }
 0x901   :  { %v5482_v11 = vadd.f32 %v5481_v54, %v5480_v63  ;;  %v5364_v5 = vsub.f32 %v4788_v14, %v5288_v46  ;;  %v7287_v63 = vld [vmem:[%s13023_s10 + $0x128] sm:$0xff]  ;;  %v14245_v54 = vld [vmem:[#allocation136_spill] sm:$0xff] }
 0x902   :  { %v5303_v0 = vpop.xlane.xlu0 %5302  ;;  %v7289_v46 = vld [vmem:[%s13023_s10 + $0x10] sm:$0xff] }
 0x903   :  { %v5484_v48 = vadd.f32 %v5483_v55, %v5482_v11  ;;  %5642 = vrot.lane.b32.xlu0 %v7282_v3, %s7328_s27  ;;  %v5485_v53 = vsel %vm5371_vm3, %v5364_v5, 0.0  ;;  %v5369_v22 = vsub.f32 %v4793_v38, %v5303_v0  ;;  %v7290_v55 = vld [vmem:[%s13023_s10 + $0x30] sm:$0xff]  ;;  %v7300_v38 = vld [vmem:[%s13023_s10 + $0x120] sm:$0xff] }
 0x905   :  { %v5291_v17 = vpop.xlane.xlu2 %5290  ;;  %v5486_v32 = vadd.f32 %v5485_v53, %v5484_v48  ;;  %v5495_v52 = vsel %vm5371_vm3, %v5369_v22, 0.0  ;;  %v14247_v48 = vld [vmem:[#allocation5_spill] sm:$0xff] }
 0x906   :  { %5634 = vrot.lane.b32.xlu1 %v7283_v2, %s7328_s27  ;;  %v5365_v50 = vsub.f32 %v4789_v42, %v5291_v17 }
 0x908   :  { %v5487_v61 = vsel %vm5371_vm3, %v5365_v50, 0.0  ;;  %v5297_v58 = vpop.xlane.xlu1 %5296  ;;  %v7293_v50 = vld [vmem:[%s13023_s10 + $0x78] sm:$0xff] }
 0x909   :  { %v5488_v37 = vadd.f32 %v5487_v61, %v5486_v32  ;;  %v5367_v47 = vsub.f32 %v4791_v62, %v5297_v58  ;;  %v7294_v61 = vld [vmem:[%s13023_s10 + $0x90] sm:$0xff] }
 0x90a   :  { %v14251_v62 = vld [vmem:[#allocation96_spill] sm:$0xff] }
 0x90b   :  { %v5490_v29 = vadd.f32 %v5489_v20, %v5488_v37  ;;  %5648 = vrot.lane.b32.xlu0 %v7284_v49, %s7328_s27  ;;  %v5491_v15 = vsel %vm5371_vm3, %v5367_v47, 0.0  ;;  %v7295_v20 = vld [vmem:[%s13023_s10 + $0xa8] sm:$0xff]  ;;  %v7296_v47 = vld [vmem:[%s13023_s10 + $0xc0] sm:$0xff] }
 0x90d   :  { %v5300_v25 = vpop.xlane.xlu2 %5299  ;;  %v5492_v39 = vadd.f32 %v5491_v15, %v5490_v29  ;;  %v7298_v29 = vld [vmem:[%s13023_s10 + $0xf0] sm:$0xff] }
 0x90e   :  { %5640 = vrot.lane.b32.xlu1 %v7285_v45, %s7328_s27  ;;  %v5368_v56 = vsub.f32 %v4792_v1, %v5300_v25  ;;  %v7301_v45 = vld [vmem:[%s13023_s10 + $0x138] sm:$0xff] }
 0x910   :  { %v5493_v57 = vsel %vm5371_vm3, %v5368_v56, 0.0  ;;  %v5306_v21 = vpop.xlane.xlu1 %5305  ;;  %v14252_v56 = vld [vmem:[#allocation12_spill] sm:$0xff] }
 0x911   :  { %v5494_v51 = vadd.f32 %v5493_v57, %v5492_v39  ;;  %v5370_v31 = vsub.f32 %v4794_v10, %v5306_v21  ;;  %v14253_v21 = vld [vmem:[#allocation17_spill] sm:$0xff] }
 0x913   :  { %v5496_v9 = vadd.f32 %v5495_v52, %v5494_v51  ;;  %5654 = vrot.lane.b32.xlu0 %v7286_v6, %s7328_s27  ;;  %v5497_v35 = vsel %vm5371_vm3, %v5370_v31, 0.0 }
 0x915   :  { %v5498_v26 = vadd.f32 %v5497_v35, %v5496_v9  ;;  %v5573_v0 = vpop.permute.xlu0 %5572  ;;  %v14254_v35 = vld [vmem:[#allocation20_spill] sm:$0xff] }
 0x916   :  { %5646 = vrot.lane.b32.xlu1 %v7287_v63, %s7328_s27  ;;  %v5764_v39 = vsub.f32 %v14252_v56, %v5573_v0  ;;  %v14255_v63 = vld [vmem:[#allocation138_spill] sm:$0xff]  ;;  %v14264_v0 = vld [vmem:[#allocation115_spill] sm:$0xff] }
 0x917   :  { %5499 = vadd.xlane.f32.xlu2 %v5498_v26 }
 0x918   :  { %v5828_v52 = vmul.f32 %v5764_v39, %v5764_v39 }
 0x91d   :  { %v5579_v49 = vpop.permute.xlu0 %5578 }
 0x91e   :  { %5652 = vrot.lane.b32.xlu1 %v7288_v19, %s7328_s27  ;;  %v5767_v26 = vsub.f32 %v14254_v35, %v5579_v49  ;;  %v14265_v49 = vld [vmem:[#allocation18_spill] sm:$0xff] }
 0x91f   :  { %v14269_v35 = vld [vmem:[#allocation122_spill] sm:$0xff] }
 0x925   :  { %v5583_v36 = vpop.permute.xlu0 %5582 }
 0x926   :  { %v5769_v19 = vsub.f32 %v14255_v63, %v5583_v36  ;;  %v14266_v36 = vld [vmem:[#allocation34_spill] sm:$0xff] }
 0x928   :  { %v5575_v30 = vpop.permute.xlu1 %5574 }
 0x929   :  { %v5765_v24 = vsub.f32 %v14245_v54, %v5575_v30  ;;  %v5831_v54 = vmul.f32 %v5767_v26, %v5767_v26 }
 0x92b   :  { %v5829_v14 = vmul.f32 %v5765_v24, %v5765_v24  ;;  %v5833_v24 = vmul.f32 %v5769_v19, %v5769_v19 }
 0x92d   :  { %5958 = vrot.lane.b32.xlu1 %v5829_v14, %s7329_s28  ;;  %v5589_v57 = vpop.permute.xlu0 %5588 }
 0x92f   :  { %5576 = vrot.lane.b32.xlu2 %v7289_v46, %s7328_s27  ;;  %v14256_v46 = vld [vmem:[#allocation80_spill] sm:$0xff] }
 0x930   :  { %v5581_v44 = vpop.permute.xlu1 %5580 }
 0x931   :  { %v5768_v11 = vsub.f32 %v14246_v41, %v5581_v44  ;;  %v5772_v44 = vsub.f32 %v14256_v46, %v5589_v57  ;;  %v14257_v41 = vld [vmem:[#allocation140_spill] sm:$0xff] }
 0x932   :  { %v7303_v57 = vld [vmem:[%s13023_s10 + $0x150] sm:$0xff] }
 0x933   :  { %v5832_v16 = vmul.f32 %v5768_v11, %v5768_v11 }
 0x935   :  { %5964 = vrot.lane.b32.xlu1 %v5832_v16, %s7329_s28  ;;  %v5595_v14 = vpop.permute.xlu0 %5594 }
 0x937   :  { %5584 = vrot.lane.b32.xlu2 %v7290_v55, %s7328_s27  ;;  %v5836_v55 = vmul.f32 %v5772_v44, %v5772_v44  ;;  %v7305_v44 = vld [vmem:[%s13023_s10 + $0x170] sm:$0xff] }
 0x938   :  { %v5587_v5 = vpop.permute.xlu1 %5586 }
 0x939   :  { %v5771_v3 = vsub.f32 %v14247_v48, %v5587_v5 }
 0x93b   :  { %v5835_v23 = vmul.f32 %v5771_v3, %v5771_v3  ;;  %v14258_v3 = vld [vmem:[#allocation19_spill] sm:$0xff] }
 0x93d   :  { %5970 = vrot.lane.b32.xlu1 %v5835_v23, %s7329_s28  ;;  %v5601_v48 = vpop.permute.xlu0 %5600  ;;  %v5775_v23 = vsub.f32 %v14258_v3, %v5595_v14  ;;  %v14272_v3 = vld [vmem:[#allocation125_spill] sm:$0xff] }
 0x93f   :  { %5590 = vrot.lane.b32.xlu2 %v7291_v40, %s7328_s27  ;;  %v14259_v40 = vld [vmem:[#allocation142_spill] sm:$0xff] }
 0x940   :  { %v5593_v28 = vpop.permute.xlu1 %5592 }
 0x941   :  { %v5774_v18 = vsub.f32 %v14248_v8, %v5593_v28 }
 0x943   :  { %v5838_v42 = vmul.f32 %v5774_v18, %v5774_v18  ;;  %v5839_v18 = vmul.f32 %v5775_v23, %v5775_v23 }
 0x945   :  { %5976 = vrot.lane.b32.xlu1 %v5838_v42, %s7329_s28 }
 0x947   :  { %5596 = vrot.lane.b32.xlu2 %v7292_v13, %s7328_s27  ;;  %v14260_v13 = vld [vmem:[#allocation152_spill] sm:$0xff] }
 0x948   :  { %v5599_v17 = vpop.permute.xlu1 %5598 }
 0x949   :  { %v5777_v53 = vsub.f32 %v14249_v43, %v5599_v17  ;;  %v5778_v17 = vsub.f32 %v14260_v13, %v5601_v48  ;;  %v5607_v43 = vpop.permute.xlu0 %5606 }
 0x94b   :  { %v5841_v2 = vmul.f32 %v5777_v53, %v5777_v53  ;;  %v14261_v53 = vld [vmem:[#allocation28_spill] sm:$0xff] }
 0x94d   :  { %5982 = vrot.lane.b32.xlu1 %v5841_v2, %s7329_s28 }
 0x94f   :  { %5602 = vrot.lane.b32.xlu2 %v7293_v50, %s7328_s27 }
 0x950   :  { %v5605_v32 = vpop.permute.xlu1 %5604 }
 0x951   :  { %v5780_v59 = vsub.f32 %v14250_v60, %v5605_v32  ;;  %v5842_v60 = vmul.f32 %v5778_v17, %v5778_v17 }
 0x953   :  { %v5844_v34 = vmul.f32 %v5780_v59, %v5780_v59 }
 0x955   :  { %5988 = vrot.lane.b32.xlu1 %v5844_v34, %s7329_s28  ;;  %v14262_v34 = vld [vmem:[#allocation86_spill] sm:$0xff] }
 0x957   :  { %5608 = vrot.lane.b32.xlu2 %v7294_v61, %s7328_s27  ;;  %v5781_v61 = vsub.f32 %v14262_v34, %v5607_v43  ;;  %v14274_v34 = vld [vmem:[#allocation153_spill] sm:$0xff] }
 0x958   :  { %v5611_v33 = vpop.permute.xlu1 %5610 }
 0x959   :  { %v5783_v58 = vsub.f32 %v14251_v62, %v5611_v33  ;;  %v14263_v33 = vld [vmem:[#allocation144_spill] sm:$0xff] }
 0x95b   :  { %v5847_v37 = vmul.f32 %v5783_v58, %v5783_v58 }
 0x95d   :  { %5994 = vrot.lane.b32.xlu1 %v5847_v37, %s7329_s28  ;;  %v5613_v37 = vpop.permute.xlu0 %5612 }
 0x95f   :  { %5614 = vrot.lane.b32.xlu2 %v7295_v20, %s7328_s27 }
 0x960   :  { %v5617_v50 = vpop.permute.xlu1 %5616 }
 0x967   :  { %5620 = vrot.lane.b32.xlu2 %v7296_v47, %s7328_s27  ;;  %v5845_v47 = vmul.f32 %v5781_v61, %v5781_v61 }
 0x968   :  { %v5623_v20 = vpop.permute.xlu1 %5622 }
 0x96f   :  { %5626 = vrot.lane.b32.xlu2 %v7297_v27, %s7328_s27 }
 0x970   :  { %v5629_v56 = vpop.permute.xlu1 %5628 }
 0x971   :  { %v5792_v61 = vsub.f32 %v14274_v34, %v5629_v56  ;;  %v14277_v56 = vld [vmem:[#allocation72_spill] sm:$0xff] }
 0x977   :  { %5632 = vrot.lane.b32.xlu2 %v7298_v29, %s7328_s27  ;;  %v5784_v29 = vsub.f32 %v14264_v0, %v5613_v37 }
 0x97f   :  { %5638 = vrot.lane.b32.xlu2 %v7299_v4, %s7328_s27 }
 0x987   :  { %5644 = vrot.lane.b32.xlu2 %v7300_v38, %s7328_s27 }
 0x98a   :  { %v5500_v1 = vpop.xlane.xlu2 %5499 }
 0x98b   :  { %v5501_v25 = vrot.slane %v5500_v1, 4 }
 0x98d   :  { %v5502_v22 = vadd.f32 %v5501_v25, %v5500_v1  ;;  %v5848_v25 = vmul.f32 %v5784_v29, %v5784_v29 }
 0x98f   :  { %v5503_v15 = vrot.slane %v5502_v22, 2  ;;  %5650 = vrot.lane.b32.xlu2 %v7301_v45, %s7328_s27 }
 0x991   :  { %v5504_v12 = vadd.f32 %v5503_v15, %v5502_v22  ;;  %v5619_v22 = vpop.permute.xlu0 %5618 }
 0x992   :  { %v5577_v10 = vpop.permute.xlu2 %5576 }
 0x993   :  { %v5766_v51 = vsub.f32 %v14253_v21, %v5577_v10  ;;  %v5505_v31 = vrot.slane %v5504_v12, 1  ;;  %v7302_v10 = vld [vmem:[%s13023_s10 + $0x158] sm:$0xff]  ;;  %v12752_v21 = vpop.permute.xlu1 %5634 }
 0x995   :  { %v5830_v9 = vmul.f32 %v5766_v51, %v5766_v51  ;;  %v5506_v6 = vadd.f32 %v5505_v31, %v5504_v12  ;;  %v7304_v51 = vld [vmem:[%s13023_s10 + $0x160] sm:$0xff]  ;;  %v14267_v31 = vld [vmem:[#allocation53_spill] sm:$0xff] }
 0x997   :  { %5956 = vrot.lane.b32.xlu2 %v5828_v52, %s7329_s28  ;;  %6950 = vpush %v5506_v6  ;;  %5960 = vrot.lane.b32.xlu0 %v5830_v9, %s7329_s28  ;;  %v5787_v52 = vsub.f32 %v14267_v31, %v5619_v22  ;;  %v14268_v9 = vld [vmem:[#allocation149_spill] sm:$0xff]  ;;  %v7313_v22 = vld [vmem:[%s13023_s10 + $0x1a8] sm:$0xff] }
 0x998   :  { %v5786_v6 = vsub.f32 %v14268_v9, %v5617_v50  ;;  %v7309_v50 = vld [vmem:[%s13023_s10 + $0x180] sm:$0xff] }
 0x999   :  { %v5625_v12 = vpop.permute.xlu0 %5624  ;;  %v5851_v19 = vmul.f32 %v5787_v52, %v5787_v52 }
 0x99a   :  { %v5585_v30 = vpop.permute.xlu2 %5584 }
 0x99b   :  { %v5770_v11 = vsub.f32 %v14257_v41, %v5585_v30  ;;  %v5850_v30 = vmul.f32 %v5786_v6, %v5786_v6  ;;  %v12764_v14 = vpop.permute.xlu1 %5640  ;;  %v7306_v41 = vld [vmem:[%s13023_s10 + $0x168] sm:$0xff] }
 0x99d   :  { %v5834_v5 = vmul.f32 %v5770_v11, %v5770_v11  ;;  %v7307_v11 = vld [vmem:[%s13023_s10 + $0x178] sm:$0xff] }
 0x99f   :  { %5962 = vrot.lane.b32.xlu2 %v5831_v54, %s7329_s28  ;;  %5966 = vrot.lane.b32.xlu0 %v5833_v24, %s7329_s28 }
 0x9a1   :  { %v5631_v24 = vpop.permute.xlu0 %5630 }
 0x9a2   :  { %v5591_v16 = vpop.permute.xlu2 %5590 }
 0x9a3   :  { %v5773_v28 = vsub.f32 %v14259_v40, %v5591_v16  ;;  %v14270_v16 = vld [vmem:[#allocation102_spill] sm:$0xff] }
 0x9a5   :  { %v5837_v42 = vmul.f32 %v5773_v28, %v5773_v28 }
 0x9a7   :  { %5972 = vrot.lane.b32.xlu0 %v5836_v55, %s7329_s28  ;;  %5968 = vrot.lane.b32.xlu2 %v5834_v5, %s7329_s28  ;;  %v5790_v55 = vsub.f32 %v14270_v16, %v5625_v12  ;;  %v14271_v5 = vld [vmem:[#allocation92_spill] sm:$0xff] }
 0x9a8   :  { %v5789_v48 = vsub.f32 %v14271_v5, %v5623_v20  ;;  %v5856_v20 = vmul.f32 %v5792_v61, %v5792_v61 }
 0x9a9   :  { %v5637_v28 = vpop.permute.xlu0 %5636 }
 0x9aa   :  { %v5597_v8 = vpop.permute.xlu2 %5596 }
 0x9ab   :  { %v5776_v2 = vsub.f32 %v14261_v53, %v5597_v8  ;;  %v12781_v8 = vpop.permute.xlu1 %5646 }
 0x9ad   :  { %v5840_v59 = vmul.f32 %v5776_v2, %v5776_v2  ;;  %v7308_v2 = vld [vmem:[%s13023_s10 + $0x188] sm:$0xff] }
 0x9af   :  { %5978 = vrot.lane.b32.xlu0 %v5839_v18, %s7329_s28  ;;  %5974 = vrot.lane.b32.xlu2 %v5837_v42, %s7329_s28  ;;  %v5854_v18 = vmul.f32 %v5790_v55, %v5790_v55  ;;  %v5853_v42 = vmul.f32 %v5789_v48, %v5789_v48  ;;  %v14280_v55 = vld [vmem:[#allocation97_spill] sm:$0xff] }
 0x9b0   :  { %v5798_v5 = vsub.f32 %v14280_v55, %v12764_v14 }
 0x9b1   :  { %v5643_v43 = vpop.permute.xlu0 %5642 }
 0x9b2   :  { %v5603_v32 = vpop.permute.xlu2 %5602 }
 0x9b3   :  { %v5779_v62 = vsub.f32 %v14263_v33, %v5603_v32  ;;  %v12786_v53 = vpop.permute.xlu1 %5652  ;;  %v7310_v32 = vld [vmem:[%s13023_s10 + $0x190] sm:$0xff]  ;;  %v14275_v33 = vld [vmem:[#allocation98_spill] sm:$0xff] }
 0x9b5   :  { %v5843_v27 = vmul.f32 %v5779_v62, %v5779_v62 }
 0x9b7   :  { %5984 = vrot.lane.b32.xlu0 %v5842_v60, %s7329_s28  ;;  %5980 = vrot.lane.b32.xlu2 %v5840_v59, %s7329_s28  ;;  %v14273_v60 = vld [vmem:[#allocation154_spill] sm:$0xff] }
 0x9b8   :  { %v5793_v59 = vsub.f32 %v14273_v60, %v5631_v24 }
 0x9b9   :  { %v12805_v0 = vpop.permute.xlu0 %5648 }
 0x9ba   :  { %v5609_v58 = vpop.permute.xlu2 %5608  ;;  %v5857_v37 = vmul.f32 %v5793_v59, %v5793_v59 }
 0x9bb   :  { %v5782_v4 = vsub.f32 %v14265_v49, %v5609_v58 }
 0x9bd   :  { %v5846_v15 = vmul.f32 %v5782_v4, %v5782_v4 }
 0x9bf   :  { %5990 = vrot.lane.b32.xlu0 %v5845_v47, %s7329_s28  ;;  %5986 = vrot.lane.b32.xlu2 %v5843_v27, %s7329_s28  ;;  %v5959_v47 = vpop.permute.xlu1 %5958 }
 0x9c0   :  { %v6149_v49 = vsel %vm5371_vm3, %v5959_v47, 0.0 }
 0x9c1   :  { %v12827_v12 = vpop.permute.xlu0 %5654 }
 0x9c2   :  { %v5615_v38 = vpop.permute.xlu2 %5614 }
 0x9c3   :  { %v5785_v1 = vsub.f32 %v14266_v36, %v5615_v38  ;;  %v7311_v36 = vld [vmem:[%s13023_s10 + $0x1a0] sm:$0xff] }
 0x9c5   :  { %v5849_v45 = vmul.f32 %v5785_v1, %v5785_v1  ;;  %v7312_v1 = vld [vmem:[%s13023_s10 + $0x198] sm:$0xff] }
 0x9c7   :  { %5996 = vrot.lane.b32.xlu0 %v5848_v25, %s7329_s28  ;;  %5992 = vrot.lane.b32.xlu2 %v5846_v15, %s7329_s28  ;;  %v5965_v25 = vpop.permute.xlu1 %5964  ;;  %v14276_v15 = vld [vmem:[#allocation131_spill] sm:$0xff] }
 0x9c8   :  { %5998 = vrot.lane.b32.xlu1 %v5849_v45, %s7329_s28  ;;  %v5796_v45 = vsub.f32 %v14276_v15, %v5637_v28 }
 0x9ca   :  { %v5621_v39 = vpop.permute.xlu2 %5620  ;;  %v5860_v31 = vmul.f32 %v5796_v45, %v5796_v45 }
 0x9cb   :  { %v5788_v26 = vsub.f32 %v14269_v35, %v5621_v39  ;;  %v5795_v39 = vsub.f32 %v14277_v56, %v12752_v21 }
 0x9cd   :  { %v5852_v54 = vmul.f32 %v5788_v26, %v5788_v26  ;;  %v5859_v52 = vmul.f32 %v5795_v39, %v5795_v39 }
 0x9cf   :  { %5658 = vrot.lane.b32.xlu0 %v7302_v10, %s7328_s27  ;;  %5656 = vrot.lane.b32.xlu2 %v7303_v57, %s7328_s27  ;;  %v14278_v10 = vld [vmem:[#allocation39_spill] sm:$0xff]  ;;  %v5971_v35 = vpop.permute.xlu1 %5970 }
 0x9d0   :  { %5660 = vrot.lane.b32.xlu1 %v7304_v51, %s7328_s27  ;;  %v6161_v60 = vsel %vm5371_vm3, %v5971_v35, 0.0 }
 0x9d2   :  { %v5627_v63 = vpop.permute.xlu2 %5626 }
 0x9d3   :  { %v5791_v23 = vsub.f32 %v14272_v3, %v5627_v63  ;;  %v14281_v3 = vld [vmem:[#allocation65_spill] sm:$0xff] }
 0x9d5   :  { %v5855_v13 = vmul.f32 %v5791_v23, %v5791_v23 }
 0x9d7   :  { %6002 = vrot.lane.b32.xlu0 %v5851_v19, %s7329_s28  ;;  %6000 = vrot.lane.b32.xlu2 %v5850_v30, %s7329_s28 }
 0x9d8   :  { %6004 = vrot.lane.b32.xlu1 %v5852_v54, %s7329_s28  ;;  %v6155_v54 = vsel %vm5371_vm3, %v5965_v25, 0.0 }
 0x9da   :  { %v5633_v46 = vpop.permute.xlu2 %5632 }
 0x9db   :  { %v5794_v62 = vsub.f32 %v14275_v33, %v5633_v46  ;;  %v7314_v46 = vld [vmem:[%s13023_s10 + $0x1b8] sm:$0xff] }
 0x9dd   :  { %v5858_v27 = vmul.f32 %v5794_v62, %v5794_v62 }
 0x9df   :  { %5664 = vrot.lane.b32.xlu0 %v7305_v44, %s7328_s27  ;;  %5662 = vrot.lane.b32.xlu2 %v7306_v41, %s7328_s27  ;;  %v7315_v44 = vld [vmem:[%s13023_s10 + $0x1b0] sm:$0xff]  ;;  %v7316_v41 = vld [vmem:[%s13023_s10 + $0x1c0] sm:$0xff] }
 0x9e0   :  { %5666 = vrot.lane.b32.xlu1 %v7307_v11, %s7328_s27  ;;  %v14279_v11 = vld [vmem:[#allocation42_spill] sm:$0xff] }
 0x9e1   :  { %v5799_v16 = vsub.f32 %v14279_v11, %v5643_v43  ;;  %v14286_v11 = vld [vmem:[#allocation172_spill] sm:$0xff] }
 0x9e2   :  { %v5639_v40 = vpop.permute.xlu2 %5638 }
 0x9e3   :  { %v5797_v57 = vsub.f32 %v14278_v10, %v5639_v40 }
 0x9e5   :  { %v5861_v9 = vmul.f32 %v5797_v57, %v5797_v57 }
 0x9e7   :  { %6008 = vrot.lane.b32.xlu0 %v5854_v18, %s7329_s28  ;;  %6006 = vrot.lane.b32.xlu2 %v5853_v42, %s7329_s28  ;;  %v5977_v42 = vpop.permute.xlu1 %5976 }
 0x9e8   :  { %6010 = vrot.lane.b32.xlu1 %v5855_v13, %s7329_s28 }
 0x9ea   :  { %v5645_v17 = vpop.permute.xlu2 %5644 }
 0x9eb   :  { %v5800_v23 = vsub.f32 %v14281_v3, %v5645_v17 }
 0x9ed   :  { %v5864_v59 = vmul.f32 %v5800_v23, %v5800_v23 }
 0x9ef   :  { %5670 = vrot.lane.b32.xlu0 %v7308_v2, %s7328_s27  ;;  %5668 = vrot.lane.b32.xlu2 %v7309_v50, %s7328_s27  ;;  %v5863_v2 = vmul.f32 %v5799_v16, %v5799_v16  ;;  %v5862_v50 = vmul.f32 %v5798_v5, %v5798_v5  ;;  %v5804_v16 = vsub.f32 %v14286_v11, %v12786_v53 }
 0x9f0   :  { %5672 = vrot.lane.b32.xlu1 %v7310_v32, %s7328_s27 }
 0x9f2   :  { %v12803_v58 = vpop.permute.xlu2 %5650 }
 0x9f7   :  { %6014 = vrot.lane.b32.xlu0 %v5857_v37, %s7329_s28  ;;  %6012 = vrot.lane.b32.xlu2 %v5856_v20, %s7329_s28  ;;  %v6167_v37 = vsel %vm5371_vm3, %v5977_v42, 0.0  ;;  %v5983_v20 = vpop.permute.xlu1 %5982 }
 0x9f8   :  { %6016 = vrot.lane.b32.xlu1 %v5858_v27, %s7329_s28  ;;  %v7317_v27 = vld [vmem:[%s13023_s10 + $0x1d0] sm:$0xff] }
 0x9fa   :  { %v5957_v29 = vpop.permute.xlu2 %5956 }
 0x9fb   :  { %v6148_v4 = vsel %vm5371_vm3, %v5957_v29, 0.0  ;;  %v7318_v29 = vld [vmem:[%s13023_s10 + $0x1c8] sm:$0xff] }
 0x9fc   :  { %v6150_v38 = vadd.f32 %v6149_v49, %v6148_v4  ;;  %v7319_v49 = vld [vmem:[%s13023_s10 + $0x1d8] sm:$0xff]  ;;  %v14282_v4 = vld [vmem:[#allocation35_spill] sm:$0xff] }
 0x9ff   :  { %5676 = vrot.lane.b32.xlu0 %v7311_v36, %s7328_s27  ;;  %5674 = vrot.lane.b32.xlu2 %v7312_v1, %s7328_s27  ;;  %v14283_v36 = vld [vmem:[#allocation130_spill] sm:$0xff] }
 0xa00   :  { %5678 = vrot.lane.b32.xlu1 %v7313_v22, %s7328_s27  ;;  %v5801_v1 = vsub.f32 %v14283_v36, %v12781_v8  ;;  %v14284_v22 = vld [vmem:[#allocation100_spill] sm:$0xff]  ;;  %v5989_v8 = vpop.permute.xlu1 %5988 }
 0xa01   :  { %v5803_v15 = vsub.f32 %v14284_v22, %v12803_v58 }
 0xa02   :  { %v5963_v51 = vpop.permute.xlu2 %5962 }
 0xa03   :  { %v6153_v19 = vsel %vm5371_vm3, %v5963_v51, 0.0  ;;  %v5865_v51 = vmul.f32 %v5801_v1, %v5801_v1 }
 0xa07   :  { %6020 = vrot.lane.b32.xlu0 %v5860_v31, %s7329_s28  ;;  %6018 = vrot.lane.b32.xlu2 %v5859_v52, %s7329_s28  ;;  %v6173_v52 = vsel %vm5371_vm3, %v5983_v20, 0.0  ;;  %v14288_v20 = vld [vmem:[#allocation38_spill] sm:$0xff] }
 0xa08   :  { %6022 = vrot.lane.b32.xlu1 %v5861_v9, %s7329_s28  ;;  %v5867_v9 = vmul.f32 %v5803_v15, %v5803_v15  ;;  %v5995_v5 = vpop.permute.xlu1 %5994 }
 0xa09   :  { %v5961_v6 = vpop.permute.xlu0 %5960  ;;  %v6185_v53 = vsel %vm5371_vm3, %v5995_v5, 0.0 }
 0xa0a   :  { %v6151_v26 = vsel %vm5371_vm3, %v5961_v6, 0.0  ;;  %v5969_v63 = vpop.permute.xlu2 %5968 }
 0xa0b   :  { %v6152_v21 = vadd.f32 %v6151_v26, %v6150_v38  ;;  %v6159_v13 = vsel %vm5371_vm3, %v5969_v63, 0.0  ;;  %v5802_v38 = vsub.f32 %v14282_v4, %v12805_v0 }
 0xa0d   :  { %v6154_v30 = vadd.f32 %v6153_v19, %v6152_v21  ;;  %v5866_v57 = vmul.f32 %v5802_v38, %v5802_v38  ;;  %v6179_v19 = vsel %vm5371_vm3, %v5989_v8, 0.0  ;;  %v14290_v38 = vld [vmem:[#allocation52_spill] sm:$0xff] }
 0xa0f   :  { %v6156_v24 = vadd.f32 %v6155_v54, %v6154_v30  ;;  %5682 = vrot.lane.b32.xlu0 %v7314_v46, %s7328_s27  ;;  %5680 = vrot.lane.b32.xlu2 %v7315_v44, %s7328_s27  ;;  %v7320_v54 = vld [vmem:[%s13023_s10 + $0x1e8] sm:$0xff]  ;;  %v7322_v46 = vld [vmem:[%s13023_s10 + $0x1f0] sm:$0xff]  ;;  %v14285_v44 = vld [vmem:[#allocation165_spill] sm:$0xff] }
 0xa10   :  { %5684 = vrot.lane.b32.xlu1 %v7316_v41, %s7328_s27  ;;  %v5805_v41 = vsub.f32 %v14285_v44, %v12827_v12 }
 0xa11   :  { %v5967_v48 = vpop.permute.xlu0 %5966 }
 0xa12   :  { %v6157_v40 = vsel %vm5371_vm3, %v5967_v48, 0.0  ;;  %v5975_v28 = vpop.permute.xlu2 %5974  ;;  %v5869_v42 = vmul.f32 %v5805_v41, %v5805_v41 }
 0xa13   :  { %v6158_v18 = vadd.f32 %v6157_v40, %v6156_v24  ;;  %v6165_v33 = vsel %vm5371_vm3, %v5975_v28, 0.0  ;;  %v7321_v24 = vld [vmem:[%s13023_s10 + $0x1e0] sm:$0xff]  ;;  %v14287_v40 = vld [vmem:[#allocation49_spill] sm:$0xff] }
 0xa15   :  { %v6160_v32 = vadd.f32 %v6159_v13, %v6158_v18  ;;  %v5868_v13 = vmul.f32 %v5804_v16, %v5804_v16 }
 0xa17   :  { %v6162_v43 = vadd.f32 %v6161_v60, %v6160_v32  ;;  %6026 = vrot.lane.b32.xlu0 %v5863_v2, %s7329_s28  ;;  %6024 = vrot.lane.b32.xlu2 %v5862_v50, %s7329_s28 }
 0xa18   :  { %6028 = vrot.lane.b32.xlu1 %v5864_v59, %s7329_s28 }
 0xa19   :  { %v5973_v14 = vpop.permute.xlu0 %5972 }
 0xa1a   :  { %v6163_v17 = vsel %vm5371_vm3, %v5973_v14, 0.0  ;;  %v5981_v34 = vpop.permute.xlu2 %5980 }
 0xa1b   :  { %v6164_v61 = vadd.f32 %v6163_v17, %v6162_v43  ;;  %v6171_v10 = vsel %vm5371_vm3, %v5981_v34, 0.0 }
 0xa1d   :  { %v6166_v62 = vadd.f32 %v6165_v33, %v6164_v61 }
 0xa1f   :  { %v6168_v47 = vadd.f32 %v6167_v37, %v6166_v62  ;;  %5688 = vrot.lane.b32.xlu0 %v7317_v27, %s7328_s27  ;;  %5686 = vrot.lane.b32.xlu2 %v7318_v29, %s7328_s27  ;;  %v7323_v62 = vld [vmem:[%s13023_s10 + $0x1f8] sm:$0xff] }
 0xa20   :  { %5690 = vrot.lane.b32.xlu1 %v7319_v49, %s7328_s27  ;;  %v14289_v49 = vld [vmem:[#allocation6_spill] sm:$0xff] }
 0xa21   :  { %v5979_v25 = vpop.permute.xlu0 %5978 }
 0xa22   :  { %v6169_v45 = vsel %vm5371_vm3, %v5979_v25, 0.0  ;;  %v5987_v56 = vpop.permute.xlu2 %5986 }
 0xa23   :  { %v6170_v39 = vadd.f32 %v6169_v45, %v6168_v47  ;;  %v6177_v63 = vsel %vm5371_vm3, %v5987_v56, 0.0 }
 0xa25   :  { %v6172_v31 = vadd.f32 %v6171_v10, %v6170_v39 }
 0xa27   :  { %v6174_v0 = vadd.f32 %v6173_v52, %v6172_v31  ;;  %6032 = vrot.lane.b32.xlu0 %v5866_v57, %s7329_s28  ;;  %6030 = vrot.lane.b32.xlu2 %v5865_v51, %s7329_s28 }
 0xa28   :  { %6034 = vrot.lane.b32.xlu1 %v5867_v9, %s7329_s28 }
 0xa29   :  { %v5985_v58 = vpop.permute.xlu0 %5984 }
 0xa2a   :  { %v6175_v6 = vsel %vm5371_vm3, %v5985_v58, 0.0  ;;  %v5993_v35 = vpop.permute.xlu2 %5992 }
 0xa2b   :  { %v6176_v26 = vadd.f32 %v6175_v6, %v6174_v0  ;;  %v6183_v18 = vsel %vm5371_vm3, %v5993_v35, 0.0  ;;  %v14291_v0 = vld [vmem:[#allocation41_spill] sm:$0xff]  ;;  %v14292_v35 = vld [vmem:[#allocation106_spill] sm:$0xff] }
 0xa2d   :  { %v6178_v21 = vadd.f32 %v6177_v63, %v6176_v26  ;;  %v14293_v63 = vld [vmem:[#allocation67_spill] sm:$0xff] }
 0xa2f   :  { %v6180_v30 = vadd.f32 %v6179_v19, %v6178_v21  ;;  %5694 = vrot.lane.b32.xlu0 %v7320_v54, %s7328_s27  ;;  %5692 = vrot.lane.b32.xlu2 %v7321_v24, %s7328_s27 }
 0xa30   :  { %5696 = vrot.lane.b32.xlu1 %v7322_v46, %s7328_s27 }
 0xa31   :  { %v5991_v55 = vpop.permute.xlu0 %5990 }
 0xa32   :  { %v6181_v48 = vsel %vm5371_vm3, %v5991_v55, 0.0  ;;  %v5657_v3 = vpop.permute.xlu2 %5656 }
 0xa33   :  { %v6182_v23 = vadd.f32 %v6181_v48, %v6180_v30  ;;  %v5806_v28 = vsub.f32 %v14287_v40, %v5657_v3 }
 0xa35   :  { %v6184_v2 = vadd.f32 %v6183_v18, %v6182_v23  ;;  %v5870_v50 = vmul.f32 %v5806_v28, %v5806_v28  ;;  %v14294_v23 = vld [vmem:[#allocation63_spill] sm:$0xff] }
 0xa37   :  { %6038 = vrot.lane.b32.xlu0 %v5869_v42, %s7329_s28  ;;  %6036 = vrot.lane.b32.xlu2 %v5868_v13, %s7329_s28  ;;  %v6186_v12 = vadd.f32 %v6185_v53, %v6184_v2  ;;  %v14295_v42 = vld [vmem:[#allocation150_spill] sm:$0xff] }
 0xa38   :  { %6040 = vrot.lane.b32.xlu1 %v5870_v50, %s7329_s28  ;;  %v14296_v2 = vld [vmem:[#allocation26_spill] sm:$0xff] }
 0xa39   :  { %v5997_v32 = vpop.permute.xlu0 %5996 }
 0xa3a   :  { %v6187_v60 = vsel %vm5371_vm3, %v5997_v32, 0.0  ;;  %v5999_v59 = vpop.permute.xlu1 %5998  ;;  %v6001_v43 = vpop.permute.xlu2 %6000 }
 0xa3b   :  { %v6188_v14 = vadd.f32 %v6187_v60, %v6186_v12  ;;  %v6189_v17 = vsel %vm5371_vm3, %v5999_v59, 0.0  ;;  %v6191_v61 = vsel %vm5371_vm3, %v6001_v43, 0.0 }
 0xa3d   :  { %v6190_v34 = vadd.f32 %v6189_v17, %v6188_v14 }
 0xa3f   :  { %v6192_v33 = vadd.f32 %v6191_v61, %v6190_v34  ;;  %5698 = vrot.lane.b32.xlu2 %v7323_v62, %s7328_s27 }
 0xa41   :  { %v5659_v37 = vpop.permute.xlu0 %5658 }
 0xa42   :  { %v5807_v47 = vsub.f32 %v14288_v20, %v5659_v37  ;;  %v5661_v27 = vpop.permute.xlu1 %5660  ;;  %v5663_v29 = vpop.permute.xlu2 %5662  ;;  %v14297_v20 = vld [vmem:[#allocation95_spill] sm:$0xff] }
 0xa43   :  { %v5808_v4 = vsub.f32 %v14289_v49, %v5661_v27  ;;  %v5809_v36 = vsub.f32 %v14290_v38, %v5663_v29  ;;  %v14298_v49 = vld [vmem:[#allocation66_spill] sm:$0xff]  ;;  %v14299_v38 = vld [vmem:[#allocation69_spill] sm:$0xff] }
 0xa44   :  { %v5871_v1 = vmul.f32 %v5807_v47, %v5807_v47 }
 0xa45   :  { %v5872_v25 = vmul.f32 %v5808_v4, %v5808_v4  ;;  %v5873_v22 = vmul.f32 %v5809_v36, %v5809_v36 }
 0xa46   :  { %6042 = vrot.lane.b32.xlu0 %v5871_v1, %s7329_s28 }
 0xa47   :  { %6046 = vrot.lane.b32.xlu1 %v5873_v22, %s7329_s28  ;;  %6044 = vrot.lane.b32.xlu2 %v5872_v25, %s7329_s28 }
 0xa49   :  { %v6003_v15 = vpop.permute.xlu0 %6002 }
 0xa4a   :  { %v6193_v45 = vsel %vm5371_vm3, %v6003_v15, 0.0  ;;  %v6005_v56 = vpop.permute.xlu1 %6004  ;;  %v6007_v39 = vpop.permute.xlu2 %6006 }
 0xa4b   :  { %v6194_v10 = vadd.f32 %v6193_v45, %v6192_v33  ;;  %v6195_v57 = vsel %vm5371_vm3, %v6005_v56, 0.0  ;;  %v6197_v31 = vsel %vm5371_vm3, %v6007_v39, 0.0 }
 0xa4d   :  { %v6196_v51 = vadd.f32 %v6195_v57, %v6194_v10 }
 0xa4f   :  { %v6198_v52 = vadd.f32 %v6197_v31, %v6196_v51 }
 0xa51   :  { %v5665_v9 = vpop.permute.xlu0 %5664 }
 0xa52   :  { %v5810_v8 = vsub.f32 %v14291_v0, %v5665_v9  ;;  %v5667_v58 = vpop.permute.xlu1 %5666  ;;  %v5669_v6 = vpop.permute.xlu2 %5668  ;;  %v14300_v0 = vld [vmem:[#allocation91_spill] sm:$0xff] }
 0xa53   :  { %v5811_v26 = vsub.f32 %v14292_v35, %v5667_v58  ;;  %v5812_v21 = vsub.f32 %v14293_v63, %v5669_v6  ;;  %v14301_v35 = vld [vmem:[#allocation124_spill] sm:$0xff] }
 0xa54   :  { %v5874_v19 = vmul.f32 %v5810_v8, %v5810_v8  ;;  %v14302_v63 = vld [vmem:[#allocation36_spill] sm:$0xff] }
 0xa55   :  { %v5875_v30 = vmul.f32 %v5811_v26, %v5811_v26  ;;  %v5876_v54 = vmul.f32 %v5812_v21, %v5812_v21 }
 0xa56   :  { %6048 = vrot.lane.b32.xlu0 %v5874_v19, %s7329_s28 }
 0xa57   :  { %6050 = vrot.lane.b32.xlu2 %v5875_v30, %s7329_s28  ;;  %6052 = vrot.lane.b32.xlu1 %v5876_v54, %s7329_s28 }
 0xa59   :  { %v6009_v24 = vpop.permute.xlu0 %6008 }
 0xa5a   :  { %v6199_v46 = vsel %vm5371_vm3, %v6009_v24, 0.0  ;;  %v6011_v44 = vpop.permute.xlu1 %6010  ;;  %v6013_v41 = vpop.permute.xlu2 %6012 }
 0xa5b   :  { %v6200_v11 = vadd.f32 %v6199_v46, %v6198_v52  ;;  %v6201_v16 = vsel %vm5371_vm3, %v6011_v44, 0.0  ;;  %v6203_v5 = vsel %vm5371_vm3, %v6013_v41, 0.0 }
 0xa5d   :  { %v6202_v55 = vadd.f32 %v6201_v16, %v6200_v11 }
 0xa5f   :  { %v6204_v48 = vadd.f32 %v6203_v5, %v6202_v55 }
 0xa61   :  { %v5671_v3 = vpop.permute.xlu0 %5670 }
 0xa62   :  { %v5813_v40 = vsub.f32 %v14294_v23, %v5671_v3  ;;  %v5673_v28 = vpop.permute.xlu1 %5672  ;;  %v5675_v18 = vpop.permute.xlu2 %5674  ;;  %v14303_v23 = vld [vmem:[#allocation135_spill] sm:$0xff] }
 0xa63   :  { %v5814_v13 = vsub.f32 %v14295_v42, %v5673_v28  ;;  %v5815_v50 = vsub.f32 %v14296_v2, %v5675_v18  ;;  %v14304_v42 = vld [vmem:[#allocation128_spill] sm:$0xff]  ;;  %v14305_v2 = vld [vmem:[#allocation137_spill] sm:$0xff] }
 0xa64   :  { %v5877_v53 = vmul.f32 %v5813_v40, %v5813_v40 }
 0xa65   :  { %v5878_v12 = vmul.f32 %v5814_v13, %v5814_v13  ;;  %v5879_v32 = vmul.f32 %v5815_v50, %v5815_v50 }
 0xa66   :  { %6054 = vrot.lane.b32.xlu0 %v5877_v53, %s7329_s28 }
 0xa67   :  { %6056 = vrot.lane.b32.xlu2 %v5878_v12, %s7329_s28  ;;  %6058 = vrot.lane.b32.xlu1 %v5879_v32, %s7329_s28 }
 0xa69   :  { %v6015_v60 = vpop.permute.xlu0 %6014 }
 0xa6a   :  { %v6205_v59 = vsel %vm5371_vm3, %v6015_v60, 0.0  ;;  %v6017_v43 = vpop.permute.xlu1 %6016  ;;  %v6019_v14 = vpop.permute.xlu2 %6018 }
 0xa6b   :  { %v6206_v17 = vadd.f32 %v6205_v59, %v6204_v48  ;;  %v6207_v34 = vsel %vm5371_vm3, %v6017_v43, 0.0  ;;  %v6209_v33 = vsel %vm5371_vm3, %v6019_v14, 0.0 }
 0xa6d   :  { %v6208_v61 = vadd.f32 %v6207_v34, %v6206_v17 }
 0xa6f   :  { %v6210_v62 = vadd.f32 %v6209_v33, %v6208_v61 }
 0xa71   :  { %v5677_v37 = vpop.permute.xlu0 %5676 }
 0xa72   :  { %v5816_v47 = vsub.f32 %v14297_v20, %v5677_v37  ;;  %v5679_v27 = vpop.permute.xlu1 %5678  ;;  %v5681_v29 = vpop.permute.xlu2 %5680  ;;  %v14306_v20 = vld [vmem:[#allocation43_spill] sm:$0xff] }
 0xa73   :  { %v5817_v4 = vsub.f32 %v14298_v49, %v5679_v27  ;;  %v5818_v36 = vsub.f32 %v14299_v38, %v5681_v29  ;;  %v14307_v49 = vld [vmem:[#allocation101_spill] sm:$0xff]  ;;  %v14308_v38 = vld [vmem:[#allocation74_spill] sm:$0xff] }
 0xa74   :  { %v5880_v1 = vmul.f32 %v5816_v47, %v5816_v47 }
 0xa75   :  { %v5881_v25 = vmul.f32 %v5817_v4, %v5817_v4  ;;  %v5882_v22 = vmul.f32 %v5818_v36, %v5818_v36 }
 0xa76   :  { %6060 = vrot.lane.b32.xlu0 %v5880_v1, %s7329_s28 }
 0xa77   :  { %6062 = vrot.lane.b32.xlu2 %v5881_v25, %s7329_s28  ;;  %6064 = vrot.lane.b32.xlu1 %v5882_v22, %s7329_s28 }
 0xa79   :  { %v6021_v15 = vpop.permute.xlu0 %6020 }
 0xa7a   :  { %v6211_v45 = vsel %vm5371_vm3, %v6021_v15, 0.0  ;;  %v6023_v56 = vpop.permute.xlu1 %6022  ;;  %v6025_v39 = vpop.permute.xlu2 %6024 }
 0xa7b   :  { %v6212_v10 = vadd.f32 %v6211_v45, %v6210_v62  ;;  %v6213_v57 = vsel %vm5371_vm3, %v6023_v56, 0.0  ;;  %v6215_v31 = vsel %vm5371_vm3, %v6025_v39, 0.0 }
 0xa7d   :  { %v6214_v51 = vadd.f32 %v6213_v57, %v6212_v10 }
 0xa7f   :  { %v6216_v52 = vadd.f32 %v6215_v31, %v6214_v51 }
 0xa81   :  { %v5683_v9 = vpop.permute.xlu0 %5682 }
 0xa82   :  { %v5819_v8 = vsub.f32 %v14300_v0, %v5683_v9  ;;  %v5685_v58 = vpop.permute.xlu1 %5684  ;;  %v5687_v6 = vpop.permute.xlu2 %5686 }
 0xa83   :  { %v5820_v26 = vsub.f32 %v14301_v35, %v5685_v58  ;;  %v5821_v21 = vsub.f32 %v14302_v63, %v5687_v6 }
 0xa84   :  { %v5883_v19 = vmul.f32 %v5819_v8, %v5819_v8 }
 0xa85   :  { %v5884_v30 = vmul.f32 %v5820_v26, %v5820_v26  ;;  %v5885_v54 = vmul.f32 %v5821_v21, %v5821_v21 }
 0xa86   :  { %6066 = vrot.lane.b32.xlu0 %v5883_v19, %s7329_s28 }
 0xa87   :  { %6068 = vrot.lane.b32.xlu2 %v5884_v30, %s7329_s28  ;;  %6070 = vrot.lane.b32.xlu1 %v5885_v54, %s7329_s28 }
 0xa89   :  { %v6027_v24 = vpop.permute.xlu0 %6026 }
 0xa8a   :  { %v6217_v46 = vsel %vm5371_vm3, %v6027_v24, 0.0  ;;  %v6029_v44 = vpop.permute.xlu1 %6028  ;;  %v6031_v41 = vpop.permute.xlu2 %6030 }
 0xa8b   :  { %v6218_v11 = vadd.f32 %v6217_v46, %v6216_v52  ;;  %v6219_v16 = vsel %vm5371_vm3, %v6029_v44, 0.0  ;;  %v6221_v5 = vsel %vm5371_vm3, %v6031_v41, 0.0 }
 0xa8d   :  { %v6220_v55 = vadd.f32 %v6219_v16, %v6218_v11 }
 0xa8f   :  { %v6222_v48 = vadd.f32 %v6221_v5, %v6220_v55 }
 0xa91   :  { %v5689_v3 = vpop.permute.xlu0 %5688 }
 0xa92   :  { %v5822_v40 = vsub.f32 %v14303_v23, %v5689_v3  ;;  %v5691_v28 = vpop.permute.xlu1 %5690  ;;  %v5693_v18 = vpop.permute.xlu2 %5692 }
 0xa93   :  { %v5823_v13 = vsub.f32 %v14304_v42, %v5691_v28  ;;  %v5824_v50 = vsub.f32 %v14305_v2, %v5693_v18 }
 0xa94   :  { %v5886_v53 = vmul.f32 %v5822_v40, %v5822_v40 }
 0xa95   :  { %v5887_v12 = vmul.f32 %v5823_v13, %v5823_v13  ;;  %v5888_v32 = vmul.f32 %v5824_v50, %v5824_v50 }
 0xa96   :  { %6072 = vrot.lane.b32.xlu0 %v5886_v53, %s7329_s28 }
 0xa97   :  { %6074 = vrot.lane.b32.xlu2 %v5887_v12, %s7329_s28  ;;  %6076 = vrot.lane.b32.xlu1 %v5888_v32, %s7329_s28 }
 0xa99   :  { %v6033_v60 = vpop.permute.xlu0 %6032 }
 0xa9a   :  { %v6223_v59 = vsel %vm5371_vm3, %v6033_v60, 0.0  ;;  %v6035_v43 = vpop.permute.xlu1 %6034  ;;  %v6037_v14 = vpop.permute.xlu2 %6036 }
 0xa9b   :  { %v6224_v17 = vadd.f32 %v6223_v59, %v6222_v48  ;;  %v6225_v34 = vsel %vm5371_vm3, %v6035_v43, 0.0  ;;  %v6227_v33 = vsel %vm5371_vm3, %v6037_v14, 0.0 }
 0xa9d   :  { %v6226_v61 = vadd.f32 %v6225_v34, %v6224_v17 }
 0xa9f   :  { %v6228_v62 = vadd.f32 %v6227_v33, %v6226_v61 }
 0xaa1   :  { %v5695_v37 = vpop.permute.xlu0 %5694 }
 0xaa2   :  { %v5825_v47 = vsub.f32 %v14306_v20, %v5695_v37  ;;  %v5697_v27 = vpop.permute.xlu1 %5696  ;;  %v5699_v29 = vpop.permute.xlu2 %5698 }
 0xaa3   :  { %v5826_v4 = vsub.f32 %v14307_v49, %v5697_v27  ;;  %v5827_v36 = vsub.f32 %v14308_v38, %v5699_v29 }
 0xaa4   :  { %v5889_v1 = vmul.f32 %v5825_v47, %v5825_v47 }
 0xaa5   :  { %v5890_v25 = vmul.f32 %v5826_v4, %v5826_v4  ;;  %v5891_v22 = vmul.f32 %v5827_v36, %v5827_v36 }
 0xaa6   :  { %6078 = vrot.lane.b32.xlu0 %v5889_v1, %s7329_s28 }
 0xaa7   :  { %6080 = vrot.lane.b32.xlu2 %v5890_v25, %s7329_s28  ;;  %6082 = vrot.lane.b32.xlu1 %v5891_v22, %s7329_s28  ;;  %s6951_s28 = spop %6950 }
 0xaa9   :  { %v6039_v15 = vpop.permute.xlu0 %6038 }
 0xaaa   :  { %v6229_v45 = vsel %vm5371_vm3, %v6039_v15, 0.0  ;;  %v6041_v39 = vpop.permute.xlu1 %6040  ;;  %v6045_v52 = vpop.permute.xlu2 %6044 }
 0xaab   :  { %v6230_v56 = vadd.f32 %v6229_v45, %v6228_v62  ;;  %v6231_v57 = vsel %vm5371_vm3, %v6041_v39, 0.0  ;;  %v6235_v0 = vsel %vm5371_vm3, %v6045_v52, 0.0 }
 0xaad   :  { %v6232_v31 = vadd.f32 %v6231_v57, %v6230_v56 }
 0xab2   :  { %v6051_v21 = vpop.permute.xlu2 %6050 }
 0xab3   :  { %v6241_v30 = vsel %vm5371_vm3, %v6051_v21, 0.0 }
 0xab8   :  { %v6043_v10 = vpop.permute.xlu0 %6042 }
 0xab9   :  { %v6233_v51 = vsel %vm5371_vm3, %v6043_v10, 0.0  ;;  %v6047_v58 = vpop.permute.xlu1 %6046 }
 0xaba   :  { %v6234_v9 = vadd.f32 %v6233_v51, %v6232_v31  ;;  %v6237_v35 = vsel %vm5371_vm3, %v6047_v58, 0.0 }
 0xabc   :  { %v6236_v8 = vadd.f32 %v6235_v0, %v6234_v9 }
 0xabe   :  { %v6238_v63 = vadd.f32 %v6237_v35, %v6236_v8  ;;  %v6285_v35 = vstv %s6951_s28 }
 0xac1   :  { %v6057_v16 = vpop.permute.xlu2 %6056 }
 0xac2   :  { %v6247_v5 = vsel %vm5371_vm3, %v6057_v16, 0.0 }
 0xac8   :  { %v6049_v6 = vpop.permute.xlu0 %6048 }
 0xac9   :  { %v6239_v26 = vsel %vm5371_vm3, %v6049_v6, 0.0  ;;  %v6053_v24 = vpop.permute.xlu1 %6052  ;;  %v7330_v6 = vmov 0.0  }
 0xaca   :  { %v6240_v19 = vadd.f32 %v6239_v26, %v6238_v63  ;;  %v6243_v44 = vsel %vm5371_vm3, %v6053_v24, 0.0  ;;  %6295 = vst [vmem:[%s13024_s12] sm:$0x1] %v7330_v6  ;;  %v6286_v63 = vsel %vm6284_vm2, %v6285_v35, 0.0 }
 0xacc   :  { %v6242_v54 = vadd.f32 %v6241_v30, %v6240_v19 }
 0xace   :  { %v6244_v11 = vadd.f32 %v6243_v44, %v6242_v54 }
 0xad1   :  { %v6063_v42 = vpop.permute.xlu2 %6062  ;;  %v6296_v19 = vld [vmem:[%s13024_s12] sm:$0x1] }
 0xad2   :  { %v6253_v2 = vsel %vm5371_vm3, %v6063_v42, 0.0 }
 0xad8   :  { %v6055_v46 = vpop.permute.xlu0 %6054 }
 0xad9   :  { %v6245_v41 = vsel %vm5371_vm3, %v6055_v46, 0.0  ;;  %v6059_v3 = vpop.permute.xlu1 %6058 }
 0xada   :  { %v6246_v55 = vadd.f32 %v6245_v41, %v6244_v11  ;;  %v6249_v40 = vsel %vm5371_vm3, %v6059_v3, 0.0 }
 0xadc   :  { %v6248_v48 = vadd.f32 %v6247_v5, %v6246_v55 }
 0xade   :  { %v6250_v18 = vadd.f32 %v6249_v40, %v6248_v48 }
 0xae1   :  { %v6069_v43 = vpop.permute.xlu2 %6068 }
 0xae2   :  { %v6259_v17 = vsel %vm5371_vm3, %v6069_v43, 0.0 }
 0xae8   :  { %v6061_v23 = vpop.permute.xlu0 %6060 }
 0xae9   :  { %v6251_v28 = vsel %vm5371_vm3, %v6061_v23, 0.0  ;;  %v6065_v53 = vpop.permute.xlu1 %6064 }
 0xaea   :  { %v6252_v13 = vadd.f32 %v6251_v28, %v6250_v18  ;;  %v6255_v32 = vsel %vm5371_vm3, %v6065_v53, 0.0 }
 0xaec   :  { %v6254_v50 = vadd.f32 %v6253_v2, %v6252_v13 }
 0xaee   :  { %v6256_v59 = vadd.f32 %v6255_v32, %v6254_v50 }
 0xaf1   :  { %v6075_v47 = vpop.permute.xlu2 %6074 }
 0xaf2   :  { %v6265_v49 = vsel %vm5371_vm3, %v6075_v47, 0.0 }
 0xaf8   :  { %v6067_v12 = vpop.permute.xlu0 %6066 }
 0xaf9   :  { %v6257_v60 = vsel %vm5371_vm3, %v6067_v12, 0.0  ;;  %v6071_v61 = vpop.permute.xlu1 %6070 }
 0xafa   :  { %v6258_v14 = vadd.f32 %v6257_v60, %v6256_v59  ;;  %v6261_v62 = vsel %vm5371_vm3, %v6071_v61, 0.0 }
 0xafc   :  { %v6260_v34 = vadd.f32 %v6259_v17, %v6258_v14 }
 0xafe   :  { %v6262_v20 = vadd.f32 %v6261_v62, %v6260_v34 }
 0xb01   :  { %v6081_v36 = vpop.permute.xlu2 %6080 }
 0xb02   :  { %v6271_v56 = vsel %vm5371_vm3, %v6081_v36, 0.0 }
 0xb08   :  { %v6073_v33 = vpop.permute.xlu0 %6072 }
 0xb09   :  { %v6263_v37 = vsel %vm5371_vm3, %v6073_v33, 0.0  ;;  %v6077_v29 = vpop.permute.xlu1 %6076 }
 0xb0a   :  { %v6264_v27 = vadd.f32 %v6263_v37, %v6262_v20  ;;  %v6267_v38 = vsel %vm5371_vm3, %v6077_v29, 0.0 }
 0xb0c   :  { %v6266_v4 = vadd.f32 %v6265_v49, %v6264_v27 }
 0xb0e   :  { %v6268_v1 = vadd.f32 %v6267_v38, %v6266_v4 }
 0xb18   :  { %v6079_v25 = vpop.permute.xlu0 %6078 }
 0xb19   :  { %v6269_v22 = vsel %vm5371_vm3, %v6079_v25, 0.0  ;;  %v6083_v45 = vpop.permute.xlu1 %6082 }
 0xb1a   :  { %v6270_v15 = vadd.f32 %v6269_v22, %v6268_v1  ;;  %v6273_v10 = vsel %vm5371_vm3, %v6083_v45, 0.0 }
 0xb1c   :  { %v6272_v39 = vadd.f32 %v6271_v56, %v6270_v15 }
 0xb1e   :  { %v6274_v57 = vadd.f32 %v6273_v10, %v6272_v39 }
 0xb20   :  { %6275 = vadd.xlane.f32.xlu0 %v6274_v57 }
 0xb93   :  { %v6276_v51 = vpop.xlane.xlu0 %6275 }
 0xb94   :  { %v6277_v31 = vrot.slane %v6276_v51, 4 }
 0xb96   :  { %v6278_v52 = vadd.f32 %v6277_v31, %v6276_v51 }
 0xb98   :  { %v6279_v9 = vrot.slane %v6278_v52, 2 }
 0xb9a   :  { %v6280_v0 = vadd.f32 %v6279_v9, %v6278_v52 }
 0xb9c   :  { %v6281_v8 = vrot.slane %v6280_v0, 1 }
 0xb9e   :  { %v6282_v58 = vadd.f32 %v6281_v8, %v6280_v0 }
 0xba0   :  { %6952 = vpush %v6282_v58 }
 0xbd1   :  { %s6953_s21 = spop %6952 }
 0xbd2   :  { %v6288_v26 = vstv %s6953_s21 }
 0xbd3   :  { %v6289_v21 = vsel %vm6287_vm1, %v6288_v26, 0.0 }
 0xbd4   :  { %v6290_v30 = vadd.f32 %v6289_v21, %v6286_v63 }
 0xbd6   :  { %v6297_v54 = vadd.f32 %v6296_v19, %v6290_v30 }
 0xbd8   :  { %6298 = vst [vmem:[%s13024_s12] sm:$0x1] %v6297_v54 }

</bundles_post_ra>
